<compile_context>
chip_gen: v6e
topology: v6e:2x2x1
jax: 0.10.0
libtpu: 0.0.40
codegen_flags: <defaults>
</compile_context>

<pallas_src>
import jax
import jax.numpy as jnp
from jax import lax
from jax.experimental import pallas as pl
from jax.experimental.pallas import tpu as pltpu

OUT_HW = 28            # affine_grid / grid_sample output size (fixed by module)
DOWNSCALE = 0.2        # module's fixed, non-trainable diag(0.2, 0.2)
POLO_DIM = 8 * 6 * 16  # 768

# conv1: 28x28 -> 24x24 (20 ch) -> pool -> 12x12 ; conv2: 12x12 -> 8x8 (50 ch) -> pool -> 4x4
C1_HALF = 256          # per-x-parity lane width for conv1 output (>= 12*20, 128-aligned)
C2_HALF = 256          # per-x-parity lane width for conv2 output (>= 4*50, 128-aligned)


# ---------------------------------------------------------------------------
# Weight preprocessing (plain JAX, done once outside the kernel)
# ---------------------------------------------------------------------------
def _build_conv1_operands(conv1_w, conv1_b):
    # conv1_w: (20, 1, 5, 5), conv1_b: (20,)
    w = conv1_w[:, 0]                                   # (cout, dy, dx)
    col = jnp.arange(2 * C1_HALF)
    parx = col // C1_HALF
    rem = col % C1_HALF
    oxh = rem // 20
    c = rem % 20
    ox = 2 * oxh + parx                                 # conv output x in [0, 24)
    valid_col = rem < 12 * 20
    x = jnp.arange(OUT_HW)                              # input x of sampled image
    dx = x[:, None] - ox[None, :]                       # (28, 512)
    valid = valid_col[None, :] & (dx >= 0) & (dx <= 4)
    dxc = jnp.clip(dx, 0, 4)
    dyv = jnp.arange(5)
    vals = w[c[None, None, :], dyv[:, None, None], dxc[None, :, :]]      # (5, 28, 512)
    r1 = jnp.where(valid[None, :, :], vals, 0.0).astype(jnp.float32)
    b1t = jnp.where(valid_col, conv1_b[c], 0.0).astype(jnp.float32)
    return r1, b1t.reshape(1, 2 * C1_HALF)


def _build_conv2_operands(conv2_w, conv2_b):
    # conv2_w: (50, 20, 5, 5) [cout, cin, dy, dx]; conv2_b: (50,)
    pin = jnp.arange(C1_HALF)                           # conv2 input column layout
    px = pin // 20
    cin = pin % 20
    valid_pin = pin < 12 * 20
    col = jnp.arange(2 * C2_HALF)
    parx = col // C2_HALF
    rem = col % C2_HALF
    oxh = rem // 50
    cout = rem % 50
    ox = 2 * oxh + parx                                 # conv2 output x in [0, 8)
    valid_col = rem < 4 * 50
    dx = px[:, None] - ox[None, :]                      # (256, 512)
    valid = valid_pin[:, None] & valid_col[None, :] & (dx >= 0) & (dx <= 4)
    dxc = jnp.clip(dx, 0, 4)
    dyv = jnp.arange(5)
    vals = conv2_w[cout[None, None, :], cin[None, :, None],
                   dyv[:, None, None], dxc[None, :, :]]                  # (5, 256, 512)
    r2 = jnp.where(valid[None, :, :], vals, 0.0).astype(jnp.float32)
    b2t = jnp.where(valid_col, conv2_b[cout], 0.0).astype(jnp.float32)
    return r2, b2t.reshape(1, 2 * C2_HALF)


def _build_fc1_operand(fc1_w):
    # fc1_w: (500, 800); PyTorch NCHW flatten index = cout*16 + py*4 + px
    pin = jnp.arange(C2_HALF)
    px = pin // 50
    cout = pin % 50
    valid = pin < 4 * 50
    jv = jnp.arange(4)                                  # pooled y index
    idx = cout[None, :] * 16 + jv[:, None] * 4 + px[None, :]             # (4, 256)
    idx = jnp.where(valid[None, :], idx, 0)
    w = fc1_w[:, idx]                                   # (500, 4, 256)
    w = jnp.where(valid[None, None, :], w, 0.0)
    return jnp.transpose(w, (1, 2, 0)).astype(jnp.float32)               # (4, 256, 500)


def prepare_kernel_params(params):
    kp = {}
    kp["wl1"] = params["loc1_w"].T.astype(jnp.float32)          # (768, 32)
    kp["bl1"] = params["loc1_b"].reshape(1, 32).astype(jnp.float32)
    kp["wl2"] = params["loc2_w"].T.astype(jnp.float32)          # (32, 2)
    kp["bl2"] = params["loc2_b"].reshape(1, 2).astype(jnp.float32)
    kp["r1"], kp["b1t"] = _build_conv1_operands(params["conv1_w"], params["conv1_b"])
    kp["r2"], kp["b2t"] = _build_conv2_operands(params["conv2_w"], params["conv2_b"])
    kp["wf1"] = _build_fc1_operand(params["fc1_w"])             # (4, 256, 500)
    kp["bf1"] = params["fc1_b"].reshape(1, 500).astype(jnp.float32)
    kp["wf2"] = params["fc2_w"].T.astype(jnp.float32)           # (500, 10)
    kp["bf2"] = params["fc2_b"].reshape(1, 10).astype(jnp.float32)
    return kp


# ---------------------------------------------------------------------------
# The fused kernel (one grid step = one block of samples, everything in VMEM)
# ---------------------------------------------------------------------------
def _fused_kernel(xp_ref, ximg_ref, wl1_ref, bl1_ref, wl2_ref, bl2_ref,
                  r1_ref, b1t_ref, r2_ref, b2t_ref, wf1_ref, bf1_ref,
                  wf2_ref, bf2_ref, o_ref,
                  t_scr, samp_scr, x1_scr, p2tmp_scr, p2_scr):
    f32 = jnp.float32
    hi = lax.Precision.HIGHEST
    bsz = xp_ref.shape[0]
    h_in = ximg_ref.shape[1]
    w_in = ximg_ref.shape[2]

    # ---- fc_loc (batched over the block) ----
    xs = xp_ref[...]
    hloc = jnp.maximum(
        jnp.dot(xs, wl1_ref[...], preferred_element_type=f32) + bl1_ref[...], 0.0)
    t_scr[...] = jnp.dot(hloc, wl2_ref[...], preferred_element_type=f32) + bl2_ref[...]

    # ---- batch-independent constants (hoisted out of the sample loop) ----
    oi = lax.broadcasted_iota(jnp.int32, (OUT_HW, h_in), 0).astype(f32)
    pi = lax.broadcasted_iota(jnp.int32, (OUT_HW, h_in), 1).astype(f32)
    base_y = (DOWNSCALE * ((2.0 * oi + 1.0) / OUT_HW - 1.0) + 1.0) * (h_in * 0.5) - 0.5 - pi
    qi = lax.broadcasted_iota(jnp.int32, (w_in, OUT_HW), 0).astype(f32)
    oj = lax.broadcasted_iota(jnp.int32, (w_in, OUT_HW), 1).astype(f32)
    base_x = (DOWNSCALE * ((2.0 * oj + 1.0) / OUT_HW - 1.0) + 1.0) * (w_in * 0.5) - 0.5 - qi

    jj1 = lax.broadcasted_iota(jnp.int32, (12, 24), 0)
    kk1 = lax.broadcasted_iota(jnp.int32, (12, 24), 1)
    e0_1 = jnp.where(kk1 == 2 * jj1, 1.0, 0.0).astype(f32)       # selects even conv rows
    e1_1 = jnp.where(kk1 == 2 * jj1 + 1, 1.0, 0.0).astype(f32)   # selects odd conv rows
    jj2 = lax.broadcasted_iota(jnp.int32, (4, 8), 0)
    kk2 = lax.broadcasted_iota(jnp.int32, (4, 8), 1)
    e0_2 = jnp.where(kk2 == 2 * jj2, 1.0, 0.0).astype(f32)
    e1_2 = jnp.where(kk2 == 2 * jj2 + 1, 1.0, 0.0).astype(f32)

    b1t = b1t_ref[...]
    b2t = b2t_ref[...]

    # ---- per-sample spatial pipeline (STN -> conv1+pool -> conv2+pool) ----
    for b in range(bsz):
        tb = t_scr[pl.ds(b, 1), :]                               # (1, 2) translation
        tx = tb[:, 0:1]
        ty = tb[:, 1:2]
        wy = jnp.maximum(0.0, 1.0 - jnp.abs(base_y + ty * (h_in * 0.5)))   # (28, H)
        wxt = jnp.maximum(0.0, 1.0 - jnp.abs(base_x + tx * (w_in * 0.5)))  # (W, 28)
        img = ximg_ref[b]                                        # (H, W)
        samp_scr[...] = jnp.dot(
            jnp.dot(wy, img, preferred_element_type=f32), wxt,
            preferred_element_type=f32)                          # (28, 28) grid_sample

        # conv1 as GEMM vs Toeplitz weights; columns = [x-parity | x/2 | chan]
        acc1 = jnp.dot(samp_scr[pl.ds(0, 24), :], r1_ref[0], preferred_element_type=f32)
        for dy in range(1, 5):
            acc1 = acc1 + jnp.dot(samp_scr[pl.ds(dy, 24), :], r1_ref[dy],
                                  preferred_element_type=f32)    # (24, 512)
        o1 = jnp.maximum(acc1 + b1t, 0.0)                        # bias + ReLU
        xpool1 = jnp.maximum(o1[:, :C1_HALF], o1[:, C1_HALF:])   # max over x-parity
        x1_scr[...] = jnp.maximum(                               # max over y-parity (exact)
            jnp.dot(e0_1, xpool1, precision=hi, preferred_element_type=f32),
            jnp.dot(e1_1, xpool1, precision=hi, preferred_element_type=f32))  # (12, 256)

        # conv2 (20 -> 50 channels), same scheme
        acc2 = jnp.dot(x1_scr[pl.ds(0, 8), :], r2_ref[0], preferred_element_type=f32)
        for dy in range(1, 5):
            acc2 = acc2 + jnp.dot(x1_scr[pl.ds(dy, 8), :], r2_ref[dy],
                                  preferred_element_type=f32)    # (8, 512)
        o2 = jnp.maximum(acc2 + b2t, 0.0)
        xpool2 = jnp.maximum(o2[:, :C2_HALF], o2[:, C2_HALF:])   # (8, 256)
        p2tmp_scr[...] = jnp.maximum(
            jnp.dot(e0_2, xpool2, precision=hi, preferred_element_type=f32),
            jnp.dot(e1_2, xpool2, precision=hi, preferred_element_type=f32))  # (4, 256)

        for j in range(4):                                       # stage for batched FC
            p2_scr[j, pl.ds(b, 1), :] = p2tmp_scr[pl.ds(j, 1), :]

    # ---- fc1 + ReLU + fc2 (batched over the block; flatten folded into wf1) ----
    accf = jnp.dot(p2_scr[0], wf1_ref[0], preferred_element_type=f32)
    for j in range(1, 4):
        accf = accf + jnp.dot(p2_scr[j], wf1_ref[j], preferred_element_type=f32)
    hfc = jnp.maximum(accf + bf1_ref[...], 0.0)                  # (B, 500)
    out = jnp.dot(hfc, wf2_ref[...], preferred_element_type=f32) + bf2_ref[...]
    o_ref[...] = out.astype(o_ref.dtype)


# ---------------------------------------------------------------------------
# Wrapper
# ---------------------------------------------------------------------------
def polo_forward(params, x, x_polo, block_b=8):
    n = x.shape[0]
    h_in, w_in = int(x.shape[2]), int(x.shape[3])
    x_img = x[:, 0].astype(jnp.float32)                  # module requires C == 1
    xp = x_polo.reshape(n, POLO_DIM).astype(jnp.float32)
    kp = prepare_kernel_params(params)

    if n <= block_b:
        bsz, nb = n, n
    else:
        bsz = block_b
        nb = ((n + bsz - 1) // bsz) * bsz
        if nb != n:
            x_img = jnp.pad(x_img, ((0, nb - n), (0, 0), (0, 0)))
            xp = jnp.pad(xp, ((0, nb - n), (0, 0)))

    rep2 = lambda i: (0, 0)
    rep3 = lambda i: (0, 0, 0)
    in_specs = [
        pl.BlockSpec((bsz, POLO_DIM), lambda i: (i, 0)),
        pl.BlockSpec((bsz, h_in, w_in), lambda i: (i, 0, 0)),
        pl.BlockSpec(kp["wl1"].shape, rep2),
        pl.BlockSpec(kp["bl1"].shape, rep2),
        pl.BlockSpec(kp["wl2"].shape, rep2),
        pl.BlockSpec(kp["bl2"].shape, rep2),
        pl.BlockSpec(kp["r1"].shape, rep3),
        pl.BlockSpec(kp["b1t"].shape, rep2),
        pl.BlockSpec(kp["r2"].shape, rep3),
        pl.BlockSpec(kp["b2t"].shape, rep2),
        pl.BlockSpec(kp["wf1"].shape, rep3),
        pl.BlockSpec(kp["bf1"].shape, rep2),
        pl.BlockSpec(kp["wf2"].shape, rep2),
        pl.BlockSpec(kp["bf2"].shape, rep2),
    ]
    out = pl.pallas_call(
        _fused_kernel,
        out_shape=jax.ShapeDtypeStruct((nb, 10), jnp.float32),
        grid=(nb // bsz,),
        in_specs=in_specs,
        out_specs=pl.BlockSpec((bsz, 10), lambda i: (i, 0)),
        scratch_shapes=[
            pltpu.VMEM((bsz, 2), jnp.float32),             # theta translations
            pltpu.VMEM((OUT_HW, OUT_HW), jnp.float32),     # STN-sampled image
            pltpu.VMEM((12, C1_HALF), jnp.float32),        # pooled conv1 activations
            pltpu.VMEM((4, C2_HALF), jnp.float32),         # pooled conv2 (one sample)
            pltpu.VMEM((4, bsz, C2_HALF), jnp.float32),    # pooled conv2 (whole block)
        ],
        compiler_params=pltpu.CompilerParams(
            dimension_semantics=("parallel",),
            vmem_limit_bytes=32 * 1024 * 1024),
    )(xp, x_img, kp["wl1"], kp["bl1"], kp["wl2"], kp["bl2"],
      kp["r1"], kp["b1t"], kp["r2"], kp["b2t"],
      kp["wf1"], kp["bf1"], kp["wf2"], kp["bf2"])
    return out[:n]


# ---------------------------------------------------------------------------
# Deterministic parameter init (module layout, shapes from __init__)
# ---------------------------------------------------------------------------
def init_params(key):
    ks = jax.random.split(key, 10)

    def u(k, shape, fan_in):
        bound = float(fan_in) ** -0.5
        return jax.random.uniform(k, shape, jnp.float32, -bound, bound)

    return {
        "conv1_w": u(ks[0], (20, 1, 5, 5), 25),
        "conv1_b": u(ks[1], (20,), 25),
        "conv2_w": u(ks[2], (50, 20, 5, 5), 500),
        "conv2_b": u(ks[3], (50,), 500),
        "fc1_w": u(ks[4], (500, 800), 800),
        "fc1_b": u(ks[5], (500,), 800),
        "fc2_w": u(ks[6], (10, 500), 500),
        "fc2_b": u(ks[7], (10,), 500),
        "loc1_w": u(ks[8], (32, POLO_DIM), POLO_DIM),
        "loc1_b": u(ks[9], (32,), POLO_DIM),
        "loc2_w": jnp.zeros((2, 32), jnp.float32),   # fc_loc[2] zero-init per module
        "loc2_b": jnp.zeros((2,), jnp.float32),
    }


# ---------------------------------------------------------------------------
# Pure-JAX reference (module semantics, full f32 precision) for validation
# ---------------------------------------------------------------------------
def polo_forward_ref(params, x, x_polo):
    hi = lax.Precision.HIGHEST
    n = x.shape[0]
    h_in, w_in = x.shape[2], x.shape[3]
    xp = x_polo.reshape(n, POLO_DIM)
    h = jnp.maximum(jnp.dot(xp, params["loc1_w"].T, precision=hi) + params["loc1_b"], 0.0)
    t = jnp.dot(h, params["loc2_w"].T, precision=hi) + params["loc2_b"]   # (N, 2)

    o = jnp.arange(OUT_HW, dtype=jnp.float32)
    norm = (2.0 * o + 1.0) / OUT_HW - 1.0
    sy = (DOWNSCALE * norm[None, :] + t[:, 1:2] + 1.0) * (h_in * 0.5) - 0.5
    sx = (DOWNSCALE * norm[None, :] + t[:, 0:1] + 1.0) * (w_in * 0.5) - 0.5
    py = jnp.arange(h_in, dtype=jnp.float32)
    qx = jnp.arange(w_in, dtype=jnp.float32)
    wy = jnp.maximum(0.0, 1.0 - jnp.abs(sy[:, :, None] - py[None, None, :]))
    wx = jnp.maximum(0.0, 1.0 - jnp.abs(sx[:, :, None] - qx[None, None, :]))
    sampled = jnp.einsum("nip,npq,njq->nij", wy, x[:, 0], wx, precision=hi)

    z = lax.conv_general_dilated(sampled[:, None], params["conv1_w"], (1, 1), "VALID",
                                 dimension_numbers=("NCHW", "OIHW", "NCHW"), precision=hi)
    z = jnp.maximum(z + params["conv1_b"][None, :, None, None], 0.0)      # (N,20,24,24)
    z = z.reshape(n, 20, 12, 2, 12, 2).max(axis=(3, 5))                   # (N,20,12,12)
    z = lax.conv_general_dilated(z, params["conv2_w"], (1, 1), "VALID",
                                 dimension_numbers=("NCHW", "OIHW", "NCHW"), precision=hi)
    z = jnp.maximum(z + params["conv2_b"][None, :, None, None], 0.0)      # (N,50,8,8)
    z = z.reshape(n, 50, 4, 2, 4, 2).max(axis=(3, 5))                     # (N,50,4,4)
    zf = z.reshape(n, 800)
    hf = jnp.maximum(jnp.dot(zf, params["fc1_w"].T, precision=hi) + params["fc1_b"], 0.0)
    return jnp.dot(hf, params["fc2_w"].T, precision=hi) + params["fc2_b"]


if __name__ == "__main__":
    key = jax.random.PRNGKey(0)
    params = init_params(key)

    kx, kp_ = jax.random.split(jax.random.fold_in(key, 7))
    x = jax.random.normal(kx, (2, 1, 28, 28), jnp.float32)        # NCHW, C=1
    x_polo = jax.random.normal(kp_, (2, 16, 8, 6), jnp.float32)   # flattens to (2, 768)

    fwd = jax.jit(polo_forward)
    out = jax.block_until_ready(fwd(params, x, x_polo))
    assert out.shape == (2, 10)
    assert bool(jnp.all(jnp.isfinite(out)))

    ref = polo_forward_ref(params, x, x_polo)
    assert bool(jnp.allclose(out, ref, atol=2e-2, rtol=2e-2)), (out, ref)

    # Extra check with non-zero fc_loc[2] so the translation path is exercised.
    params2 = dict(params)
    k1, k2 = jax.random.split(jax.random.fold_in(key, 13))
    params2["loc2_w"] = 0.05 * jax.random.normal(k1, (2, 32), jnp.float32)
    params2["loc2_b"] = 0.05 * jax.random.normal(k2, (2,), jnp.float32)
    out2 = jax.block_until_ready(fwd(params2, x, x_polo))
    ref2 = polo_forward_ref(params2, x, x_polo)
    assert bool(jnp.allclose(out2, ref2, atol=2e-2, rtol=2e-2)), (out2, ref2)

    print("KERNEL_OK")
</pallas_src>

<mosaic_0001>
module attributes {stable_mosaic.version = 11 : i64} {
  func.func @_fused_kernel(%arg0: i32, %arg1: memref<2x768xf32, #tpu.memory_space<vmem>>, %arg2: memref<2x28x28xf32, #tpu.memory_space<vmem>>, %arg3: memref<768x32xf32, #tpu.memory_space<vmem>>, %arg4: memref<1x32xf32, #tpu.memory_space<vmem>>, %arg5: memref<32x2xf32, #tpu.memory_space<vmem>>, %arg6: memref<1x2xf32, #tpu.memory_space<vmem>>, %arg7: memref<5x28x512xf32, #tpu.memory_space<vmem>>, %arg8: memref<1x512xf32, #tpu.memory_space<vmem>>, %arg9: memref<5x256x512xf32, #tpu.memory_space<vmem>>, %arg10: memref<1x512xf32, #tpu.memory_space<vmem>>, %arg11: memref<4x256x500xf32, #tpu.memory_space<vmem>>, %arg12: memref<1x500xf32, #tpu.memory_space<vmem>>, %arg13: memref<500x10xf32, #tpu.memory_space<vmem>>, %arg14: memref<1x10xf32, #tpu.memory_space<vmem>>, %arg15: memref<2x10xf32, #tpu.memory_space<vmem>>, %arg16: memref<2x2xf32, #tpu.memory_space<vmem>>, %arg17: memref<28x28xf32, #tpu.memory_space<vmem>>, %arg18: memref<12x256xf32, #tpu.memory_space<vmem>>, %arg19: memref<4x256xf32, #tpu.memory_space<vmem>>, %arg20: memref<4x2x256xf32, #tpu.memory_space<vmem>>) attributes {dimension_semantics = [#tpu.dimension_semantics<parallel>], iteration_bounds = array<i64: 1>, scalar_prefetch = 0 : i64, scratch_operands = 5 : i64, tpu.core_type = #tpu.core_type<tc>, window_params = [{transform_indices = @transform_0, window_bounds = array<i64: 2, 768>}, {transform_indices = @transform_1, window_bounds = array<i64: 2, 28, 28>}, {pipeline_mode = #tpu.pipeline_mode<synchronous>, transform_indices = @transform_2, window_bounds = array<i64: 768, 32>}, {pipeline_mode = #tpu.pipeline_mode<synchronous>, transform_indices = @transform_3, window_bounds = array<i64: 1, 32>}, {pipeline_mode = #tpu.pipeline_mode<synchronous>, transform_indices = @transform_4, window_bounds = array<i64: 32, 2>}, {pipeline_mode = #tpu.pipeline_mode<synchronous>, transform_indices = @transform_5, window_bounds = array<i64: 1, 2>}, {pipeline_mode = #tpu.pipeline_mode<synchronous>, transform_indices = @transform_6, window_bounds = array<i64: 5, 28, 512>}, {pipeline_mode = #tpu.pipeline_mode<synchronous>, transform_indices = @transform_7, window_bounds = array<i64: 1, 512>}, {pipeline_mode = #tpu.pipeline_mode<synchronous>, transform_indices = @transform_8, window_bounds = array<i64: 5, 256, 512>}, {pipeline_mode = #tpu.pipeline_mode<synchronous>, transform_indices = @transform_9, window_bounds = array<i64: 1, 512>}, {pipeline_mode = #tpu.pipeline_mode<synchronous>, transform_indices = @transform_10, window_bounds = array<i64: 4, 256, 500>}, {pipeline_mode = #tpu.pipeline_mode<synchronous>, transform_indices = @transform_11, window_bounds = array<i64: 1, 500>}, {pipeline_mode = #tpu.pipeline_mode<synchronous>, transform_indices = @transform_12, window_bounds = array<i64: 500, 10>}, {pipeline_mode = #tpu.pipeline_mode<synchronous>, transform_indices = @transform_13, window_bounds = array<i64: 1, 10>}, {transform_indices = @transform_14, window_bounds = array<i64: 2, 10>}]} {
    %c0 = arith.constant 0 : index
    %c0_0 = arith.constant 0 : index
    %0 = vector.load %arg1[%c0, %c0_0] : memref<2x768xf32, #tpu.memory_space<vmem>>, vector<2x768xf32>
    %c0_1 = arith.constant 0 : index
    %c0_2 = arith.constant 0 : index
    %1 = vector.load %arg3[%c0_1, %c0_2] : memref<768x32xf32, #tpu.memory_space<vmem>>, vector<768x32xf32>
    %cst = arith.constant dense<0.000000e+00> : vector<2x32xf32>
    %2 = tpu.matmul %0, %1, %cst {dimension_numbers = #tpu.dot_dimension_numbers<[1], [0], [0], [1], [0, 0, 1, 1], [], []>} : vector<2x768xf32>, vector<768x32xf32>, vector<2x32xf32> -> vector<2x32xf32>
    %c0_3 = arith.constant 0 : index
    %c0_4 = arith.constant 0 : index
    %3 = vector.load %arg4[%c0_3, %c0_4] : memref<1x32xf32, #tpu.memory_space<vmem>>, vector<1x32xf32>
    %4 = vector.broadcast %3 : vector<1x32xf32> to vector<2x32xf32>
    %5 = arith.addf %2, %4 : vector<2x32xf32>
    %cst_5 = arith.constant 0.000000e+00 : f32
    %6 = vector.broadcast %cst_5 : f32 to vector<2x32xf32>
    %7 = arith.maximumf %5, %6 : vector<2x32xf32>
    %c0_6 = arith.constant 0 : index
    %c0_7 = arith.constant 0 : index
    %8 = vector.load %arg5[%c0_6, %c0_7] : memref<32x2xf32, #tpu.memory_space<vmem>>, vector<32x2xf32>
    %cst_8 = arith.constant dense<0.000000e+00> : vector<2x2xf32>
    %9 = tpu.matmul %7, %8, %cst_8 {dimension_numbers = #tpu.dot_dimension_numbers<[1], [0], [0], [1], [0, 0, 1, 1], [], []>} : vector<2x32xf32>, vector<32x2xf32>, vector<2x2xf32> -> vector<2x2xf32>
    %c0_9 = arith.constant 0 : index
    %c0_10 = arith.constant 0 : index
    %10 = vector.load %arg6[%c0_9, %c0_10] : memref<1x2xf32, #tpu.memory_space<vmem>>, vector<1x2xf32>
    %11 = vector.broadcast %10 : vector<1x2xf32> to vector<2x2xf32>
    %12 = arith.addf %9, %11 : vector<2x2xf32>
    %c0_11 = arith.constant 0 : index
    %c0_12 = arith.constant 0 : index
    %13 = vector.load %arg16[%c0_11, %c0_12] : memref<2x2xf32, #tpu.memory_space<vmem>>, vector<2x2xf32>
    tpu.vector_store %arg16[%c0_11, %c0_12], %12 {strides = array<i32>} : memref<2x2xf32, #tpu.memory_space<vmem>>, vector<2x2xf32>,
    %14 = tpu.iota {dimensions = array<i32: 0>} : vector<28x28xi32>
    %15 = arith.sitofp %14 : vector<28x28xi32> to vector<28x28xf32>
    %16 = tpu.iota {dimensions = array<i32: 1>} : vector<28x28xi32>
    %17 = arith.sitofp %16 : vector<28x28xi32> to vector<28x28xf32>
    %cst_13 = arith.constant 2.000000e+00 : f32
    %18 = vector.broadcast %cst_13 : f32 to vector<28x28xf32>
    %19 = arith.mulf %18, %15 : vector<28x28xf32>
    %cst_14 = arith.constant 1.000000e+00 : f32
    %20 = vector.broadcast %cst_14 : f32 to vector<28x28xf32>
    %21 = arith.addf %19, %20 : vector<28x28xf32>
    %cst_15 = arith.constant 2.800000e+01 : f32
    %22 = vector.broadcast %cst_15 : f32 to vector<28x28xf32>
    %23 = arith.divf %21, %22 : vector<28x28xf32>
    %cst_16 = arith.constant 1.000000e+00 : f32
    %24 = vector.broadcast %cst_16 : f32 to vector<28x28xf32>
    %25 = arith.subf %23, %24 : vector<28x28xf32>
    %cst_17 = arith.constant 2.000000e-01 : f32
    %26 = vector.broadcast %cst_17 : f32 to vector<28x28xf32>
    %27 = arith.mulf %26, %25 : vector<28x28xf32>
    %cst_18 = arith.constant 1.000000e+00 : f32
    %28 = vector.broadcast %cst_18 : f32 to vector<28x28xf32>
    %29 = arith.addf %27, %28 : vector<28x28xf32>
    %cst_19 = arith.constant 1.400000e+01 : f32
    %30 = vector.broadcast %cst_19 : f32 to vector<28x28xf32>
    %31 = arith.mulf %29, %30 : vector<28x28xf32>
    %cst_20 = arith.constant 5.000000e-01 : f32
    %32 = vector.broadcast %cst_20 : f32 to vector<28x28xf32>
    %33 = arith.subf %31, %32 : vector<28x28xf32>
    %34 = arith.subf %33, %17 : vector<28x28xf32>
    %35 = tpu.iota {dimensions = array<i32: 0>} : vector<28x28xi32>
    %36 = arith.sitofp %35 : vector<28x28xi32> to vector<28x28xf32>
    %37 = tpu.iota {dimensions = array<i32: 1>} : vector<28x28xi32>
    %38 = arith.sitofp %37 : vector<28x28xi32> to vector<28x28xf32>
    %cst_21 = arith.constant 2.000000e+00 : f32
    %39 = vector.broadcast %cst_21 : f32 to vector<28x28xf32>
    %40 = arith.mulf %39, %38 : vector<28x28xf32>
    %cst_22 = arith.constant 1.000000e+00 : f32
    %41 = vector.broadcast %cst_22 : f32 to vector<28x28xf32>
    %42 = arith.addf %40, %41 : vector<28x28xf32>
    %cst_23 = arith.constant 2.800000e+01 : f32
    %43 = vector.broadcast %cst_23 : f32 to vector<28x28xf32>
    %44 = arith.divf %42, %43 : vector<28x28xf32>
    %cst_24 = arith.constant 1.000000e+00 : f32
    %45 = vector.broadcast %cst_24 : f32 to vector<28x28xf32>
    %46 = arith.subf %44, %45 : vector<28x28xf32>
    %cst_25 = arith.constant 2.000000e-01 : f32
    %47 = vector.broadcast %cst_25 : f32 to vector<28x28xf32>
    %48 = arith.mulf %47, %46 : vector<28x28xf32>
    %cst_26 = arith.constant 1.000000e+00 : f32
    %49 = vector.broadcast %cst_26 : f32 to vector<28x28xf32>
    %50 = arith.addf %48, %49 : vector<28x28xf32>
    %cst_27 = arith.constant 1.400000e+01 : f32
    %51 = vector.broadcast %cst_27 : f32 to vector<28x28xf32>
    %52 = arith.mulf %50, %51 : vector<28x28xf32>
    %cst_28 = arith.constant 5.000000e-01 : f32
    %53 = vector.broadcast %cst_28 : f32 to vector<28x28xf32>
    %54 = arith.subf %52, %53 : vector<28x28xf32>
    %55 = arith.subf %54, %36 : vector<28x28xf32>
    %56 = tpu.iota {dimensions = array<i32: 0>} : vector<12x24xi32>
    %57 = tpu.iota {dimensions = array<i32: 1>} : vector<12x24xi32>
    %c2_i32 = arith.constant 2 : i32
    %58 = vector.broadcast %c2_i32 : i32 to vector<12x24xi32>
    %59 = arith.muli %58, %56 : vector<12x24xi32>
    %60 = arith.cmpi eq, %57, %59 : vector<12x24xi32>
    %cst_29 = arith.constant 1.000000e+00 : f32
    %cst_30 = arith.constant 0.000000e+00 : f32
    %61 = vector.broadcast %cst_29 : f32 to vector<12x24xf32>
    %62 = vector.broadcast %cst_30 : f32 to vector<12x24xf32>
    %63 = arith.select %60, %61, %62 : vector<12x24xi1>, vector<12x24xf32>
    %c2_i32_31 = arith.constant 2 : i32
    %64 = vector.broadcast %c2_i32_31 : i32 to vector<12x24xi32>
    %65 = arith.muli %64, %56 : vector<12x24xi32>
    %c1_i32 = arith.constant 1 : i32
    %66 = vector.broadcast %c1_i32 : i32 to vector<12x24xi32>
    %67 = arith.addi %65, %66 : vector<12x24xi32>
    %68 = arith.cmpi eq, %57, %67 : vector<12x24xi32>
    %cst_32 = arith.constant 1.000000e+00 : f32
    %cst_33 = arith.constant 0.000000e+00 : f32
    %69 = vector.broadcast %cst_32 : f32 to vector<12x24xf32>
    %70 = vector.broadcast %cst_33 : f32 to vector<12x24xf32>
    %71 = arith.select %68, %69, %70 : vector<12x24xi1>, vector<12x24xf32>
    %72 = tpu.iota {dimensions = array<i32: 0>} : vector<4x8xi32>
    %73 = tpu.iota {dimensions = array<i32: 1>} : vector<4x8xi32>
    %c2_i32_34 = arith.constant 2 : i32
    %74 = vector.broadcast %c2_i32_34 : i32 to vector<4x8xi32>
    %75 = arith.muli %74, %72 : vector<4x8xi32>
    %76 = arith.cmpi eq, %73, %75 : vector<4x8xi32>
    %cst_35 = arith.constant 1.000000e+00 : f32
    %cst_36 = arith.constant 0.000000e+00 : f32
    %77 = vector.broadcast %cst_35 : f32 to vector<4x8xf32>
    %78 = vector.broadcast %cst_36 : f32 to vector<4x8xf32>
    %79 = arith.select %76, %77, %78 : vector<4x8xi1>, vector<4x8xf32>
    %c2_i32_37 = arith.constant 2 : i32
    %80 = vector.broadcast %c2_i32_37 : i32 to vector<4x8xi32>
    %81 = arith.muli %80, %72 : vector<4x8xi32>
    %c1_i32_38 = arith.constant 1 : i32
    %82 = vector.broadcast %c1_i32_38 : i32 to vector<4x8xi32>
    %83 = arith.addi %81, %82 : vector<4x8xi32>
    %84 = arith.cmpi eq, %73, %83 : vector<4x8xi32>
    %cst_39 = arith.constant 1.000000e+00 : f32
    %cst_40 = arith.constant 0.000000e+00 : f32
    %85 = vector.broadcast %cst_39 : f32 to vector<4x8xf32>
    %86 = vector.broadcast %cst_40 : f32 to vector<4x8xf32>
    %87 = arith.select %84, %85, %86 : vector<4x8xi1>, vector<4x8xf32>
    %c0_41 = arith.constant 0 : index
    %c0_42 = arith.constant 0 : index
    %88 = vector.load %arg8[%c0_41, %c0_42] : memref<1x512xf32, #tpu.memory_space<vmem>>, vector<1x512xf32>
    %c0_43 = arith.constant 0 : index
    %c0_44 = arith.constant 0 : index
    %89 = vector.load %arg10[%c0_43, %c0_44] : memref<1x512xf32, #tpu.memory_space<vmem>>, vector<1x512xf32>
    %c0_45 = arith.constant 0 : index
    %c0_46 = arith.constant 0 : index
    %90 = vector.load %arg16[%c0_45, %c0_46] : memref<2x2xf32, #tpu.memory_space<vmem>>, vector<1x2xf32>
    %91 = vector.extract_strided_slice %90 {offsets = [0, 0], sizes = [1, 1], strides = [1, 1]} : vector<1x2xf32> to vector<1x1xf32>
    %92 = vector.extract_strided_slice %90 {offsets = [0, 1], sizes = [1, 1], strides = [1, 1]} : vector<1x2xf32> to vector<1x1xf32>
    %cst_47 = arith.constant 1.400000e+01 : f32
    %93 = vector.broadcast %cst_47 : f32 to vector<1x1xf32>
    %94 = arith.mulf %92, %93 : vector<1x1xf32>
    %95 = vector.broadcast %94 : vector<1x1xf32> to vector<28x28xf32>
    %96 = arith.addf %34, %95 : vector<28x28xf32>
    %97 = math.absf %96 : vector<28x28xf32>
    %cst_48 = arith.constant 1.000000e+00 : f32
    %98 = vector.broadcast %cst_48 : f32 to vector<28x28xf32>
    %99 = arith.subf %98, %97 : vector<28x28xf32>
    %cst_49 = arith.constant 0.000000e+00 : f32
    %100 = vector.broadcast %cst_49 : f32 to vector<28x28xf32>
    %101 = arith.maximumf %100, %99 : vector<28x28xf32>
    %cst_50 = arith.constant 1.400000e+01 : f32
    %102 = vector.broadcast %cst_50 : f32 to vector<1x1xf32>
    %103 = arith.mulf %91, %102 : vector<1x1xf32>
    %104 = vector.broadcast %103 : vector<1x1xf32> to vector<28x28xf32>
    %105 = arith.addf %55, %104 : vector<28x28xf32>
    %106 = math.absf %105 : vector<28x28xf32>
    %cst_51 = arith.constant 1.000000e+00 : f32
    %107 = vector.broadcast %cst_51 : f32 to vector<28x28xf32>
    %108 = arith.subf %107, %106 : vector<28x28xf32>
    %cst_52 = arith.constant 0.000000e+00 : f32
    %109 = vector.broadcast %cst_52 : f32 to vector<28x28xf32>
    %110 = arith.maximumf %109, %108 : vector<28x28xf32>
    %c0_53 = arith.constant 0 : index
    %c0_54 = arith.constant 0 : index
    %c0_55 = arith.constant 0 : index
    %111 = vector.load %arg2[%c0_53, %c0_54, %c0_55] : memref<2x28x28xf32, #tpu.memory_space<vmem>>, vector<1x28x28xf32>
    %112 = vector.shape_cast %111 : vector<1x28x28xf32> to vector<28x28xf32>
    %cst_56 = arith.constant dense<0.000000e+00> : vector<28x28xf32>
    %113 = tpu.matmul %101, %112, %cst_56 {dimension_numbers = #tpu.dot_dimension_numbers<[1], [0], [0], [1], [0, 0, 1, 1], [], []>} : vector<28x28xf32>, vector<28x28xf32>, vector<28x28xf32> -> vector<28x28xf32>
    %cst_57 = arith.constant dense<0.000000e+00> : vector<28x28xf32>
    %114 = tpu.matmul %113, %110, %cst_57 {dimension_numbers = #tpu.dot_dimension_numbers<[1], [0], [0], [1], [0, 0, 1, 1], [], []>} : vector<28x28xf32>, vector<28x28xf32>, vector<28x28xf32> -> vector<28x28xf32>
    %c0_58 = arith.constant 0 : index
    %c0_59 = arith.constant 0 : index
    %115 = vector.load %arg17[%c0_58, %c0_59] : memref<28x28xf32, #tpu.memory_space<vmem>>, vector<28x28xf32>
    tpu.vector_store %arg17[%c0_58, %c0_59], %114 {strides = array<i32>} : memref<28x28xf32, #tpu.memory_space<vmem>>, vector<28x28xf32>,
    %c0_60 = arith.constant 0 : index
    %c0_61 = arith.constant 0 : index
    %116 = vector.load %arg17[%c0_60, %c0_61] : memref<28x28xf32, #tpu.memory_space<vmem>>, vector<24x28xf32>
    %c0_62 = arith.constant 0 : index
    %c0_63 = arith.constant 0 : index
    %c0_64 = arith.constant 0 : index
    %117 = vector.load %arg7[%c0_62, %c0_63, %c0_64] : memref<5x28x512xf32, #tpu.memory_space<vmem>>, vector<1x28x512xf32>
    %118 = vector.shape_cast %117 : vector<1x28x512xf32> to vector<28x512xf32>
    %cst_65 = arith.constant dense<0.000000e+00> : vector<24x512xf32>
    %119 = tpu.matmul %116, %118, %cst_65 {dimension_numbers = #tpu.dot_dimension_numbers<[1], [0], [0], [1], [0, 0, 1, 1], [], []>} : vector<24x28xf32>, vector<28x512xf32>, vector<24x512xf32> -> vector<24x512xf32>
    %c1 = arith.constant 1 : index
    %c0_66 = arith.constant 0 : index
    %120 = vector.load %arg17[%c1, %c0_66] : memref<28x28xf32, #tpu.memory_space<vmem>>, vector<24x28xf32>
    %c1_67 = arith.constant 1 : index
    %c0_68 = arith.constant 0 : index
    %c0_69 = arith.constant 0 : index
    %121 = vector.load %arg7[%c1_67, %c0_68, %c0_69] : memref<5x28x512xf32, #tpu.memory_space<vmem>>, vector<1x28x512xf32>
    %122 = vector.shape_cast %121 : vector<1x28x512xf32> to vector<28x512xf32>
    %cst_70 = arith.constant dense<0.000000e+00> : vector<24x512xf32>
    %123 = tpu.matmul %120, %122, %cst_70 {dimension_numbers = #tpu.dot_dimension_numbers<[1], [0], [0], [1], [0, 0, 1, 1], [], []>} : vector<24x28xf32>, vector<28x512xf32>, vector<24x512xf32> -> vector<24x512xf32>
    %124 = arith.addf %119, %123 : vector<24x512xf32>
    %c2 = arith.constant 2 : index
    %c0_71 = arith.constant 0 : index
    %125 = vector.load %arg17[%c2, %c0_71] : memref<28x28xf32, #tpu.memory_space<vmem>>, vector<24x28xf32>
    %c2_72 = arith.constant 2 : index
    %c0_73 = arith.constant 0 : index
    %c0_74 = arith.constant 0 : index
    %126 = vector.load %arg7[%c2_72, %c0_73, %c0_74] : memref<5x28x512xf32, #tpu.memory_space<vmem>>, vector<1x28x512xf32>
    %127 = vector.shape_cast %126 : vector<1x28x512xf32> to vector<28x512xf32>
    %cst_75 = arith.constant dense<0.000000e+00> : vector<24x512xf32>
    %128 = tpu.matmul %125, %127, %cst_75 {dimension_numbers = #tpu.dot_dimension_numbers<[1], [0], [0], [1], [0, 0, 1, 1], [], []>} : vector<24x28xf32>, vector<28x512xf32>, vector<24x512xf32> -> vector<24x512xf32>
    %129 = arith.addf %124, %128 : vector<24x512xf32>
    %c3 = arith.constant 3 : index
    %c0_76 = arith.constant 0 : index
    %130 = vector.load %arg17[%c3, %c0_76] : memref<28x28xf32, #tpu.memory_space<vmem>>, vector<24x28xf32>
    %c3_77 = arith.constant 3 : index
    %c0_78 = arith.constant 0 : index
    %c0_79 = arith.constant 0 : index
    %131 = vector.load %arg7[%c3_77, %c0_78, %c0_79] : memref<5x28x512xf32, #tpu.memory_space<vmem>>, vector<1x28x512xf32>
    %132 = vector.shape_cast %131 : vector<1x28x512xf32> to vector<28x512xf32>
    %cst_80 = arith.constant dense<0.000000e+00> : vector<24x512xf32>
    %133 = tpu.matmul %130, %132, %cst_80 {dimension_numbers = #tpu.dot_dimension_numbers<[1], [0], [0], [1], [0, 0, 1, 1], [], []>} : vector<24x28xf32>, vector<28x512xf32>, vector<24x512xf32> -> vector<24x512xf32>
    %134 = arith.addf %129, %133 : vector<24x512xf32>
    %c4 = arith.constant 4 : index
    %c0_81 = arith.constant 0 : index
    %135 = vector.load %arg17[%c4, %c0_81] : memref<28x28xf32, #tpu.memory_space<vmem>>, vector<24x28xf32>
    %c4_82 = arith.constant 4 : index
    %c0_83 = arith.constant 0 : index
    %c0_84 = arith.constant 0 : index
    %136 = vector.load %arg7[%c4_82, %c0_83, %c0_84] : memref<5x28x512xf32, #tpu.memory_space<vmem>>, vector<1x28x512xf32>
    %137 = vector.shape_cast %136 : vector<1x28x512xf32> to vector<28x512xf32>
    %cst_85 = arith.constant dense<0.000000e+00> : vector<24x512xf32>
    %138 = tpu.matmul %135, %137, %cst_85 {dimension_numbers = #tpu.dot_dimension_numbers<[1], [0], [0], [1], [0, 0, 1, 1], [], []>} : vector<24x28xf32>, vector<28x512xf32>, vector<24x512xf32> -> vector<24x512xf32>
    %139 = arith.addf %134, %138 : vector<24x512xf32>
    %140 = vector.broadcast %88 : vector<1x512xf32> to vector<24x512xf32>
    %141 = arith.addf %139, %140 : vector<24x512xf32>
    %cst_86 = arith.constant 0.000000e+00 : f32
    %142 = vector.broadcast %cst_86 : f32 to vector<24x512xf32>
    %143 = arith.maximumf %141, %142 : vector<24x512xf32>
    %144 = vector.extract_strided_slice %143 {offsets = [0, 0], sizes = [24, 256], strides = [1, 1]} : vector<24x512xf32> to vector<24x256xf32>
    %145 = vector.extract_strided_slice %143 {offsets = [0, 256], sizes = [24, 256], strides = [1, 1]} : vector<24x512xf32> to vector<24x256xf32>
    %146 = arith.maximumf %144, %145 : vector<24x256xf32>
    %cst_87 = arith.constant dense<0.000000e+00> : vector<12x256xf32>
    %147 = tpu.matmul %63, %146, %cst_87 {dimension_numbers = #tpu.dot_dimension_numbers<[1], [0], [0], [1], [0, 0, 1, 1], [], []>, precision = #tpu.contract_precision<fp32>} : vector<12x24xf32>, vector<24x256xf32>, vector<12x256xf32> -> vector<12x256xf32>
    %cst_88 = arith.constant dense<0.000000e+00> : vector<12x256xf32>
    %148 = tpu.matmul %71, %146, %cst_88 {dimension_numbers = #tpu.dot_dimension_numbers<[1], [0], [0], [1], [0, 0, 1, 1], [], []>, precision = #tpu.contract_precision<fp32>} : vector<12x24xf32>, vector<24x256xf32>, vector<12x256xf32> -> vector<12x256xf32>
    %149 = arith.maximumf %147, %148 : vector<12x256xf32>
    %c0_89 = arith.constant 0 : index
    %c0_90 = arith.constant 0 : index
    %150 = vector.load %arg18[%c0_89, %c0_90] : memref<12x256xf32, #tpu.memory_space<vmem>>, vector<12x256xf32>
    tpu.vector_store %arg18[%c0_89, %c0_90], %149 {strides = array<i32>} : memref<12x256xf32, #tpu.memory_space<vmem>>, vector<12x256xf32>,
    %c0_91 = arith.constant 0 : index
    %c0_92 = arith.constant 0 : index
    %151 = vector.load %arg18[%c0_91, %c0_92] : memref<12x256xf32, #tpu.memory_space<vmem>>, vector<8x256xf32>
    %c0_93 = arith.constant 0 : index
    %c0_94 = arith.constant 0 : index
    %c0_95 = arith.constant 0 : index
    %152 = vector.load %arg9[%c0_93, %c0_94, %c0_95] : memref<5x256x512xf32, #tpu.memory_space<vmem>>, vector<1x256x512xf32>
    %153 = vector.shape_cast %152 : vector<1x256x512xf32> to vector<256x512xf32>
    %cst_96 = arith.constant dense<0.000000e+00> : vector<8x512xf32>
    %154 = tpu.matmul %151, %153, %cst_96 {dimension_numbers = #tpu.dot_dimension_numbers<[1], [0], [0], [1], [0, 0, 1, 1], [], []>} : vector<8x256xf32>, vector<256x512xf32>, vector<8x512xf32> -> vector<8x512xf32>
    %c1_97 = arith.constant 1 : index
    %c0_98 = arith.constant 0 : index
    %155 = vector.load %arg18[%c1_97, %c0_98] : memref<12x256xf32, #tpu.memory_space<vmem>>, vector<8x256xf32>
    %c1_99 = arith.constant 1 : index
    %c0_100 = arith.constant 0 : index
    %c0_101 = arith.constant 0 : index
    %156 = vector.load %arg9[%c1_99, %c0_100, %c0_101] : memref<5x256x512xf32, #tpu.memory_space<vmem>>, vector<1x256x512xf32>
    %157 = vector.shape_cast %156 : vector<1x256x512xf32> to vector<256x512xf32>
    %cst_102 = arith.constant dense<0.000000e+00> : vector<8x512xf32>
    %158 = tpu.matmul %155, %157, %cst_102 {dimension_numbers = #tpu.dot_dimension_numbers<[1], [0], [0], [1], [0, 0, 1, 1], [], []>} : vector<8x256xf32>, vector<256x512xf32>, vector<8x512xf32> -> vector<8x512xf32>
    %159 = arith.addf %154, %158 : vector<8x512xf32>
    %c2_103 = arith.constant 2 : index
    %c0_104 = arith.constant 0 : index
    %160 = vector.load %arg18[%c2_103, %c0_104] : memref<12x256xf32, #tpu.memory_space<vmem>>, vector<8x256xf32>
    %c2_105 = arith.constant 2 : index
    %c0_106 = arith.constant 0 : index
    %c0_107 = arith.constant 0 : index
    %161 = vector.load %arg9[%c2_105, %c0_106, %c0_107] : memref<5x256x512xf32, #tpu.memory_space<vmem>>, vector<1x256x512xf32>
    %162 = vector.shape_cast %161 : vector<1x256x512xf32> to vector<256x512xf32>
    %cst_108 = arith.constant dense<0.000000e+00> : vector<8x512xf32>
    %163 = tpu.matmul %160, %162, %cst_108 {dimension_numbers = #tpu.dot_dimension_numbers<[1], [0], [0], [1], [0, 0, 1, 1], [], []>} : vector<8x256xf32>, vector<256x512xf32>, vector<8x512xf32> -> vector<8x512xf32>
    %164 = arith.addf %159, %163 : vector<8x512xf32>
    %c3_109 = arith.constant 3 : index
    %c0_110 = arith.constant 0 : index
    %165 = vector.load %arg18[%c3_109, %c0_110] : memref<12x256xf32, #tpu.memory_space<vmem>>, vector<8x256xf32>
    %c3_111 = arith.constant 3 : index
    %c0_112 = arith.constant 0 : index
    %c0_113 = arith.constant 0 : index
    %166 = vector.load %arg9[%c3_111, %c0_112, %c0_113] : memref<5x256x512xf32, #tpu.memory_space<vmem>>, vector<1x256x512xf32>
    %167 = vector.shape_cast %166 : vector<1x256x512xf32> to vector<256x512xf32>
    %cst_114 = arith.constant dense<0.000000e+00> : vector<8x512xf32>
    %168 = tpu.matmul %165, %167, %cst_114 {dimension_numbers = #tpu.dot_dimension_numbers<[1], [0], [0], [1], [0, 0, 1, 1], [], []>} : vector<8x256xf32>, vector<256x512xf32>, vector<8x512xf32> -> vector<8x512xf32>
    %169 = arith.addf %164, %168 : vector<8x512xf32>
    %c4_115 = arith.constant 4 : index
    %c0_116 = arith.constant 0 : index
    %170 = vector.load %arg18[%c4_115, %c0_116] : memref<12x256xf32, #tpu.memory_space<vmem>>, vector<8x256xf32>
    %c4_117 = arith.constant 4 : index
    %c0_118 = arith.constant 0 : index
    %c0_119 = arith.constant 0 : index
    %171 = vector.load %arg9[%c4_117, %c0_118, %c0_119] : memref<5x256x512xf32, #tpu.memory_space<vmem>>, vector<1x256x512xf32>
    %172 = vector.shape_cast %171 : vector<1x256x512xf32> to vector<256x512xf32>
    %cst_120 = arith.constant dense<0.000000e+00> : vector<8x512xf32>
    %173 = tpu.matmul %170, %172, %cst_120 {dimension_numbers = #tpu.dot_dimension_numbers<[1], [0], [0], [1], [0, 0, 1, 1], [], []>} : vector<8x256xf32>, vector<256x512xf32>, vector<8x512xf32> -> vector<8x512xf32>
    %174 = arith.addf %169, %173 : vector<8x512xf32>
    %175 = vector.broadcast %89 : vector<1x512xf32> to vector<8x512xf32>
    %176 = arith.addf %174, %175 : vector<8x512xf32>
    %cst_121 = arith.constant 0.000000e+00 : f32
    %177 = vector.broadcast %cst_121 : f32 to vector<8x512xf32>
    %178 = arith.maximumf %176, %177 : vector<8x512xf32>
    %179 = vector.extract_strided_slice %178 {offsets = [0, 0], sizes = [8, 256], strides = [1, 1]} : vector<8x512xf32> to vector<8x256xf32>
    %180 = vector.extract_strided_slice %178 {offsets = [0, 256], sizes = [8, 256], strides = [1, 1]} : vector<8x512xf32> to vector<8x256xf32>
    %181 = arith.maximumf %179, %180 : vector<8x256xf32>
    %cst_122 = arith.constant dense<0.000000e+00> : vector<4x256xf32>
    %182 = tpu.matmul %79, %181, %cst_122 {dimension_numbers = #tpu.dot_dimension_numbers<[1], [0], [0], [1], [0, 0, 1, 1], [], []>, precision = #tpu.contract_precision<fp32>} : vector<4x8xf32>, vector<8x256xf32>, vector<4x256xf32> -> vector<4x256xf32>
    %cst_123 = arith.constant dense<0.000000e+00> : vector<4x256xf32>
    %183 = tpu.matmul %87, %181, %cst_123 {dimension_numbers = #tpu.dot_dimension_numbers<[1], [0], [0], [1], [0, 0, 1, 1], [], []>, precision = #tpu.contract_precision<fp32>} : vector<4x8xf32>, vector<8x256xf32>, vector<4x256xf32> -> vector<4x256xf32>
    %184 = arith.maximumf %182, %183 : vector<4x256xf32>
    %c0_124 = arith.constant 0 : index
    %c0_125 = arith.constant 0 : index
    %185 = vector.load %arg19[%c0_124, %c0_125] : memref<4x256xf32, #tpu.memory_space<vmem>>, vector<4x256xf32>
    tpu.vector_store %arg19[%c0_124, %c0_125], %184 {strides = array<i32>} : memref<4x256xf32, #tpu.memory_space<vmem>>, vector<4x256xf32>,
    %c0_126 = arith.constant 0 : index
    %c0_127 = arith.constant 0 : index
    %186 = vector.load %arg19[%c0_126, %c0_127] : memref<4x256xf32, #tpu.memory_space<vmem>>, vector<1x256xf32>
    %c0_128 = arith.constant 0 : index
    %c0_129 = arith.constant 0 : index
    %c0_130 = arith.constant 0 : index
    %187 = vector.load %arg20[%c0_128, %c0_129, %c0_130] : memref<4x2x256xf32, #tpu.memory_space<vmem>>, vector<1x1x256xf32>
    %188 = vector.shape_cast %187 : vector<1x1x256xf32> to vector<1x256xf32>
    %189 = vector.shape_cast %186 : vector<1x256xf32> to vector<1x1x256xf32>
    tpu.vector_store %arg20[%c0_128, %c0_129, %c0_130], %189 {strides = array<i32>} : memref<4x2x256xf32, #tpu.memory_space<vmem>>, vector<1x1x256xf32>,
    %c1_131 = arith.constant 1 : index
    %c0_132 = arith.constant 0 : index
    %190 = vector.load %arg19[%c1_131, %c0_132] : memref<4x256xf32, #tpu.memory_space<vmem>>, vector<1x256xf32>
    %c1_133 = arith.constant 1 : index
    %c0_134 = arith.constant 0 : index
    %c0_135 = arith.constant 0 : index
    %191 = vector.load %arg20[%c1_133, %c0_134, %c0_135] : memref<4x2x256xf32, #tpu.memory_space<vmem>>, vector<1x1x256xf32>
    %192 = vector.shape_cast %191 : vector<1x1x256xf32> to vector<1x256xf32>
    %193 = vector.shape_cast %190 : vector<1x256xf32> to vector<1x1x256xf32>
    tpu.vector_store %arg20[%c1_133, %c0_134, %c0_135], %193 {strides = array<i32>} : memref<4x2x256xf32, #tpu.memory_space<vmem>>, vector<1x1x256xf32>,
    %c2_136 = arith.constant 2 : index
    %c0_137 = arith.constant 0 : index
    %194 = vector.load %arg19[%c2_136, %c0_137] : memref<4x256xf32, #tpu.memory_space<vmem>>, vector<1x256xf32>
    %c2_138 = arith.constant 2 : index
    %c0_139 = arith.constant 0 : index
    %c0_140 = arith.constant 0 : index
    %195 = vector.load %arg20[%c2_138, %c0_139, %c0_140] : memref<4x2x256xf32, #tpu.memory_space<vmem>>, vector<1x1x256xf32>
    %196 = vector.shape_cast %195 : vector<1x1x256xf32> to vector<1x256xf32>
    %197 = vector.shape_cast %194 : vector<1x256xf32> to vector<1x1x256xf32>
    tpu.vector_store %arg20[%c2_138, %c0_139, %c0_140], %197 {strides = array<i32>} : memref<4x2x256xf32, #tpu.memory_space<vmem>>, vector<1x1x256xf32>,
    %c3_141 = arith.constant 3 : index
    %c0_142 = arith.constant 0 : index
    %198 = vector.load %arg19[%c3_141, %c0_142] : memref<4x256xf32, #tpu.memory_space<vmem>>, vector<1x256xf32>
    %c3_143 = arith.constant 3 : index
    %c0_144 = arith.constant 0 : index
    %c0_145 = arith.constant 0 : index
    %199 = vector.load %arg20[%c3_143, %c0_144, %c0_145] : memref<4x2x256xf32, #tpu.memory_space<vmem>>, vector<1x1x256xf32>
    %200 = vector.shape_cast %199 : vector<1x1x256xf32> to vector<1x256xf32>
    %201 = vector.shape_cast %198 : vector<1x256xf32> to vector<1x1x256xf32>
    tpu.vector_store %arg20[%c3_143, %c0_144, %c0_145], %201 {strides = array<i32>} : memref<4x2x256xf32, #tpu.memory_space<vmem>>, vector<1x1x256xf32>,
    %c1_146 = arith.constant 1 : index
    %c0_147 = arith.constant 0 : index
    %202 = vector.load %arg16[%c1_146, %c0_147] : memref<2x2xf32, #tpu.memory_space<vmem>>, vector<1x2xf32>
    %203 = vector.extract_strided_slice %202 {offsets = [0, 0], sizes = [1, 1], strides = [1, 1]} : vector<1x2xf32> to vector<1x1xf32>
    %204 = vector.extract_strided_slice %202 {offsets = [0, 1], sizes = [1, 1], strides = [1, 1]} : vector<1x2xf32> to vector<1x1xf32>
    %cst_148 = arith.constant 1.400000e+01 : f32
    %205 = vector.broadcast %cst_148 : f32 to vector<1x1xf32>
    %206 = arith.mulf %204, %205 : vector<1x1xf32>
    %207 = vector.broadcast %206 : vector<1x1xf32> to vector<28x28xf32>
    %208 = arith.addf %34, %207 : vector<28x28xf32>
    %209 = math.absf %208 : vector<28x28xf32>
    %cst_149 = arith.constant 1.000000e+00 : f32
    %210 = vector.broadcast %cst_149 : f32 to vector<28x28xf32>
    %211 = arith.subf %210, %209 : vector<28x28xf32>
    %cst_150 = arith.constant 0.000000e+00 : f32
    %212 = vector.broadcast %cst_150 : f32 to vector<28x28xf32>
    %213 = arith.maximumf %212, %211 : vector<28x28xf32>
    %cst_151 = arith.constant 1.400000e+01 : f32
    %214 = vector.broadcast %cst_151 : f32 to vector<1x1xf32>
    %215 = arith.mulf %203, %214 : vector<1x1xf32>
    %216 = vector.broadcast %215 : vector<1x1xf32> to vector<28x28xf32>
    %217 = arith.addf %55, %216 : vector<28x28xf32>
    %218 = math.absf %217 : vector<28x28xf32>
    %cst_152 = arith.constant 1.000000e+00 : f32
    %219 = vector.broadcast %cst_152 : f32 to vector<28x28xf32>
    %220 = arith.subf %219, %218 : vector<28x28xf32>
    %cst_153 = arith.constant 0.000000e+00 : f32
    %221 = vector.broadcast %cst_153 : f32 to vector<28x28xf32>
    %222 = arith.maximumf %221, %220 : vector<28x28xf32>
    %c1_154 = arith.constant 1 : index
    %c0_155 = arith.constant 0 : index
    %c0_156 = arith.constant 0 : index
    %223 = vector.load %arg2[%c1_154, %c0_155, %c0_156] : memref<2x28x28xf32, #tpu.memory_space<vmem>>, vector<1x28x28xf32>
    %224 = vector.shape_cast %223 : vector<1x28x28xf32> to vector<28x28xf32>
    %cst_157 = arith.constant dense<0.000000e+00> : vector<28x28xf32>
    %225 = tpu.matmul %213, %224, %cst_157 {dimension_numbers = #tpu.dot_dimension_numbers<[1], [0], [0], [1], [0, 0, 1, 1], [], []>} : vector<28x28xf32>, vector<28x28xf32>, vector<28x28xf32> -> vector<28x28xf32>
    %cst_158 = arith.constant dense<0.000000e+00> : vector<28x28xf32>
    %226 = tpu.matmul %225, %222, %cst_158 {dimension_numbers = #tpu.dot_dimension_numbers<[1], [0], [0], [1], [0, 0, 1, 1], [], []>} : vector<28x28xf32>, vector<28x28xf32>, vector<28x28xf32> -> vector<28x28xf32>
    %c0_159 = arith.constant 0 : index
    %c0_160 = arith.constant 0 : index
    %227 = vector.load %arg17[%c0_159, %c0_160] : memref<28x28xf32, #tpu.memory_space<vmem>>, vector<28x28xf32>
    tpu.vector_store %arg17[%c0_159, %c0_160], %226 {strides = array<i32>} : memref<28x28xf32, #tpu.memory_space<vmem>>, vector<28x28xf32>,
    %c0_161 = arith.constant 0 : index
    %c0_162 = arith.constant 0 : index
    %228 = vector.load %arg17[%c0_161, %c0_162] : memref<28x28xf32, #tpu.memory_space<vmem>>, vector<24x28xf32>
    %c0_163 = arith.constant 0 : index
    %c0_164 = arith.constant 0 : index
    %c0_165 = arith.constant 0 : index
    %229 = vector.load %arg7[%c0_163, %c0_164, %c0_165] : memref<5x28x512xf32, #tpu.memory_space<vmem>>, vector<1x28x512xf32>
    %230 = vector.shape_cast %229 : vector<1x28x512xf32> to vector<28x512xf32>
    %cst_166 = arith.constant dense<0.000000e+00> : vector<24x512xf32>
    %231 = tpu.matmul %228, %230, %cst_166 {dimension_numbers = #tpu.dot_dimension_numbers<[1], [0], [0], [1], [0, 0, 1, 1], [], []>} : vector<24x28xf32>, vector<28x512xf32>, vector<24x512xf32> -> vector<24x512xf32>
    %c1_167 = arith.constant 1 : index
    %c0_168 = arith.constant 0 : index
    %232 = vector.load %arg17[%c1_167, %c0_168] : memref<28x28xf32, #tpu.memory_space<vmem>>, vector<24x28xf32>
    %c1_169 = arith.constant 1 : index
    %c0_170 = arith.constant 0 : index
    %c0_171 = arith.constant 0 : index
    %233 = vector.load %arg7[%c1_169, %c0_170, %c0_171] : memref<5x28x512xf32, #tpu.memory_space<vmem>>, vector<1x28x512xf32>
    %234 = vector.shape_cast %233 : vector<1x28x512xf32> to vector<28x512xf32>
    %cst_172 = arith.constant dense<0.000000e+00> : vector<24x512xf32>
    %235 = tpu.matmul %232, %234, %cst_172 {dimension_numbers = #tpu.dot_dimension_numbers<[1], [0], [0], [1], [0, 0, 1, 1], [], []>} : vector<24x28xf32>, vector<28x512xf32>, vector<24x512xf32> -> vector<24x512xf32>
    %236 = arith.addf %231, %235 : vector<24x512xf32>
    %c2_173 = arith.constant 2 : index
    %c0_174 = arith.constant 0 : index
    %237 = vector.load %arg17[%c2_173, %c0_174] : memref<28x28xf32, #tpu.memory_space<vmem>>, vector<24x28xf32>
    %c2_175 = arith.constant 2 : index
    %c0_176 = arith.constant 0 : index
    %c0_177 = arith.constant 0 : index
    %238 = vector.load %arg7[%c2_175, %c0_176, %c0_177] : memref<5x28x512xf32, #tpu.memory_space<vmem>>, vector<1x28x512xf32>
    %239 = vector.shape_cast %238 : vector<1x28x512xf32> to vector<28x512xf32>
    %cst_178 = arith.constant dense<0.000000e+00> : vector<24x512xf32>
    %240 = tpu.matmul %237, %239, %cst_178 {dimension_numbers = #tpu.dot_dimension_numbers<[1], [0], [0], [1], [0, 0, 1, 1], [], []>} : vector<24x28xf32>, vector<28x512xf32>, vector<24x512xf32> -> vector<24x512xf32>
    %241 = arith.addf %236, %240 : vector<24x512xf32>
    %c3_179 = arith.constant 3 : index
    %c0_180 = arith.constant 0 : index
    %242 = vector.load %arg17[%c3_179, %c0_180] : memref<28x28xf32, #tpu.memory_space<vmem>>, vector<24x28xf32>
    %c3_181 = arith.constant 3 : index
    %c0_182 = arith.constant 0 : index
    %c0_183 = arith.constant 0 : index
    %243 = vector.load %arg7[%c3_181, %c0_182, %c0_183] : memref<5x28x512xf32, #tpu.memory_space<vmem>>, vector<1x28x512xf32>
    %244 = vector.shape_cast %243 : vector<1x28x512xf32> to vector<28x512xf32>
    %cst_184 = arith.constant dense<0.000000e+00> : vector<24x512xf32>
    %245 = tpu.matmul %242, %244, %cst_184 {dimension_numbers = #tpu.dot_dimension_numbers<[1], [0], [0], [1], [0, 0, 1, 1], [], []>} : vector<24x28xf32>, vector<28x512xf32>, vector<24x512xf32> -> vector<24x512xf32>
    %246 = arith.addf %241, %245 : vector<24x512xf32>
    %c4_185 = arith.constant 4 : index
    %c0_186 = arith.constant 0 : index
    %247 = vector.load %arg17[%c4_185, %c0_186] : memref<28x28xf32, #tpu.memory_space<vmem>>, vector<24x28xf32>
    %c4_187 = arith.constant 4 : index
    %c0_188 = arith.constant 0 : index
    %c0_189 = arith.constant 0 : index
    %248 = vector.load %arg7[%c4_187, %c0_188, %c0_189] : memref<5x28x512xf32, #tpu.memory_space<vmem>>, vector<1x28x512xf32>
    %249 = vector.shape_cast %248 : vector<1x28x512xf32> to vector<28x512xf32>
    %cst_190 = arith.constant dense<0.000000e+00> : vector<24x512xf32>
    %250 = tpu.matmul %247, %249, %cst_190 {dimension_numbers = #tpu.dot_dimension_numbers<[1], [0], [0], [1], [0, 0, 1, 1], [], []>} : vector<24x28xf32>, vector<28x512xf32>, vector<24x512xf32> -> vector<24x512xf32>
    %251 = arith.addf %246, %250 : vector<24x512xf32>
    %252 = vector.broadcast %88 : vector<1x512xf32> to vector<24x512xf32>
    %253 = arith.addf %251, %252 : vector<24x512xf32>
    %cst_191 = arith.constant 0.000000e+00 : f32
    %254 = vector.broadcast %cst_191 : f32 to vector<24x512xf32>
    %255 = arith.maximumf %253, %254 : vector<24x512xf32>
    %256 = vector.extract_strided_slice %255 {offsets = [0, 0], sizes = [24, 256], strides = [1, 1]} : vector<24x512xf32> to vector<24x256xf32>
    %257 = vector.extract_strided_slice %255 {offsets = [0, 256], sizes = [24, 256], strides = [1, 1]} : vector<24x512xf32> to vector<24x256xf32>
    %258 = arith.maximumf %256, %257 : vector<24x256xf32>
    %cst_192 = arith.constant dense<0.000000e+00> : vector<12x256xf32>
    %259 = tpu.matmul %63, %258, %cst_192 {dimension_numbers = #tpu.dot_dimension_numbers<[1], [0], [0], [1], [0, 0, 1, 1], [], []>, precision = #tpu.contract_precision<fp32>} : vector<12x24xf32>, vector<24x256xf32>, vector<12x256xf32> -> vector<12x256xf32>
    %cst_193 = arith.constant dense<0.000000e+00> : vector<12x256xf32>
    %260 = tpu.matmul %71, %258, %cst_193 {dimension_numbers = #tpu.dot_dimension_numbers<[1], [0], [0], [1], [0, 0, 1, 1], [], []>, precision = #tpu.contract_precision<fp32>} : vector<12x24xf32>, vector<24x256xf32>, vector<12x256xf32> -> vector<12x256xf32>
    %261 = arith.maximumf %259, %260 : vector<12x256xf32>
    %c0_194 = arith.constant 0 : index
    %c0_195 = arith.constant 0 : index
    %262 = vector.load %arg18[%c0_194, %c0_195] : memref<12x256xf32, #tpu.memory_space<vmem>>, vector<12x256xf32>
    tpu.vector_store %arg18[%c0_194, %c0_195], %261 {strides = array<i32>} : memref<12x256xf32, #tpu.memory_space<vmem>>, vector<12x256xf32>,
    %c0_196 = arith.constant 0 : index
    %c0_197 = arith.constant 0 : index
    %263 = vector.load %arg18[%c0_196, %c0_197] : memref<12x256xf32, #tpu.memory_space<vmem>>, vector<8x256xf32>
    %c0_198 = arith.constant 0 : index
    %c0_199 = arith.constant 0 : index
    %c0_200 = arith.constant 0 : index
    %264 = vector.load %arg9[%c0_198, %c0_199, %c0_200] : memref<5x256x512xf32, #tpu.memory_space<vmem>>, vector<1x256x512xf32>
    %265 = vector.shape_cast %264 : vector<1x256x512xf32> to vector<256x512xf32>
    %cst_201 = arith.constant dense<0.000000e+00> : vector<8x512xf32>
    %266 = tpu.matmul %263, %265, %cst_201 {dimension_numbers = #tpu.dot_dimension_numbers<[1], [0], [0], [1], [0, 0, 1, 1], [], []>} : vector<8x256xf32>, vector<256x512xf32>, vector<8x512xf32> -> vector<8x512xf32>
    %c1_202 = arith.constant 1 : index
    %c0_203 = arith.constant 0 : index
    %267 = vector.load %arg18[%c1_202, %c0_203] : memref<12x256xf32, #tpu.memory_space<vmem>>, vector<8x256xf32>
    %c1_204 = arith.constant 1 : index
    %c0_205 = arith.constant 0 : index
    %c0_206 = arith.constant 0 : index
    %268 = vector.load %arg9[%c1_204, %c0_205, %c0_206] : memref<5x256x512xf32, #tpu.memory_space<vmem>>, vector<1x256x512xf32>
    %269 = vector.shape_cast %268 : vector<1x256x512xf32> to vector<256x512xf32>
    %cst_207 = arith.constant dense<0.000000e+00> : vector<8x512xf32>
    %270 = tpu.matmul %267, %269, %cst_207 {dimension_numbers = #tpu.dot_dimension_numbers<[1], [0], [0], [1], [0, 0, 1, 1], [], []>} : vector<8x256xf32>, vector<256x512xf32>, vector<8x512xf32> -> vector<8x512xf32>
    %271 = arith.addf %266, %270 : vector<8x512xf32>
    %c2_208 = arith.constant 2 : index
    %c0_209 = arith.constant 0 : index
    %272 = vector.load %arg18[%c2_208, %c0_209] : memref<12x256xf32, #tpu.memory_space<vmem>>, vector<8x256xf32>
    %c2_210 = arith.constant 2 : index
    %c0_211 = arith.constant 0 : index
    %c0_212 = arith.constant 0 : index
    %273 = vector.load %arg9[%c2_210, %c0_211, %c0_212] : memref<5x256x512xf32, #tpu.memory_space<vmem>>, vector<1x256x512xf32>
    %274 = vector.shape_cast %273 : vector<1x256x512xf32> to vector<256x512xf32>
    %cst_213 = arith.constant dense<0.000000e+00> : vector<8x512xf32>
    %275 = tpu.matmul %272, %274, %cst_213 {dimension_numbers = #tpu.dot_dimension_numbers<[1], [0], [0], [1], [0, 0, 1, 1], [], []>} : vector<8x256xf32>, vector<256x512xf32>, vector<8x512xf32> -> vector<8x512xf32>
    %276 = arith.addf %271, %275 : vector<8x512xf32>
    %c3_214 = arith.constant 3 : index
    %c0_215 = arith.constant 0 : index
    %277 = vector.load %arg18[%c3_214, %c0_215] : memref<12x256xf32, #tpu.memory_space<vmem>>, vector<8x256xf32>
    %c3_216 = arith.constant 3 : index
    %c0_217 = arith.constant 0 : index
    %c0_218 = arith.constant 0 : index
    %278 = vector.load %arg9[%c3_216, %c0_217, %c0_218] : memref<5x256x512xf32, #tpu.memory_space<vmem>>, vector<1x256x512xf32>
    %279 = vector.shape_cast %278 : vector<1x256x512xf32> to vector<256x512xf32>
    %cst_219 = arith.constant dense<0.000000e+00> : vector<8x512xf32>
    %280 = tpu.matmul %277, %279, %cst_219 {dimension_numbers = #tpu.dot_dimension_numbers<[1], [0], [0], [1], [0, 0, 1, 1], [], []>} : vector<8x256xf32>, vector<256x512xf32>, vector<8x512xf32> -> vector<8x512xf32>
    %281 = arith.addf %276, %280 : vector<8x512xf32>
    %c4_220 = arith.constant 4 : index
    %c0_221 = arith.constant 0 : index
    %282 = vector.load %arg18[%c4_220, %c0_221] : memref<12x256xf32, #tpu.memory_space<vmem>>, vector<8x256xf32>
    %c4_222 = arith.constant 4 : index
    %c0_223 = arith.constant 0 : index
    %c0_224 = arith.constant 0 : index
    %283 = vector.load %arg9[%c4_222, %c0_223, %c0_224] : memref<5x256x512xf32, #tpu.memory_space<vmem>>, vector<1x256x512xf32>
    %284 = vector.shape_cast %283 : vector<1x256x512xf32> to vector<256x512xf32>
    %cst_225 = arith.constant dense<0.000000e+00> : vector<8x512xf32>
    %285 = tpu.matmul %282, %284, %cst_225 {dimension_numbers = #tpu.dot_dimension_numbers<[1], [0], [0], [1], [0, 0, 1, 1], [], []>} : vector<8x256xf32>, vector<256x512xf32>, vector<8x512xf32> -> vector<8x512xf32>
    %286 = arith.addf %281, %285 : vector<8x512xf32>
    %287 = vector.broadcast %89 : vector<1x512xf32> to vector<8x512xf32>
    %288 = arith.addf %286, %287 : vector<8x512xf32>
    %cst_226 = arith.constant 0.000000e+00 : f32
    %289 = vector.broadcast %cst_226 : f32 to vector<8x512xf32>
    %290 = arith.maximumf %288, %289 : vector<8x512xf32>
    %291 = vector.extract_strided_slice %290 {offsets = [0, 0], sizes = [8, 256], strides = [1, 1]} : vector<8x512xf32> to vector<8x256xf32>
    %292 = vector.extract_strided_slice %290 {offsets = [0, 256], sizes = [8, 256], strides = [1, 1]} : vector<8x512xf32> to vector<8x256xf32>
    %293 = arith.maximumf %291, %292 : vector<8x256xf32>
    %cst_227 = arith.constant dense<0.000000e+00> : vector<4x256xf32>
    %294 = tpu.matmul %79, %293, %cst_227 {dimension_numbers = #tpu.dot_dimension_numbers<[1], [0], [0], [1], [0, 0, 1, 1], [], []>, precision = #tpu.contract_precision<fp32>} : vector<4x8xf32>, vector<8x256xf32>, vector<4x256xf32> -> vector<4x256xf32>
    %cst_228 = arith.constant dense<0.000000e+00> : vector<4x256xf32>
    %295 = tpu.matmul %87, %293, %cst_228 {dimension_numbers = #tpu.dot_dimension_numbers<[1], [0], [0], [1], [0, 0, 1, 1], [], []>, precision = #tpu.contract_precision<fp32>} : vector<4x8xf32>, vector<8x256xf32>, vector<4x256xf32> -> vector<4x256xf32>
    %296 = arith.maximumf %294, %295 : vector<4x256xf32>
    %c0_229 = arith.constant 0 : index
    %c0_230 = arith.constant 0 : index
    %297 = vector.load %arg19[%c0_229, %c0_230] : memref<4x256xf32, #tpu.memory_space<vmem>>, vector<4x256xf32>
    tpu.vector_store %arg19[%c0_229, %c0_230], %296 {strides = array<i32>} : memref<4x256xf32, #tpu.memory_space<vmem>>, vector<4x256xf32>,
    %c0_231 = arith.constant 0 : index
    %c0_232 = arith.constant 0 : index
    %298 = vector.load %arg19[%c0_231, %c0_232] : memref<4x256xf32, #tpu.memory_space<vmem>>, vector<1x256xf32>
    %c0_233 = arith.constant 0 : index
    %c1_234 = arith.constant 1 : index
    %c0_235 = arith.constant 0 : index
    %299 = vector.load %arg20[%c0_233, %c1_234, %c0_235] : memref<4x2x256xf32, #tpu.memory_space<vmem>>, vector<1x1x256xf32>
    %300 = vector.shape_cast %299 : vector<1x1x256xf32> to vector<1x256xf32>
    %301 = vector.shape_cast %298 : vector<1x256xf32> to vector<1x1x256xf32>
    tpu.vector_store %arg20[%c0_233, %c1_234, %c0_235], %301 {strides = array<i32>} : memref<4x2x256xf32, #tpu.memory_space<vmem>>, vector<1x1x256xf32>,
    %c1_236 = arith.constant 1 : index
    %c0_237 = arith.constant 0 : index
    %302 = vector.load %arg19[%c1_236, %c0_237] : memref<4x256xf32, #tpu.memory_space<vmem>>, vector<1x256xf32>
    %c1_238 = arith.constant 1 : index
    %c1_239 = arith.constant 1 : index
    %c0_240 = arith.constant 0 : index
    %303 = vector.load %arg20[%c1_238, %c1_239, %c0_240] : memref<4x2x256xf32, #tpu.memory_space<vmem>>, vector<1x1x256xf32>
    %304 = vector.shape_cast %303 : vector<1x1x256xf32> to vector<1x256xf32>
    %305 = vector.shape_cast %302 : vector<1x256xf32> to vector<1x1x256xf32>
    tpu.vector_store %arg20[%c1_238, %c1_239, %c0_240], %305 {strides = array<i32>} : memref<4x2x256xf32, #tpu.memory_space<vmem>>, vector<1x1x256xf32>,
    %c2_241 = arith.constant 2 : index
    %c0_242 = arith.constant 0 : index
    %306 = vector.load %arg19[%c2_241, %c0_242] : memref<4x256xf32, #tpu.memory_space<vmem>>, vector<1x256xf32>
    %c2_243 = arith.constant 2 : index
    %c1_244 = arith.constant 1 : index
    %c0_245 = arith.constant 0 : index
    %307 = vector.load %arg20[%c2_243, %c1_244, %c0_245] : memref<4x2x256xf32, #tpu.memory_space<vmem>>, vector<1x1x256xf32>
    %308 = vector.shape_cast %307 : vector<1x1x256xf32> to vector<1x256xf32>
    %309 = vector.shape_cast %306 : vector<1x256xf32> to vector<1x1x256xf32>
    tpu.vector_store %arg20[%c2_243, %c1_244, %c0_245], %309 {strides = array<i32>} : memref<4x2x256xf32, #tpu.memory_space<vmem>>, vector<1x1x256xf32>,
    %c3_246 = arith.constant 3 : index
    %c0_247 = arith.constant 0 : index
    %310 = vector.load %arg19[%c3_246, %c0_247] : memref<4x256xf32, #tpu.memory_space<vmem>>, vector<1x256xf32>
    %c3_248 = arith.constant 3 : index
    %c1_249 = arith.constant 1 : index
    %c0_250 = arith.constant 0 : index
    %311 = vector.load %arg20[%c3_248, %c1_249, %c0_250] : memref<4x2x256xf32, #tpu.memory_space<vmem>>, vector<1x1x256xf32>
    %312 = vector.shape_cast %311 : vector<1x1x256xf32> to vector<1x256xf32>
    %313 = vector.shape_cast %310 : vector<1x256xf32> to vector<1x1x256xf32>
    tpu.vector_store %arg20[%c3_248, %c1_249, %c0_250], %313 {strides = array<i32>} : memref<4x2x256xf32, #tpu.memory_space<vmem>>, vector<1x1x256xf32>,
    %c0_251 = arith.constant 0 : index
    %c0_252 = arith.constant 0 : index
    %c0_253 = arith.constant 0 : index
    %314 = vector.load %arg20[%c0_251, %c0_252, %c0_253] : memref<4x2x256xf32, #tpu.memory_space<vmem>>, vector<1x2x256xf32>
    %315 = vector.shape_cast %314 : vector<1x2x256xf32> to vector<2x256xf32>
    %c0_254 = arith.constant 0 : index
    %c0_255 = arith.constant 0 : index
    %c0_256 = arith.constant 0 : index
    %316 = vector.load %arg11[%c0_254, %c0_255, %c0_256] : memref<4x256x500xf32, #tpu.memory_space<vmem>>, vector<1x256x500xf32>
    %317 = vector.shape_cast %316 : vector<1x256x500xf32> to vector<256x500xf32>
    %cst_257 = arith.constant dense<0.000000e+00> : vector<2x500xf32>
    %318 = tpu.matmul %315, %317, %cst_257 {dimension_numbers = #tpu.dot_dimension_numbers<[1], [0], [0], [1], [0, 0, 1, 1], [], []>} : vector<2x256xf32>, vector<256x500xf32>, vector<2x500xf32> -> vector<2x500xf32>
    %c1_258 = arith.constant 1 : index
    %c0_259 = arith.constant 0 : index
    %c0_260 = arith.constant 0 : index
    %319 = vector.load %arg20[%c1_258, %c0_259, %c0_260] : memref<4x2x256xf32, #tpu.memory_space<vmem>>, vector<1x2x256xf32>
    %320 = vector.shape_cast %319 : vector<1x2x256xf32> to vector<2x256xf32>
    %c1_261 = arith.constant 1 : index
    %c0_262 = arith.constant 0 : index
    %c0_263 = arith.constant 0 : index
    %321 = vector.load %arg11[%c1_261, %c0_262, %c0_263] : memref<4x256x500xf32, #tpu.memory_space<vmem>>, vector<1x256x500xf32>
    %322 = vector.shape_cast %321 : vector<1x256x500xf32> to vector<256x500xf32>
    %cst_264 = arith.constant dense<0.000000e+00> : vector<2x500xf32>
    %323 = tpu.matmul %320, %322, %cst_264 {dimension_numbers = #tpu.dot_dimension_numbers<[1], [0], [0], [1], [0, 0, 1, 1], [], []>} : vector<2x256xf32>, vector<256x500xf32>, vector<2x500xf32> -> vector<2x500xf32>
    %324 = arith.addf %318, %323 : vector<2x500xf32>
    %c2_265 = arith.constant 2 : index
    %c0_266 = arith.constant 0 : index
    %c0_267 = arith.constant 0 : index
    %325 = vector.load %arg20[%c2_265, %c0_266, %c0_267] : memref<4x2x256xf32, #tpu.memory_space<vmem>>, vector<1x2x256xf32>
    %326 = vector.shape_cast %325 : vector<1x2x256xf32> to vector<2x256xf32>
    %c2_268 = arith.constant 2 : index
    %c0_269 = arith.constant 0 : index
    %c0_270 = arith.constant 0 : index
    %327 = vector.load %arg11[%c2_268, %c0_269, %c0_270] : memref<4x256x500xf32, #tpu.memory_space<vmem>>, vector<1x256x500xf32>
    %328 = vector.shape_cast %327 : vector<1x256x500xf32> to vector<256x500xf32>
    %cst_271 = arith.constant dense<0.000000e+00> : vector<2x500xf32>
    %329 = tpu.matmul %326, %328, %cst_271 {dimension_numbers = #tpu.dot_dimension_numbers<[1], [0], [0], [1], [0, 0, 1, 1], [], []>} : vector<2x256xf32>, vector<256x500xf32>, vector<2x500xf32> -> vector<2x500xf32>
    %330 = arith.addf %324, %329 : vector<2x500xf32>
    %c3_272 = arith.constant 3 : index
    %c0_273 = arith.constant 0 : index
    %c0_274 = arith.constant 0 : index
    %331 = vector.load %arg20[%c3_272, %c0_273, %c0_274] : memref<4x2x256xf32, #tpu.memory_space<vmem>>, vector<1x2x256xf32>
    %332 = vector.shape_cast %331 : vector<1x2x256xf32> to vector<2x256xf32>
    %c3_275 = arith.constant 3 : index
    %c0_276 = arith.constant 0 : index
    %c0_277 = arith.constant 0 : index
    %333 = vector.load %arg11[%c3_275, %c0_276, %c0_277] : memref<4x256x500xf32, #tpu.memory_space<vmem>>, vector<1x256x500xf32>
    %334 = vector.shape_cast %333 : vector<1x256x500xf32> to vector<256x500xf32>
    %cst_278 = arith.constant dense<0.000000e+00> : vector<2x500xf32>
    %335 = tpu.matmul %332, %334, %cst_278 {dimension_numbers = #tpu.dot_dimension_numbers<[1], [0], [0], [1], [0, 0, 1, 1], [], []>} : vector<2x256xf32>, vector<256x500xf32>, vector<2x500xf32> -> vector<2x500xf32>
    %336 = arith.addf %330, %335 : vector<2x500xf32>
    %c0_279 = arith.constant 0 : index
    %c0_280 = arith.constant 0 : index
    %337 = vector.load %arg12[%c0_279, %c0_280] : memref<1x500xf32, #tpu.memory_space<vmem>>, vector<1x500xf32>
    %338 = vector.broadcast %337 : vector<1x500xf32> to vector<2x500xf32>
    %339 = arith.addf %336, %338 : vector<2x500xf32>
    %cst_281 = arith.constant 0.000000e+00 : f32
    %340 = vector.broadcast %cst_281 : f32 to vector<2x500xf32>
    %341 = arith.maximumf %339, %340 : vector<2x500xf32>
    %c0_282 = arith.constant 0 : index
    %c0_283 = arith.constant 0 : index
    %342 = vector.load %arg13[%c0_282, %c0_283] : memref<500x10xf32, #tpu.memory_space<vmem>>, vector<500x10xf32>
    %cst_284 = arith.constant dense<0.000000e+00> : vector<2x10xf32>
    %343 = tpu.matmul %341, %342, %cst_284 {dimension_numbers = #tpu.dot_dimension_numbers<[1], [0], [0], [1], [0, 0, 1, 1], [], []>} : vector<2x500xf32>, vector<500x10xf32>, vector<2x10xf32> -> vector<2x10xf32>
    %c0_285 = arith.constant 0 : index
    %c0_286 = arith.constant 0 : index
    %344 = vector.load %arg14[%c0_285, %c0_286] : memref<1x10xf32, #tpu.memory_space<vmem>>, vector<1x10xf32>
    %345 = vector.broadcast %344 : vector<1x10xf32> to vector<2x10xf32>
    %346 = arith.addf %343, %345 : vector<2x10xf32>
    %c0_287 = arith.constant 0 : index
    %c0_288 = arith.constant 0 : index
    %347 = vector.load %arg15[%c0_287, %c0_288] : memref<2x10xf32, #tpu.memory_space<vmem>>, vector<2x10xf32>
    tpu.vector_store %arg15[%c0_287, %c0_288], %346 {strides = array<i32>} : memref<2x10xf32, #tpu.memory_space<vmem>>, vector<2x10xf32>,
    return
  }
  func.func @transform_0(%arg0: i32) -> (i32, i32) {
    %c0_i32 = arith.constant 0 : i32
    %c0_i32_0 = arith.constant 0 : i32
    return %arg0, %c0_i32 : i32, i32
  }
  func.func @transform_1(%arg0: i32) -> (i32, i32, i32) {
    %c0_i32 = arith.constant 0 : i32
    %c0_i32_0 = arith.constant 0 : i32
    %c0_i32_1 = arith.constant 0 : i32
    return %arg0, %c0_i32, %c0_i32_0 : i32, i32, i32
  }
  func.func @transform_2(%arg0: i32) -> (i32, i32) {
    %c0_i32 = arith.constant 0 : i32
    %c0_i32_0 = arith.constant 0 : i32
    %c0_i32_1 = arith.constant 0 : i32
    return %c0_i32, %c0_i32_0 : i32, i32
  }
  func.func @transform_3(%arg0: i32) -> (i32, i32) {
    %c0_i32 = arith.constant 0 : i32
    %c0_i32_0 = arith.constant 0 : i32
    %c0_i32_1 = arith.constant 0 : i32
    return %c0_i32, %c0_i32_0 : i32, i32
  }
  func.func @transform_4(%arg0: i32) -> (i32, i32) {
    %c0_i32 = arith.constant 0 : i32
    %c0_i32_0 = arith.constant 0 : i32
    %c0_i32_1 = arith.constant 0 : i32
    return %c0_i32, %c0_i32_0 : i32, i32
  }
  func.func @transform_5(%arg0: i32) -> (i32, i32) {
    %c0_i32 = arith.constant 0 : i32
    %c0_i32_0 = arith.constant 0 : i32
    %c0_i32_1 = arith.constant 0 : i32
    return %c0_i32, %c0_i32_0 : i32, i32
  }
  func.func @transform_6(%arg0: i32) -> (i32, i32, i32) {
    %c0_i32 = arith.constant 0 : i32
    %c0_i32_0 = arith.constant 0 : i32
    %c0_i32_1 = arith.constant 0 : i32
    %c0_i32_2 = arith.constant 0 : i32
    return %c0_i32, %c0_i32_0, %c0_i32_1 : i32, i32, i32
  }
  func.func @transform_7(%arg0: i32) -> (i32, i32) {
    %c0_i32 = arith.constant 0 : i32
    %c0_i32_0 = arith.constant 0 : i32
    %c0_i32_1 = arith.constant 0 : i32
    return %c0_i32, %c0_i32_0 : i32, i32
  }
  func.func @transform_8(%arg0: i32) -> (i32, i32, i32) {
    %c0_i32 = arith.constant 0 : i32
    %c0_i32_0 = arith.constant 0 : i32
    %c0_i32_1 = arith.constant 0 : i32
    %c0_i32_2 = arith.constant 0 : i32
    return %c0_i32, %c0_i32_0, %c0_i32_1 : i32, i32, i32
  }
  func.func @transform_9(%arg0: i32) -> (i32, i32) {
    %c0_i32 = arith.constant 0 : i32
    %c0_i32_0 = arith.constant 0 : i32
    %c0_i32_1 = arith.constant 0 : i32
    return %c0_i32, %c0_i32_0 : i32, i32
  }
  func.func @transform_10(%arg0: i32) -> (i32, i32, i32) {
    %c0_i32 = arith.constant 0 : i32
    %c0_i32_0 = arith.constant 0 : i32
    %c0_i32_1 = arith.constant 0 : i32
    %c0_i32_2 = arith.constant 0 : i32
    return %c0_i32, %c0_i32_0, %c0_i32_1 : i32, i32, i32
  }
  func.func @transform_11(%arg0: i32) -> (i32, i32) {
    %c0_i32 = arith.constant 0 : i32
    %c0_i32_0 = arith.constant 0 : i32
    %c0_i32_1 = arith.constant 0 : i32
    return %c0_i32, %c0_i32_0 : i32, i32
  }
  func.func @transform_12(%arg0: i32) -> (i32, i32) {
    %c0_i32 = arith.constant 0 : i32
    %c0_i32_0 = arith.constant 0 : i32
    %c0_i32_1 = arith.constant 0 : i32
    return %c0_i32, %c0_i32_0 : i32, i32
  }
  func.func @transform_13(%arg0: i32) -> (i32, i32) {
    %c0_i32 = arith.constant 0 : i32
    %c0_i32_0 = arith.constant 0 : i32
    %c0_i32_1 = arith.constant 0 : i32
    return %c0_i32, %c0_i32_0 : i32, i32
  }
  func.func @transform_14(%arg0: i32) -> (i32, i32) {
    %c0_i32 = arith.constant 0 : i32
    %c0_i32_0 = arith.constant 0 : i32
    return %arg0, %c0_i32 : i32, i32
  }
}

</mosaic_0001>

<bundles_post_ra>
// kernel: polo_forward.1
= control target key start
LH: loop header
LB: loop body
LE: loop exit
PB: predicated region body
PF: predicated region fallthrough
CT: control target
= control target key end

     0   :  { %v13790_v27 = vmov 1983009808   ;;  %v21393_v29 = vlaneseq  ;;  %s21378_s0 = inlined_call_operand.vmem [shape: f32[2,768], index: 0, kind: input, shape index: {}]   ;;  %s21379_s1 = inlined_call_operand.vmem [shape: f32[2,28,28], index: 1, kind: input, shape index: {}]   ;;  %s21380_s2 = inlined_call_operand.vmem [shape: f32[768,32], index: 2, kind: input, shape index: {}]   ;;  %s21381_s3 = inlined_call_operand.vmem [shape: f32[1,32], index: 3, kind: input, shape index: {}]   ;;  %s21382_s4 = inlined_call_operand.vmem [shape: f32[32,2], index: 4, kind: input, shape index: {}]   ;;  %s21383_s5 = inlined_call_operand.vmem [shape: f32[1,2], index: 5, kind: input, shape index: {}]   ;;  %s21384_s6 = inlined_call_operand.vmem [shape: f32[5,28,512], index: 6, kind: input, shape index: {}]   ;;  %s21385_s7 = inlined_call_operand.vmem [shape: f32[1,512], index: 7, kind: input, shape index: {}]   ;;  %s21386_s8 = inlined_call_operand.vmem [shape: f32[5,256,512], index: 8, kind: input, shape index: {}]   ;;  %s21387_s9 = inlined_call_operand.vmem [shape: f32[1,512], index: 9, kind: input, shape index: {}]   ;;  %s21388_s10 = inlined_call_operand.vmem [shape: f32[4,256,500], index: 10, kind: input, shape index: {}]   ;;  %s21389_s11 = inlined_call_operand.vmem [shape: f32[1,500], index: 11, kind: input, shape index: {}]   ;;  %s21390_s12 = inlined_call_operand.vmem [shape: f32[500,10], index: 12, kind: input, shape index: {}]   ;;  %s21391_s13 = inlined_call_operand.vmem [shape: f32[1,10], index: 13, kind: input, shape index: {}]   ;;  %s21392_s14 = inlined_call_operand.hbm [shape: f32[2,10], index: 14, kind: output, shape index: {}]  }
   0x1   :  { %v81_v0 = vld [vmem:[%s21380_s2 + $0xf8] sm:$0xff]  ;;  %v80_v2 = vld [vmem:[%s21380_s2 + $0xf0] sm:$0xff]  ;;  %v79_v6 = vld [vmem:[%s21380_s2 + $0xe8] sm:$0xff]  ;;  %v157_v28 = vunpack.c.l.s4 %v13790_v27 }
   0x2   :  { %v65_v1 = vld [vmem:[%s21380_s2 + $0x78] sm:$0xff]  ;;  %13510 = vmatprep.subr.mxu0 %v81_v0  ;;  %v64_v4 = vld [vmem:[%s21380_s2 + $0x70] sm:$0xff]  ;;  %v63_v8 = vld [vmem:[%s21380_s2 + $0x68] sm:$0xff]  ;;  %v13976_v39 = vshrl.u32 %v21393_v29, 7 }
   0x3   :  { %v113_v3 = vld [vmem:[%s21380_s2 + $0x1f8] sm:$0xff]  ;;  %13511 = vmatpush3.msra.mxu0 %v65_v1  ;;  %v112_v7 = vld [vmem:[%s21380_s2 + $0x1f0] sm:$0xff]  ;;  %v111_v10 = vld [vmem:[%s21380_s2 + $0x1e8] sm:$0xff]  ;;  %v158_v38 = vunpack.c.0.s8 %v157_v28 }
   0x4   :  { %v97_v5 = vld [vmem:[%s21380_s2 + $0x178] sm:$0xff]  ;;  %13545 = vmatprep.subr.mxu1 %v113_v3  ;;  %13512 = vmatprep.subr.mxu0 %v80_v2  ;;  %v96_v9 = vld [vmem:[%s21380_s2 + $0x170] sm:$0xff]  ;;  %v78_v11 = vld [vmem:[%s21380_s2 + $0xe0] sm:$0xff]  ;;  %21460 = vst [vmem:[#allocation10_spill] sm:$0xff] %v13976_v39 }
   0x5   :  { %13546 = vmatpush3.msra.mxu1 %v97_v5  ;;  %13513 = vmatpush3.msra.mxu0 %v64_v4  ;;  %v95_v12 = vld [vmem:[%s21380_s2 + $0x168] sm:$0xff]  ;;  %v62_v13 = vld [vmem:[%s21380_s2 + $0x60] sm:$0xff]  ;;  %v77_v15 = vld [vmem:[%s21380_s2 + $0xd8] sm:$0xff]  ;;  %v161_v48 = vsub.s32 %v158_v38, %v13976_v39 }
   0x6   :  { %13547 = vmatprep.subr.mxu1 %v112_v7  ;;  %13514 = vmatprep.subr.mxu0 %v79_v6  ;;  %v110_v14 = vld [vmem:[%s21380_s2 + $0x1e0] sm:$0xff]  ;;  %v61_v17 = vld [vmem:[%s21380_s2 + $0x58] sm:$0xff]  ;;  %v76_v19 = vld [vmem:[%s21380_s2 + $0xd0] sm:$0xff] }
   0x7   :  { %13548 = vmatpush3.msra.mxu1 %v96_v9  ;;  %13515 = vmatpush3.msra.mxu0 %v63_v8  ;;  %v94_v16 = vld [vmem:[%s21380_s2 + $0x160] sm:$0xff]  ;;  %v109_v18 = vld [vmem:[%s21380_s2 + $0x1d8] sm:$0xff]  ;;  %v60_v21 = vld [vmem:[%s21380_s2 + $0x50] sm:$0xff] }
   0x8   :  { %13549 = vmatprep.subr.mxu1 %v111_v10  ;;  %13516 = vmatprep.subr.mxu0 %v78_v11  ;;  %v93_v20 = vld [vmem:[%s21380_s2 + $0x158] sm:$0xff]  ;;  %v108_v22 = vld [vmem:[%s21380_s2 + $0x1d0] sm:$0xff]  ;;  %v75_v23 = vld [vmem:[%s21380_s2 + $0xc8] sm:$0xff] }
   0x9   :  { %13550 = vmatpush3.msra.mxu1 %v95_v12  ;;  %13517 = vmatpush3.msra.mxu0 %v62_v13  ;;  %v92_v24 = vld [vmem:[%s21380_s2 + $0x150] sm:$0xff]  ;;  %v59_v25 = vld [vmem:[%s21380_s2 + $0x48] sm:$0xff]  ;;  %v74_v30 = vld [vmem:[%s21380_s2 + $0xc0] sm:$0xff] }
   0xa   :  { %13551 = vmatprep.subr.mxu1 %v110_v14  ;;  %13518 = vmatprep.subr.mxu0 %v77_v15  ;;  %v107_v26 = vld [vmem:[%s21380_s2 + $0x1c8] sm:$0xff]  ;;  %v58_v32 = vld [vmem:[%s21380_s2 + $0x40] sm:$0xff]  ;;  %v73_v34 = vld [vmem:[%s21380_s2 + $0xb8] sm:$0xff] }
   0xb   :  { %13552 = vmatpush3.msra.mxu1 %v94_v16  ;;  %13519 = vmatpush3.msra.mxu0 %v61_v17  ;;  %v91_v31 = vld [vmem:[%s21380_s2 + $0x148] sm:$0xff]  ;;  %v106_v33 = vld [vmem:[%s21380_s2 + $0x1c0] sm:$0xff]  ;;  %v57_v36 = vld [vmem:[%s21380_s2 + $0x38] sm:$0xff] }
   0xc   :  { %13553 = vmatprep.subr.mxu1 %v109_v18  ;;  %13520 = vmatprep.subr.mxu0 %v76_v19  ;;  %v90_v35 = vld [vmem:[%s21380_s2 + $0x140] sm:$0xff]  ;;  %v105_v37 = vld [vmem:[%s21380_s2 + $0x1b8] sm:$0xff]  ;;  %v72_v40 = vld [vmem:[%s21380_s2 + $0xb0] sm:$0xff] }
   0xd   :  { %13554 = vmatpush3.msra.mxu1 %v93_v20  ;;  %13521 = vmatpush3.msra.mxu0 %v60_v21  ;;  %v89_v41 = vld [vmem:[%s21380_s2 + $0x138] sm:$0xff]  ;;  %v56_v42 = vld [vmem:[%s21380_s2 + $0x30] sm:$0xff]  ;;  %v71_v44 = vld [vmem:[%s21380_s2 + $0xa8] sm:$0xff] }
   0xe   :  { %13555 = vmatprep.subr.mxu1 %v108_v22  ;;  %13522 = vmatprep.subr.mxu0 %v75_v23  ;;  %v104_v43 = vld [vmem:[%s21380_s2 + $0x1b0] sm:$0xff]  ;;  %v55_v46 = vld [vmem:[%s21380_s2 + $0x28] sm:$0xff]  ;;  %v70_v49 = vld [vmem:[%s21380_s2 + $0xa0] sm:$0xff] }
   0xf   :  { %13556 = vmatpush3.msra.mxu1 %v92_v24  ;;  %13523 = vmatpush3.msra.mxu0 %v59_v25  ;;  %v88_v45 = vld [vmem:[%s21380_s2 + $0x130] sm:$0xff]  ;;  %v103_v47 = vld [vmem:[%s21380_s2 + $0x1a8] sm:$0xff]  ;;  %v48_v51 = vld [vmem:[%s21378_s0] sm:$0xff] }
  0x10   :  { %13557 = vmatprep.subr.mxu1 %v107_v26  ;;  %13524 = vmatprep.subr.mxu0 %v74_v30  ;;  %v87_v50 = vld [vmem:[%s21380_s2 + $0x128] sm:$0xff]  ;;  %v54_v52 = vld [vmem:[%s21380_s2 + $0x20] sm:$0xff]  ;;  %v69_v54 = vld [vmem:[%s21380_s2 + $0x98] sm:$0xff]  ;;  %v162_v58 = vrot.slane %v48_v51, %v161_v48  ;;  %v155_v59 = vcombine.high %v48_v51, %v48_v51 }
  0x11   :  { %13558 = vmatpush3.msra.mxu1 %v91_v31  ;;  %13525 = vmatpush3.msra.mxu0 %v58_v32  ;;  %v102_v53 = vld [vmem:[%s21380_s2 + $0x1a0] sm:$0xff]  ;;  %v53_v56 = vld [vmem:[%s21380_s2 + $0x18] sm:$0xff]  ;;  %v68_v60 = vld [vmem:[%s21380_s2 + $0x90] sm:$0xff] }
  0x12   :  { %13559 = vmatprep.subr.mxu1 %v106_v33  ;;  %13526 = vmatprep.subr.mxu0 %v73_v34  ;;  %v86_v55 = vld [vmem:[%s21380_s2 + $0x120] sm:$0xff]  ;;  %v101_v57 = vld [vmem:[%s21380_s2 + $0x198] sm:$0xff]  ;;  %v52_v62 = vld [vmem:[%s21380_s2 + $0x10] sm:$0xff]  ;;  %v170_v4 = vcombine.high %v162_v58, %v162_v58  ;;  %v169_v5 = vrot.slane %v155_v59, %v161_v48 }
  0x13   :  { %13560 = vmatpush3.msra.mxu1 %v90_v35  ;;  %13527 = vmatpush3.msra.mxu0 %v57_v36  ;;  %v85_v61 = vld [vmem:[%s21380_s2 + $0x118] sm:$0xff]  ;;  %v100_v63 = vld [vmem:[%s21380_s2 + $0x190] sm:$0xff]  ;;  %v67_v0 = vld [vmem:[%s21380_s2 + $0x88] sm:$0xff] }
  0x14   :  { %13561 = vmatprep.subr.mxu1 %v105_v37  ;;  %13528 = vmatprep.subr.mxu0 %v72_v40  ;;  %v84_v1 = vld [vmem:[%s21380_s2 + $0x110] sm:$0xff]  ;;  %v51_v2 = vld [vmem:[%s21380_s2 + $0x8] sm:$0xff]  ;;  %v66_v6 = vld [vmem:[%s21380_s2 + $0x80] sm:$0xff]  ;;  %v171_v12 = vcombine.high %v169_v5, %v169_v5 }
  0x15   :  { %13562 = vmatpush3.msra.mxu1 %v89_v41  ;;  %13529 = vmatpush3.msra.mxu0 %v56_v42  ;;  %v99_v3 = vld [vmem:[%s21380_s2 + $0x188] sm:$0xff]  ;;  %v50_v7 = vld [vmem:[%s21380_s2] sm:$0xff]  ;;  %v145_v10 = vld [vmem:[%s21380_s2 + $0x2f8] sm:$0xff] }
  0x16   :  { %13563 = vmatprep.subr.mxu1 %v104_v43  ;;  %13530 = vmatprep.subr.mxu0 %v71_v44  ;;  %v83_v8 = vld [vmem:[%s21380_s2 + $0x108] sm:$0xff]  ;;  %v98_v9 = vld [vmem:[%s21380_s2 + $0x180] sm:$0xff]  ;;  %v129_v13 = vld [vmem:[%s21380_s2 + $0x278] sm:$0xff] }
  0x17   :  { %13564 = vmatpush3.msra.mxu1 %v88_v45  ;;  %13531 = vmatpush3.msra.mxu0 %v55_v46  ;;  %v82_v11 = vld [vmem:[%s21380_s2 + $0x100] sm:$0xff]  ;;  %v14078_v14 = vld.sshfl [vmem:[%s21378_s0 + $0x8] sm:$0x33 pattern:$0x76325410]  ;;  %v144_v15 = vld [vmem:[%s21380_s2 + $0x2f0] sm:$0xff] }
  0x18   :  { %13565 = vmatprep.subr.mxu1 %v103_v47  ;;  %13532 = vmatprep.subr.mxu0 %v70_v49  ;;  %v179_v16 = vcombine.high %v14078_v14, %v14078_v14 }
  0x19   :  { %13566 = vmatpush3.msra.mxu1 %v87_v50  ;;  %13533 = vmatpush3.msra.mxu0 %v54_v52 }
  0x1a   :  { %13567 = vmatprep.subr.mxu1 %v102_v53  ;;  %13534 = vmatprep.subr.mxu0 %v69_v54 }
  0x1b   :  { %13568 = vmatpush3.msra.mxu1 %v86_v55  ;;  %13535 = vmatpush3.msra.mxu0 %v53_v56 }
  0x1c   :  { %13569 = vmatprep.subr.mxu1 %v101_v57  ;;  %13536 = vmatprep.subr.mxu0 %v68_v60 }
  0x1d   :  { %13570 = vmatpush3.msra.mxu1 %v85_v61  ;;  %13537 = vmatpush3.msra.mxu0 %v52_v62 }
  0x1e   :  { %13571 = vmatprep.subr.mxu1 %v100_v63  ;;  %13538 = vmatprep.subr.mxu0 %v67_v0 }
  0x1f   :  { %13572 = vmatpush3.msra.mxu1 %v84_v1  ;;  %13539 = vmatpush3.msra.mxu0 %v51_v2 }
  0x20   :  { %13573 = vmatprep.subr.mxu1 %v99_v3  ;;  %13540 = vmatprep.subr.mxu0 %v66_v6 }
  0x21   :  { %250 = vmatprep.mubr.f32.mxu0 %v170_v4  ;;  %13541 = vmatpush3.msra.mxu0 %v50_v7 }
  0x22   :  { %13574 = vmatpush3.msra.mxu1 %v83_v8  ;;  %251 = vmatmul.mubr.f32.vlgmr.msra.gmra.mxu0 %v162_v58 }
  0x23   :  { %13575 = vmatprep.subr.mxu1 %v98_v9 }
  0x24   :  { %19 = vsyncpa [#allocation8], 0  ;;  %13580 = vmatprep.subr.mxu0 %v145_v10  ;;  %13576 = vmatpush3.msra.mxu1 %v82_v11  ;;  %v128_v17 = vld [vmem:[%s21380_s2 + $0x270] sm:$0xff]  ;;  %v143_v18 = vld [vmem:[%s21380_s2 + $0x2e8] sm:$0xff]  ;;  %v21396_v48 = vmov 0.0   ;;  %vm13792_vm0 = vmmov 0  }
  0x25   :  { %320 = vmatprep.mubr.f32.mxu1 %v171_v12  ;;  %13581 = vmatpush3.msra.mxu0 %v129_v13  ;;  %v127_v19 = vld [vmem:[%s21380_s2 + $0x268] sm:$0xff]  ;;  %v142_v20 = vld [vmem:[%s21380_s2 + $0x2e0] sm:$0xff]  ;;  %v141_v22 = vld [vmem:[%s21380_s2 + $0x2d8] sm:$0xff]  ;;  %vm408_vm1 = vcmask 261120   ;;  %vm482_vm2 = vcmask 9216   ;;  %v14198_v7 = vadd.s32 8, %v13976_v39 }
  0x26   :  { %321 = vmatmul.mubr.f32.vlgmr.msra.gmra.mxu1 %v169_v5  ;;  %13582 = vmatprep.subr.mxu0 %v144_v15  ;;  %v126_v21 = vld [vmem:[%s21380_s2 + $0x260] sm:$0xff]  ;;  %v125_v23 = vld [vmem:[%s21380_s2 + $0x258] sm:$0xff]  ;;  %v140_v24 = vld [vmem:[%s21380_s2 + $0x2d0] sm:$0xff]  ;;  %v14201_v8 = vand.u32 127, %v21393_v29  ;;  %vm619_vm5 = vcmask 1043456   ;;  %vm606_vm6 = vcmask 228352  }
  0x27   :  { %13583 = vmatpush3.msra.mxu0 %v128_v17  ;;  %390 = vmatprep.mubr.f32.mxu0 %v179_v16  ;;  %v124_v25 = vld [vmem:[%s21380_s2 + $0x250] sm:$0xff]  ;;  %v139_v26 = vld [vmem:[%s21380_s2 + $0x2c8] sm:$0xff]  ;;  %v138_v28 = vld [vmem:[%s21380_s2 + $0x2c0] sm:$0xff]  ;;  %v546_v9 = vmul.u32 2, %v14198_v7  ;;  %vm811_vm7 = vcmask 224256   ;;  %vm1934_vm9 = vcmask 195584  }
  0x28   :  { %13584 = vmatprep.subr.mxu0 %v143_v18  ;;  %v123_v27 = vld [vmem:[%s21380_s2 + $0x248] sm:$0xff]  ;;  %v122_v30 = vld [vmem:[%s21380_s2 + $0x240] sm:$0xff]  ;;  %v137_v31 = vld [vmem:[%s21380_s2 + $0x2b8] sm:$0xff]  ;;  %13687 = vmatprep.subr.mxu1 %v21396_v48  ;;  %21461 = vst [vmem:[#allocation11_spill] sm:$0xff] %v14201_v8  ;;  %vm3354_vm11 = vcmask 1046528   ;;  %vm3784_vm12 = vcmask 1045504  }
  0x29   :  { %13585 = vmatpush3.msra.mxu0 %v127_v19  ;;  %v121_v32 = vld [vmem:[%s21380_s2 + $0x238] sm:$0xff]  ;;  %v136_v33 = vld [vmem:[%s21380_s2 + $0x2b0] sm:$0xff]  ;;  %v135_v35 = vld [vmem:[%s21380_s2 + $0x2a8] sm:$0xff]  ;;  %13695 = vmatprep.mubr.msk.f32.mxu1 %vm13792_vm0, %v21396_v48  ;;  %vm14205_vm3 = vcmp.eq.s32.totalorder %v14201_v8, %v546_v9  ;;  %v14209_v12 = vadd.s32 1, %v546_v9  ;;  %vm4076_vm13 = vcmask 1044480   ;;  %vm4553_vm14 = vcmask 64512  }
  0x2a   :  { %13586 = vmatprep.subr.mxu0 %v142_v20  ;;  %v120_v34 = vld [vmem:[%s21380_s2 + $0x230] sm:$0xff]  ;;  %v119_v36 = vld [vmem:[%s21380_s2 + $0x228] sm:$0xff]  ;;  %v134_v37 = vld [vmem:[%s21380_s2 + $0x2a0] sm:$0xff]  ;;  %vm11627_vm0 = vcmask 949248   ;;  %s13794_s20 = smov [#allocation7]  }
  0x2b   :  { %13587 = vmatpush3.msra.mxu0 %v126_v21  ;;  %v118_v38 = vld [vmem:[%s21380_s2 + $0x220] sm:$0xff]  ;;  %v133_v40 = vld [vmem:[%s21380_s2 + $0x298] sm:$0xff]  ;;  %v132_v42 = vld [vmem:[%s21380_s2 + $0x290] sm:$0xff]  ;;  %21464 = vst [vmem:[#allocation12_spill] sm:$0xff] %v14209_v12  ;;  %vm554_vm4 = vcmp.eq.s32.totalorder %v14201_v8, %v14209_v12  ;;  %s11782_s21 = sshll.u32 %s13794_s20, 4  ;;  %s11783_s21 = int_to_ptr.vmem [resolvable:$true] %s11782_s21 }
  0x2c   :  { %13588 = vmatprep.subr.mxu0 %v141_v22  ;;  %v117_v41 = vld [vmem:[%s21380_s2 + $0x218] sm:$0xff]  ;;  %v116_v43 = vld [vmem:[%s21380_s2 + $0x210] sm:$0xff]  ;;  %v131_v44 = vld [vmem:[%s21380_s2 + $0x288] sm:$0xff]  ;;  %v487_v22 = vadd.s32 16, %v13976_v39  ;;  %p13773_p1 = scmp.lt.s32.totalorder %s11783_s21, %s11783_s21 }
  0x2d   :  { %13589 = vmatpush3.msra.mxu0 %v125_v23  ;;  %v115_v45 = vld [vmem:[%s21380_s2 + $0x208] sm:$0xff]  ;;  %v130_v46 = vld [vmem:[%s21380_s2 + $0x280] sm:$0xff]  ;;  %v400_v49 = vld [vmem:[%s21382_s4 + $0x18] sm:$0xff]  ;;  %v488_v23 = vadd.s32 24, %v13976_v39 }
  0x2e   :  { %13590 = vmatprep.subr.mxu0 %v140_v24  ;;  %v114_v47 = vld [vmem:[%s21380_s2 + $0x200] sm:$0xff]  ;;  %13688 = vmatpush3.msra.mxu1 %v400_v49  ;;  %v399_v50 = vld [vmem:[%s21382_s4 + $0x10] sm:$0xff]  ;;  %v398_v51 = vld [vmem:[%s21382_s4 + $0x8] sm:$0xff]  ;;  %v489_v24 = vcvt.s32.f32 %v13976_v39 }
  0x2f   :  { %13591 = vmatpush3.msra.mxu0 %v124_v25  ;;  %13689 = vmatprep.subr.mxu1 %v21396_v48  ;;  %v397_v52 = vld [vmem:[%s21382_s4] sm:$0xff]  ;;  %v605_v16 = vld [vmem:[%s21379_s1 + $0x18] sm:$0xf]  ;;  %v604_v17 = vld [vmem:[%s21379_s1 + $0x10] sm:$0xff]  ;;  %v490_v25 = vcvt.s32.f32 %v14198_v7 }
  0x30   :  { %13592 = vmatprep.subr.mxu0 %v139_v26  ;;  %13690 = vmatpush3.msra.mxu1 %v399_v50  ;;  %v11793_v57 = vld [vmem:[%s21381_s3] ss:$0 sm:$0xff]  ;;  %s13793_s3 = smov 127   ;;  %v603_v18 = vld [vmem:[%s21379_s1 + $0x8] sm:$0xff]  ;;  %v491_v26 = vcvt.s32.f32 %v487_v22 }
  0x31   :  { %13593 = vmatpush3.msra.mxu0 %v123_v27  ;;  %13691 = vmatprep.subr.mxu1 %v21396_v48  ;;  %v11795_v3 = vld [vmem:[%s21383_s5] ss:$0 sm:$0xff]  ;;  %v492_v27 = vcvt.s32.f32 %v488_v23 }
  0x32   :  { %13594 = vmatprep.subr.mxu0 %v138_v28  ;;  %13692 = vmatpush3.msra.mxu1 %v398_v51  ;;  %v602_v19 = vld [vmem:[%s21379_s1] sm:$0xff]  ;;  %v495_v28 = vcvt.s32.f32 %v14201_v8 }
  0x33   :  { %13595 = vmatpush3.msra.mxu0 %v122_v30  ;;  %13693 = vmatprep.subr.mxu1 %v21396_v48  ;;  %v496_v30 = vmul.f32 2.0, %v489_v24  ;;  %v557_v29 = vld [vmem:[%s21385_s7] sm:$0xf] }
  0x34   :  { %13596 = vmatprep.subr.mxu0 %v137_v31  ;;  %13694 = vmatpush3.msra.mxu1 %v397_v52  ;;  %v497_v31 = vmul.f32 2.0, %v490_v25 }
  0x35   :  { %13597 = vmatpush3.msra.mxu0 %v121_v32  ;;  %13698 = vmatprep.subr.msk.mxu1 %vm619_vm5, %v605_v16  ;;  %v498_v32 = vmul.f32 2.0, %v491_v26 }
  0x36   :  { %13598 = vmatprep.subr.mxu0 %v136_v33  ;;  %v499_v33 = vmul.f32 2.0, %v492_v27 }
  0x37   :  { %13599 = vmatpush3.msra.mxu0 %v120_v34  ;;  %v500_v34 = vadd.f32 1.0, %v496_v30 }
  0x38   :  { %13600 = vmatprep.subr.mxu0 %v135_v35  ;;  %v533_v35 = vmul.f32 2.0, %v495_v28 }
  0x39   :  { %13601 = vmatpush3.msra.mxu0 %v119_v36  ;;  %v501_v36 = vadd.f32 1.0, %v497_v31 }
  0x3a   :  { %13602 = vmatprep.subr.mxu0 %v134_v37  ;;  %v502_v37 = vadd.f32 1.0, %v498_v32 }
  0x3b   :  { %13603 = vmatpush3.msra.mxu0 %v118_v38  ;;  %v503_v38 = vadd.f32 1.0, %v499_v33 }
  0x3c   :  { %13604 = vmatprep.subr.mxu0 %v133_v40  ;;  %v505_v40 = vmul.f32 0.035714287, %v500_v34 }
  0x3d   :  { %13605 = vmatpush3.msra.mxu0 %v117_v41  ;;  %v534_v41 = vadd.f32 1.0, %v533_v35 }
  0x3e   :  { %13606 = vmatprep.subr.mxu0 %v132_v42  ;;  %v506_v42 = vmul.f32 0.035714287, %v501_v36 }
  0x3f   :  { %13607 = vmatpush3.msra.mxu0 %v116_v43  ;;  %v507_v43 = vmul.f32 0.035714287, %v502_v37 }
  0x40   :  { %13608 = vmatprep.subr.mxu0 %v131_v44  ;;  %v508_v44 = vmul.f32 0.035714287, %v503_v38 }
  0x41   :  { %13609 = vmatpush3.msra.mxu0 %v115_v45  ;;  %v11797_v45 = vadd.f32 -1.0, %v505_v40  ;;  %v11799_v49 = vadd.f32 -1.0, %v507_v43 }
  0x42   :  { %13610 = vmatprep.subr.mxu0 %v130_v46  ;;  %v535_v46 = vmul.f32 0.035714287, %v534_v41  ;;  %v11800_v50 = vadd.f32 -1.0, %v508_v44 }
  0x43   :  { %13611 = vmatpush3.msra.mxu0 %v114_v47  ;;  %v11798_v47 = vadd.f32 -1.0, %v506_v42  ;;  %v513_v51 = vmul.f32 0.2, %v11797_v45 }
  0x44   :  { %391 = vmatmul.mubr.f32.vlgmr.msra.gmra.mxu0 %v14078_v14  ;;  %v11805_v52 = vadd.f32 -1.0, %v535_v46 }
  0x45   :  { %937 = vmatprep.mubr.f32.mxu0 %v21396_v48 }
  0xe2   :  { %v13542_v53 = vpop.f32.mrf.mxu0 }
  0xe4   :  { %v13543_v54 = vpop.f32.mrf.mxu0 }
  0xe5   :  { %v13544_v56 = vadd.f32 %v13543_v54, %v13542_v53  ;;  %v514_v53 = vmul.f32 0.2, %v11798_v47  ;;  %v515_v54 = vmul.f32 0.2, %v11799_v49 }
  0xe6   :  { %v13577_v55 = vpop.f32.mrf.mxu1 }
  0xe7   :  { %v253_v59 = vadd.f32 %v13544_v56, %v11793_v57  ;;  %v537_v56 = vmul.f32 0.2, %v11805_v52  ;;  %v517_v57 = vadd.f32 1.0, %v513_v51 }
  0xe8   :  { %v13578_v58 = vpop.f32.mrf.mxu1 }
  0xe9   :  { %v13579_v60 = vadd.f32 %v13578_v58, %v13577_v55  ;;  %v516_v55 = vmul.f32 0.2, %v11800_v50  ;;  %v518_v58 = vadd.f32 1.0, %v514_v53 }
  0xeb   :  { %v323_v63 = vadd.f32 %v13579_v60, %v253_v59  ;;  %v519_v59 = vadd.f32 1.0, %v515_v54  ;;  %v520_v60 = vadd.f32 1.0, %v516_v55 }
 0x104   :  { %v13612_v61 = vpop.f32.mrf.mxu0 }
 0x106   :  { %v13613_v62 = vpop.f32.mrf.mxu0 }
 0x107   :  { %v13614_v0 = vadd.f32 %v13613_v62, %v13612_v61  ;;  %v538_v61 = vadd.f32 1.0, %v537_v56  ;;  %v521_v62 = vmul.f32 14.0, %v517_v57 }
 0x109   :  { %v393_v1 = vadd.f32 %v13614_v0, %v323_v63  ;;  %v522_v63 = vmul.f32 14.0, %v518_v58  ;;  %v523_v0 = vmul.f32 14.0, %v519_v59 }
 0x10b   :  { %v396_v2 = vmax.f32 %v393_v1, 0.0  ;;  %v524_v1 = vmul.f32 14.0, %v520_v60  ;;  %v11830_v60 = vld [vmem:[%s21384_s6 + $0xe8] sm:$0xf] }
 0x10c   :  { %11833 = vmatprep.subr.msk.mxu0 %vm619_vm5, %v11830_v60  ;;  %v826_v60 = vld [vmem:[%s21384_s6 + $0x50] sm:$0xff] }
 0x10d   :  { %13696 = vmatmul.mubr.msk.f32.vlgmr.msra.gmra.mxu1 %vm408_vm1, %v396_v2  ;;  %v539_v2 = vmul.f32 14.0, %v538_v61  ;;  %v829_v61 = vld [vmem:[%s21384_s6 + $0x68] sm:$0xf]  ;;  %vm11774_vm1 = vcmask 74752  }
 0x10e   :  { %13699 = vmatpush3.msk.msra.mxu1 %vm619_vm5, %v605_v16 }
 0x10f   :  { %13700 = vmatprep.subr.mxu1 %v604_v17  ;;  %v11806_v9 = vadd.f32 -0.5, %v539_v2  ;;  %v11825_v2 = vld [vmem:[%s21384_s6 + $0xc0] sm:$0xff] }
 0x110   :  { %13701 = vmatpush3.msra.mxu1 %v604_v17 }
 0x111   :  { %13702 = vmatprep.subr.mxu1 %v603_v18  ;;  %v14244_v17 = vsub.f32 %v11806_v9, %v492_v27  ;;  %v14250_v22 = vsub.f32 %v11806_v9, %v491_v26  ;;  %v14255_v36 = vsub.f32 %v11806_v9, %v490_v25  ;;  %v14260_v41 = vsub.f32 %v11806_v9, %v489_v24  ;;  %v820_v9 = vld [vmem:[%s21384_s6 + $0x20] sm:$0xff] }
 0x112   :  { %13703 = vmatpush3.msra.mxu1 %v603_v18 }
 0x113   :  { %13704 = vmatprep.subr.mxu1 %v602_v19  ;;  %21469 = vst [vmem:[#allocation17_spill] sm:$0xff] %v14244_v17  ;;  %21470 = vst [vmem:[#allocation18_spill] sm:$0xff] %v14250_v22 }
 0x114   :  { %13705 = vmatpush3.msra.mxu1 %v602_v19  ;;  %21471 = vst [vmem:[#allocation19_spill] sm:$0xff] %v14255_v36  ;;  %21472 = vst [vmem:[#allocation20_spill] sm:$0xff] %v14260_v41 }
 0x1cd   :  { %v478_v4 = vpop.f32.mrf.mxu1 }
 0x1ce   :  { %v479_v5 = vadd.f32 %v11795_v3, %v478_v4  ;;  %v11801_v3 = vadd.f32 -0.5, %v521_v62  ;;  %v11802_v4 = vadd.f32 -0.5, %v522_v63  ;;  %v11829_v62 = vld [vmem:[%s21384_s6 + $0xe0] sm:$0xf] }
 0x1cf   :  { %v13697_v6 = vpop.f32.mrf.mxu1  ;;  %v828_v63 = vld [vmem:[%s21384_s6 + $0x60] sm:$0xf]  ;;  %11834 = vmatpush1.msk.msra.mxu0 %vm619_vm5, %v11829_v62  ;;  %v823_v62 = vld [vmem:[%s21384_s6 + $0x38] sm:$0xff] }
 0x1d0   :  { %483 = vst.msk [vmem:[#allocation2] sm:$0x3] %vm482_vm2, %v479_v5  ;;  %v11803_v5 = vadd.f32 -0.5, %v523_v0  ;;  %v11804_v6 = vadd.f32 -0.5, %v524_v1  ;;  %v11826_v0 = vld [vmem:[%s21384_s6 + $0xc8] sm:$0xff] }
 0x1d1   :  { %v825_v1 = vld [vmem:[%s21384_s6 + $0x48] sm:$0xff]  ;;  %899 = vmatprep.subr.mxu0 %v11826_v0  ;;  %v822_v0 = vld [vmem:[%s21384_s6 + $0x30] sm:$0xff] }
 0x1d2   :  { %900 = vmatpush1.msra.mxu0 %v11825_v2 }
 0x1d7   :  { %v559_v10 = vld [vmem:[#allocation2] sm:$0x1]  ;;  %v5513_v14 = vld [vmem:[#allocation2 + $0x1] sm:$0x1] }
 0x1d8   :  { %v560_v13 = vmul.f32 14.0, %v559_v10  ;;  %v5514_v15 = vmul.f32 14.0, %v5513_v14  ;;  %v14236_v10 = vsub.f32 %v11801_v3, %v495_v28  ;;  %v14240_v14 = vsub.f32 %v11803_v5, %v495_v28  ;;  %v824_v3 = vld [vmem:[%s21384_s6 + $0x40] sm:$0xff]  ;;  %v821_v5 = vld [vmem:[%s21384_s6 + $0x28] sm:$0xff] }
 0x1da   :  { %562 = vrot.lane.b32.xlu0 %v560_v13, %s13793_s3  ;;  %21465 = vst [vmem:[#allocation13_spill] sm:$0xff] %v14236_v10  ;;  %21467 = vst [vmem:[#allocation15_spill] sm:$0xff] %v14240_v14 }
 0x1de   :  { %5516 = vrot.lane.b32.xlu0 %v5514_v15, %s13793_s3 }
 0x24c   :  { %v563_v20 = vpop.permute.xlu0 %562 }
 0x24d   :  { %13754 = vpush %v563_v20 }
 0x24e   :  { %13756 = vpush %v560_v13  ;;  %v14238_v13 = vsub.f32 %v11802_v4, %v495_v28  ;;  %v11822_v4 = vld [vmem:[%s21384_s6 + $0xa8] sm:$0xff] }
 0x24f   :  { %901 = vmatprep.subr.mxu0 %v11822_v4  ;;  %v11880_v4 = vld [vmem:[%s21384_s6 + $0x188] sm:$0xff] }
 0x250   :  { %v5517_v21 = vpop.permute.xlu0 %5516  ;;  %21466 = vst [vmem:[#allocation14_spill] sm:$0xff] %v14238_v13 }
 0x251   :  { %13758 = vpush %v5517_v21 }
 0x252   :  { %13760 = vpush %v5514_v15  ;;  %v14242_v15 = vsub.f32 %v11804_v6, %v495_v28  ;;  %v11821_v6 = vld [vmem:[%s21384_s6 + $0xa0] sm:$0xff] }
 0x253   :  { %902 = vmatpush1.msra.mxu0 %v11821_v6  ;;  %v11879_v6 = vld [vmem:[%s21384_s6 + $0x180] sm:$0xff] }
 0x254   :  { %21468 = vst [vmem:[#allocation16_spill] sm:$0xff] %v14242_v15 }
 0x27e   :  { %s13755_s29 = spop %13754 }
 0x27f   :  { %v565_v16 = vstv %s13755_s29  ;;  %s13757_s30 = spop %13756 }
 0x280   :  { %v567_v18 = vadd.f32 %v565_v16, %v14236_v10  ;;  %v568_v19 = vadd.f32 %v565_v16, %v14238_v13  ;;  %v569_v20 = vadd.f32 %v565_v16, %v14240_v14  ;;  %v570_v21 = vadd.f32 %v565_v16, %v14242_v15  ;;  %v11818_v16 = vld [vmem:[%s21384_s6 + $0x88] sm:$0xff] }
 0x281   :  { %v584_v23 = vstv %s13757_s30  ;;  %903 = vmatprep.subr.mxu0 %v11818_v16  ;;  %v11868_v16 = vld [vmem:[%s21384_s6 + $0x178] sm:$0xf]  ;;  %v21479_v15 = vmov 0.0  }
 0x282   :  { %v571_v30 = vand.u32 2147483647, %v567_v18  ;;  %v572_v31 = vand.u32 2147483647, %v568_v19  ;;  %v573_v28 = vand.u32 2147483647, %v569_v20  ;;  %v589_v33 = vadd.f32 %v584_v23, %v14244_v17 }
 0x283   :  { %v574_v32 = vand.u32 2147483647, %v570_v21  ;;  %v588_v37 = vadd.f32 %v584_v23, %v14250_v22  ;;  %v587_v45 = vadd.f32 %v584_v23, %v14255_v36  ;;  %v586_v46 = vadd.f32 %v584_v23, %v14260_v41  ;;  %v817_v18 = vld [vmem:[%s21384_s6 + $0x8] sm:$0xff]  ;;  %v11817_v19 = vld [vmem:[%s21384_s6 + $0x80] sm:$0xff]  ;;  %v11832_v21 = vld [vmem:[%s21384_s6 + $0xf8] sm:$0xf] }
 0x284   :  { %v575_v27 = vsub.f32 1.0, %v571_v30  ;;  %v576_v34 = vsub.f32 1.0, %v572_v31  ;;  %v577_v35 = vsub.f32 1.0, %v573_v28  ;;  %v593_v38 = vand.u32 2147483647, %v589_v33  ;;  %v816_v20 = vld [vmem:[%s21384_s6] sm:$0xff]  ;;  %904 = vmatpush1.msra.mxu0 %v11817_v19 }
 0x285   :  { %v578_v42 = vsub.f32 1.0, %v574_v32  ;;  %v592_v25 = vand.u32 2147483647, %v588_v37  ;;  %v591_v49 = vand.u32 2147483647, %v587_v45  ;;  %11838 = vmatprep.subr.msk.mxu0 %vm619_vm5, %v11832_v21  ;;  %v11828_v37 = vld [vmem:[%s21384_s6 + $0xd8] sm:$0xff] }
 0x286   :  { %v579_v26 = vmax.f32 %v575_v27, 0.0  ;;  %v580_v40 = vmax.f32 %v576_v34, 0.0  ;;  %v597_v43 = vsub.f32 1.0, %v593_v38  ;;  %v581_v44 = vmax.f32 %v577_v35, 0.0  ;;  %v11866_v23 = vld [vmem:[%s21384_s6 + $0x168] sm:$0xf] }
 0x287   :  { %v582_v47 = vmax.f32 %v578_v42, 0.0  ;;  %v596_v24 = vsub.f32 1.0, %v592_v25  ;;  %v590_v50 = vand.u32 2147483647, %v586_v46  ;;  %v595_v52 = vsub.f32 1.0, %v591_v49  ;;  %v11862_v38 = vld [vmem:[%s21384_s6 + $0x148] sm:$0xff] }
 0x288   :  { %13706 = vmatprep.mubr.msk.f32.mxu1 %vm606_vm6, %v579_v26  ;;  %v601_v7 = vmax.f32 %v597_v43, 0.0  ;;  %v11831_v33 = vld [vmem:[%s21384_s6 + $0xf0] sm:$0xf]  ;;  %v11865_v35 = vld [vmem:[%s21384_s6 + $0x160] sm:$0xf]  ;;  %v11858_v45 = vld [vmem:[%s21384_s6 + $0x128] sm:$0xff] }
 0x289   :  { %13707 = vmatmul.mubr.msk.f32.vlgmr.msra.gmra.mxu1 %vm606_vm6, %v580_v40  ;;  %v600_v51 = vmax.f32 %v596_v24, 0.0  ;;  %v594_v53 = vsub.f32 1.0, %v590_v50  ;;  %v599_v54 = vmax.f32 %v595_v52, 0.0  ;;  %v11827_v26 = vld [vmem:[%s21384_s6 + $0xd0] sm:$0xff]  ;;  %v11861_v43 = vld [vmem:[%s21384_s6 + $0x140] sm:$0xff]  ;;  %v11820_v46 = vld [vmem:[%s21384_s6 + $0x98] sm:$0xff] }
 0x28a   :  { %13709 = vmatprep.mubr.msk.f32.mxu1 %vm606_vm6, %v581_v44  ;;  %13712 = vmatprep.subr.msk.mxu1 %vm619_vm5, %v601_v7  ;;  %v11824_v44 = vld [vmem:[%s21384_s6 + $0xb8] sm:$0xff]  ;;  %v11857_v25 = vld [vmem:[%s21384_s6 + $0x120] sm:$0xff]  ;;  %v11854_v49 = vld [vmem:[%s21384_s6 + $0x108] sm:$0xff]  ;;  %v14705_v41 = vsub.s32 3, %v13976_v39  ;;  %v14712_v22 = vsel %vm14205_vm3, 1.0, %v21479_v15 }
 0x28b   :  { %13713 = vmatpush3.msk.msra.mxu1 %vm619_vm5, %v601_v7  ;;  %v598_v55 = vmax.f32 %v594_v53, 0.0  ;;  %v11823_v7 = vld [vmem:[%s21384_s6 + $0xb0] sm:$0xff]  ;;  %v831_v53 = vld [vmem:[%s21384_s6 + $0x78] sm:$0xf]  ;;  %21480 = vst [vmem:[#allocation27_spill] sm:$0xff] %v14712_v22 }
 0x28c   :  { %13714 = vmatprep.subr.mxu1 %v600_v51  ;;  %v11819_v50 = vld [vmem:[%s21384_s6 + $0x90] sm:$0xff]  ;;  %v11864_v21 = vld [vmem:[%s21384_s6 + $0x158] sm:$0xff]  ;;  %21478 = vst [vmem:[#allocation26_spill] sm:$0xff] %v14705_v41 }
 0x28d   :  { %13710 = vmatmul.mubr.msk.f32.gmra.mxu1 %vm606_vm6, %v582_v47  ;;  %v11867_v19 = vld [vmem:[%s21384_s6 + $0x170] sm:$0xf] }
 0x28e   :  { %13715 = vmatpush3.msra.mxu1 %v600_v51  ;;  %v11853_v51 = vld [vmem:[%s21384_s6 + $0x100] sm:$0xff] }
 0x28f   :  { %13716 = vmatprep.subr.mxu1 %v599_v54 }
 0x290   :  { %13717 = vmatpush3.msra.mxu1 %v599_v54  ;;  %v11892_v54 = vld [vmem:[%s21384_s6 + $0x1e8] sm:$0xf] }
 0x291   :  { %13718 = vmatprep.subr.mxu1 %v598_v55 }
 0x292   :  { %13719 = vmatpush3.msra.mxu1 %v598_v55  ;;  %v830_v55 = vld [vmem:[%s21384_s6 + $0x70] sm:$0xf] }
 0x293   :  { %11843 = vmatprep.subr.msk.mxu1 %vm619_vm5, %v829_v61  ;;  %v11887_v61 = vld [vmem:[%s21384_s6 + $0x1c0] sm:$0xff] }
 0x349   :  { %v13708_v56 = vpop.f32.mrf.mxu1 }
 0x34b   :  { %v689_v57 = vpop.f32.mrf.mxu1 }
 0x34c   :  { %13720 = vmatprep.mubr.msk.f32.mxu1 %vm606_vm6, %v689_v57  ;;  %v827_v57 = vld [vmem:[%s21384_s6 + $0x58] sm:$0xff] }
 0x34d   :  { %v13711_v58 = vpop.f32.mrf.mxu1  ;;  %13721 = vmatmul.mubr.msk.f32.vlgmr.msra.gmra.mxu1 %vm606_vm6, %v13708_v56  ;;  %v11891_v56 = vld [vmem:[%s21384_s6 + $0x1e0] sm:$0xf] }
 0x34e   :  { %11844 = vmatpush1.msk.msra.mxu1 %vm619_vm5, %v828_v63  ;;  %v11884_v63 = vld [vmem:[%s21384_s6 + $0x1a8] sm:$0xff] }
 0x34f   :  { %v699_v59 = vpop.f32.mrf.mxu1  ;;  %1086 = vmatprep.subr.mxu1 %v825_v1  ;;  %v11883_v1 = vld [vmem:[%s21384_s6 + $0x1a0] sm:$0xff] }
 0x350   :  { %13723 = vmatprep.mubr.msk.f32.mxu1 %vm606_vm6, %v699_v59  ;;  %1087 = vmatpush1.msra.mxu1 %v824_v3  ;;  %v819_v3 = vld [vmem:[%s21384_s6 + $0x18] sm:$0xff] }
 0x351   :  { %13724 = vmatmul.mubr.msk.f32.gmra.mxu1 %vm606_vm6, %v13711_v58  ;;  %1088 = vmatprep.subr.mxu1 %v821_v5  ;;  %v11888_v58 = vld [vmem:[%s21384_s6 + $0x1c8] sm:$0xff]  ;;  %v818_v5 = vld [vmem:[%s21384_s6 + $0x10] sm:$0xff] }
 0x352   :  { %1124 = vmatprep.mubr.f32.mxu1 %v21396_v48  ;;  %1089 = vmatpush1.msra.mxu1 %v820_v9 }
 0x353   :  { %1090 = vmatprep.subr.mxu1 %v817_v18  ;;  %v11918_v18 = vld [vmem:[%s21384_s6 + $0x268] sm:$0xf] }
 0x354   :  { %1091 = vmatpush1.msra.mxu1 %v816_v20  ;;  %v11917_v20 = vld [vmem:[%s21384_s6 + $0x260] sm:$0xf] }
 0x355   :  { %11869 = vmatprep.subr.msk.mxu1 %vm619_vm5, %v11866_v23  ;;  %v11914_v23 = vld [vmem:[%s21384_s6 + $0x248] sm:$0xff] }
 0x40d   :  { %v13722_v30 = vpop.f32.mrf.mxu1 }
 0x40e   :  { %809 = vst.msk [vmem:[#allocation3 + $0x8] sm:$0xff] %vm606_vm6, %v13722_v30 }
 0x40f   :  { %v789_v31 = vpop.f32.mrf.mxu1 }
 0x410   :  { %808 = vst.msk [vmem:[#allocation3] sm:$0xff] %vm606_vm6, %v789_v31  ;;  %v11863_v31 = vld [vmem:[%s21384_s6 + $0x150] sm:$0xff] }
 0x411   :  { %v13725_v28 = vpop.f32.mrf.mxu1 }
 0x412   :  { %812 = vst.msk [vmem:[#allocation3 + $0x18] sm:$0xf] %vm811_vm7, %v13725_v28  ;;  %v11913_v28 = vld [vmem:[%s21384_s6 + $0x240] sm:$0xff] }
 0x413   :  { %v799_v32 = vpop.f32.mrf.mxu1 }
 0x414   :  { %810 = vst.msk [vmem:[#allocation3 + $0x10] sm:$0xff] %vm606_vm6, %v799_v32  ;;  %v11860_v32 = vld [vmem:[%s21384_s6 + $0x138] sm:$0xff] }
 0x415   :  { %v14363_v42 = vld [vmem:[#allocation3 + $0x8] sm:$0xff] }
 0x417   :  { %v832_v27 = vld [vmem:[#allocation3 + $0x1] sm:$0xff] }
 0x418   :  { %v14342_v34 = vld [vmem:[#allocation3] sm:$0xff]  ;;  %11835 = vmatmul.mubr.msk.f32.vlgmr.msra.gmra.mxu0 %vm606_vm6, %v832_v27 }
 0x419   :  { %11845 = vmatmul.mubr.msk.f32.vlgmr.msra.gmra.mxu1 %vm606_vm6, %v14342_v34  ;;  %943 = vmatprep.mubr.f32.mxu0 %v21396_v48  ;;  %v14404_v52 = vld [vmem:[#allocation3 + $0x2] sm:$0xff] }
 0x41a   :  { %1130 = vmatprep.mubr.f32.mxu1 %v21396_v48  ;;  %11839 = vmatpush1.msk.msra.mxu0 %vm619_vm5, %v11831_v33  ;;  %v14477_v9 = vld [vmem:[#allocation3 + $0x3] sm:$0xff] }
 0x41b   :  { %11870 = vmatpush1.msk.msra.mxu1 %vm619_vm5, %v11865_v35  ;;  %v833_v40 = vld [vmem:[#allocation3 + $0x9] sm:$0xff]  ;;  %982 = vmatprep.subr.mxu0 %v11828_v37  ;;  %v834_v47 = vld [vmem:[#allocation3 + $0x11] sm:$0xff] }
 0x41c   :  { %1293 = vmatprep.subr.mxu1 %v11862_v38  ;;  %11836 = vmatmul.mubr.msk.f32.gmra.mxu0 %vm606_vm6, %v833_v40  ;;  %v14388_v24 = vld [vmem:[#allocation3 + $0x10] sm:$0xff]  ;;  %v11910_v33 = vld [vmem:[%s21384_s6 + $0x228] sm:$0xff] }
 0x41d   :  { %11846 = vmatmul.mubr.msk.f32.gmra.mxu1 %vm606_vm6, %v14363_v42  ;;  %949 = vmatprep.mubr.f32.mxu0 %v21396_v48  ;;  %v14431_v59 = vld [vmem:[#allocation3 + $0xa] sm:$0xff]  ;;  %v14459_v2 = vld [vmem:[#allocation3 + $0x12] sm:$0xff] }
 0x41e   :  { %983 = vmatpush1.msra.mxu0 %v11827_v26  ;;  %1136 = vmatprep.mubr.f32.mxu1 %v21396_v48  ;;  %v14505_v30 = vld [vmem:[#allocation3 + $0xb] sm:$0xff]  ;;  %v14535_v35 = vld [vmem:[#allocation3 + $0x13] sm:$0xff] }
 0x41f   :  { %1294 = vmatpush1.msra.mxu1 %v11861_v43  ;;  %984 = vmatprep.subr.mxu0 %v11824_v44  ;;  %v11856_v37 = vld [vmem:[%s21384_s6 + $0x118] sm:$0xff]  ;;  %v11906_v38 = vld [vmem:[%s21384_s6 + $0x208] sm:$0xff]  ;;  %v11855_v26 = vld [vmem:[%s21384_s6 + $0x110] sm:$0xff] }
 0x420   :  { %1295 = vmatprep.subr.mxu1 %v11858_v45  ;;  %11837 = vmatmul.mubr.msk.f32.gmra.mxu0 %vm606_vm6, %v834_v47  ;;  %v11894_v43 = vld [vmem:[%s21384_s6 + $0x1f8] sm:$0xf]  ;;  %v11893_v44 = vld [vmem:[%s21384_s6 + $0x1f0] sm:$0xf] }
 0x421   :  { %11847 = vmatmul.mubr.msk.f32.gmra.mxu1 %vm606_vm6, %v14388_v24  ;;  %985 = vmatpush1.msra.mxu0 %v11823_v7  ;;  %v11890_v45 = vld [vmem:[%s21384_s6 + $0x1d8] sm:$0xff]  ;;  %v1665_v7 = vld [vmem:[#allocation3 + $0xc] sm:$0xff] }
 0x422   :  { %1296 = vmatpush1.msra.mxu1 %v11857_v25  ;;  %986 = vmatprep.subr.mxu0 %v11820_v46  ;;  %v11889_v25 = vld [vmem:[%s21384_s6 + $0x1d0] sm:$0xff]  ;;  %v11886_v46 = vld [vmem:[%s21384_s6 + $0x1b8] sm:$0xff] }
 0x423   :  { %1297 = vmatprep.subr.mxu1 %v11854_v49  ;;  %987 = vmatpush1.msra.mxu0 %v11819_v50  ;;  %v11882_v49 = vld [vmem:[%s21384_s6 + $0x198] sm:$0xff]  ;;  %v11881_v50 = vld [vmem:[%s21384_s6 + $0x190] sm:$0xff] }
 0x424   :  { %1020 = vmatprep.mubr.f32.mxu0 %v21396_v48  ;;  %1298 = vmatpush1.msra.mxu1 %v11853_v51  ;;  %v11920_v51 = vld [vmem:[%s21384_s6 + $0x278] sm:$0xf] }
 0x425   :  { %1331 = vmatprep.mubr.f32.mxu1 %v21396_v48  ;;  %11840 = vmatmul.mubr.msk.f32.vlgmr.msra.gmra.mxu0 %vm606_vm6, %v832_v27  ;;  %v11859_v27 = vld [vmem:[%s21384_s6 + $0x130] sm:$0xff] }
 0x426   :  { %11871 = vmatmul.mubr.msk.f32.vlgmr.msra.gmra.mxu1 %vm606_vm6, %v14404_v52  ;;  %1026 = vmatprep.mubr.f32.mxu0 %v21396_v48 }
 0x427   :  { %1337 = vmatprep.mubr.f32.mxu1 %v21396_v48  ;;  %11848 = vmatprep.subr.msk.mxu0 %vm619_vm5, %v831_v53  ;;  %v11916_v53 = vld [vmem:[%s21384_s6 + $0x258] sm:$0xff] }
 0x428   :  { %11895 = vmatprep.subr.msk.mxu1 %vm619_vm5, %v11892_v54  ;;  %11849 = vmatpush1.msk.msra.mxu0 %vm619_vm5, %v830_v55  ;;  %v11915_v54 = vld [vmem:[%s21384_s6 + $0x250] sm:$0xff]  ;;  %v11912_v55 = vld [vmem:[%s21384_s6 + $0x238] sm:$0xff] }
 0x429   :  { %11896 = vmatpush1.msk.msra.mxu1 %vm619_vm5, %v11891_v56  ;;  %11841 = vmatmul.mubr.msk.f32.gmra.mxu0 %vm606_vm6, %v833_v40  ;;  %v11905_v40 = vld [vmem:[%s21384_s6 + $0x200] sm:$0xff]  ;;  %v11911_v56 = vld [vmem:[%s21384_s6 + $0x230] sm:$0xff] }
 0x42a   :  { %11872 = vmatmul.mubr.msk.f32.gmra.mxu1 %vm606_vm6, %v14431_v59  ;;  %1169 = vmatprep.subr.mxu0 %v827_v57  ;;  %v11908_v57 = vld [vmem:[%s21384_s6 + $0x218] sm:$0xff] }
 0x42b   :  { %1512 = vmatprep.subr.mxu1 %v11888_v58  ;;  %1032 = vmatprep.mubr.f32.mxu0 %v21396_v48  ;;  %v11907_v58 = vld [vmem:[%s21384_s6 + $0x210] sm:$0xff] }
 0x42c   :  { %1170 = vmatpush1.msra.mxu0 %v826_v60  ;;  %1343 = vmatprep.mubr.f32.mxu1 %v21396_v48 }
 0x42d   :  { %1513 = vmatpush1.msra.mxu1 %v11887_v61  ;;  %11842 = vmatmul.mubr.msk.f32.gmra.mxu0 %vm606_vm6, %v834_v47  ;;  %v11885_v47 = vld [vmem:[%s21384_s6 + $0x1b0] sm:$0xff] }
 0x42e   :  { %1171 = vmatprep.subr.mxu0 %v823_v62  ;;  %11873 = vmatmul.mubr.msk.f32.gmra.mxu1 %vm606_vm6, %v14459_v2 }
 0x42f   :  { %1514 = vmatprep.subr.mxu1 %v11884_v63  ;;  %1172 = vmatpush1.msra.mxu0 %v822_v0 }
 0x430   :  { %1515 = vmatpush1.msra.mxu1 %v11883_v1  ;;  %1173 = vmatprep.subr.mxu0 %v819_v3 }
 0x431   :  { %1516 = vmatprep.subr.mxu1 %v11880_v4  ;;  %1174 = vmatpush1.msra.mxu0 %v818_v5 }
 0x432   :  { %1207 = vmatprep.mubr.f32.mxu0 %v21396_v48  ;;  %1517 = vmatpush1.msra.mxu1 %v11879_v6 }
 0x433   :  { %1550 = vmatprep.mubr.f32.mxu1 %v21396_v48  ;;  %11850 = vmatmul.mubr.msk.f32.vlgmr.msra.gmra.mxu0 %vm606_vm6, %v14342_v34  ;;  %v11909_v34 = vld [vmem:[%s21384_s6 + $0x220] sm:$0xff] }
 0x434   :  { %11897 = vmatmul.mubr.msk.f32.vlgmr.msra.gmra.mxu1 %vm606_vm6, %v14477_v9  ;;  %1213 = vmatprep.mubr.f32.mxu0 %v21396_v48 }
 0x435   :  { %1556 = vmatprep.mubr.f32.mxu1 %v21396_v48  ;;  %11874 = vmatprep.subr.msk.mxu0 %vm619_vm5, %v11868_v16 }
 0x436   :  { %11921 = vmatprep.subr.msk.mxu1 %vm619_vm5, %v11918_v18  ;;  %11875 = vmatpush1.msk.msra.mxu0 %vm619_vm5, %v11867_v19 }
 0x437   :  { %11922 = vmatpush1.msk.msra.mxu1 %vm619_vm5, %v11917_v20  ;;  %11851 = vmatmul.mubr.msk.f32.gmra.mxu0 %vm606_vm6, %v14363_v42  ;;  %v1664_v42 = vld [vmem:[#allocation3 + $0x4] sm:$0xff] }
 0x438   :  { %11898 = vmatmul.mubr.msk.f32.gmra.mxu1 %vm606_vm6, %v14505_v30  ;;  %1376 = vmatprep.subr.mxu0 %v11864_v21 }
 0x439   :  { %1731 = vmatprep.subr.mxu1 %v11914_v23  ;;  %1219 = vmatprep.mubr.f32.mxu0 %v21396_v48 }
 0x43a   :  { %1377 = vmatpush1.msra.mxu0 %v11863_v31  ;;  %1562 = vmatprep.mubr.f32.mxu1 %v21396_v48 }
 0x43b   :  { %1732 = vmatpush1.msra.mxu1 %v11913_v28  ;;  %11852 = vmatmul.mubr.msk.f32.gmra.mxu0 %vm606_vm6, %v14388_v24  ;;  %v1666_v24 = vld [vmem:[#allocation3 + $0x14] sm:$0xff] }
 0x43c   :  { %1378 = vmatprep.subr.mxu0 %v11860_v32  ;;  %11899 = vmatmul.mubr.msk.f32.gmra.mxu1 %vm606_vm6, %v14535_v35 }
 0x43d   :  { %1733 = vmatprep.subr.mxu1 %v11910_v33  ;;  %1379 = vmatpush1.msra.mxu0 %v11859_v27 }
 0x43e   :  { %1734 = vmatpush1.msra.mxu1 %v11909_v34  ;;  %1380 = vmatprep.subr.mxu0 %v11856_v37 }
 0x43f   :  { %1735 = vmatprep.subr.mxu1 %v11906_v38  ;;  %1381 = vmatpush1.msra.mxu0 %v11855_v26 }
 0x440   :  { %1414 = vmatprep.mubr.f32.mxu0 %v21396_v48  ;;  %1736 = vmatpush1.msra.mxu1 %v11905_v40 }
 0x441   :  { %1769 = vmatprep.mubr.f32.mxu1 %v21396_v48  ;;  %11876 = vmatmul.mubr.msk.f32.vlgmr.msra.gmra.mxu0 %vm606_vm6, %v14404_v52  ;;  %v11919_v52 = vld [vmem:[%s21384_s6 + $0x270] sm:$0xf] }
 0x442   :  { %11923 = vmatmul.mubr.msk.f32.vlgmr.msra.gmra.mxu1 %vm606_vm6, %v1664_v42  ;;  %1420 = vmatprep.mubr.f32.mxu0 %v21396_v48 }
 0x443   :  { %1775 = vmatprep.mubr.f32.mxu1 %v21396_v48  ;;  %11900 = vmatprep.subr.msk.mxu0 %vm619_vm5, %v11894_v43 }
 0x444   :  { %11901 = vmatpush1.msk.msra.mxu0 %vm619_vm5, %v11893_v44 }
 0x445   :  { %11877 = vmatmul.mubr.msk.f32.gmra.mxu0 %vm606_vm6, %v14431_v59  ;;  %1595 = vmatprep.subr.mxu0 %v11890_v45 }
 0x446   :  { %11924 = vmatmul.mubr.msk.f32.gmra.mxu1 %vm606_vm6, %v1665_v7  ;;  %1426 = vmatprep.mubr.f32.mxu0 %v21396_v48 }
 0x447   :  { %1596 = vmatpush1.msra.mxu0 %v11889_v25  ;;  %1781 = vmatprep.mubr.f32.mxu1 %v21396_v48 }
 0x448   :  { %1597 = vmatprep.subr.mxu0 %v11886_v46 }
 0x449   :  { %11878 = vmatmul.mubr.msk.f32.gmra.mxu0 %vm606_vm6, %v14459_v2 }
 0x44a   :  { %11925 = vmatmul.mubr.msk.f32.gmra.mxu1 %vm606_vm6, %v1666_v24  ;;  %1598 = vmatpush1.msra.mxu0 %v11885_v47 }
 0x44b   :  { %1633 = vmatprep.mubr.f32.mxu0 %v21396_v48  ;;  %1599 = vmatprep.subr.mxu0 %v11882_v49 }
 0x44c   :  { %2011 = vmatprep.mubr.f32.mxu1 %v21396_v48  ;;  %1600 = vmatpush1.msra.mxu0 %v11881_v50 }
 0x44d   :  { %11902 = vmatmul.mubr.msk.f32.vlgmr.msra.gmra.mxu0 %vm606_vm6, %v14477_v9  ;;  %11926 = vmatprep.subr.msk.mxu0 %vm619_vm5, %v11920_v51 }
 0x44e   :  { %1639 = vmatprep.mubr.f32.mxu0 %v21396_v48  ;;  %11927 = vmatpush1.msk.msra.mxu0 %vm619_vm5, %v11919_v52 }
 0x44f   :  { %1814 = vmatprep.subr.mxu0 %v11916_v53 }
 0x450   :  { %1815 = vmatpush1.msra.mxu0 %v11915_v54 }
 0x451   :  { %11903 = vmatmul.mubr.msk.f32.gmra.mxu0 %vm606_vm6, %v14505_v30  ;;  %1816 = vmatprep.subr.mxu0 %v11912_v55 }
 0x452   :  { %1645 = vmatprep.mubr.f32.mxu0 %v21396_v48  ;;  %1817 = vmatpush1.msra.mxu0 %v11911_v56  ;;  %v14693_v56 = vsub.s32 0, %v13976_v39 }
 0x453   :  { %1818 = vmatprep.subr.mxu0 %v11908_v57  ;;  %v14696_v57 = vsub.s32 1, %v13976_v39 }
 0x454   :  { %1819 = vmatpush1.msra.mxu0 %v11907_v58  ;;  %21475 = vst [vmem:[#allocation23_spill] sm:$0xff] %v14693_v56  ;;  %v14715_v17 = vrot.slane %v557_v29, %v14693_v56 }
 0x455   :  { %11904 = vmatmul.mubr.msk.f32.gmra.mxu0 %vm606_vm6, %v14535_v35  ;;  %21476 = vst [vmem:[#allocation24_spill] sm:$0xff] %v14696_v57  ;;  %v14718_v10 = vrot.slane %v557_v29, %v14696_v57  ;;  %v14734_v57 = vsel %vm1934_vm9, %v14712_v22, 0 }
 0x456   :  { %1852 = vmatprep.mubr.f32.mxu0 %v21396_v48  ;;  %21481 = vst [vmem:[#allocation28_spill] sm:$0xff] %v14715_v17 }
 0x457   :  { %21482 = vst [vmem:[#allocation29_spill] sm:$0xff] %v14718_v10 }
 0x459   :  { %11928 = vmatmul.mubr.msk.f32.vlgmr.msra.gmra.mxu0 %vm606_vm6, %v1664_v42 }
 0x45a   :  { %1858 = vmatprep.mubr.f32.mxu0 %v21396_v48 }
 0x45d   :  { %11929 = vmatmul.mubr.msk.f32.gmra.mxu0 %vm606_vm6, %v1665_v7 }
 0x45e   :  { %1864 = vmatprep.mubr.f32.mxu0 %v21396_v48 }
 0x461   :  { %11930 = vmatmul.mubr.msk.f32.gmra.mxu0 %vm606_vm6, %v1666_v24  ;;  %v21394_v24 = vmul.u32 2, %v13976_v39 }
 0x462   :  { %2128 = vmatprep.mubr.f32.mxu0 %v21396_v48 }
 0x463   :  { %vm547_vm8 = vcmp.eq.s32.totalorder %v14201_v8, %v21394_v24  ;;  %v14702_v24 = vsub.s32 2, %v13976_v39 }
 0x464   :  { %v14690_v54 = vsel %vm547_vm8, 1.0, %v21396_v48 }
 0x465   :  { %21474 = vst [vmem:[#allocation22_spill] sm:$0xff] %v14690_v54  ;;  %21477 = vst [vmem:[#allocation25_spill] sm:$0xff] %v14702_v24  ;;  %v1936_v36 = vsel %vm1934_vm9, %v14690_v54, 0  ;;  %v14721_v39 = vrot.slane %v557_v29, %v14702_v24  ;;  %v14724_v54 = vrot.slane %v557_v29, %v14705_v41 }
 0x467   :  { %21483 = vst [vmem:[#allocation30_spill] sm:$0xff] %v14721_v39  ;;  %21484 = vst [vmem:[#allocation31_spill] sm:$0xff] %v14724_v54 }
 0x4d8   :  { %v14635_v59 = vpop.f32.mrf.mxu0 }
 0x4d9   :  { %v14637_v60 = vpop.f32.mrf.mxu1 }
 0x4da   :  { %v14639_v61 = vpop.f32.mrf.mxu0  ;;  %v1127_v11 = vadd.f32 %v14637_v60, %v14635_v59 }
 0x4db   :  { %v14641_v62 = vpop.f32.mrf.mxu1 }
 0x4dc   :  { %v945_v63 = vpop.f32.mrf.mxu0 }
 0x4dd   :  { %v1132_v0 = vpop.f32.mrf.mxu1 }
 0x4de   :  { %v14643_v1 = vpop.f32.mrf.mxu0  ;;  %v1133_v13 = vadd.f32 %v1132_v0, %v945_v63  ;;  %v1129_v63 = vadd.f32 %v14641_v62, %v14639_v61 }
 0x4df   :  { %v14645_v2 = vpop.f32.mrf.mxu1 }
 0x4e0   :  { %v14647_v3 = vpop.f32.mrf.mxu0 }
 0x4e1   :  { %v14649_v4 = vpop.f32.mrf.mxu1 }
 0x4e2   :  { %v14651_v5 = vpop.f32.mrf.mxu0  ;;  %v1139_v29 = vadd.f32 %v14649_v4, %v14647_v3 }
 0x4e3   :  { %v14653_v6 = vpop.f32.mrf.mxu1 }
 0x4e4   :  { %v1141_v59 = vadd.f32 %v14653_v6, %v14651_v5 }
 0x4e5   :  { %v1022_v9 = vpop.f32.mrf.mxu0 }
 0x4e6   :  { %v14655_v16 = vpop.f32.mrf.mxu1 }
 0x4e7   :  { %v1024_v18 = vpop.f32.mrf.mxu0  ;;  %v1433_v60 = vadd.f32 %v14655_v16, %v1127_v11 }
 0x4e8   :  { %v14657_v19 = vpop.f32.mrf.mxu1 }
 0x4e9   :  { %v14659_v20 = vpop.f32.mrf.mxu0 }
 0x4ea   :  { %v1339_v21 = vpop.f32.mrf.mxu1 }
 0x4eb   :  { %v14661_v23 = vpop.f32.mrf.mxu0  ;;  %v1437_v0 = vadd.f32 %v1339_v21, %v1133_v13  ;;  %v1434_v13 = vadd.f32 %v14657_v19, %v1129_v63 }
 0x4ec   :  { %v14663_v30 = vpop.f32.mrf.mxu1 }
 0x4ed   :  { %v14665_v31 = vpop.f32.mrf.mxu0 }
 0x4ee   :  { %v14667_v28 = vpop.f32.mrf.mxu1 }
 0x4ef   :  { %v14669_v32 = vpop.f32.mrf.mxu0  ;;  %v1441_v19 = vadd.f32 %v14667_v28, %v1139_v29 }
 0x4f0   :  { %v14671_v33 = vpop.f32.mrf.mxu1 }
 0x4f3   :  { %v1209_v27 = vpop.f32.mrf.mxu0 }
 0x4f4   :  { %v1552_v34 = vpop.f32.mrf.mxu1  ;;  %v1210_v8 = vadd.f32 %v1209_v27, %v1022_v9  ;;  %v1135_v9 = vadd.f32 %v14645_v2, %v14643_v1 }
 0x4f5   :  { %v1211_v35 = vpop.f32.mrf.mxu0  ;;  %v1652_v22 = vadd.f32 %v1552_v34, %v1433_v60 }
 0x4f6   :  { %v1554_v37 = vpop.f32.mrf.mxu1  ;;  %v1438_v21 = vadd.f32 %v14663_v30, %v1135_v9 }
 0x4f7   :  { %v1215_v38 = vpop.f32.mrf.mxu0  ;;  %v1653_v3 = vadd.f32 %v1554_v37, %v1434_v13 }
 0x4f8   :  { %v1558_v40 = vpop.f32.mrf.mxu1  ;;  %v1216_v24 = vadd.f32 %v1215_v38, %v14659_v20 }
 0x4f9   :  { %v1217_v26 = vpop.f32.mrf.mxu0  ;;  %v1656_v61 = vadd.f32 %v1558_v40, %v1437_v0  ;;  %v1442_v40 = vadd.f32 %v14671_v33, %v1141_v59 }
 0x4fa   :  { %v1560_v44 = vpop.f32.mrf.mxu1 }
 0x4fb   :  { %v14673_v42 = vpop.f32.mrf.mxu0 }
 0x4fc   :  { %v14677_v7 = vpop.f32.mrf.mxu1 }
 0x4fd   :  { %v14675_v43 = vpop.f32.mrf.mxu0 }
 0x4fe   :  { %v14679_v47 = vpop.f32.mrf.mxu1 }
 0x501   :  { %v1416_v45 = vpop.f32.mrf.mxu0 }
 0x502   :  { %v1771_v51 = vpop.f32.mrf.mxu1  ;;  %v1435_v27 = vadd.f32 %v1416_v45, %v1210_v8  ;;  %v1218_v8 = vadd.f32 %v1217_v26, %v14661_v23  ;;  %v1660_v23 = vadd.f32 %v14677_v7, %v1441_v19  ;;  %v1224_v26 = vadd.f32 %v14675_v43, %v14669_v32 }
 0x503   :  { %v1418_v25 = vpop.f32.mrf.mxu0  ;;  %v1871_v30 = vadd.f32 %v1771_v51, %v1652_v22 }
 0x504   :  { %v1773_v55 = vpop.f32.mrf.mxu1 }
 0x505   :  { %v1422_v46 = vpop.f32.mrf.mxu0  ;;  %v1872_v11 = vadd.f32 %v1773_v55, %v1653_v3  ;;  %v1904_v32 = vadd.f32 %v14715_v17, %v1871_v30  ;;  %v14778_v30 = vsub.f32 %v14734_v57, %v14734_v57 }
 0x506   :  { %v1777_v14 = vpop.f32.mrf.mxu1  ;;  %v1439_v5 = vadd.f32 %v1422_v46, %v1216_v24 }
 0x507   :  { %v1424_v49 = vpop.f32.mrf.mxu0  ;;  %v1875_v4 = vadd.f32 %v1777_v14, %v1656_v61  ;;  %v1222_v14 = vadd.f32 %v14673_v42, %v14665_v31  ;;  %21488 = vst [vmem:[#allocation33_spill] sm:$0xff] %v14778_v30 }
 0x508   :  { %v1779_v41 = vpop.f32.mrf.mxu1  ;;  %v1440_v38 = vadd.f32 %v1424_v49, %v1218_v8  ;;  %v1905_v49 = vadd.f32 %v14718_v10, %v1872_v11 }
 0x509   :  { %v14682_v50 = vpop.f32.mrf.mxu0 }
 0x50a   :  { %v1783_v6 = vpop.f32.mrf.mxu1  ;;  %v1443_v31 = vadd.f32 %v14682_v50, %v1222_v14 }
 0x50b   :  { %v14687_v52 = vpop.f32.mrf.mxu0  ;;  %v1879_v42 = vadd.f32 %v1783_v6, %v1660_v23 }
 0x50c   :  { %21473 = vst [vmem:[#allocation21_spill] sm:$0xff] %v14687_v52  ;;  %v14726_v52 = vsub.f32 %v1936_v36, %v1936_v36  ;;  %v1212_v36 = vadd.f32 %v1211_v35, %v1024_v18  ;;  %v1657_v35 = vadd.f32 %v1560_v44, %v1438_v21  ;;  %v1908_v44 = vadd.f32 %v14715_v17, %v1875_v4  ;;  %v1785_v46 = vpop.f32.mrf.mxu1 }
 0x50d   :  { %v1635_v53 = vpop.f32.mrf.mxu0  ;;  %v1912_v59 = vadd.f32 %v14715_v17, %v1879_v42  ;;  %v1916_v21 = vmax.f32 %v1904_v32, 0.0 }
 0x50e   :  { %21485 = vst [vmem:[#allocation32_spill] sm:$0xff] %v14726_v52  ;;  %v1436_v1 = vadd.f32 %v1418_v25, %v1212_v36  ;;  %v1654_v2 = vadd.f32 %v1635_v53, %v1435_v27  ;;  %v1876_v25 = vadd.f32 %v1779_v41, %v1657_v35  ;;  %v1917_v27 = vmax.f32 %v1905_v49, 0.0 }
 0x50f   :  { %v1637_v58 = vpop.f32.mrf.mxu0  ;;  %v1924_v6 = vmax.f32 %v1912_v59, 0.0 }
 0x510   :  { %v1655_v16 = vadd.f32 %v1637_v58, %v1436_v1  ;;  %v1909_v43 = vadd.f32 %v14718_v10, %v1876_v25 }
 0x511   :  { %v1641_v48 = vpop.f32.mrf.mxu0 }
 0x512   :  { %v1658_v34 = vadd.f32 %v1641_v48, %v1439_v5  ;;  %v1661_v48 = vadd.f32 %v14679_v47, %v1442_v40  ;;  %v1920_v47 = vmax.f32 %v1908_v44, 0.0  ;;  %v1921_v1 = vmax.f32 %v1909_v43, 0.0 }
 0x513   :  { %v1643_v12 = vpop.f32.mrf.mxu0  ;;  %v21486_v53 = vld [vmem:[#allocation21_spill] sm:$0xff]  ;;  %v14774_v40 = vand.u32 4294901760, %v14726_v52 }
 0x514   :  { %v1659_v33 = vadd.f32 %v1643_v12, %v1440_v38  ;;  %v1444_v55 = vadd.f32 %v21486_v53, %v1224_v26  ;;  %v1880_v58 = vadd.f32 %v1785_v46, %v1661_v48  ;;  %v14800_v46 = vand.u32 4294901760, %v14778_v30 }
 0x515   :  { %v1647_v56 = vpop.f32.mrf.mxu0  ;;  %21487 = vst [vmem:[#allocation21_spill] sm:$0xff] %v14774_v40  ;;  %v2015_v57 = vsub.f32 %v14726_v52, %v14774_v40 }
 0x516   :  { %v1662_v63 = vadd.f32 %v1647_v56, %v1443_v31  ;;  %v1913_v8 = vadd.f32 %v14718_v10, %v1880_v58  ;;  %21489 = vst [vmem:[#allocation34_spill] sm:$0xff] %v14800_v46  ;;  %v21491_v58 = vld [vmem:[#allocation10_spill] sm:$0xff] }
 0x517   :  { %v1649_v62 = vpop.f32.mrf.mxu0  ;;  %v14823_v31 = vand.u32 4294901760, %v2015_v57  ;;  %v11998_v57 = vld [vmem:[%s21386_s8 + $0x5b8] sm:$0xff] }
 0x518   :  { %v1663_v60 = vadd.f32 %v1649_v62, %v1444_v55  ;;  %v1925_v11 = vmax.f32 %v1913_v8, 0.0  ;;  %v14904_v8 = vsel %vm554_vm4, 1.0, %v21479_v15 }
 0x519   :  { %v1854_v18 = vpop.f32.mrf.mxu0  ;;  %21490 = vst [vmem:[#allocation35_spill] sm:$0xff] %v14823_v31  ;;  %21498 = vst [vmem:[#allocation12_spill] sm:$0xff] %v14904_v8 }
 0x51a   :  { %v1873_v45 = vadd.f32 %v1854_v18, %v1654_v2 }
 0x51b   :  { %v1856_v20 = vpop.f32.mrf.mxu0 }
 0x51c   :  { %v1874_v37 = vadd.f32 %v1856_v20, %v1655_v16  ;;  %v1906_v22 = vadd.f32 %v14721_v39, %v1873_v45 }
 0x51d   :  { %v1860_v28 = vpop.f32.mrf.mxu0 }
 0x51e   :  { %v1907_v24 = vadd.f32 %v14724_v54, %v1874_v37  ;;  %v1877_v41 = vadd.f32 %v1860_v28, %v1658_v34  ;;  %v1918_v29 = vmax.f32 %v1906_v22, 0.0 }
 0x51f   :  { %v1862_v7 = vpop.f32.mrf.mxu0 }
 0x520   :  { %v1910_v51 = vadd.f32 %v14721_v39, %v1877_v41  ;;  %v1878_v12 = vadd.f32 %v1862_v7, %v1659_v33  ;;  %v1919_v0 = vmax.f32 %v1907_v24, 0.0  ;;  %v1928_v35 = vmax.f32 %v1916_v21, %v1918_v29 }
 0x521   :  { %v1866_v9 = vpop.f32.mrf.mxu0  ;;  %v2026_v7 = vsub.f32 %v14778_v30, %v14800_v46 }
 0x522   :  { %v1922_v36 = vmax.f32 %v1910_v51, 0.0  ;;  %v1911_v50 = vadd.f32 %v14724_v54, %v1878_v12  ;;  %v1881_v13 = vadd.f32 %v1866_v9, %v1662_v63  ;;  %v1929_v56 = vmax.f32 %v1917_v27, %v1919_v0 }
 0x523   :  { %v1868_v61 = vpop.f32.mrf.mxu0  ;;  %v14782_v34 = vand.u32 4294901760, %v1928_v35  ;;  %v21492_v63 = vmul.u32 2, %v21491_v58  ;;  %v11979_v58 = vld [vmem:[%s21386_s8 + $0x520] sm:$0xff] }
 0x524   :  { %v1930_v2 = vmax.f32 %v1920_v47, %v1922_v36  ;;  %v1923_v3 = vmax.f32 %v1911_v50, 0.0  ;;  %v1914_v4 = vadd.f32 %v14721_v39, %v1881_v13  ;;  %v1882_v18 = vadd.f32 %v1868_v61, %v1663_v60  ;;  %v21494_v60 = vld [vmem:[#allocation11_spill] sm:$0xff] }
 0x525   :  { %v14780_v20 = vand.u32 4294901760, %v1929_v56  ;;  %v14806_v22 = vsub.f32 %v1928_v35, %v14782_v34  ;;  %v551_v0 = vadd.s32 1, %v21492_v63  ;;  %v14853_v47 = vand.u32 4294901760, %v2026_v7  ;;  %v11989_v7 = vld [vmem:[%s21386_s8 + $0x570] sm:$0xff] }
 0x526   :  { %v1931_v5 = vmax.f32 %v1921_v1, %v1923_v3  ;;  %v1926_v16 = vmax.f32 %v1914_v4, 0.0  ;;  %v1915_v45 = vadd.f32 %v14724_v54, %v1882_v18  ;;  %v14769_v19 = vand.u32 4294901760, %v1930_v2  ;;  %v21496_v1 = vld [vmem:[#allocation22_spill] sm:$0xff]  ;;  %v21500_v4 = vld [vmem:[#allocation27_spill] sm:$0xff]  ;;  %v11981_v63 = vld [vmem:[%s21386_s8 + $0x530] sm:$0xff] }
 0x527   :  { %v14803_v33 = vsub.f32 %v1929_v56, %v14780_v20  ;;  %v14837_v51 = vand.u32 4294901760, %v14806_v22  ;;  %21493 = vst [vmem:[#allocation10_spill] sm:$0xff] %v14853_v47  ;;  %vm553_vm10 = vcmp.eq.s32.totalorder %v21494_v60, %v551_v0  ;;  %v2511_v18 = vsel %vm1934_vm9, %v14904_v8, 0  ;;  %v11976_v0 = vld [vmem:[%s21386_s8 + $0x508] sm:$0xff]  ;;  %v11973_v60 = vld [vmem:[%s21386_s8 + $0x4f0] sm:$0xff] }
 0x528   :  { %v14771_v62 = vand.u32 4294901760, %v1931_v5  ;;  %v1932_v38 = vmax.f32 %v1924_v6, %v1926_v16  ;;  %v1927_v25 = vmax.f32 %v1915_v45, 0.0  ;;  %v14790_v26 = vsub.f32 %v1930_v2, %v14769_v19  ;;  %v11969_v3 = vld [vmem:[%s21386_s8 + $0x4d0] sm:$0xff] }
 0x529   :  { %v14831_v32 = vand.u32 4294901760, %v14803_v33  ;;  %v2093_v50 = vsub.f32 %v14806_v22, %v14837_v51  ;;  %v14883_v21 = vsel %vm553_vm10, 1.0, %v21479_v15 }
 0x52a   :  { %v14784_v37 = vand.u32 4294901760, %v1932_v38  ;;  %v1933_v14 = vmax.f32 %v1925_v11, %v1927_v25  ;;  %v14787_v23 = vsub.f32 %v1931_v5, %v14771_v62  ;;  %v14820_v49 = vand.u32 4294901760, %v14790_v26  ;;  %21495 = vst [vmem:[#allocation11_spill] sm:$0xff] %v14883_v21  ;;  %v12005_v25 = vld [vmem:[%s21386_s8 + $0x5f0] sm:$0xff] }
 0x52b   :  { %v2087_v29 = vsub.f32 %v14803_v33, %v14831_v32  ;;  %v14878_v61 = vand.u32 4294901760, %v2093_v50  ;;  %v2508_v2 = vsel %vm1934_vm9, %v14883_v21, 0  ;;  %v14929_v5 = vsub.f32 %v2511_v18, %v2511_v18  ;;  %v11972_v50 = vld [vmem:[%s21386_s8 + $0x4e8] sm:$0xff] }
 0x52c   :  { %v14795_v44 = vsub.f32 %v1932_v38, %v14784_v37  ;;  %v14797_v28 = vand.u32 4294901760, %v1933_v14  ;;  %v14816_v48 = vand.u32 4294901760, %v14787_v23  ;;  %v2081_v55 = vsub.f32 %v14790_v26, %v14820_v49  ;;  %v11964_v18 = vld [vmem:[%s21386_s8 + $0x4a8] sm:$0xff] }
 0x52d   :  { %v14874_v13 = vand.u32 4294901760, %v2087_v29  ;;  %v14908_v56 = vsub.f32 %v2508_v2, %v2508_v2  ;;  %21502 = vst [vmem:[#allocation38_spill] sm:$0xff] %v14929_v5  ;;  %v14942_v16 = vand.u32 4294901760, %v14929_v5  ;;  %v11975_v29 = vld [vmem:[%s21386_s8 + $0x500] sm:$0xff] }
 0x52e   :  { %1968 = vmatprep.subr.mxu1 %v14797_v28  ;;  %v14810_v24 = vsub.f32 %v1933_v14, %v14797_v28  ;;  %v14813_v41 = vand.u32 4294901760, %v14795_v44  ;;  %v2075_v53 = vsub.f32 %v14787_v23, %v14816_v48  ;;  %v14869_v59 = vand.u32 4294901760, %v2081_v55  ;;  %v11999_v14 = vld [vmem:[%s21386_s8 + $0x5c0] sm:$0xff]  ;;  %v11982_v55 = vld [vmem:[%s21386_s8 + $0x538] sm:$0xff] }
 0x52f   :  { %1970 = vmatpush1.msra.mxu1 %v14784_v37  ;;  %21499 = vst [vmem:[#allocation36_spill] sm:$0xff] %v14908_v56  ;;  %v14922_v35 = vand.u32 4294901760, %v14908_v56  ;;  %21503 = vst [vmem:[#allocation39_spill] sm:$0xff] %v14942_v16  ;;  %v2598_v11 = vsub.f32 %v14929_v5, %v14942_v16  ;;  %v11967_v2 = vld [vmem:[%s21386_s8 + $0x4c0] sm:$0xff] }
 0x530   :  { %1972 = vmatprep.subr.mxu1 %v14771_v62  ;;  %v14826_v42 = vand.u32 4294901760, %v14810_v24  ;;  %v2069_v43 = vsub.f32 %v14795_v44, %v14813_v41  ;;  %v14865_v27 = vand.u32 4294901760, %v2075_v53  ;;  %v11980_v53 = vld [vmem:[%s21386_s8 + $0x528] sm:$0xff] }
 0x531   :  { %1974 = vmatpush1.msra.mxu1 %v14769_v19  ;;  %21501 = vst [vmem:[#allocation37_spill] sm:$0xff] %v14922_v35  ;;  %v2587_v6 = vsub.f32 %v14908_v56, %v14922_v35  ;;  %v14966_v38 = vand.u32 4294901760, %v2598_v11  ;;  %v11963_v11 = vld [vmem:[%s21386_s8 + $0x4a0] sm:$0xff] }
 0x532   :  { %1976 = vmatprep.subr.mxu1 %v14780_v20  ;;  %v2063_v12 = vsub.f32 %v14810_v24, %v14826_v42  ;;  %v14859_v36 = vand.u32 4294901760, %v2069_v43  ;;  %v11986_v43 = vld [vmem:[%s21386_s8 + $0x558] sm:$0xff] }
 0x533   :  { %1978 = vmatpush1.msra.mxu1 %v14782_v34  ;;  %v14949_v45 = vand.u32 4294901760, %v2587_v6  ;;  %21505 = vst [vmem:[#allocation41_spill] sm:$0xff] %v14966_v38  ;;  %v11966_v6 = vld [vmem:[%s21386_s8 + $0x4b8] sm:$0xff] }
 0x534   :  { %2017 = vmatmul.mubr.f32.vlgmr.msra.gmra.mxu1 %v14823_v31  ;;  %2171 = vmatprep.subr.mxu1 %v14810_v24  ;;  %v14851_v9 = vand.u32 4294901760, %v2063_v12  ;;  %v11985_v12 = vld [vmem:[%s21386_s8 + $0x550] sm:$0xff] }
 0x535   :  { %2174 = vmatpush1.msra.mxu1 %v14795_v44  ;;  %2022 = vmatprep.mubr.f32.mxu1 %v21479_v15  ;;  %21504 = vst [vmem:[#allocation40_spill] sm:$0xff] %v14949_v45 }
 0x536   :  { %2065 = vmatprep.subr.mxu0 %v14851_v9  ;;  %2177 = vmatprep.subr.mxu1 %v14787_v23 }
 0x537   :  { %2071 = vmatpush1.msra.mxu0 %v14859_v36  ;;  %2180 = vmatpush1.msra.mxu1 %v14790_v26 }
 0x538   :  { %2028 = vmatmul.mubr.f32.gmra.mxu1 %v14853_v47  ;;  %2077 = vmatprep.subr.mxu0 %v14865_v27 }
 0x539   :  { %2183 = vmatprep.subr.mxu1 %v14803_v33  ;;  %2083 = vmatpush1.msra.mxu0 %v14869_v59 }
 0x53a   :  { %2186 = vmatpush1.msra.mxu1 %v14806_v22  ;;  %2089 = vmatprep.subr.mxu0 %v14874_v13 }
 0x53b   :  { %2354 = vmatprep.subr.mxu1 %v14826_v42  ;;  %2095 = vmatpush1.msra.mxu0 %v14878_v61 }
 0x53c   :  { %2219 = vmatprep.mubr.f32.mxu1 %v21479_v15  ;;  %11931 = vmatmul.mubr.msk.f32.vlgmr.msra.gmra.mxu0 %vm1934_vm9, %v21496_v1 }
 0x53d   :  { %2222 = vmatmul.mubr.f32.vlgmr.msra.gmra.mxu1 %v14726_v52  ;;  %2263 = vmatprep.subr.mxu0 %v14797_v28 }
 0x53e   :  { %2358 = vmatpush1.msra.mxu1 %v14813_v41  ;;  %2265 = vmatpush1.msra.mxu0 %v14784_v37 }
 0x53f   :  { %2362 = vmatprep.subr.mxu1 %v14816_v48  ;;  %2267 = vmatprep.subr.mxu0 %v14771_v62 }
 0x540   :  { %2366 = vmatpush1.msra.mxu1 %v14820_v49  ;;  %2135 = vmatprep.mubr.f32.mxu0 %v21479_v15 }
 0x541   :  { %2227 = vmatprep.mubr.f32.mxu1 %v21479_v15  ;;  %2269 = vmatpush1.msra.mxu0 %v14769_v19 }
 0x542   :  { %2370 = vmatprep.subr.mxu1 %v14831_v32  ;;  %11932 = vmatmul.mubr.msk.f32.gmra.mxu0 %vm1934_vm9, %v21500_v4 }
 0x543   :  { %2230 = vmatmul.mubr.f32.gmra.mxu1 %v14778_v30  ;;  %2271 = vmatprep.subr.mxu0 %v14780_v20 }
 0x544   :  { %2374 = vmatpush1.msra.mxu1 %v14837_v51  ;;  %2273 = vmatpush1.msra.mxu0 %v14782_v34 }
 0x545   :  { %2540 = vmatprep.subr.mxu1 %v14797_v28  ;;  %2449 = vmatprep.subr.mxu0 %v14797_v28 }
 0x546   :  { %2306 = vmatprep.mubr.f32.mxu0 %v21479_v15  ;;  %2407 = vmatprep.mubr.f32.mxu1 %v21479_v15 }
 0x547   :  { %2310 = vmatmul.mubr.f32.vlgmr.msra.gmra.mxu0 %v14774_v40  ;;  %11933 = vmatmul.mubr.msk.f32.vlgmr.msra.gmra.mxu1 %vm1934_vm9, %v21496_v1 }
 0x548   :  { %2451 = vmatpush1.msra.mxu0 %v14784_v37  ;;  %2542 = vmatpush1.msra.mxu1 %v14784_v37 }
 0x549   :  { %2453 = vmatprep.subr.mxu0 %v14771_v62  ;;  %2544 = vmatprep.subr.mxu1 %v14771_v62 }
 0x54a   :  { %2455 = vmatpush1.msra.mxu0 %v14769_v19  ;;  %2546 = vmatpush1.msra.mxu1 %v14769_v19 }
 0x54b   :  { %2315 = vmatprep.mubr.f32.mxu0 %v21479_v15  ;;  %2414 = vmatprep.mubr.f32.mxu1 %v21479_v15 }
 0x54c   :  { %2457 = vmatprep.subr.mxu0 %v14780_v20  ;;  %2548 = vmatprep.subr.mxu1 %v14780_v20 }
 0x54d   :  { %2319 = vmatmul.mubr.f32.gmra.mxu0 %v14800_v46  ;;  %11934 = vmatmul.mubr.msk.f32.gmra.mxu1 %vm1934_vm9, %v21500_v4 }
 0x54e   :  { %2459 = vmatpush1.msra.mxu0 %v14782_v34  ;;  %2550 = vmatpush1.msra.mxu1 %v14782_v34 }
 0x54f   :  { %2637 = vmatprep.subr.mxu0 %v14851_v9  ;;  %2743 = vmatprep.subr.mxu1 %v14810_v24  ;;  %v11991_v24 = vld [vmem:[%s21386_s8 + $0x580] sm:$0xff]  ;;  %v11978_v9 = vld [vmem:[%s21386_s8 + $0x518] sm:$0xff] }
 0x550   :  { %2492 = vmatprep.mubr.f32.mxu0 %v21479_v15  ;;  %2583 = vmatprep.mubr.f32.mxu1 %v21479_v15 }
 0x551   :  { %11935 = vmatmul.mubr.msk.f32.vlgmr.msra.gmra.mxu0 %vm1934_vm9, %v21496_v1  ;;  %2589 = vmatmul.mubr.f32.vlgmr.msra.gmra.mxu1 %v14949_v45 }
 0x552   :  { %2643 = vmatpush1.msra.mxu0 %v14859_v36  ;;  %2746 = vmatpush1.msra.mxu1 %v14795_v44  ;;  %v11995_v44 = vld [vmem:[%s21386_s8 + $0x5a0] sm:$0xff]  ;;  %v11977_v36 = vld [vmem:[%s21386_s8 + $0x510] sm:$0xff] }
 0x553   :  { %2649 = vmatprep.subr.mxu0 %v14865_v27  ;;  %2749 = vmatprep.subr.mxu1 %v14787_v23  ;;  %v12001_v23 = vld [vmem:[%s21386_s8 + $0x5d0] sm:$0xff]  ;;  %v11974_v27 = vld [vmem:[%s21386_s8 + $0x4f8] sm:$0xff] }
 0x554   :  { %2655 = vmatpush1.msra.mxu0 %v14869_v59  ;;  %2752 = vmatpush1.msra.mxu1 %v14790_v26  ;;  %v11996_v26 = vld [vmem:[%s21386_s8 + $0x5a8] sm:$0xff]  ;;  %v11971_v59 = vld [vmem:[%s21386_s8 + $0x4e0] sm:$0xff] }
 0x555   :  { %2499 = vmatprep.mubr.f32.mxu0 %v21479_v15  ;;  %2594 = vmatprep.mubr.f32.mxu1 %v21479_v15 }
 0x556   :  { %2661 = vmatprep.subr.mxu0 %v14874_v13  ;;  %2755 = vmatprep.subr.mxu1 %v14803_v33  ;;  %v11992_v33 = vld [vmem:[%s21386_s8 + $0x588] sm:$0xff] }
 0x557   :  { %11936 = vmatmul.mubr.msk.f32.gmra.mxu0 %vm1934_vm9, %v21500_v4  ;;  %2600 = vmatmul.mubr.f32.gmra.mxu1 %v14966_v38  ;;  %v11968_v13 = vld [vmem:[%s21386_s8 + $0x4c8] sm:$0xff] }
 0x558   :  { %2667 = vmatpush1.msra.mxu0 %v14878_v61  ;;  %2758 = vmatpush1.msra.mxu1 %v14806_v22  ;;  %v11994_v22 = vld [vmem:[%s21386_s8 + $0x598] sm:$0xff] }
 0x559   :  { %2835 = vmatprep.subr.mxu0 %v14797_v28  ;;  %2926 = vmatprep.subr.mxu1 %v14826_v42  ;;  %v11987_v42 = vld [vmem:[%s21386_s8 + $0x560] sm:$0xff]  ;;  %v11970_v61 = vld [vmem:[%s21386_s8 + $0x4d8] sm:$0xff] }
 0x55a   :  { %2700 = vmatprep.mubr.f32.mxu0 %v21479_v15  ;;  %2791 = vmatprep.mubr.f32.mxu1 %v21479_v15 }
 0x55b   :  { %11937 = vmatmul.mubr.msk.f32.vlgmr.msra.gmra.mxu0 %vm1934_vm9, %v14883_v21  ;;  %2794 = vmatmul.mubr.f32.vlgmr.msra.gmra.mxu1 %v14908_v56 }
 0x55c   :  { %2837 = vmatpush1.msra.mxu0 %v14784_v37  ;;  %2930 = vmatpush1.msra.mxu1 %v14813_v41  ;;  %v11993_v41 = vld [vmem:[%s21386_s8 + $0x590] sm:$0xff] }
 0x55d   :  { %2839 = vmatprep.subr.mxu0 %v14771_v62  ;;  %2934 = vmatprep.subr.mxu1 %v14816_v48  ;;  %v11988_v48 = vld [vmem:[%s21386_s8 + $0x568] sm:$0xff] }
 0x55e   :  { %2841 = vmatpush1.msra.mxu0 %v14769_v19  ;;  %2938 = vmatpush1.msra.mxu1 %v14820_v49  ;;  %v11990_v49 = vld [vmem:[%s21386_s8 + $0x578] sm:$0xff] }
 0x55f   :  { %2707 = vmatprep.mubr.f32.mxu0 %v21479_v15  ;;  %2843 = vmatprep.subr.mxu0 %v14780_v20 }
 0x560   :  { %2942 = vmatprep.subr.mxu1 %v14831_v32  ;;  %11938 = vmatmul.mubr.msk.f32.gmra.mxu0 %vm1934_vm9, %v14904_v8  ;;  %v11984_v32 = vld [vmem:[%s21386_s8 + $0x548] sm:$0xff] }
 0x561   :  { %2845 = vmatpush1.msra.mxu0 %v14782_v34  ;;  %2946 = vmatpush1.msra.mxu1 %v14837_v51  ;;  %v11983_v51 = vld [vmem:[%s21386_s8 + $0x540] sm:$0xff] }
 0x562   :  { %2799 = vmatprep.mubr.f32.mxu1 %v21479_v15  ;;  %3021 = vmatprep.subr.mxu0 %v14797_v28  ;;  %v11997_v28 = vld [vmem:[%s21386_s8 + $0x5b0] sm:$0xff] }
 0x563   :  { %2802 = vmatmul.mubr.f32.gmra.mxu1 %v14929_v5  ;;  %2878 = vmatprep.mubr.f32.mxu0 %v21479_v15 }
 0x564   :  { %2882 = vmatmul.mubr.f32.vlgmr.msra.gmra.mxu0 %v14922_v35  ;;  %2979 = vmatprep.mubr.f32.mxu1 %v21479_v15 }
 0x565   :  { %3023 = vmatpush1.msra.mxu0 %v14784_v37  ;;  %2887 = vmatprep.mubr.f32.mxu0 %v21479_v15  ;;  %v12002_v37 = vld [vmem:[%s21386_s8 + $0x5d8] sm:$0xff] }
 0x566   :  { %3025 = vmatprep.subr.mxu0 %v14771_v62  ;;  %v12006_v62 = vld [vmem:[%s21386_s8 + $0x5f8] sm:$0xff] }
 0x567   :  { %11939 = vmatmul.mubr.msk.f32.vlgmr.msra.gmra.mxu1 %vm1934_vm9, %v14883_v21  ;;  %3027 = vmatpush1.msra.mxu0 %v14769_v19  ;;  %v12004_v19 = vld [vmem:[%s21386_s8 + $0x5e8] sm:$0xff] }
 0x568   :  { %3029 = vmatprep.subr.mxu0 %v14780_v20  ;;  %2891 = vmatmul.mubr.f32.gmra.mxu0 %v14942_v16  ;;  %v12003_v20 = vld [vmem:[%s21386_s8 + $0x5e0] sm:$0xff] }
 0x569   :  { %3031 = vmatpush1.msra.mxu0 %v14782_v34  ;;  %2986 = vmatprep.mubr.f32.mxu1 %v21479_v15  ;;  %v12000_v34 = vld [vmem:[%s21386_s8 + $0x5c8] sm:$0xff] }
 0x56a   :  { %3064 = vmatprep.mubr.f32.mxu0 %v21479_v15  ;;  %3363 = vmatprep.subr.mxu1 %v12004_v19  ;;  %v11965_v19 = vld [vmem:[%s21386_s8 + $0x4b0] sm:$0xff] }
 0x56b   :  { %11940 = vmatmul.mubr.msk.f32.gmra.mxu1 %vm1934_vm9, %v14904_v8  ;;  %3434 = vmatprep.subr.mxu0 %v12006_v62  ;;  %v11960_v62 = vld [vmem:[%s21386_s8 + $0x488] sm:$0xff] }
 0x56c   :  { %11941 = vmatmul.mubr.msk.f32.vlgmr.msra.gmra.mxu0 %vm1934_vm9, %v14883_v21  ;;  %3364 = vmatpush1.msra.mxu1 %v12003_v20  ;;  %v11962_v20 = vld [vmem:[%s21386_s8 + $0x498] sm:$0xff] }
 0x56d   :  { %3071 = vmatprep.mubr.f32.mxu0 %v21479_v15  ;;  %3435 = vmatpush1.msra.mxu0 %v12005_v25  ;;  %v11959_v25 = vld [vmem:[%s21386_s8 + $0x480] sm:$0xff] }
 0x56e   :  { %3365 = vmatprep.subr.mxu1 %v12000_v34  ;;  %3436 = vmatprep.subr.mxu0 %v12002_v37  ;;  %v11961_v34 = vld [vmem:[%s21386_s8 + $0x490] sm:$0xff]  ;;  %v11956_v37 = vld [vmem:[%s21386_s8 + $0x468] sm:$0xff] }
 0x56f   :  { %3366 = vmatpush1.msra.mxu1 %v11999_v14  ;;  %3437 = vmatpush1.msra.mxu0 %v12001_v23  ;;  %v11958_v14 = vld [vmem:[%s21386_s8 + $0x478] sm:$0xff]  ;;  %v11955_v23 = vld [vmem:[%s21386_s8 + $0x460] sm:$0xff] }
 0x570   :  { %11942 = vmatmul.mubr.msk.f32.gmra.mxu0 %vm1934_vm9, %v14904_v8  ;;  %3367 = vmatprep.subr.mxu1 %v11996_v26  ;;  %v11957_v26 = vld [vmem:[%s21386_s8 + $0x470] sm:$0xff] }
 0x571   :  { %3438 = vmatprep.subr.mxu0 %v11998_v57  ;;  %3368 = vmatpush1.msra.mxu1 %v11995_v44  ;;  %v11952_v57 = vld [vmem:[%s21386_s8 + $0x448] sm:$0xff]  ;;  %v11954_v44 = vld [vmem:[%s21386_s8 + $0x458] sm:$0xff] }
 0x572   :  { %3439 = vmatpush1.msra.mxu0 %v11997_v28  ;;  %3369 = vmatprep.subr.mxu1 %v11992_v33  ;;  %v11951_v28 = vld [vmem:[%s21386_s8 + $0x440] sm:$0xff]  ;;  %v11953_v33 = vld [vmem:[%s21386_s8 + $0x450] sm:$0xff] }
 0x573   :  { %3440 = vmatprep.subr.mxu0 %v11994_v22  ;;  %3370 = vmatpush1.msra.mxu1 %v11991_v24  ;;  %v11948_v22 = vld [vmem:[%s21386_s8 + $0x428] sm:$0xff]  ;;  %v11950_v24 = vld [vmem:[%s21386_s8 + $0x438] sm:$0xff] }
 0x574   :  { %3441 = vmatpush1.msra.mxu0 %v11993_v41  ;;  %3371 = vmatprep.subr.mxu1 %v11988_v48  ;;  %v11947_v41 = vld [vmem:[%s21386_s8 + $0x420] sm:$0xff]  ;;  %v11949_v48 = vld [vmem:[%s21386_s8 + $0x430] sm:$0xff] }
 0x575   :  { %3442 = vmatprep.subr.mxu0 %v11990_v49  ;;  %3372 = vmatpush1.msra.mxu1 %v11987_v42  ;;  %v11944_v49 = vld [vmem:[%s21386_s8 + $0x408] sm:$0xff]  ;;  %v11946_v42 = vld [vmem:[%s21386_s8 + $0x418] sm:$0xff] }
 0x576   :  { %3443 = vmatpush1.msra.mxu0 %v11989_v7  ;;  %3373 = vmatprep.subr.mxu1 %v11984_v32  ;;  %v11943_v7 = vld [vmem:[%s21386_s8 + $0x400] sm:$0xff]  ;;  %v11945_v32 = vld [vmem:[%s21386_s8 + $0x410] sm:$0xff] }
 0x577   :  { %3444 = vmatprep.subr.mxu0 %v11986_v43  ;;  %3374 = vmatpush1.msra.mxu1 %v11983_v51  ;;  %v12068_v43 = vld [vmem:[%s21386_s8 + $0x7e8] sm:$0xff]  ;;  %v12070_v51 = vld [vmem:[%s21386_s8 + $0x7f8] sm:$0xff] }
 0x578   :  { %3445 = vmatpush1.msra.mxu0 %v11985_v12  ;;  %3375 = vmatprep.subr.mxu1 %v11980_v53  ;;  %v12067_v12 = vld [vmem:[%s21386_s8 + $0x7e0] sm:$0xff]  ;;  %v12069_v53 = vld [vmem:[%s21386_s8 + $0x7f0] sm:$0xff] }
 0x579   :  { %3446 = vmatprep.subr.mxu0 %v11982_v55  ;;  %3376 = vmatpush1.msra.mxu1 %v11979_v58  ;;  %v12064_v55 = vld [vmem:[%s21386_s8 + $0x7c8] sm:$0xff]  ;;  %v12066_v58 = vld [vmem:[%s21386_s8 + $0x7d8] sm:$0xff] }
 0x57a   :  { %3447 = vmatpush1.msra.mxu0 %v11981_v63  ;;  %3377 = vmatprep.subr.mxu1 %v11976_v0  ;;  %v12063_v63 = vld [vmem:[%s21386_s8 + $0x7c0] sm:$0xff]  ;;  %v12065_v0 = vld [vmem:[%s21386_s8 + $0x7d0] sm:$0xff] }
 0x57b   :  { %3448 = vmatprep.subr.mxu0 %v11978_v9  ;;  %3378 = vmatpush1.msra.mxu1 %v11975_v29  ;;  %v12060_v9 = vld [vmem:[%s21386_s8 + $0x7a8] sm:$0xff]  ;;  %v12062_v29 = vld [vmem:[%s21386_s8 + $0x7b8] sm:$0xff] }
 0x57c   :  { %3449 = vmatpush1.msra.mxu0 %v11977_v36  ;;  %3379 = vmatprep.subr.mxu1 %v11972_v50  ;;  %v12059_v36 = vld [vmem:[%s21386_s8 + $0x7a0] sm:$0xff]  ;;  %v12061_v50 = vld [vmem:[%s21386_s8 + $0x7b0] sm:$0xff] }
 0x57d   :  { %3450 = vmatprep.subr.mxu0 %v11974_v27  ;;  %3380 = vmatpush1.msra.mxu1 %v11971_v59  ;;  %v12056_v27 = vld [vmem:[%s21386_s8 + $0x788] sm:$0xff]  ;;  %v12058_v59 = vld [vmem:[%s21386_s8 + $0x798] sm:$0xff] }
 0x57e   :  { %3451 = vmatpush1.msra.mxu0 %v11973_v60  ;;  %3381 = vmatprep.subr.mxu1 %v11968_v13  ;;  %v12055_v60 = vld [vmem:[%s21386_s8 + $0x780] sm:$0xff]  ;;  %v12057_v13 = vld [vmem:[%s21386_s8 + $0x790] sm:$0xff] }
 0x57f   :  { %3452 = vmatprep.subr.mxu0 %v11970_v61  ;;  %3382 = vmatpush1.msra.mxu1 %v11967_v2  ;;  %v12052_v61 = vld [vmem:[%s21386_s8 + $0x768] sm:$0xff]  ;;  %v12054_v2 = vld [vmem:[%s21386_s8 + $0x778] sm:$0xff] }
 0x580   :  { %3453 = vmatpush1.msra.mxu0 %v11969_v3  ;;  %3383 = vmatprep.subr.mxu1 %v11964_v18  ;;  %v12051_v3 = vld [vmem:[%s21386_s8 + $0x760] sm:$0xff]  ;;  %v12053_v18 = vld [vmem:[%s21386_s8 + $0x770] sm:$0xff] }
 0x581   :  { %3454 = vmatprep.subr.mxu0 %v11966_v6  ;;  %3384 = vmatpush1.msra.mxu1 %v11963_v11  ;;  %v12048_v6 = vld [vmem:[%s21386_s8 + $0x748] sm:$0xff]  ;;  %v12050_v11 = vld [vmem:[%s21386_s8 + $0x758] sm:$0xff] }
 0x582   :  { %3455 = vmatpush1.msra.mxu0 %v11965_v19  ;;  %3385 = vmatprep.subr.mxu1 %v11960_v62  ;;  %v12047_v19 = vld [vmem:[%s21386_s8 + $0x740] sm:$0xff]  ;;  %v12049_v62 = vld [vmem:[%s21386_s8 + $0x750] sm:$0xff] }
 0x583   :  { %3456 = vmatprep.subr.mxu0 %v11962_v20  ;;  %3386 = vmatpush1.msra.mxu1 %v11959_v25  ;;  %v12044_v20 = vld [vmem:[%s21386_s8 + $0x728] sm:$0xff]  ;;  %v12046_v25 = vld [vmem:[%s21386_s8 + $0x738] sm:$0xff] }
 0x584   :  { %3457 = vmatpush1.msra.mxu0 %v11961_v34  ;;  %3387 = vmatprep.subr.mxu1 %v11956_v37  ;;  %v12043_v34 = vld [vmem:[%s21386_s8 + $0x720] sm:$0xff]  ;;  %v12045_v37 = vld [vmem:[%s21386_s8 + $0x730] sm:$0xff] }
 0x585   :  { %3458 = vmatprep.subr.mxu0 %v11958_v14  ;;  %3388 = vmatpush1.msra.mxu1 %v11955_v23  ;;  %v12040_v14 = vld [vmem:[%s21386_s8 + $0x708] sm:$0xff]  ;;  %v12042_v23 = vld [vmem:[%s21386_s8 + $0x718] sm:$0xff] }
 0x586   :  { %3459 = vmatpush1.msra.mxu0 %v11957_v26  ;;  %3389 = vmatprep.subr.mxu1 %v11952_v57  ;;  %v12039_v26 = vld [vmem:[%s21386_s8 + $0x700] sm:$0xff]  ;;  %v12041_v57 = vld [vmem:[%s21386_s8 + $0x710] sm:$0xff] }
 0x587   :  { %3460 = vmatprep.subr.mxu0 %v11954_v44  ;;  %3390 = vmatpush1.msra.mxu1 %v11951_v28  ;;  %v12036_v44 = vld [vmem:[%s21386_s8 + $0x6e8] sm:$0xff]  ;;  %v12038_v28 = vld [vmem:[%s21386_s8 + $0x6f8] sm:$0xff] }
 0x588   :  { %3461 = vmatpush1.msra.mxu0 %v11953_v33  ;;  %3391 = vmatprep.subr.mxu1 %v11948_v22  ;;  %v12035_v33 = vld [vmem:[%s21386_s8 + $0x6e0] sm:$0xff]  ;;  %v12037_v22 = vld [vmem:[%s21386_s8 + $0x6f0] sm:$0xff] }
 0x589   :  { %3462 = vmatprep.subr.mxu0 %v11950_v24  ;;  %3392 = vmatpush1.msra.mxu1 %v11947_v41  ;;  %v12032_v24 = vld [vmem:[%s21386_s8 + $0x6c8] sm:$0xff]  ;;  %v12034_v41 = vld [vmem:[%s21386_s8 + $0x6d8] sm:$0xff] }
 0x58a   :  { %3463 = vmatpush1.msra.mxu0 %v11949_v48  ;;  %3393 = vmatprep.subr.mxu1 %v11944_v49  ;;  %v12031_v48 = vld [vmem:[%s21386_s8 + $0x6c0] sm:$0xff]  ;;  %v12033_v49 = vld [vmem:[%s21386_s8 + $0x6d0] sm:$0xff] }
 0x58b   :  { %3464 = vmatprep.subr.mxu0 %v11946_v42  ;;  %3394 = vmatpush1.msra.mxu1 %v11943_v7  ;;  %v12028_v42 = vld [vmem:[%s21386_s8 + $0x6a8] sm:$0xff]  ;;  %v12030_v7 = vld [vmem:[%s21386_s8 + $0x6b8] sm:$0xff] }
 0x58c   :  { %3465 = vmatpush1.msra.mxu0 %v11945_v32  ;;  %3395 = vmatprep.subr.mxu1 %v12068_v43  ;;  %v12027_v32 = vld [vmem:[%s21386_s8 + $0x6a0] sm:$0xff]  ;;  %v12029_v43 = vld [vmem:[%s21386_s8 + $0x6b0] sm:$0xff] }
 0x58d   :  { %3466 = vmatprep.subr.mxu0 %v12070_v51  ;;  %3396 = vmatpush2.msra.mxu1 %v12067_v12  ;;  %v12024_v51 = vld [vmem:[%s21386_s8 + $0x688] sm:$0xff]  ;;  %v12026_v12 = vld [vmem:[%s21386_s8 + $0x698] sm:$0xff] }
 0x58e   :  { %3467 = vmatpush2.msra.mxu0 %v12069_v53  ;;  %3397 = vmatprep.subr.mxu1 %v12064_v55  ;;  %v12023_v53 = vld [vmem:[%s21386_s8 + $0x680] sm:$0xff]  ;;  %v12025_v55 = vld [vmem:[%s21386_s8 + $0x690] sm:$0xff] }
 0x58f   :  { %3468 = vmatprep.subr.mxu0 %v12066_v58  ;;  %3398 = vmatpush2.msra.mxu1 %v12063_v63  ;;  %v12020_v58 = vld [vmem:[%s21386_s8 + $0x668] sm:$0xff]  ;;  %v12022_v63 = vld [vmem:[%s21386_s8 + $0x678] sm:$0xff] }
 0x590   :  { %3469 = vmatpush2.msra.mxu0 %v12065_v0  ;;  %3399 = vmatprep.subr.mxu1 %v12060_v9  ;;  %v12019_v0 = vld [vmem:[%s21386_s8 + $0x660] sm:$0xff]  ;;  %v12021_v9 = vld [vmem:[%s21386_s8 + $0x670] sm:$0xff] }
 0x591   :  { %3470 = vmatprep.subr.mxu0 %v12062_v29  ;;  %3400 = vmatpush2.msra.mxu1 %v12059_v36  ;;  %v12016_v29 = vld [vmem:[%s21386_s8 + $0x648] sm:$0xff]  ;;  %v12018_v36 = vld [vmem:[%s21386_s8 + $0x658] sm:$0xff] }
 0x592   :  { %3471 = vmatpush2.msra.mxu0 %v12061_v50  ;;  %3401 = vmatprep.subr.mxu1 %v12056_v27  ;;  %v12015_v50 = vld [vmem:[%s21386_s8 + $0x640] sm:$0xff]  ;;  %v12017_v27 = vld [vmem:[%s21386_s8 + $0x650] sm:$0xff] }
 0x593   :  { %3472 = vmatprep.subr.mxu0 %v12058_v59  ;;  %3402 = vmatpush2.msra.mxu1 %v12055_v60  ;;  %v12012_v59 = vld [vmem:[%s21386_s8 + $0x628] sm:$0xff]  ;;  %v12014_v60 = vld [vmem:[%s21386_s8 + $0x638] sm:$0xff] }
 0x594   :  { %3473 = vmatpush2.msra.mxu0 %v12057_v13  ;;  %3403 = vmatprep.subr.mxu1 %v12052_v61  ;;  %v12011_v13 = vld [vmem:[%s21386_s8 + $0x620] sm:$0xff]  ;;  %v12013_v61 = vld [vmem:[%s21386_s8 + $0x630] sm:$0xff] }
 0x595   :  { %3474 = vmatprep.subr.mxu0 %v12054_v2  ;;  %3404 = vmatpush2.msra.mxu1 %v12051_v3  ;;  %v12008_v2 = vld [vmem:[%s21386_s8 + $0x608] sm:$0xff]  ;;  %v12010_v3 = vld [vmem:[%s21386_s8 + $0x618] sm:$0xff] }
 0x596   :  { %3475 = vmatpush2.msra.mxu0 %v12053_v18  ;;  %3405 = vmatprep.subr.mxu1 %v12048_v6  ;;  %v12007_v18 = vld [vmem:[%s21386_s8 + $0x600] sm:$0xff]  ;;  %v12009_v6 = vld [vmem:[%s21386_s8 + $0x610] sm:$0xff] }
 0x597   :  { %3476 = vmatprep.subr.mxu0 %v12050_v11  ;;  %3406 = vmatpush2.msra.mxu1 %v12047_v19  ;;  %v3150_v11 = vld [vmem:[%s21386_s8 + $0x1e8] sm:$0xff]  ;;  %v3152_v19 = vld [vmem:[%s21386_s8 + $0x1f8] sm:$0xff] }
 0x598   :  { %3477 = vmatpush2.msra.mxu0 %v12049_v62  ;;  %3407 = vmatprep.subr.mxu1 %v12044_v20 }
 0x599   :  { %3478 = vmatprep.subr.mxu0 %v12046_v25  ;;  %3408 = vmatpush2.msra.mxu1 %v12043_v34 }
 0x59a   :  { %3479 = vmatpush2.msra.mxu0 %v12045_v37  ;;  %3409 = vmatprep.subr.mxu1 %v12040_v14 }
 0x59b   :  { %3480 = vmatprep.subr.mxu0 %v12042_v23  ;;  %3410 = vmatpush2.msra.mxu1 %v12039_v26 }
 0x59c   :  { %3481 = vmatpush2.msra.mxu0 %v12041_v57  ;;  %3411 = vmatprep.subr.mxu1 %v12036_v44 }
 0x59d   :  { %3482 = vmatprep.subr.mxu0 %v12038_v28  ;;  %3412 = vmatpush2.msra.mxu1 %v12035_v33 }
 0x59e   :  { %3483 = vmatpush2.msra.mxu0 %v12037_v22  ;;  %3413 = vmatprep.subr.mxu1 %v12032_v24 }
 0x59f   :  { %3484 = vmatprep.subr.mxu0 %v12034_v41  ;;  %3414 = vmatpush2.msra.mxu1 %v12031_v48 }
 0x5a0   :  { %3485 = vmatpush2.msra.mxu0 %v12033_v49  ;;  %3415 = vmatprep.subr.mxu1 %v12028_v42 }
 0x5a1   :  { %3486 = vmatprep.subr.mxu0 %v12030_v7  ;;  %3416 = vmatpush2.msra.mxu1 %v12027_v32 }
 0x5a2   :  { %3487 = vmatpush2.msra.mxu0 %v12029_v43  ;;  %3417 = vmatprep.subr.mxu1 %v12024_v51 }
 0x5a3   :  { %3488 = vmatprep.subr.mxu0 %v12026_v12  ;;  %3418 = vmatpush2.msra.mxu1 %v12023_v53 }
 0x5a4   :  { %3489 = vmatpush2.msra.mxu0 %v12025_v55  ;;  %3419 = vmatprep.subr.mxu1 %v12020_v58 }
 0x5a5   :  { %3490 = vmatprep.subr.mxu0 %v12022_v63  ;;  %3420 = vmatpush2.msra.mxu1 %v12019_v0 }
 0x5a6   :  { %3491 = vmatpush2.msra.mxu0 %v12021_v9  ;;  %3421 = vmatprep.subr.mxu1 %v12016_v29 }
 0x5a7   :  { %3492 = vmatprep.subr.mxu0 %v12018_v36  ;;  %3422 = vmatpush2.msra.mxu1 %v12015_v50 }
 0x5a8   :  { %3493 = vmatpush2.msra.mxu0 %v12017_v27  ;;  %3423 = vmatprep.subr.mxu1 %v12012_v59 }
 0x5a9   :  { %3494 = vmatprep.subr.mxu0 %v12014_v60  ;;  %3424 = vmatpush2.msra.mxu1 %v12011_v13 }
 0x5aa   :  { %3495 = vmatpush2.msra.mxu0 %v12013_v61  ;;  %3425 = vmatprep.subr.mxu1 %v12008_v2 }
 0x5ab   :  { %3496 = vmatprep.subr.mxu0 %v12010_v3  ;;  %3426 = vmatpush2.msra.mxu1 %v12007_v18 }
 0x5ac   :  { %3497 = vmatpush2.msra.mxu0 %v12009_v6  ;;  %3505 = vmatprep.subr.mxu1 %v3150_v11 }
 0x5ad   :  { %3576 = vmatprep.subr.mxu0 %v3152_v19 }
 0x5f4   :  { %v2018_v62 = vpop.f32.mrf.mxu1 }
 0x5f6   :  { %v2020_v20 = vpop.f32.mrf.mxu1 }
 0x5f8   :  { %v2029_v25 = vpop.f32.mrf.mxu1 }
 0x5fa   :  { %v2031_v34 = vpop.f32.mrf.mxu1 }
 0x5fc   :  { %v2131_v37 = vpop.f32.mrf.mxu0 }
 0x5fd   :  { %v2223_v14 = vpop.f32.mrf.mxu1  ;;  %v2132_v59 = vadd.f32 %v2131_v37, %v2018_v62 }
 0x5fe   :  { %v2133_v23 = vpop.f32.mrf.mxu0 }
 0x5ff   :  { %v2225_v26 = vpop.f32.mrf.mxu1  ;;  %v2134_v13 = vadd.f32 %v2133_v23, %v2020_v20  ;;  %v2224_v11 = vadd.f32 %v2223_v14, %v2132_v59 }
 0x601   :  { %v2226_v5 = vadd.f32 %v2225_v26, %v2134_v13 }
 0x602   :  { %v2138_v57 = vpop.f32.mrf.mxu0 }
 0x603   :  { %v2231_v44 = vpop.f32.mrf.mxu1  ;;  %v2139_v18 = vadd.f32 %v2138_v57, %v2029_v25 }
 0x604   :  { %v2140_v28 = vpop.f32.mrf.mxu0 }
 0x605   :  { %v2233_v33 = vpop.f32.mrf.mxu1  ;;  %v2141_v8 = vadd.f32 %v2140_v28, %v2031_v34  ;;  %v2232_v62 = vadd.f32 %v2231_v44, %v2139_v18  ;;  %v3151_v18 = vld [vmem:[%s21386_s8 + $0x1f0] sm:$0xff] }
 0x607   :  { %v2311_v22 = vpop.f32.mrf.mxu0  ;;  %v2410_v24 = vpop.f32.mrf.mxu1  ;;  %v2234_v25 = vadd.f32 %v2233_v33, %v2141_v8 }
 0x608   :  { %v2312_v38 = vadd.f32 %v2311_v22, %v2224_v11  ;;  %v3146_v11 = vld [vmem:[%s21386_s8 + $0x1c8] sm:$0xff] }
 0x609   :  { %v2313_v41 = vpop.f32.mrf.mxu0  ;;  %v2412_v48 = vpop.f32.mrf.mxu1 }
 0x60a   :  { %v2314_v37 = vadd.f32 %v2313_v41, %v2226_v5 }
 0x60c   :  { %v2413_v28 = vadd.f32 %v2412_v48, %v2314_v37  ;;  %v3147_v37 = vld [vmem:[%s21386_s8 + $0x1d0] sm:$0xff] }
 0x60d   :  { %v2320_v49 = vpop.f32.mrf.mxu0  ;;  %v2417_v42 = vpop.f32.mrf.mxu1 }
 0x60e   :  { %v2321_v57 = vadd.f32 %v2320_v49, %v2232_v62  ;;  %v3145_v62 = vld [vmem:[%s21386_s8 + $0x1c0] sm:$0xff] }
 0x60f   :  { %v2322_v7 = vpop.f32.mrf.mxu0  ;;  %v2419_v32 = vpop.f32.mrf.mxu1 }
 0x610   :  { %v2323_v22 = vadd.f32 %v2322_v7, %v2234_v25  ;;  %v2418_v5 = vadd.f32 %v2417_v42, %v2321_v57  ;;  %v3138_v25 = vld [vmem:[%s21386_s8 + $0x188] sm:$0xff]  ;;  %v3140_v57 = vld [vmem:[%s21386_s8 + $0x198] sm:$0xff] }
 0x611   :  { %v2495_v43 = vpop.f32.mrf.mxu0  ;;  %v2590_v51 = vpop.f32.mrf.mxu1 }
 0x613   :  { %v2497_v12 = vpop.f32.mrf.mxu0  ;;  %v2592_v53 = vpop.f32.mrf.mxu1 }
 0x617   :  { %v2502_v55 = vpop.f32.mrf.mxu0  ;;  %v2601_v58 = vpop.f32.mrf.mxu1 }
 0x619   :  { %v15413_v63 = vpop.f32.mrf.mxu0  ;;  %v2603_v0 = vpop.f32.mrf.mxu1 }
 0x61b   :  { %v2703_v9 = vpop.f32.mrf.mxu0  ;;  %v2795_v29 = vpop.f32.mrf.mxu1 }
 0x61c   :  { %v2704_v60 = vadd.f32 %v2703_v9, %v2590_v51  ;;  %v2411_v9 = vadd.f32 %v2410_v24, %v2312_v38  ;;  %v2420_v38 = vadd.f32 %v2419_v32, %v2323_v22  ;;  %v3132_v22 = vld [vmem:[%s21386_s8 + $0x158] sm:$0xff] }
 0x61d   :  { %v2705_v36 = vpop.f32.mrf.mxu0  ;;  %v2797_v50 = vpop.f32.mrf.mxu1 }
 0x61e   :  { %v2706_v2 = vadd.f32 %v2705_v36, %v2592_v53  ;;  %v2796_v19 = vadd.f32 %v2795_v29, %v2704_v60  ;;  %v2505_v49 = vadd.f32 %v15413_v63, %v2420_v38  ;;  %v3149_v63 = vld [vmem:[%s21386_s8 + $0x1e0] sm:$0xff]  ;;  %v3120_v38 = vld [vmem:[%s21386_s8 + $0xf8] sm:$0xff] }
 0x620   :  { %v2710_v27 = vpop.f32.mrf.mxu0  ;;  %v2798_v45 = vadd.f32 %v2797_v50, %v2706_v2 }
 0x621   :  { %v2711_v16 = vadd.f32 %v2710_v27, %v2601_v58 }
 0x622   :  { %v2712_v61 = vpop.f32.mrf.mxu0 }
 0x623   :  { %v2803_v3 = vpop.f32.mrf.mxu1  ;;  %v2713_v46 = vadd.f32 %v2712_v61, %v2603_v0  ;;  %v2496_v0 = vadd.f32 %v2495_v43, %v2411_v9  ;;  %v3139_v9 = vld [vmem:[%s21386_s8 + $0x190] sm:$0xff] }
 0x624   :  { %v2883_v6 = vpop.f32.mrf.mxu0  ;;  %v2804_v23 = vadd.f32 %v2803_v3, %v2711_v16 }
 0x625   :  { %v2805_v35 = vpop.f32.mrf.mxu1  ;;  %v2884_v40 = vadd.f32 %v2883_v6, %v2796_v19  ;;  %v3148_v19 = vld [vmem:[%s21386_s8 + $0x1d8] sm:$0xff] }
 0x626   :  { %v2885_v56 = vpop.f32.mrf.mxu0  ;;  %v2806_v58 = vadd.f32 %v2805_v35, %v2713_v46 }
 0x627   :  { %v2982_v30 = vpop.f32.mrf.mxu1  ;;  %v2886_v51 = vadd.f32 %v2885_v56, %v2798_v45  ;;  %v2498_v56 = vadd.f32 %v2497_v12, %v2413_v28  ;;  %v3130_v28 = vld [vmem:[%s21386_s8 + $0x148] sm:$0xff] }
 0x628   :  { %v2892_v20 = vpop.f32.mrf.mxu0  ;;  %v2983_v29 = vadd.f32 %v2982_v30, %v2884_v40  ;;  %v2503_v40 = vadd.f32 %v2502_v55, %v2418_v5  ;;  %v3127_v5 = vld [vmem:[%s21386_s8 + $0x130] sm:$0xff] }
 0x629   :  { %v2984_v53 = vpop.f32.mrf.mxu1  ;;  %v2893_v26 = vadd.f32 %v2892_v20, %v2804_v23  ;;  %v3142_v20 = vld [vmem:[%s21386_s8 + $0x1a8] sm:$0xff]  ;;  %v3144_v23 = vld [vmem:[%s21386_s8 + $0x1b8] sm:$0xff] }
 0x62a   :  { %v2894_v14 = vpop.f32.mrf.mxu0  ;;  %v2985_v50 = vadd.f32 %v2984_v53, %v2886_v51  ;;  %v3141_v51 = vld [vmem:[%s21386_s8 + $0x1a0] sm:$0xff]  ;;  %v3143_v53 = vld [vmem:[%s21386_s8 + $0x1b0] sm:$0xff] }
 0x62b   :  { %v2989_v34 = vpop.f32.mrf.mxu1  ;;  %v2895_v27 = vadd.f32 %v2894_v14, %v2806_v58  ;;  %v3137_v14 = vld [vmem:[%s21386_s8 + $0x180] sm:$0xff]  ;;  %v3134_v58 = vld [vmem:[%s21386_s8 + $0x168] sm:$0xff] }
 0x62c   :  { %v3067_v36 = vpop.f32.mrf.mxu0  ;;  %v2990_v45 = vadd.f32 %v2989_v34, %v2893_v26  ;;  %v3133_v26 = vld [vmem:[%s21386_s8 + $0x160] sm:$0xff]  ;;  %v3135_v34 = vld [vmem:[%s21386_s8 + $0x170] sm:$0xff] }
 0x62d   :  { %v3068_v44 = vadd.f32 %v3067_v36, %v2983_v29  ;;  %v2991_v41 = vpop.f32.mrf.mxu1  ;;  %v3136_v29 = vld [vmem:[%s21386_s8 + $0x178] sm:$0xff]  ;;  %v3129_v36 = vld [vmem:[%s21386_s8 + $0x140] sm:$0xff] }
 0x62e   :  { %v3069_v16 = vpop.f32.mrf.mxu0  ;;  %v2992_v30 = vadd.f32 %v2991_v41, %v2895_v27  ;;  %v3128_v27 = vld [vmem:[%s21386_s8 + $0x138] sm:$0xff]  ;;  %v3122_v41 = vld [vmem:[%s21386_s8 + $0x108] sm:$0xff] }
 0x62f   :  { %v15415_v8 = vmax.f32 %v2496_v0, %v3068_v44  ;;  %v3070_v33 = vadd.f32 %v3069_v16, %v2985_v50  ;;  %v3131_v0 = vld [vmem:[%s21386_s8 + $0x150] sm:$0xff]  ;;  %v3126_v50 = vld [vmem:[%s21386_s8 + $0x128] sm:$0xff]  ;;  %v3125_v44 = vld [vmem:[%s21386_s8 + $0x120] sm:$0xff] }
 0x630   :  { %v3074_v46 = vpop.f32.mrf.mxu0  ;;  %v3124_v16 = vld [vmem:[%s21386_s8 + $0x118] sm:$0xff] }
 0x631   :  { %3083 = vst [vmem:[#allocation4 + $0x10] sm:$0xff] %v15415_v8  ;;  %v3080_v35 = vmax.f32 %v2498_v56, %v3070_v33  ;;  %v3075_v24 = vadd.f32 %v3074_v46, %v2990_v45  ;;  %v3121_v56 = vld [vmem:[%s21386_s8 + $0x100] sm:$0xff]  ;;  %v3123_v45 = vld [vmem:[%s21386_s8 + $0x110] sm:$0xff]  ;;  %v3118_v33 = vld [vmem:[%s21386_s8 + $0xe8] sm:$0xff] }
 0x632   :  { %v3076_v48 = vpop.f32.mrf.mxu0  ;;  %v3117_v46 = vld [vmem:[%s21386_s8 + $0xe0] sm:$0xff] }
 0x633   :  { %3084 = vst [vmem:[#allocation4] sm:$0xff] %v3080_v35  ;;  %v3081_v42 = vmax.f32 %v2503_v40, %v3075_v24  ;;  %v3077_v7 = vadd.f32 %v3076_v48, %v2992_v30  ;;  %v3119_v40 = vld [vmem:[%s21386_s8 + $0xf0] sm:$0xff]  ;;  %v3114_v30 = vld [vmem:[%s21386_s8 + $0xc8] sm:$0xff]  ;;  %v3113_v24 = vld [vmem:[%s21386_s8 + $0xc0] sm:$0xff] }
 0x634   :  { %v3115_v48 = vld [vmem:[%s21386_s8 + $0xd0] sm:$0xff] }
 0x635   :  { %3085 = vst [vmem:[#allocation4 + $0x18] sm:$0xf] %v3081_v42  ;;  %v3082_v43 = vmax.f32 %v2505_v49, %v3077_v7  ;;  %v3110_v49 = vld [vmem:[%s21386_s8 + $0xa8] sm:$0xff]  ;;  %v3112_v42 = vld [vmem:[%s21386_s8 + $0xb8] sm:$0xff]  ;;  %v3109_v7 = vld [vmem:[%s21386_s8 + $0xa0] sm:$0xff] }
 0x637   :  { %3086 = vst [vmem:[#allocation4 + $0x8] sm:$0xf] %v3082_v43  ;;  %v3111_v43 = vld [vmem:[%s21386_s8 + $0xb0] sm:$0xff] }
 0x638   :  { %v3217_v60 = vld [vmem:[#allocation4 + $0x10] sm:$0xfe] }
 0x639   :  { %v3355_v2 = vrot.slane %v3217_v60, 1  ;;  %v3105_v60 = vld [vmem:[%s21386_s8 + $0x80] sm:$0xff] }
 0x63a   :  { %v3218_v12 = vld [vmem:[#allocation4] sm:$0xfe] }
 0x63b   :  { %v3358_v55 = vrot.slane %v3218_v12, 1  ;;  %v3106_v12 = vld [vmem:[%s21386_s8 + $0x88] sm:$0xff] }
 0x63c   :  { %v3219_v59 = vld [vmem:[#allocation4 + $0x18] sm:$0x1] }
 0x63d   :  { %v3356_v13 = vrot.slane %v3219_v59, 1  ;;  %v3108_v59 = vld [vmem:[%s21386_s8 + $0x98] sm:$0xff] }
 0x63e   :  { %v3220_v32 = vld [vmem:[#allocation4 + $0x8] sm:$0x1] }
 0x63f   :  { %v3359_v61 = vrot.slane %v3220_v32, 1  ;;  %v3357_v6 = vsel %vm3354_vm11, %v3355_v2, %v3356_v13  ;;  %v3107_v32 = vld [vmem:[%s21386_s8 + $0x90] sm:$0xff]  ;;  %v3102_v13 = vld [vmem:[%s21386_s8 + $0x68] sm:$0xff] }
 0x640   :  { %v3103_v2 = vld [vmem:[%s21386_s8 + $0x70] sm:$0xff] }
 0x641   :  { %v3360_v3 = vsel %vm3354_vm11, %v3358_v55, %v3359_v61  ;;  %v3104_v55 = vld [vmem:[%s21386_s8 + $0x78] sm:$0xff]  ;;  %v3101_v61 = vld [vmem:[%s21386_s8 + $0x60] sm:$0xff] }
 0x642   :  { %3427 = vmatprep.mubr.f32.mxu1 %v3360_v3  ;;  %3498 = vmatprep.mubr.f32.mxu0 %v3360_v3  ;;  %v3098_v3 = vld [vmem:[%s21386_s8 + $0x48] sm:$0xff] }
 0x643   :  { %3428 = vmatmul.mubr.f32.vlgmr.msra.gmra.mxu1 %v3357_v6  ;;  %3499 = vmatmul.mubr.f32.vlgmr.msra.gmra.mxu0 %v3357_v6  ;;  %v3099_v6 = vld [vmem:[%s21386_s8 + $0x50] sm:$0xff] }
 0x644   :  { %3506 = vmatpush1.msra.mxu1 %v3149_v63  ;;  %3577 = vmatpush1.msra.mxu0 %v3151_v18  ;;  %v3100_v63 = vld [vmem:[%s21386_s8 + $0x58] sm:$0xff]  ;;  %v3097_v18 = vld [vmem:[%s21386_s8 + $0x40] sm:$0xff] }
 0x645   :  { %3507 = vmatprep.subr.mxu1 %v3146_v11  ;;  %3569 = vmatprep.mubr.f32.mxu1 %v3080_v35  ;;  %v3094_v11 = vld [vmem:[%s21386_s8 + $0x28] sm:$0xff] }
 0x646   :  { %3578 = vmatprep.subr.mxu0 %v3148_v19  ;;  %3640 = vmatprep.mubr.f32.mxu0 %v3080_v35  ;;  %v3116_v35 = vld [vmem:[%s21386_s8 + $0xd8] sm:$0xff] }
 0x647   :  { %3508 = vmatpush1.msra.mxu1 %v3145_v62  ;;  %3579 = vmatpush1.msra.mxu0 %v3147_v37  ;;  %v3096_v19 = vld [vmem:[%s21386_s8 + $0x38] sm:$0xff]  ;;  %v3093_v62 = vld [vmem:[%s21386_s8 + $0x20] sm:$0xff]  ;;  %v3095_v37 = vld [vmem:[%s21386_s8 + $0x30] sm:$0xff] }
 0x648   :  { %3509 = vmatprep.subr.mxu1 %v3142_v20  ;;  %3580 = vmatprep.subr.mxu0 %v3144_v23  ;;  %v3090_v20 = vld [vmem:[%s21386_s8 + $0x8] sm:$0xff]  ;;  %v3092_v23 = vld [vmem:[%s21386_s8 + $0x18] sm:$0xff] }
 0x649   :  { %3510 = vmatpush1.msra.mxu1 %v3141_v51  ;;  %3581 = vmatpush1.msra.mxu0 %v3143_v53  ;;  %v3089_v51 = vld [vmem:[%s21386_s8] sm:$0xff]  ;;  %v3091_v53 = vld [vmem:[%s21386_s8 + $0x10] sm:$0xff] }
 0x64a   :  { %3511 = vmatprep.subr.mxu1 %v3138_v25  ;;  %3582 = vmatprep.subr.mxu0 %v3140_v57  ;;  %v3214_v25 = vld [vmem:[%s21386_s8 + $0x3e8] sm:$0xff]  ;;  %v3216_v57 = vld [vmem:[%s21386_s8 + $0x3f8] sm:$0xff] }
 0x64b   :  { %3512 = vmatpush1.msra.mxu1 %v3137_v14  ;;  %3583 = vmatpush1.msra.mxu0 %v3139_v9  ;;  %v3213_v14 = vld [vmem:[%s21386_s8 + $0x3e0] sm:$0xff]  ;;  %v3215_v9 = vld [vmem:[%s21386_s8 + $0x3f0] sm:$0xff] }
 0x64c   :  { %3513 = vmatprep.subr.mxu1 %v3134_v58  ;;  %3584 = vmatprep.subr.mxu0 %v3136_v29  ;;  %v3210_v58 = vld [vmem:[%s21386_s8 + $0x3c8] sm:$0xff]  ;;  %v3212_v29 = vld [vmem:[%s21386_s8 + $0x3d8] sm:$0xff] }
 0x64d   :  { %3514 = vmatpush1.msra.mxu1 %v3133_v26  ;;  %3585 = vmatpush1.msra.mxu0 %v3135_v34  ;;  %v3209_v26 = vld [vmem:[%s21386_s8 + $0x3c0] sm:$0xff]  ;;  %v3211_v34 = vld [vmem:[%s21386_s8 + $0x3d0] sm:$0xff] }
 0x64e   :  { %3515 = vmatprep.subr.mxu1 %v3130_v28  ;;  %3586 = vmatprep.subr.mxu0 %v3132_v22  ;;  %v3206_v28 = vld [vmem:[%s21386_s8 + $0x3a8] sm:$0xff]  ;;  %v3208_v22 = vld [vmem:[%s21386_s8 + $0x3b8] sm:$0xff] }
 0x64f   :  { %3516 = vmatpush1.msra.mxu1 %v3129_v36  ;;  %3587 = vmatpush1.msra.mxu0 %v3131_v0  ;;  %v3205_v36 = vld [vmem:[%s21386_s8 + $0x3a0] sm:$0xff]  ;;  %v3207_v0 = vld [vmem:[%s21386_s8 + $0x3b0] sm:$0xff] }
 0x650   :  { %3517 = vmatprep.subr.mxu1 %v3126_v50  ;;  %3588 = vmatprep.subr.mxu0 %v3128_v27  ;;  %v3202_v50 = vld [vmem:[%s21386_s8 + $0x388] sm:$0xff]  ;;  %v3204_v27 = vld [vmem:[%s21386_s8 + $0x398] sm:$0xff] }
 0x651   :  { %3518 = vmatpush1.msra.mxu1 %v3125_v44  ;;  %3589 = vmatpush1.msra.mxu0 %v3127_v5  ;;  %v3201_v44 = vld [vmem:[%s21386_s8 + $0x380] sm:$0xff]  ;;  %v3203_v5 = vld [vmem:[%s21386_s8 + $0x390] sm:$0xff] }
 0x652   :  { %3519 = vmatprep.subr.mxu1 %v3122_v41  ;;  %3590 = vmatprep.subr.mxu0 %v3124_v16  ;;  %v3198_v41 = vld [vmem:[%s21386_s8 + $0x368] sm:$0xff]  ;;  %v3200_v16 = vld [vmem:[%s21386_s8 + $0x378] sm:$0xff] }
 0x653   :  { %3520 = vmatpush1.msra.mxu1 %v3121_v56  ;;  %3591 = vmatpush1.msra.mxu0 %v3123_v45  ;;  %v3197_v56 = vld [vmem:[%s21386_s8 + $0x360] sm:$0xff]  ;;  %v3199_v45 = vld [vmem:[%s21386_s8 + $0x370] sm:$0xff] }
 0x654   :  { %3521 = vmatprep.subr.mxu1 %v3118_v33  ;;  %3592 = vmatprep.subr.mxu0 %v3120_v38  ;;  %v3194_v33 = vld [vmem:[%s21386_s8 + $0x348] sm:$0xff]  ;;  %v3196_v38 = vld [vmem:[%s21386_s8 + $0x358] sm:$0xff] }
 0x655   :  { %3522 = vmatpush1.msra.mxu1 %v3117_v46  ;;  %3593 = vmatpush1.msra.mxu0 %v3119_v40  ;;  %v3193_v46 = vld [vmem:[%s21386_s8 + $0x340] sm:$0xff]  ;;  %v3195_v40 = vld [vmem:[%s21386_s8 + $0x350] sm:$0xff] }
 0x656   :  { %3523 = vmatprep.subr.mxu1 %v3114_v30  ;;  %3594 = vmatprep.subr.mxu0 %v3116_v35  ;;  %v3190_v30 = vld [vmem:[%s21386_s8 + $0x328] sm:$0xff]  ;;  %v3192_v35 = vld [vmem:[%s21386_s8 + $0x338] sm:$0xff] }
 0x657   :  { %3524 = vmatpush1.msra.mxu1 %v3113_v24  ;;  %3595 = vmatpush1.msra.mxu0 %v3115_v48  ;;  %v3189_v24 = vld [vmem:[%s21386_s8 + $0x320] sm:$0xff]  ;;  %v3191_v48 = vld [vmem:[%s21386_s8 + $0x330] sm:$0xff] }
 0x658   :  { %3525 = vmatprep.subr.mxu1 %v3110_v49  ;;  %3596 = vmatprep.subr.mxu0 %v3112_v42  ;;  %v3186_v49 = vld [vmem:[%s21386_s8 + $0x308] sm:$0xff]  ;;  %v3188_v42 = vld [vmem:[%s21386_s8 + $0x318] sm:$0xff] }
 0x659   :  { %3526 = vmatpush1.msra.mxu1 %v3109_v7  ;;  %3597 = vmatpush1.msra.mxu0 %v3111_v43  ;;  %v3185_v7 = vld [vmem:[%s21386_s8 + $0x300] sm:$0xff]  ;;  %v3187_v43 = vld [vmem:[%s21386_s8 + $0x310] sm:$0xff] }
 0x65a   :  { %3527 = vmatprep.subr.mxu1 %v3106_v12  ;;  %3598 = vmatprep.subr.mxu0 %v3108_v59  ;;  %v3182_v12 = vld [vmem:[%s21386_s8 + $0x2e8] sm:$0xff]  ;;  %v3184_v59 = vld [vmem:[%s21386_s8 + $0x2f8] sm:$0xff] }
 0x65b   :  { %3528 = vmatpush1.msra.mxu1 %v3105_v60  ;;  %3599 = vmatpush1.msra.mxu0 %v3107_v32  ;;  %v3181_v60 = vld [vmem:[%s21386_s8 + $0x2e0] sm:$0xff]  ;;  %v3183_v32 = vld [vmem:[%s21386_s8 + $0x2f0] sm:$0xff] }
 0x65c   :  { %3529 = vmatprep.subr.mxu1 %v3102_v13  ;;  %3600 = vmatprep.subr.mxu0 %v3104_v55  ;;  %v3178_v13 = vld [vmem:[%s21386_s8 + $0x2c8] sm:$0xff]  ;;  %v3180_v55 = vld [vmem:[%s21386_s8 + $0x2d8] sm:$0xff] }
 0x65d   :  { %3530 = vmatpush1.msra.mxu1 %v3101_v61  ;;  %3601 = vmatpush1.msra.mxu0 %v3103_v2  ;;  %v3177_v61 = vld [vmem:[%s21386_s8 + $0x2c0] sm:$0xff]  ;;  %v3179_v2 = vld [vmem:[%s21386_s8 + $0x2d0] sm:$0xff] }
 0x65e   :  { %3531 = vmatprep.subr.mxu1 %v3098_v3  ;;  %3602 = vmatprep.subr.mxu0 %v3100_v63  ;;  %v3174_v3 = vld [vmem:[%s21386_s8 + $0x2a8] sm:$0xff]  ;;  %v3176_v63 = vld [vmem:[%s21386_s8 + $0x2b8] sm:$0xff] }
 0x65f   :  { %3532 = vmatpush1.msra.mxu1 %v3097_v18  ;;  %3603 = vmatpush1.msra.mxu0 %v3099_v6  ;;  %v3173_v18 = vld [vmem:[%s21386_s8 + $0x2a0] sm:$0xff]  ;;  %v3175_v6 = vld [vmem:[%s21386_s8 + $0x2b0] sm:$0xff] }
 0x660   :  { %3533 = vmatprep.subr.mxu1 %v3094_v11  ;;  %3604 = vmatprep.subr.mxu0 %v3096_v19  ;;  %v3170_v11 = vld [vmem:[%s21386_s8 + $0x288] sm:$0xff]  ;;  %v3172_v19 = vld [vmem:[%s21386_s8 + $0x298] sm:$0xff] }
 0x661   :  { %3534 = vmatpush1.msra.mxu1 %v3093_v62  ;;  %3605 = vmatpush1.msra.mxu0 %v3095_v37  ;;  %v3169_v62 = vld [vmem:[%s21386_s8 + $0x280] sm:$0xff]  ;;  %v3171_v37 = vld [vmem:[%s21386_s8 + $0x290] sm:$0xff] }
 0x662   :  { %3535 = vmatprep.subr.mxu1 %v3090_v20  ;;  %3606 = vmatprep.subr.mxu0 %v3092_v23  ;;  %v3166_v20 = vld [vmem:[%s21386_s8 + $0x268] sm:$0xff]  ;;  %v3168_v23 = vld [vmem:[%s21386_s8 + $0x278] sm:$0xff] }
 0x663   :  { %3536 = vmatpush1.msra.mxu1 %v3089_v51  ;;  %3607 = vmatpush1.msra.mxu0 %v3091_v53  ;;  %v3165_v51 = vld [vmem:[%s21386_s8 + $0x260] sm:$0xff]  ;;  %v3167_v53 = vld [vmem:[%s21386_s8 + $0x270] sm:$0xff] }
 0x664   :  { %3537 = vmatprep.subr.mxu1 %v3214_v25  ;;  %3608 = vmatprep.subr.mxu0 %v3216_v57  ;;  %v3162_v25 = vld [vmem:[%s21386_s8 + $0x248] sm:$0xff]  ;;  %v3164_v57 = vld [vmem:[%s21386_s8 + $0x258] sm:$0xff] }
 0x665   :  { %3538 = vmatpush2.msra.mxu1 %v3213_v14  ;;  %3609 = vmatpush2.msra.mxu0 %v3215_v9  ;;  %v3161_v14 = vld [vmem:[%s21386_s8 + $0x240] sm:$0xff]  ;;  %v3163_v9 = vld [vmem:[%s21386_s8 + $0x250] sm:$0xff] }
 0x666   :  { %3539 = vmatprep.subr.mxu1 %v3210_v58  ;;  %3610 = vmatprep.subr.mxu0 %v3212_v29  ;;  %v3158_v58 = vld [vmem:[%s21386_s8 + $0x228] sm:$0xff]  ;;  %v3160_v29 = vld [vmem:[%s21386_s8 + $0x238] sm:$0xff] }
 0x667   :  { %3540 = vmatpush2.msra.mxu1 %v3209_v26  ;;  %3611 = vmatpush2.msra.mxu0 %v3211_v34  ;;  %v3157_v26 = vld [vmem:[%s21386_s8 + $0x220] sm:$0xff]  ;;  %v3159_v34 = vld [vmem:[%s21386_s8 + $0x230] sm:$0xff] }
 0x668   :  { %3541 = vmatprep.subr.mxu1 %v3206_v28  ;;  %3612 = vmatprep.subr.mxu0 %v3208_v22  ;;  %v3650_v28 = vld [vmem:[#allocation4 + $0x8] sm:$0x3] }
 0x669   :  { %3542 = vmatpush2.msra.mxu1 %v3205_v36  ;;  %3613 = vmatpush2.msra.mxu0 %v3207_v0  ;;  %v3154_v22 = vld [vmem:[%s21386_s8 + $0x208] sm:$0xff]  ;;  %v3156_v36 = vld [vmem:[%s21386_s8 + $0x218] sm:$0xff]  ;;  %v3153_v0 = vld [vmem:[%s21386_s8 + $0x200] sm:$0xff] }
 0x66a   :  { %3543 = vmatprep.subr.mxu1 %v3202_v50  ;;  %3614 = vmatprep.subr.mxu0 %v3204_v27  ;;  %v3155_v50 = vld [vmem:[%s21386_s8 + $0x210] sm:$0xff]  ;;  %v3648_v27 = vld [vmem:[#allocation4] sm:$0xfc] }
 0x66b   :  { %3544 = vmatpush2.msra.mxu1 %v3201_v44  ;;  %3615 = vmatpush2.msra.mxu0 %v3203_v5  ;;  %v3789_v44 = vrot.slane %v3650_v28, 2  ;;  %v12132_v5 = vld [vmem:[%s21386_s8 + $0x9e8] sm:$0xff] }
 0x66c   :  { %3545 = vmatprep.subr.mxu1 %v3198_v41  ;;  %3616 = vmatprep.subr.mxu0 %v3200_v16  ;;  %v12134_v41 = vld [vmem:[%s21386_s8 + $0x9f8] sm:$0xff]  ;;  %v12131_v16 = vld [vmem:[%s21386_s8 + $0x9e0] sm:$0xff]  ;;  %v12088_v28 = vld [vmem:[%s21386_s8 + $0x888] sm:$0xff] }
 0x66d   :  { %3546 = vmatpush2.msra.mxu1 %v3197_v56  ;;  %3617 = vmatpush2.msra.mxu0 %v3199_v45  ;;  %v3788_v56 = vrot.slane %v3648_v27, 2  ;;  %v12133_v45 = vld [vmem:[%s21386_s8 + $0x9f0] sm:$0xff]  ;;  %v12086_v27 = vld [vmem:[%s21386_s8 + $0x878] sm:$0xff] }
 0x66e   :  { %3547 = vmatprep.subr.mxu1 %v3194_v33  ;;  %3618 = vmatprep.subr.mxu0 %v3196_v38  ;;  %v12128_v38 = vld [vmem:[%s21386_s8 + $0x9c8] sm:$0xff] }
 0x66f   :  { %3548 = vmatpush2.msra.mxu1 %v3193_v46  ;;  %3619 = vmatpush2.msra.mxu0 %v3195_v40  ;;  %v3790_v33 = vsel %vm3784_vm12, %v3788_v56, %v3789_v44  ;;  %v12130_v46 = vld [vmem:[%s21386_s8 + $0x9d8] sm:$0xff]  ;;  %v12129_v40 = vld [vmem:[%s21386_s8 + $0x9d0] sm:$0xff]  ;;  %v12083_v44 = vld [vmem:[%s21386_s8 + $0x860] sm:$0xff] }
 0x670   :  { %3549 = vmatprep.subr.mxu1 %v3190_v30  ;;  %3620 = vmatprep.subr.mxu0 %v3192_v35  ;;  %v12124_v30 = vld [vmem:[%s21386_s8 + $0x9a8] sm:$0xff]  ;;  %v12126_v35 = vld [vmem:[%s21386_s8 + $0x9b8] sm:$0xff]  ;;  %v12079_v56 = vld [vmem:[%s21386_s8 + $0x840] sm:$0xff] }
 0x671   :  { %3550 = vmatpush2.msra.mxu1 %v3189_v24  ;;  %3621 = vmatpush2.msra.mxu0 %v3191_v48  ;;  %v12123_v24 = vld [vmem:[%s21386_s8 + $0x9a0] sm:$0xff]  ;;  %v12125_v48 = vld [vmem:[%s21386_s8 + $0x9b0] sm:$0xff] }
 0x672   :  { %3551 = vmatprep.subr.mxu1 %v3186_v49  ;;  %3622 = vmatprep.subr.mxu0 %v3188_v42  ;;  %v12120_v49 = vld [vmem:[%s21386_s8 + $0x988] sm:$0xff]  ;;  %v12122_v42 = vld [vmem:[%s21386_s8 + $0x998] sm:$0xff] }
 0x673   :  { %3552 = vmatpush2.msra.mxu1 %v3185_v7  ;;  %3623 = vmatpush2.msra.mxu0 %v3187_v43  ;;  %v12119_v7 = vld [vmem:[%s21386_s8 + $0x980] sm:$0xff]  ;;  %v12121_v43 = vld [vmem:[%s21386_s8 + $0x990] sm:$0xff] }
 0x674   :  { %3553 = vmatprep.subr.mxu1 %v3182_v12  ;;  %3624 = vmatprep.subr.mxu0 %v3184_v59  ;;  %v12116_v12 = vld [vmem:[%s21386_s8 + $0x968] sm:$0xff]  ;;  %v12118_v59 = vld [vmem:[%s21386_s8 + $0x978] sm:$0xff] }
 0x675   :  { %3554 = vmatpush2.msra.mxu1 %v3181_v60  ;;  %3625 = vmatpush2.msra.mxu0 %v3183_v32  ;;  %v12115_v60 = vld [vmem:[%s21386_s8 + $0x960] sm:$0xff]  ;;  %v12117_v32 = vld [vmem:[%s21386_s8 + $0x970] sm:$0xff] }
 0x676   :  { %3555 = vmatprep.subr.mxu1 %v3178_v13  ;;  %3626 = vmatprep.subr.mxu0 %v3180_v55  ;;  %v12112_v13 = vld [vmem:[%s21386_s8 + $0x948] sm:$0xff]  ;;  %v12114_v55 = vld [vmem:[%s21386_s8 + $0x958] sm:$0xff] }
 0x677   :  { %3556 = vmatpush2.msra.mxu1 %v3177_v61  ;;  %3627 = vmatpush2.msra.mxu0 %v3179_v2  ;;  %v12111_v61 = vld [vmem:[%s21386_s8 + $0x940] sm:$0xff]  ;;  %v12113_v2 = vld [vmem:[%s21386_s8 + $0x950] sm:$0xff] }
 0x678   :  { %3557 = vmatprep.subr.mxu1 %v3174_v3  ;;  %3628 = vmatprep.subr.mxu0 %v3176_v63  ;;  %v12108_v3 = vld [vmem:[%s21386_s8 + $0x928] sm:$0xff]  ;;  %v12110_v63 = vld [vmem:[%s21386_s8 + $0x938] sm:$0xff] }
 0x679   :  { %3558 = vmatpush2.msra.mxu1 %v3173_v18  ;;  %3629 = vmatpush2.msra.mxu0 %v3175_v6  ;;  %v12107_v18 = vld [vmem:[%s21386_s8 + $0x920] sm:$0xff]  ;;  %v12109_v6 = vld [vmem:[%s21386_s8 + $0x930] sm:$0xff] }
 0x67a   :  { %3559 = vmatprep.subr.mxu1 %v3170_v11  ;;  %3630 = vmatprep.subr.mxu0 %v3172_v19  ;;  %v12104_v11 = vld [vmem:[%s21386_s8 + $0x908] sm:$0xff]  ;;  %v12106_v19 = vld [vmem:[%s21386_s8 + $0x918] sm:$0xff] }
 0x67b   :  { %3560 = vmatpush2.msra.mxu1 %v3169_v62  ;;  %3631 = vmatpush2.msra.mxu0 %v3171_v37  ;;  %v12103_v62 = vld [vmem:[%s21386_s8 + $0x900] sm:$0xff]  ;;  %v12105_v37 = vld [vmem:[%s21386_s8 + $0x910] sm:$0xff] }
 0x67c   :  { %3561 = vmatprep.subr.mxu1 %v3166_v20  ;;  %3632 = vmatprep.subr.mxu0 %v3168_v23  ;;  %v12100_v20 = vld [vmem:[%s21386_s8 + $0x8e8] sm:$0xff]  ;;  %v12102_v23 = vld [vmem:[%s21386_s8 + $0x8f8] sm:$0xff] }
 0x67d   :  { %3562 = vmatpush2.msra.mxu1 %v3165_v51  ;;  %3633 = vmatpush2.msra.mxu0 %v3167_v53  ;;  %v12099_v51 = vld [vmem:[%s21386_s8 + $0x8e0] sm:$0xff]  ;;  %v12101_v53 = vld [vmem:[%s21386_s8 + $0x8f0] sm:$0xff] }
 0x67e   :  { %3563 = vmatprep.subr.mxu1 %v3162_v25  ;;  %3634 = vmatprep.subr.mxu0 %v3164_v57  ;;  %v12096_v25 = vld [vmem:[%s21386_s8 + $0x8c8] sm:$0xff]  ;;  %v12098_v57 = vld [vmem:[%s21386_s8 + $0x8d8] sm:$0xff] }
 0x67f   :  { %3564 = vmatpush2.msra.mxu1 %v3161_v14  ;;  %3635 = vmatpush2.msra.mxu0 %v3163_v9  ;;  %v12095_v14 = vld [vmem:[%s21386_s8 + $0x8c0] sm:$0xff]  ;;  %v12097_v9 = vld [vmem:[%s21386_s8 + $0x8d0] sm:$0xff] }
 0x680   :  { %3565 = vmatprep.subr.mxu1 %v3158_v58  ;;  %3636 = vmatprep.subr.mxu0 %v3160_v29  ;;  %v12092_v58 = vld [vmem:[%s21386_s8 + $0x8a8] sm:$0xff]  ;;  %v12094_v29 = vld [vmem:[%s21386_s8 + $0x8b8] sm:$0xff] }
 0x681   :  { %3566 = vmatpush2.msra.mxu1 %v3157_v26  ;;  %3637 = vmatpush2.msra.mxu0 %v3159_v34  ;;  %v12091_v26 = vld [vmem:[%s21386_s8 + $0x8a0] sm:$0xff]  ;;  %v12093_v34 = vld [vmem:[%s21386_s8 + $0x8b0] sm:$0xff] }
 0x682   :  { %3567 = vmatprep.subr.mxu1 %v3154_v22  ;;  %3638 = vmatprep.subr.mxu0 %v3156_v36  ;;  %v12090_v22 = vld [vmem:[%s21386_s8 + $0x898] sm:$0xff]  ;;  %v12087_v36 = vld [vmem:[%s21386_s8 + $0x880] sm:$0xff] }
 0x683   :  { %3568 = vmatpush2.msra.mxu1 %v3153_v0  ;;  %3639 = vmatpush2.msra.mxu0 %v3155_v50  ;;  %v12089_v0 = vld [vmem:[%s21386_s8 + $0x890] sm:$0xff]  ;;  %v12084_v50 = vld [vmem:[%s21386_s8 + $0x868] sm:$0xff] }
 0x684   :  { %3570 = vmatmul.mubr.f32.vlgmr.msra.gmra.mxu1 %v15415_v8  ;;  %3641 = vmatmul.mubr.f32.vlgmr.msra.gmra.mxu0 %v15415_v8  ;;  %v12127_v8 = vld [vmem:[%s21386_s8 + $0x9c0] sm:$0xff] }
 0x685   :  { %3793 = vmatprep.subr.mxu1 %v12132_v5  ;;  %3864 = vmatprep.subr.mxu0 %v12134_v41  ;;  %v12085_v5 = vld [vmem:[%s21386_s8 + $0x870] sm:$0xff]  ;;  %v12080_v41 = vld [vmem:[%s21386_s8 + $0x848] sm:$0xff] }
 0x686   :  { %3794 = vmatpush1.msra.mxu1 %v12131_v16  ;;  %3857 = vmatprep.mubr.f32.mxu1 %v3790_v33  ;;  %v12082_v16 = vld [vmem:[%s21386_s8 + $0x858] sm:$0xff] }
 0x687   :  { %3865 = vmatpush1.msra.mxu0 %v12133_v45  ;;  %3928 = vmatprep.mubr.f32.mxu0 %v3790_v33  ;;  %v12081_v45 = vld [vmem:[%s21386_s8 + $0x850] sm:$0xff]  ;;  %v12076_v33 = vld [vmem:[%s21386_s8 + $0x828] sm:$0xff] }
 0x688   :  { %3795 = vmatprep.subr.mxu1 %v12128_v38  ;;  %3866 = vmatprep.subr.mxu0 %v12130_v46  ;;  %v12078_v38 = vld [vmem:[%s21386_s8 + $0x838] sm:$0xff]  ;;  %v12075_v46 = vld [vmem:[%s21386_s8 + $0x820] sm:$0xff] }
 0x689   :  { %3796 = vmatpush1.msra.mxu1 %v12127_v8  ;;  %3867 = vmatpush1.msra.mxu0 %v12129_v40  ;;  %v12077_v8 = vld [vmem:[%s21386_s8 + $0x830] sm:$0xff]  ;;  %v12072_v40 = vld [vmem:[%s21386_s8 + $0x808] sm:$0xff] }
 0x68a   :  { %3797 = vmatprep.subr.mxu1 %v12124_v30  ;;  %3868 = vmatprep.subr.mxu0 %v12126_v35  ;;  %v12074_v30 = vld [vmem:[%s21386_s8 + $0x818] sm:$0xff]  ;;  %v12071_v35 = vld [vmem:[%s21386_s8 + $0x800] sm:$0xff] }
 0x68b   :  { %3798 = vmatpush1.msra.mxu1 %v12123_v24  ;;  %3869 = vmatpush1.msra.mxu0 %v12125_v48  ;;  %v12073_v24 = vld [vmem:[%s21386_s8 + $0x810] sm:$0xff]  ;;  %v12196_v48 = vld [vmem:[%s21386_s8 + $0xbe8] sm:$0xff] }
 0x68c   :  { %3799 = vmatprep.subr.mxu1 %v12120_v49  ;;  %3870 = vmatprep.subr.mxu0 %v12122_v42  ;;  %v12198_v49 = vld [vmem:[%s21386_s8 + $0xbf8] sm:$0xff]  ;;  %v12195_v42 = vld [vmem:[%s21386_s8 + $0xbe0] sm:$0xff] }
 0x68d   :  { %3800 = vmatpush1.msra.mxu1 %v12119_v7  ;;  %3871 = vmatpush1.msra.mxu0 %v12121_v43  ;;  %v12197_v7 = vld [vmem:[%s21386_s8 + $0xbf0] sm:$0xff]  ;;  %v12192_v43 = vld [vmem:[%s21386_s8 + $0xbc8] sm:$0xff] }
 0x68e   :  { %3801 = vmatprep.subr.mxu1 %v12116_v12  ;;  %3872 = vmatprep.subr.mxu0 %v12118_v59  ;;  %v12194_v12 = vld [vmem:[%s21386_s8 + $0xbd8] sm:$0xff]  ;;  %v12191_v59 = vld [vmem:[%s21386_s8 + $0xbc0] sm:$0xff] }
 0x68f   :  { %3802 = vmatpush1.msra.mxu1 %v12115_v60  ;;  %3873 = vmatpush1.msra.mxu0 %v12117_v32  ;;  %v12193_v60 = vld [vmem:[%s21386_s8 + $0xbd0] sm:$0xff]  ;;  %v12188_v32 = vld [vmem:[%s21386_s8 + $0xba8] sm:$0xff] }
 0x690   :  { %3803 = vmatprep.subr.mxu1 %v12112_v13  ;;  %3874 = vmatprep.subr.mxu0 %v12114_v55  ;;  %v12190_v13 = vld [vmem:[%s21386_s8 + $0xbb8] sm:$0xff]  ;;  %v12187_v55 = vld [vmem:[%s21386_s8 + $0xba0] sm:$0xff] }
 0x691   :  { %3804 = vmatpush1.msra.mxu1 %v12111_v61  ;;  %3875 = vmatpush1.msra.mxu0 %v12113_v2  ;;  %v12189_v61 = vld [vmem:[%s21386_s8 + $0xbb0] sm:$0xff]  ;;  %v12184_v2 = vld [vmem:[%s21386_s8 + $0xb88] sm:$0xff] }
 0x692   :  { %3805 = vmatprep.subr.mxu1 %v12108_v3  ;;  %3876 = vmatprep.subr.mxu0 %v12110_v63  ;;  %v12186_v3 = vld [vmem:[%s21386_s8 + $0xb98] sm:$0xff]  ;;  %v12183_v63 = vld [vmem:[%s21386_s8 + $0xb80] sm:$0xff] }
 0x693   :  { %3806 = vmatpush1.msra.mxu1 %v12107_v18  ;;  %3877 = vmatpush1.msra.mxu0 %v12109_v6  ;;  %v12185_v18 = vld [vmem:[%s21386_s8 + $0xb90] sm:$0xff]  ;;  %v12180_v6 = vld [vmem:[%s21386_s8 + $0xb68] sm:$0xff] }
 0x694   :  { %3807 = vmatprep.subr.mxu1 %v12104_v11  ;;  %3878 = vmatprep.subr.mxu0 %v12106_v19  ;;  %v12182_v11 = vld [vmem:[%s21386_s8 + $0xb78] sm:$0xff]  ;;  %v12179_v19 = vld [vmem:[%s21386_s8 + $0xb60] sm:$0xff] }
 0x695   :  { %3808 = vmatpush1.msra.mxu1 %v12103_v62  ;;  %3879 = vmatpush1.msra.mxu0 %v12105_v37  ;;  %v12181_v62 = vld [vmem:[%s21386_s8 + $0xb70] sm:$0xff]  ;;  %v12176_v37 = vld [vmem:[%s21386_s8 + $0xb48] sm:$0xff] }
 0x696   :  { %3809 = vmatprep.subr.mxu1 %v12100_v20  ;;  %3880 = vmatprep.subr.mxu0 %v12102_v23  ;;  %v12178_v20 = vld [vmem:[%s21386_s8 + $0xb58] sm:$0xff]  ;;  %v12175_v23 = vld [vmem:[%s21386_s8 + $0xb40] sm:$0xff] }
 0x697   :  { %3810 = vmatpush1.msra.mxu1 %v12099_v51  ;;  %3881 = vmatpush1.msra.mxu0 %v12101_v53  ;;  %v12177_v51 = vld [vmem:[%s21386_s8 + $0xb50] sm:$0xff]  ;;  %v12172_v53 = vld [vmem:[%s21386_s8 + $0xb28] sm:$0xff] }
 0x698   :  { %3811 = vmatprep.subr.mxu1 %v12096_v25  ;;  %3882 = vmatprep.subr.mxu0 %v12098_v57  ;;  %v12174_v25 = vld [vmem:[%s21386_s8 + $0xb38] sm:$0xff]  ;;  %v12171_v57 = vld [vmem:[%s21386_s8 + $0xb20] sm:$0xff] }
 0x699   :  { %3812 = vmatpush1.msra.mxu1 %v12095_v14  ;;  %3883 = vmatpush1.msra.mxu0 %v12097_v9  ;;  %v12173_v14 = vld [vmem:[%s21386_s8 + $0xb30] sm:$0xff]  ;;  %v12168_v9 = vld [vmem:[%s21386_s8 + $0xb08] sm:$0xff] }
 0x69a   :  { %3813 = vmatprep.subr.mxu1 %v12092_v58  ;;  %3884 = vmatprep.subr.mxu0 %v12094_v29  ;;  %v12170_v58 = vld [vmem:[%s21386_s8 + $0xb18] sm:$0xff]  ;;  %v12167_v29 = vld [vmem:[%s21386_s8 + $0xb00] sm:$0xff] }
 0x69b   :  { %3814 = vmatpush1.msra.mxu1 %v12091_v26  ;;  %3885 = vmatpush1.msra.mxu0 %v12093_v34  ;;  %v12169_v26 = vld [vmem:[%s21386_s8 + $0xb10] sm:$0xff]  ;;  %v12164_v34 = vld [vmem:[%s21386_s8 + $0xae8] sm:$0xff] }
 0x69c   :  { %3815 = vmatprep.subr.mxu1 %v12088_v28  ;;  %3886 = vmatprep.subr.mxu0 %v12090_v22  ;;  %v12166_v28 = vld [vmem:[%s21386_s8 + $0xaf8] sm:$0xff]  ;;  %v12163_v22 = vld [vmem:[%s21386_s8 + $0xae0] sm:$0xff] }
 0x69d   :  { %3816 = vmatpush1.msra.mxu1 %v12087_v36  ;;  %3887 = vmatpush1.msra.mxu0 %v12089_v0  ;;  %v12165_v36 = vld [vmem:[%s21386_s8 + $0xaf0] sm:$0xff]  ;;  %v12160_v0 = vld [vmem:[%s21386_s8 + $0xac8] sm:$0xff] }
 0x69e   :  { %3817 = vmatprep.subr.mxu1 %v12084_v50  ;;  %3888 = vmatprep.subr.mxu0 %v12086_v27  ;;  %v12162_v50 = vld [vmem:[%s21386_s8 + $0xad8] sm:$0xff]  ;;  %v12159_v27 = vld [vmem:[%s21386_s8 + $0xac0] sm:$0xff] }
 0x69f   :  { %3818 = vmatpush1.msra.mxu1 %v12083_v44  ;;  %3889 = vmatpush1.msra.mxu0 %v12085_v5  ;;  %v12161_v44 = vld [vmem:[%s21386_s8 + $0xad0] sm:$0xff]  ;;  %v12156_v5 = vld [vmem:[%s21386_s8 + $0xaa8] sm:$0xff] }
 0x6a0   :  { %3819 = vmatprep.subr.mxu1 %v12080_v41  ;;  %3890 = vmatprep.subr.mxu0 %v12082_v16  ;;  %v12158_v41 = vld [vmem:[%s21386_s8 + $0xab8] sm:$0xff]  ;;  %v12155_v16 = vld [vmem:[%s21386_s8 + $0xaa0] sm:$0xff] }
 0x6a1   :  { %3820 = vmatpush1.msra.mxu1 %v12079_v56  ;;  %3891 = vmatpush1.msra.mxu0 %v12081_v45  ;;  %v12157_v56 = vld [vmem:[%s21386_s8 + $0xab0] sm:$0xff]  ;;  %v12152_v45 = vld [vmem:[%s21386_s8 + $0xa88] sm:$0xff] }
 0x6a2   :  { %3821 = vmatprep.subr.mxu1 %v12076_v33  ;;  %3892 = vmatprep.subr.mxu0 %v12078_v38  ;;  %v12154_v33 = vld [vmem:[%s21386_s8 + $0xa98] sm:$0xff]  ;;  %v12151_v38 = vld [vmem:[%s21386_s8 + $0xa80] sm:$0xff] }
 0x6a3   :  { %3822 = vmatpush1.msra.mxu1 %v12075_v46  ;;  %3893 = vmatpush1.msra.mxu0 %v12077_v8  ;;  %v12153_v46 = vld [vmem:[%s21386_s8 + $0xa90] sm:$0xff]  ;;  %v12148_v8 = vld [vmem:[%s21386_s8 + $0xa68] sm:$0xff] }
 0x6a4   :  { %3823 = vmatprep.subr.mxu1 %v12072_v40  ;;  %3894 = vmatprep.subr.mxu0 %v12074_v30  ;;  %v12150_v40 = vld [vmem:[%s21386_s8 + $0xa78] sm:$0xff]  ;;  %v12147_v30 = vld [vmem:[%s21386_s8 + $0xa60] sm:$0xff] }
 0x6a5   :  { %3824 = vmatpush1.msra.mxu1 %v12071_v35  ;;  %3895 = vmatpush1.msra.mxu0 %v12073_v24  ;;  %v12149_v35 = vld [vmem:[%s21386_s8 + $0xa70] sm:$0xff]  ;;  %v12144_v24 = vld [vmem:[%s21386_s8 + $0xa48] sm:$0xff] }
 0x6a6   :  { %3825 = vmatprep.subr.mxu1 %v12196_v48  ;;  %3896 = vmatprep.subr.mxu0 %v12198_v49  ;;  %v12146_v48 = vld [vmem:[%s21386_s8 + $0xa58] sm:$0xff]  ;;  %v12143_v49 = vld [vmem:[%s21386_s8 + $0xa40] sm:$0xff] }
 0x6a7   :  { %3826 = vmatpush2.msra.mxu1 %v12195_v42  ;;  %3897 = vmatpush2.msra.mxu0 %v12197_v7  ;;  %v12145_v42 = vld [vmem:[%s21386_s8 + $0xa50] sm:$0xff]  ;;  %v3649_v7 = vld [vmem:[#allocation4 + $0x18] sm:$0x3] }
 0x6a8   :  { %3827 = vmatprep.subr.mxu1 %v12192_v43  ;;  %3898 = vmatprep.subr.mxu0 %v12194_v12  ;;  %v12140_v43 = vld [vmem:[%s21386_s8 + $0xa28] sm:$0xff]  ;;  %v12142_v12 = vld [vmem:[%s21386_s8 + $0xa38] sm:$0xff] }
 0x6a9   :  { %3828 = vmatpush2.msra.mxu1 %v12191_v59  ;;  %3899 = vmatpush2.msra.mxu0 %v12193_v60  ;;  %v3647_v59 = vld [vmem:[#allocation4 + $0x10] sm:$0xfc]  ;;  %v12139_v60 = vld [vmem:[%s21386_s8 + $0xa20] sm:$0xff] }
 0x6aa   :  { %3829 = vmatprep.subr.mxu1 %v12188_v32  ;;  %3900 = vmatprep.subr.mxu0 %v12190_v13  ;;  %v12141_v32 = vld [vmem:[%s21386_s8 + $0xa30] sm:$0xff]  ;;  %v3942_v13 = vld [vmem:[#allocation4 + $0x8] sm:$0x7] }
 0x6ab   :  { %3830 = vmatpush2.msra.mxu1 %v12187_v55  ;;  %3901 = vmatpush2.msra.mxu0 %v12189_v61  ;;  %v12136_v55 = vld [vmem:[%s21386_s8 + $0xa08] sm:$0xff]  ;;  %v12138_v61 = vld [vmem:[%s21386_s8 + $0xa18] sm:$0xff] }
 0x6ac   :  { %3831 = vmatprep.subr.mxu1 %v12184_v2  ;;  %3902 = vmatprep.subr.mxu0 %v12186_v3  ;;  %v3786_v2 = vrot.slane %v3649_v7, 2  ;;  %v12135_v3 = vld [vmem:[%s21386_s8 + $0xa00] sm:$0xff]  ;;  %v12229_v7 = vld [vmem:[%s21386_s8 + $0xcf0] sm:$0xff] }
 0x6ad   :  { %3832 = vmatpush2.msra.mxu1 %v12183_v63  ;;  %3903 = vmatpush2.msra.mxu0 %v12185_v18  ;;  %v12137_v63 = vld [vmem:[%s21386_s8 + $0xa10] sm:$0xff]  ;;  %v3940_v18 = vld [vmem:[#allocation4] sm:$0xf8] }
 0x6ae   :  { %3833 = vmatprep.subr.mxu1 %v12180_v6  ;;  %3904 = vmatprep.subr.mxu0 %v12182_v11  ;;  %v3785_v6 = vrot.slane %v3647_v59, 2  ;;  %v4081_v11 = vrot.slane %v3942_v13, 3  ;;  %v12223_v59 = vld [vmem:[%s21386_s8 + $0xcc0] sm:$0xff]  ;;  %v12222_v13 = vld [vmem:[%s21386_s8 + $0xcb8] sm:$0xff] }
 0x6af   :  { %3834 = vmatpush2.msra.mxu1 %v12179_v19  ;;  %3905 = vmatpush2.msra.mxu0 %v12181_v62  ;;  %v12260_v19 = vld [vmem:[%s21386_s8 + $0xde8] sm:$0xff]  ;;  %v12262_v62 = vld [vmem:[%s21386_s8 + $0xdf8] sm:$0xff] }
 0x6b0   :  { %3835 = vmatprep.subr.mxu1 %v12176_v37  ;;  %3906 = vmatprep.subr.mxu0 %v12178_v20  ;;  %v3787_v37 = vsel %vm3784_vm12, %v3785_v6, %v3786_v2  ;;  %v12259_v20 = vld [vmem:[%s21386_s8 + $0xde0] sm:$0xff]  ;;  %v12216_v2 = vld [vmem:[%s21386_s8 + $0xc88] sm:$0xff] }
 0x6b1   :  { %3836 = vmatpush2.msra.mxu1 %v12175_v23  ;;  %3907 = vmatpush2.msra.mxu0 %v12177_v51  ;;  %v4080_v23 = vrot.slane %v3940_v18, 3  ;;  %v12261_v51 = vld [vmem:[%s21386_s8 + $0xdf0] sm:$0xff]  ;;  %v12212_v6 = vld [vmem:[%s21386_s8 + $0xc68] sm:$0xff] }
 0x6b2   :  { %3837 = vmatprep.subr.mxu1 %v12172_v53  ;;  %3908 = vmatprep.subr.mxu0 %v12174_v25  ;;  %v12256_v25 = vld [vmem:[%s21386_s8 + $0xdc8] sm:$0xff]  ;;  %v12217_v18 = vld [vmem:[%s21386_s8 + $0xc90] sm:$0xff] }
 0x6b3   :  { %3838 = vmatpush2.msra.mxu1 %v12171_v57  ;;  %3909 = vmatpush2.msra.mxu0 %v12173_v14  ;;  %v4082_v53 = vsel %vm4076_vm13, %v4080_v23, %v4081_v11  ;;  %v12258_v57 = vld [vmem:[%s21386_s8 + $0xdd8] sm:$0xff]  ;;  %v12255_v14 = vld [vmem:[%s21386_s8 + $0xdc0] sm:$0xff] }
 0x6b4   :  { %3839 = vmatprep.subr.mxu1 %v12168_v9  ;;  %3910 = vmatprep.subr.mxu0 %v12170_v58  ;;  %v12257_v9 = vld [vmem:[%s21386_s8 + $0xdd0] sm:$0xff]  ;;  %v12252_v58 = vld [vmem:[%s21386_s8 + $0xda8] sm:$0xff]  ;;  %v12214_v11 = vld [vmem:[%s21386_s8 + $0xc78] sm:$0xff] }
 0x6b5   :  { %3840 = vmatpush2.msra.mxu1 %v12167_v29  ;;  %3911 = vmatpush2.msra.mxu0 %v12169_v26  ;;  %v12254_v29 = vld [vmem:[%s21386_s8 + $0xdb8] sm:$0xff]  ;;  %v12251_v26 = vld [vmem:[%s21386_s8 + $0xda0] sm:$0xff] }
 0x6b6   :  { %3841 = vmatprep.subr.mxu1 %v12164_v34  ;;  %3912 = vmatprep.subr.mxu0 %v12166_v28  ;;  %v12253_v34 = vld [vmem:[%s21386_s8 + $0xdb0] sm:$0xff]  ;;  %v12248_v28 = vld [vmem:[%s21386_s8 + $0xd88] sm:$0xff]  ;;  %v12207_v23 = vld [vmem:[%s21386_s8 + $0xc40] sm:$0xff] }
 0x6b7   :  { %3842 = vmatpush2.msra.mxu1 %v12163_v22  ;;  %3913 = vmatpush2.msra.mxu0 %v12165_v36  ;;  %v12250_v22 = vld [vmem:[%s21386_s8 + $0xd98] sm:$0xff]  ;;  %v12247_v36 = vld [vmem:[%s21386_s8 + $0xd80] sm:$0xff] }
 0x6b8   :  { %3843 = vmatprep.subr.mxu1 %v12160_v0  ;;  %3914 = vmatprep.subr.mxu0 %v12162_v50  ;;  %v12249_v0 = vld [vmem:[%s21386_s8 + $0xd90] sm:$0xff]  ;;  %v12244_v50 = vld [vmem:[%s21386_s8 + $0xd68] sm:$0xff] }
 0x6b9   :  { %3844 = vmatpush2.msra.mxu1 %v12159_v27  ;;  %3915 = vmatpush2.msra.mxu0 %v12161_v44  ;;  %v12246_v27 = vld [vmem:[%s21386_s8 + $0xd78] sm:$0xff]  ;;  %v12243_v44 = vld [vmem:[%s21386_s8 + $0xd60] sm:$0xff] }
 0x6ba   :  { %3845 = vmatprep.subr.mxu1 %v12156_v5  ;;  %3916 = vmatprep.subr.mxu0 %v12158_v41  ;;  %v12245_v5 = vld [vmem:[%s21386_s8 + $0xd70] sm:$0xff]  ;;  %v12240_v41 = vld [vmem:[%s21386_s8 + $0xd48] sm:$0xff] }
 0x6bb   :  { %3846 = vmatpush2.msra.mxu1 %v12155_v16  ;;  %3917 = vmatpush2.msra.mxu0 %v12157_v56  ;;  %v12242_v16 = vld [vmem:[%s21386_s8 + $0xd58] sm:$0xff]  ;;  %v12239_v56 = vld [vmem:[%s21386_s8 + $0xd40] sm:$0xff] }
 0x6bc   :  { %3847 = vmatprep.subr.mxu1 %v12152_v45  ;;  %3918 = vmatprep.subr.mxu0 %v12154_v33  ;;  %v12241_v45 = vld [vmem:[%s21386_s8 + $0xd50] sm:$0xff]  ;;  %v12236_v33 = vld [vmem:[%s21386_s8 + $0xd28] sm:$0xff] }
 0x6bd   :  { %3848 = vmatpush2.msra.mxu1 %v12151_v38  ;;  %3919 = vmatpush2.msra.mxu0 %v12153_v46  ;;  %v12238_v38 = vld [vmem:[%s21386_s8 + $0xd38] sm:$0xff]  ;;  %v12235_v46 = vld [vmem:[%s21386_s8 + $0xd20] sm:$0xff] }
 0x6be   :  { %3849 = vmatprep.subr.mxu1 %v12148_v8  ;;  %3920 = vmatprep.subr.mxu0 %v12150_v40  ;;  %v12237_v8 = vld [vmem:[%s21386_s8 + $0xd30] sm:$0xff]  ;;  %v12232_v40 = vld [vmem:[%s21386_s8 + $0xd08] sm:$0xff] }
 0x6bf   :  { %3850 = vmatpush2.msra.mxu1 %v12147_v30  ;;  %3921 = vmatpush2.msra.mxu0 %v12149_v35  ;;  %v12234_v30 = vld [vmem:[%s21386_s8 + $0xd18] sm:$0xff]  ;;  %v12231_v35 = vld [vmem:[%s21386_s8 + $0xd00] sm:$0xff] }
 0x6c0   :  { %3851 = vmatprep.subr.mxu1 %v12144_v24  ;;  %3922 = vmatprep.subr.mxu0 %v12146_v48  ;;  %v12233_v24 = vld [vmem:[%s21386_s8 + $0xd10] sm:$0xff]  ;;  %v12228_v48 = vld [vmem:[%s21386_s8 + $0xce8] sm:$0xff] }
 0x6c1   :  { %3852 = vmatpush2.msra.mxu1 %v12143_v49  ;;  %3923 = vmatpush2.msra.mxu0 %v12145_v42  ;;  %v12230_v49 = vld [vmem:[%s21386_s8 + $0xcf8] sm:$0xff]  ;;  %v12227_v42 = vld [vmem:[%s21386_s8 + $0xce0] sm:$0xff] }
 0x6c2   :  { %3853 = vmatprep.subr.mxu1 %v12140_v43  ;;  %3924 = vmatprep.subr.mxu0 %v12142_v12  ;;  %v12224_v43 = vld [vmem:[%s21386_s8 + $0xcc8] sm:$0xff]  ;;  %v12226_v12 = vld [vmem:[%s21386_s8 + $0xcd8] sm:$0xff] }
 0x6c3   :  { %3854 = vmatpush2.msra.mxu1 %v12139_v60  ;;  %3925 = vmatpush2.msra.mxu0 %v12141_v32  ;;  %v12225_v60 = vld [vmem:[%s21386_s8 + $0xcd0] sm:$0xff]  ;;  %v12220_v32 = vld [vmem:[%s21386_s8 + $0xca8] sm:$0xff] }
 0x6c4   :  { %3855 = vmatprep.subr.mxu1 %v12136_v55  ;;  %3926 = vmatprep.subr.mxu0 %v12138_v61  ;;  %v12219_v55 = vld [vmem:[%s21386_s8 + $0xca0] sm:$0xff]  ;;  %v12221_v61 = vld [vmem:[%s21386_s8 + $0xcb0] sm:$0xff] }
 0x6c5   :  { %3856 = vmatpush2.msra.mxu1 %v12135_v3  ;;  %3927 = vmatpush2.msra.mxu0 %v12137_v63  ;;  %v12218_v3 = vld [vmem:[%s21386_s8 + $0xc98] sm:$0xff]  ;;  %v12215_v63 = vld [vmem:[%s21386_s8 + $0xc80] sm:$0xff] }
 0x6c6   :  { %3858 = vmatmul.mubr.f32.vlgmr.msra.gmra.mxu1 %v3787_v37  ;;  %3929 = vmatmul.mubr.f32.vlgmr.msra.gmra.mxu0 %v3787_v37  ;;  %v12208_v37 = vld [vmem:[%s21386_s8 + $0xc48] sm:$0xff] }
 0x6c7   :  { %4085 = vmatprep.subr.mxu1 %v12260_v19  ;;  %4156 = vmatprep.subr.mxu0 %v12262_v62  ;;  %v12211_v19 = vld [vmem:[%s21386_s8 + $0xc60] sm:$0xff]  ;;  %v12213_v62 = vld [vmem:[%s21386_s8 + $0xc70] sm:$0xff] }
 0x6c8   :  { %4086 = vmatpush1.msra.mxu1 %v12259_v20  ;;  %4149 = vmatprep.mubr.f32.mxu1 %v4082_v53  ;;  %v12210_v20 = vld [vmem:[%s21386_s8 + $0xc58] sm:$0xff] }
 0x6c9   :  { %4157 = vmatpush1.msra.mxu0 %v12261_v51  ;;  %4220 = vmatprep.mubr.f32.mxu0 %v4082_v53  ;;  %v12209_v51 = vld [vmem:[%s21386_s8 + $0xc50] sm:$0xff]  ;;  %v12204_v53 = vld [vmem:[%s21386_s8 + $0xc28] sm:$0xff] }
 0x6ca   :  { %4087 = vmatprep.subr.mxu1 %v12256_v25  ;;  %4158 = vmatprep.subr.mxu0 %v12258_v57  ;;  %v12206_v25 = vld [vmem:[%s21386_s8 + $0xc38] sm:$0xff]  ;;  %v12203_v57 = vld [vmem:[%s21386_s8 + $0xc20] sm:$0xff] }
 0x6cb   :  { %4088 = vmatpush1.msra.mxu1 %v12255_v14  ;;  %4159 = vmatpush1.msra.mxu0 %v12257_v9  ;;  %v12205_v14 = vld [vmem:[%s21386_s8 + $0xc30] sm:$0xff]  ;;  %v12200_v9 = vld [vmem:[%s21386_s8 + $0xc08] sm:$0xff] }
 0x6cc   :  { %4089 = vmatprep.subr.mxu1 %v12252_v58  ;;  %4160 = vmatprep.subr.mxu0 %v12254_v29  ;;  %v12202_v58 = vld [vmem:[%s21386_s8 + $0xc18] sm:$0xff]  ;;  %v12199_v29 = vld [vmem:[%s21386_s8 + $0xc00] sm:$0xff] }
 0x6cd   :  { %4090 = vmatpush1.msra.mxu1 %v12251_v26  ;;  %4161 = vmatpush1.msra.mxu0 %v12253_v34  ;;  %v12201_v26 = vld [vmem:[%s21386_s8 + $0xc10] sm:$0xff]  ;;  %v12324_v34 = vld [vmem:[%s21386_s8 + $0xfe8] sm:$0xff] }
 0x6ce   :  { %4091 = vmatprep.subr.mxu1 %v12248_v28  ;;  %4162 = vmatprep.subr.mxu0 %v12250_v22  ;;  %v12326_v28 = vld [vmem:[%s21386_s8 + $0xff8] sm:$0xff]  ;;  %v12323_v22 = vld [vmem:[%s21386_s8 + $0xfe0] sm:$0xff] }
 0x6cf   :  { %4092 = vmatpush1.msra.mxu1 %v12247_v36  ;;  %4163 = vmatpush1.msra.mxu0 %v12249_v0  ;;  %v12325_v36 = vld [vmem:[%s21386_s8 + $0xff0] sm:$0xff]  ;;  %v12320_v0 = vld [vmem:[%s21386_s8 + $0xfc8] sm:$0xff] }
 0x6d0   :  { %4093 = vmatprep.subr.mxu1 %v12244_v50  ;;  %4164 = vmatprep.subr.mxu0 %v12246_v27  ;;  %v12322_v50 = vld [vmem:[%s21386_s8 + $0xfd8] sm:$0xff]  ;;  %v12319_v27 = vld [vmem:[%s21386_s8 + $0xfc0] sm:$0xff] }
 0x6d1   :  { %4094 = vmatpush1.msra.mxu1 %v12243_v44  ;;  %4165 = vmatpush1.msra.mxu0 %v12245_v5  ;;  %v12321_v44 = vld [vmem:[%s21386_s8 + $0xfd0] sm:$0xff]  ;;  %v12316_v5 = vld [vmem:[%s21386_s8 + $0xfa8] sm:$0xff] }
 0x6d2   :  { %4095 = vmatprep.subr.mxu1 %v12240_v41  ;;  %4166 = vmatprep.subr.mxu0 %v12242_v16  ;;  %v12318_v41 = vld [vmem:[%s21386_s8 + $0xfb8] sm:$0xff]  ;;  %v12315_v16 = vld [vmem:[%s21386_s8 + $0xfa0] sm:$0xff] }
 0x6d3   :  { %4096 = vmatpush1.msra.mxu1 %v12239_v56  ;;  %4167 = vmatpush1.msra.mxu0 %v12241_v45  ;;  %v12317_v56 = vld [vmem:[%s21386_s8 + $0xfb0] sm:$0xff]  ;;  %v12312_v45 = vld [vmem:[%s21386_s8 + $0xf88] sm:$0xff] }
 0x6d4   :  { %4097 = vmatprep.subr.mxu1 %v12236_v33  ;;  %4168 = vmatprep.subr.mxu0 %v12238_v38  ;;  %v12314_v33 = vld [vmem:[%s21386_s8 + $0xf98] sm:$0xff]  ;;  %v12311_v38 = vld [vmem:[%s21386_s8 + $0xf80] sm:$0xff] }
 0x6d5   :  { %4098 = vmatpush1.msra.mxu1 %v12235_v46  ;;  %4169 = vmatpush1.msra.mxu0 %v12237_v8  ;;  %v12313_v46 = vld [vmem:[%s21386_s8 + $0xf90] sm:$0xff]  ;;  %v12308_v8 = vld [vmem:[%s21386_s8 + $0xf68] sm:$0xff] }
 0x6d6   :  { %4099 = vmatprep.subr.mxu1 %v12232_v40  ;;  %4170 = vmatprep.subr.mxu0 %v12234_v30  ;;  %v12310_v40 = vld [vmem:[%s21386_s8 + $0xf78] sm:$0xff]  ;;  %v12307_v30 = vld [vmem:[%s21386_s8 + $0xf60] sm:$0xff] }
 0x6d7   :  { %4100 = vmatpush1.msra.mxu1 %v12231_v35  ;;  %4171 = vmatpush1.msra.mxu0 %v12233_v24  ;;  %v12309_v35 = vld [vmem:[%s21386_s8 + $0xf70] sm:$0xff]  ;;  %v12304_v24 = vld [vmem:[%s21386_s8 + $0xf48] sm:$0xff] }
 0x6d8   :  { %4101 = vmatprep.subr.mxu1 %v12228_v48  ;;  %4172 = vmatprep.subr.mxu0 %v12230_v49  ;;  %v12306_v48 = vld [vmem:[%s21386_s8 + $0xf58] sm:$0xff]  ;;  %v12303_v49 = vld [vmem:[%s21386_s8 + $0xf40] sm:$0xff] }
 0x6d9   :  { %4102 = vmatpush1.msra.mxu1 %v12227_v42  ;;  %4173 = vmatpush1.msra.mxu0 %v12229_v7  ;;  %v12305_v42 = vld [vmem:[%s21386_s8 + $0xf50] sm:$0xff]  ;;  %v12300_v7 = vld [vmem:[%s21386_s8 + $0xf28] sm:$0xff] }
 0x6da   :  { %4103 = vmatprep.subr.mxu1 %v12224_v43  ;;  %4174 = vmatprep.subr.mxu0 %v12226_v12  ;;  %v12302_v43 = vld [vmem:[%s21386_s8 + $0xf38] sm:$0xff]  ;;  %v12299_v12 = vld [vmem:[%s21386_s8 + $0xf20] sm:$0xff] }
 0x6db   :  { %4104 = vmatpush1.msra.mxu1 %v12223_v59  ;;  %4175 = vmatpush1.msra.mxu0 %v12225_v60  ;;  %v12301_v59 = vld [vmem:[%s21386_s8 + $0xf30] sm:$0xff]  ;;  %v12296_v60 = vld [vmem:[%s21386_s8 + $0xf08] sm:$0xff] }
 0x6dc   :  { %4105 = vmatprep.subr.mxu1 %v12220_v32  ;;  %4176 = vmatprep.subr.mxu0 %v12222_v13  ;;  %v12298_v32 = vld [vmem:[%s21386_s8 + $0xf18] sm:$0xff]  ;;  %v12295_v13 = vld [vmem:[%s21386_s8 + $0xf00] sm:$0xff] }
 0x6dd   :  { %4106 = vmatpush1.msra.mxu1 %v12219_v55  ;;  %4177 = vmatpush1.msra.mxu0 %v12221_v61  ;;  %v12297_v55 = vld [vmem:[%s21386_s8 + $0xf10] sm:$0xff]  ;;  %v12292_v61 = vld [vmem:[%s21386_s8 + $0xee8] sm:$0xff] }
 0x6de   :  { %4107 = vmatprep.subr.mxu1 %v12216_v2  ;;  %4178 = vmatprep.subr.mxu0 %v12218_v3  ;;  %v12294_v2 = vld [vmem:[%s21386_s8 + $0xef8] sm:$0xff]  ;;  %v12291_v3 = vld [vmem:[%s21386_s8 + $0xee0] sm:$0xff] }
 0x6df   :  { %4108 = vmatpush1.msra.mxu1 %v12215_v63  ;;  %4179 = vmatpush1.msra.mxu0 %v12217_v18  ;;  %v12293_v63 = vld [vmem:[%s21386_s8 + $0xef0] sm:$0xff]  ;;  %v12288_v18 = vld [vmem:[%s21386_s8 + $0xec8] sm:$0xff] }
 0x6e0   :  { %4109 = vmatprep.subr.mxu1 %v12212_v6  ;;  %4180 = vmatprep.subr.mxu0 %v12214_v11  ;;  %v12290_v6 = vld [vmem:[%s21386_s8 + $0xed8] sm:$0xff]  ;;  %v12287_v11 = vld [vmem:[%s21386_s8 + $0xec0] sm:$0xff] }
 0x6e1   :  { %4110 = vmatpush1.msra.mxu1 %v12211_v19  ;;  %4181 = vmatpush1.msra.mxu0 %v12213_v62  ;;  %v12289_v19 = vld [vmem:[%s21386_s8 + $0xed0] sm:$0xff]  ;;  %v12284_v62 = vld [vmem:[%s21386_s8 + $0xea8] sm:$0xff] }
 0x6e2   :  { %4111 = vmatprep.subr.mxu1 %v12208_v37  ;;  %4182 = vmatprep.subr.mxu0 %v12210_v20  ;;  %v12286_v37 = vld [vmem:[%s21386_s8 + $0xeb8] sm:$0xff]  ;;  %v12283_v20 = vld [vmem:[%s21386_s8 + $0xea0] sm:$0xff] }
 0x6e3   :  { %4112 = vmatpush1.msra.mxu1 %v12207_v23  ;;  %4183 = vmatpush1.msra.mxu0 %v12209_v51  ;;  %v12285_v23 = vld [vmem:[%s21386_s8 + $0xeb0] sm:$0xff]  ;;  %v12280_v51 = vld [vmem:[%s21386_s8 + $0xe88] sm:$0xff] }
 0x6e4   :  { %4113 = vmatprep.subr.mxu1 %v12204_v53  ;;  %4184 = vmatprep.subr.mxu0 %v12206_v25  ;;  %v12282_v53 = vld [vmem:[%s21386_s8 + $0xe98] sm:$0xff]  ;;  %v12279_v25 = vld [vmem:[%s21386_s8 + $0xe80] sm:$0xff] }
 0x6e5   :  { %4114 = vmatpush1.msra.mxu1 %v12203_v57  ;;  %4185 = vmatpush1.msra.mxu0 %v12205_v14  ;;  %v12281_v57 = vld [vmem:[%s21386_s8 + $0xe90] sm:$0xff]  ;;  %v12276_v14 = vld [vmem:[%s21386_s8 + $0xe68] sm:$0xff] }
 0x6e6   :  { %4115 = vmatprep.subr.mxu1 %v12200_v9  ;;  %4186 = vmatprep.subr.mxu0 %v12202_v58  ;;  %v12278_v9 = vld [vmem:[%s21386_s8 + $0xe78] sm:$0xff]  ;;  %v12275_v58 = vld [vmem:[%s21386_s8 + $0xe60] sm:$0xff] }
 0x6e7   :  { %4116 = vmatpush1.msra.mxu1 %v12199_v29  ;;  %4187 = vmatpush1.msra.mxu0 %v12201_v26  ;;  %v12277_v29 = vld [vmem:[%s21386_s8 + $0xe70] sm:$0xff]  ;;  %v12272_v26 = vld [vmem:[%s21386_s8 + $0xe48] sm:$0xff] }
 0x6e8   :  { %4117 = vmatprep.subr.mxu1 %v12324_v34  ;;  %4188 = vmatprep.subr.mxu0 %v12326_v28  ;;  %v12274_v34 = vld [vmem:[%s21386_s8 + $0xe58] sm:$0xff]  ;;  %v12271_v28 = vld [vmem:[%s21386_s8 + $0xe40] sm:$0xff] }
 0x6e9   :  { %4118 = vmatpush2.msra.mxu1 %v12323_v22  ;;  %4189 = vmatpush2.msra.mxu0 %v12325_v36  ;;  %v12273_v22 = vld [vmem:[%s21386_s8 + $0xe50] sm:$0xff]  ;;  %v3941_v36 = vld [vmem:[#allocation4 + $0x18] sm:$0x7] }
 0x6ea   :  { %4119 = vmatprep.subr.mxu1 %v12320_v0  ;;  %4190 = vmatprep.subr.mxu0 %v12322_v50  ;;  %v12268_v0 = vld [vmem:[%s21386_s8 + $0xe28] sm:$0xff]  ;;  %v12270_v50 = vld [vmem:[%s21386_s8 + $0xe38] sm:$0xff] }
 0x6eb   :  { %4120 = vmatpush2.msra.mxu1 %v12319_v27  ;;  %4191 = vmatpush2.msra.mxu0 %v12321_v44  ;;  %v3939_v27 = vld [vmem:[#allocation4 + $0x10] sm:$0xf8]  ;;  %v12267_v44 = vld [vmem:[%s21386_s8 + $0xe20] sm:$0xff] }
 0x6ec   :  { %4121 = vmatprep.subr.mxu1 %v12316_v5  ;;  %4192 = vmatprep.subr.mxu0 %v12318_v41  ;;  %v12269_v5 = vld [vmem:[%s21386_s8 + $0xe30] sm:$0xff]  ;;  %v4234_v41 = vld [vmem:[#allocation4 + $0x8] sm:$0xf] }
 0x6ed   :  { %4122 = vmatpush2.msra.mxu1 %v12315_v16  ;;  %4193 = vmatpush2.msra.mxu0 %v12317_v56  ;;  %v12264_v16 = vld [vmem:[%s21386_s8 + $0xe08] sm:$0xff]  ;;  %v12266_v56 = vld [vmem:[%s21386_s8 + $0xe18] sm:$0xff] }
 0x6ee   :  { %4123 = vmatprep.subr.mxu1 %v12312_v45  ;;  %4194 = vmatprep.subr.mxu0 %v12314_v33  ;;  %v4078_v45 = vrot.slane %v3941_v36, 3  ;;  %v12263_v33 = vld [vmem:[%s21386_s8 + $0xe00] sm:$0xff]  ;;  %v12357_v36 = vld [vmem:[%s21386_s8 + $0x10f0] sm:$0xff] }
 0x6ef   :  { %4124 = vmatpush2.msra.mxu1 %v12311_v38  ;;  %4195 = vmatpush2.msra.mxu0 %v12313_v46  ;;  %v12265_v38 = vld [vmem:[%s21386_s8 + $0xe10] sm:$0xff]  ;;  %v4232_v46 = vld [vmem:[#allocation4] sm:$0xf0] }
 0x6f0   :  { %4125 = vmatprep.subr.mxu1 %v12308_v8  ;;  %4196 = vmatprep.subr.mxu0 %v12310_v40  ;;  %v4077_v8 = vrot.slane %v3939_v27, 3  ;;  %v4372_v40 = vrot.slane %v4234_v41, 4  ;;  %v12351_v27 = vld [vmem:[%s21386_s8 + $0x10c0] sm:$0xff]  ;;  %v12350_v41 = vld [vmem:[%s21386_s8 + $0x10b8] sm:$0xff] }
 0x6f1   :  { %4126 = vmatpush2.msra.mxu1 %v12307_v30  ;;  %4197 = vmatpush2.msra.mxu0 %v12309_v35  ;;  %v12388_v30 = vld [vmem:[%s21386_s8 + $0x11e8] sm:$0xff]  ;;  %v12390_v35 = vld [vmem:[%s21386_s8 + $0x11f8] sm:$0xff] }
 0x6f2   :  { %4127 = vmatprep.subr.mxu1 %v12304_v24  ;;  %4198 = vmatprep.subr.mxu0 %v12306_v48  ;;  %v4079_v24 = vsel %vm4076_vm13, %v4077_v8, %v4078_v45  ;;  %v12387_v48 = vld [vmem:[%s21386_s8 + $0x11e0] sm:$0xff]  ;;  %v12344_v45 = vld [vmem:[%s21386_s8 + $0x1088] sm:$0xff] }
 0x6f3   :  { %4128 = vmatpush2.msra.mxu1 %v12303_v49  ;;  %4199 = vmatpush2.msra.mxu0 %v12305_v42  ;;  %v4371_v49 = vrot.slane %v4232_v46, 4  ;;  %v12389_v42 = vld [vmem:[%s21386_s8 + $0x11f0] sm:$0xff]  ;;  %v12340_v8 = vld [vmem:[%s21386_s8 + $0x1068] sm:$0xff] }
 0x6f4   :  { %4129 = vmatprep.subr.mxu1 %v12300_v7  ;;  %4200 = vmatprep.subr.mxu0 %v12302_v43  ;;  %v12384_v43 = vld [vmem:[%s21386_s8 + $0x11c8] sm:$0xff]  ;;  %v12345_v46 = vld [vmem:[%s21386_s8 + $0x1090] sm:$0xff] }
 0x6f5   :  { %4130 = vmatpush2.msra.mxu1 %v12299_v12  ;;  %4201 = vmatpush2.msra.mxu0 %v12301_v59  ;;  %v4373_v7 = vsel %vm619_vm5, %v4371_v49, %v4372_v40  ;;  %v12386_v12 = vld [vmem:[%s21386_s8 + $0x11d8] sm:$0xff]  ;;  %v12383_v59 = vld [vmem:[%s21386_s8 + $0x11c0] sm:$0xff] }
 0x6f6   :  { %4131 = vmatprep.subr.mxu1 %v12296_v60  ;;  %4202 = vmatprep.subr.mxu0 %v12298_v32  ;;  %v12385_v60 = vld [vmem:[%s21386_s8 + $0x11d0] sm:$0xff]  ;;  %v12380_v32 = vld [vmem:[%s21386_s8 + $0x11a8] sm:$0xff]  ;;  %v12342_v40 = vld [vmem:[%s21386_s8 + $0x1078] sm:$0xff] }
 0x6f7   :  { %4132 = vmatpush2.msra.mxu1 %v12295_v13  ;;  %4203 = vmatpush2.msra.mxu0 %v12297_v55  ;;  %v12382_v13 = vld [vmem:[%s21386_s8 + $0x11b8] sm:$0xff]  ;;  %v12379_v55 = vld [vmem:[%s21386_s8 + $0x11a0] sm:$0xff] }
 0x6f8   :  { %4133 = vmatprep.subr.mxu1 %v12292_v61  ;;  %4204 = vmatprep.subr.mxu0 %v12294_v2  ;;  %v12381_v61 = vld [vmem:[%s21386_s8 + $0x11b0] sm:$0xff]  ;;  %v12376_v2 = vld [vmem:[%s21386_s8 + $0x1188] sm:$0xff]  ;;  %v12335_v49 = vld [vmem:[%s21386_s8 + $0x1040] sm:$0xff] }
 0x6f9   :  { %4134 = vmatpush2.msra.mxu1 %v12291_v3  ;;  %4205 = vmatpush2.msra.mxu0 %v12293_v63  ;;  %v12378_v3 = vld [vmem:[%s21386_s8 + $0x1198] sm:$0xff]  ;;  %v12375_v63 = vld [vmem:[%s21386_s8 + $0x1180] sm:$0xff] }
 0x6fa   :  { %4135 = vmatprep.subr.mxu1 %v12288_v18  ;;  %4206 = vmatprep.subr.mxu0 %v12290_v6  ;;  %v12377_v18 = vld [vmem:[%s21386_s8 + $0x1190] sm:$0xff]  ;;  %v12372_v6 = vld [vmem:[%s21386_s8 + $0x1168] sm:$0xff] }
 0x6fb   :  { %4136 = vmatpush2.msra.mxu1 %v12287_v11  ;;  %4207 = vmatpush2.msra.mxu0 %v12289_v19  ;;  %v12374_v11 = vld [vmem:[%s21386_s8 + $0x1178] sm:$0xff]  ;;  %v12371_v19 = vld [vmem:[%s21386_s8 + $0x1160] sm:$0xff] }
 0x6fc   :  { %4137 = vmatprep.subr.mxu1 %v12284_v62  ;;  %4208 = vmatprep.subr.mxu0 %v12286_v37  ;;  %v12373_v62 = vld [vmem:[%s21386_s8 + $0x1170] sm:$0xff]  ;;  %v12368_v37 = vld [vmem:[%s21386_s8 + $0x1148] sm:$0xff] }
 0x6fd   :  { %4138 = vmatpush2.msra.mxu1 %v12283_v20  ;;  %4209 = vmatpush2.msra.mxu0 %v12285_v23  ;;  %v12370_v20 = vld [vmem:[%s21386_s8 + $0x1158] sm:$0xff]  ;;  %v12367_v23 = vld [vmem:[%s21386_s8 + $0x1140] sm:$0xff] }
 0x6fe   :  { %4139 = vmatprep.subr.mxu1 %v12280_v51  ;;  %4210 = vmatprep.subr.mxu0 %v12282_v53  ;;  %v12369_v51 = vld [vmem:[%s21386_s8 + $0x1150] sm:$0xff]  ;;  %v12364_v53 = vld [vmem:[%s21386_s8 + $0x1128] sm:$0xff] }
 0x6ff   :  { %4140 = vmatpush2.msra.mxu1 %v12279_v25  ;;  %4211 = vmatpush2.msra.mxu0 %v12281_v57  ;;  %v12366_v25 = vld [vmem:[%s21386_s8 + $0x1138] sm:$0xff]  ;;  %v12363_v57 = vld [vmem:[%s21386_s8 + $0x1120] sm:$0xff] }
 0x700   :  { %4141 = vmatprep.subr.mxu1 %v12276_v14  ;;  %4212 = vmatprep.subr.mxu0 %v12278_v9  ;;  %v12365_v14 = vld [vmem:[%s21386_s8 + $0x1130] sm:$0xff]  ;;  %v12360_v9 = vld [vmem:[%s21386_s8 + $0x1108] sm:$0xff] }
 0x701   :  { %4142 = vmatpush2.msra.mxu1 %v12275_v58  ;;  %4213 = vmatpush2.msra.mxu0 %v12277_v29  ;;  %v12362_v58 = vld [vmem:[%s21386_s8 + $0x1118] sm:$0xff]  ;;  %v12359_v29 = vld [vmem:[%s21386_s8 + $0x1100] sm:$0xff] }
 0x702   :  { %4143 = vmatprep.subr.mxu1 %v12272_v26  ;;  %4214 = vmatprep.subr.mxu0 %v12274_v34  ;;  %v12361_v26 = vld [vmem:[%s21386_s8 + $0x1110] sm:$0xff]  ;;  %v12356_v34 = vld [vmem:[%s21386_s8 + $0x10e8] sm:$0xff] }
 0x703   :  { %4144 = vmatpush2.msra.mxu1 %v12271_v28  ;;  %4215 = vmatpush2.msra.mxu0 %v12273_v22  ;;  %v12358_v28 = vld [vmem:[%s21386_s8 + $0x10f8] sm:$0xff]  ;;  %v12355_v22 = vld [vmem:[%s21386_s8 + $0x10e0] sm:$0xff] }
 0x704   :  { %4145 = vmatprep.subr.mxu1 %v12268_v0  ;;  %4216 = vmatprep.subr.mxu0 %v12270_v50  ;;  %v12352_v0 = vld [vmem:[%s21386_s8 + $0x10c8] sm:$0xff]  ;;  %v12354_v50 = vld [vmem:[%s21386_s8 + $0x10d8] sm:$0xff] }
 0x705   :  { %4146 = vmatpush2.msra.mxu1 %v12267_v44  ;;  %4217 = vmatpush2.msra.mxu0 %v12269_v5  ;;  %v12353_v44 = vld [vmem:[%s21386_s8 + $0x10d0] sm:$0xff]  ;;  %v12348_v5 = vld [vmem:[%s21386_s8 + $0x10a8] sm:$0xff] }
 0x706   :  { %4147 = vmatprep.subr.mxu1 %v12264_v16  ;;  %4218 = vmatprep.subr.mxu0 %v12266_v56  ;;  %v12347_v16 = vld [vmem:[%s21386_s8 + $0x10a0] sm:$0xff]  ;;  %v12349_v56 = vld [vmem:[%s21386_s8 + $0x10b0] sm:$0xff] }
 0x707   :  { %4148 = vmatpush2.msra.mxu1 %v12263_v33  ;;  %4219 = vmatpush2.msra.mxu0 %v12265_v38  ;;  %v12346_v33 = vld [vmem:[%s21386_s8 + $0x1098] sm:$0xff]  ;;  %v12343_v38 = vld [vmem:[%s21386_s8 + $0x1080] sm:$0xff] }
 0x708   :  { %4150 = vmatmul.mubr.f32.vlgmr.msra.gmra.mxu1 %v4079_v24  ;;  %4221 = vmatmul.mubr.f32.vlgmr.msra.gmra.mxu0 %v4079_v24  ;;  %v12336_v24 = vld [vmem:[%s21386_s8 + $0x1048] sm:$0xff] }
 0x709   :  { %4376 = vmatprep.subr.mxu1 %v12388_v30  ;;  %4447 = vmatprep.subr.mxu0 %v12390_v35  ;;  %v12339_v30 = vld [vmem:[%s21386_s8 + $0x1060] sm:$0xff]  ;;  %v12341_v35 = vld [vmem:[%s21386_s8 + $0x1070] sm:$0xff] }
 0x70a   :  { %4377 = vmatpush1.msra.mxu1 %v12387_v48  ;;  %4440 = vmatprep.mubr.f32.mxu1 %v4373_v7  ;;  %v12338_v48 = vld [vmem:[%s21386_s8 + $0x1058] sm:$0xff] }
 0x70b   :  { %4448 = vmatpush1.msra.mxu0 %v12389_v42  ;;  %4511 = vmatprep.mubr.f32.mxu0 %v4373_v7  ;;  %v12337_v42 = vld [vmem:[%s21386_s8 + $0x1050] sm:$0xff]  ;;  %v12332_v7 = vld [vmem:[%s21386_s8 + $0x1028] sm:$0xff] }
 0x70c   :  { %4378 = vmatprep.subr.mxu1 %v12384_v43  ;;  %4449 = vmatprep.subr.mxu0 %v12386_v12  ;;  %v12334_v43 = vld [vmem:[%s21386_s8 + $0x1038] sm:$0xff]  ;;  %v12331_v12 = vld [vmem:[%s21386_s8 + $0x1020] sm:$0xff] }
 0x70d   :  { %4379 = vmatpush1.msra.mxu1 %v12383_v59  ;;  %4450 = vmatpush1.msra.mxu0 %v12385_v60  ;;  %v12333_v59 = vld [vmem:[%s21386_s8 + $0x1030] sm:$0xff]  ;;  %v12328_v60 = vld [vmem:[%s21386_s8 + $0x1008] sm:$0xff] }
 0x70e   :  { %4380 = vmatprep.subr.mxu1 %v12380_v32  ;;  %4451 = vmatprep.subr.mxu0 %v12382_v13  ;;  %v12330_v32 = vld [vmem:[%s21386_s8 + $0x1018] sm:$0xff]  ;;  %v12327_v13 = vld [vmem:[%s21386_s8 + $0x1000] sm:$0xff] }
 0x70f   :  { %4381 = vmatpush1.msra.mxu1 %v12379_v55  ;;  %4452 = vmatpush1.msra.mxu0 %v12381_v61  ;;  %v12329_v55 = vld [vmem:[%s21386_s8 + $0x1010] sm:$0xff]  ;;  %v12452_v61 = vld [vmem:[%s21386_s8 + $0x13e8] sm:$0xff] }
 0x710   :  { %4382 = vmatprep.subr.mxu1 %v12376_v2  ;;  %4453 = vmatprep.subr.mxu0 %v12378_v3  ;;  %v12454_v2 = vld [vmem:[%s21386_s8 + $0x13f8] sm:$0xff]  ;;  %v12451_v3 = vld [vmem:[%s21386_s8 + $0x13e0] sm:$0xff] }
 0x711   :  { %4383 = vmatpush1.msra.mxu1 %v12375_v63  ;;  %4454 = vmatpush1.msra.mxu0 %v12377_v18  ;;  %v12453_v63 = vld [vmem:[%s21386_s8 + $0x13f0] sm:$0xff]  ;;  %v12448_v18 = vld [vmem:[%s21386_s8 + $0x13c8] sm:$0xff] }
 0x712   :  { %4384 = vmatprep.subr.mxu1 %v12372_v6  ;;  %4455 = vmatprep.subr.mxu0 %v12374_v11  ;;  %v12450_v6 = vld [vmem:[%s21386_s8 + $0x13d8] sm:$0xff]  ;;  %v12447_v11 = vld [vmem:[%s21386_s8 + $0x13c0] sm:$0xff] }
 0x713   :  { %4385 = vmatpush1.msra.mxu1 %v12371_v19  ;;  %4456 = vmatpush1.msra.mxu0 %v12373_v62  ;;  %v12449_v19 = vld [vmem:[%s21386_s8 + $0x13d0] sm:$0xff]  ;;  %v12444_v62 = vld [vmem:[%s21386_s8 + $0x13a8] sm:$0xff] }
 0x714   :  { %4386 = vmatprep.subr.mxu1 %v12368_v37  ;;  %4457 = vmatprep.subr.mxu0 %v12370_v20  ;;  %v12446_v37 = vld [vmem:[%s21386_s8 + $0x13b8] sm:$0xff]  ;;  %v12443_v20 = vld [vmem:[%s21386_s8 + $0x13a0] sm:$0xff] }
 0x715   :  { %4387 = vmatpush1.msra.mxu1 %v12367_v23  ;;  %4458 = vmatpush1.msra.mxu0 %v12369_v51  ;;  %v12445_v23 = vld [vmem:[%s21386_s8 + $0x13b0] sm:$0xff]  ;;  %v12440_v51 = vld [vmem:[%s21386_s8 + $0x1388] sm:$0xff] }
 0x716   :  { %4388 = vmatprep.subr.mxu1 %v12364_v53  ;;  %4459 = vmatprep.subr.mxu0 %v12366_v25  ;;  %v12442_v53 = vld [vmem:[%s21386_s8 + $0x1398] sm:$0xff]  ;;  %v12439_v25 = vld [vmem:[%s21386_s8 + $0x1380] sm:$0xff] }
 0x717   :  { %4389 = vmatpush1.msra.mxu1 %v12363_v57  ;;  %4460 = vmatpush1.msra.mxu0 %v12365_v14  ;;  %v12441_v57 = vld [vmem:[%s21386_s8 + $0x1390] sm:$0xff]  ;;  %v12436_v14 = vld [vmem:[%s21386_s8 + $0x1368] sm:$0xff] }
 0x718   :  { %4390 = vmatprep.subr.mxu1 %v12360_v9  ;;  %4461 = vmatprep.subr.mxu0 %v12362_v58  ;;  %v12438_v9 = vld [vmem:[%s21386_s8 + $0x1378] sm:$0xff]  ;;  %v12435_v58 = vld [vmem:[%s21386_s8 + $0x1360] sm:$0xff] }
 0x719   :  { %4391 = vmatpush1.msra.mxu1 %v12359_v29  ;;  %4462 = vmatpush1.msra.mxu0 %v12361_v26  ;;  %v12437_v29 = vld [vmem:[%s21386_s8 + $0x1370] sm:$0xff]  ;;  %v12432_v26 = vld [vmem:[%s21386_s8 + $0x1348] sm:$0xff] }
 0x71a   :  { %4392 = vmatprep.subr.mxu1 %v12356_v34  ;;  %4463 = vmatprep.subr.mxu0 %v12358_v28  ;;  %v12434_v34 = vld [vmem:[%s21386_s8 + $0x1358] sm:$0xff]  ;;  %v12431_v28 = vld [vmem:[%s21386_s8 + $0x1340] sm:$0xff] }
 0x71b   :  { %4393 = vmatpush1.msra.mxu1 %v12355_v22  ;;  %4464 = vmatpush1.msra.mxu0 %v12357_v36  ;;  %v12433_v22 = vld [vmem:[%s21386_s8 + $0x1350] sm:$0xff]  ;;  %v12428_v36 = vld [vmem:[%s21386_s8 + $0x1328] sm:$0xff] }
 0x71c   :  { %4394 = vmatprep.subr.mxu1 %v12352_v0  ;;  %4465 = vmatprep.subr.mxu0 %v12354_v50  ;;  %v12430_v0 = vld [vmem:[%s21386_s8 + $0x1338] sm:$0xff]  ;;  %v12427_v50 = vld [vmem:[%s21386_s8 + $0x1320] sm:$0xff] }
 0x71d   :  { %4395 = vmatpush1.msra.mxu1 %v12351_v27  ;;  %4466 = vmatpush1.msra.mxu0 %v12353_v44  ;;  %v12429_v27 = vld [vmem:[%s21386_s8 + $0x1330] sm:$0xff]  ;;  %v12424_v44 = vld [vmem:[%s21386_s8 + $0x1308] sm:$0xff] }
 0x71e   :  { %4396 = vmatprep.subr.mxu1 %v12348_v5  ;;  %4467 = vmatprep.subr.mxu0 %v12350_v41  ;;  %v12426_v5 = vld [vmem:[%s21386_s8 + $0x1318] sm:$0xff]  ;;  %v12423_v41 = vld [vmem:[%s21386_s8 + $0x1300] sm:$0xff] }
 0x71f   :  { %4397 = vmatpush1.msra.mxu1 %v12347_v16  ;;  %4468 = vmatpush1.msra.mxu0 %v12349_v56  ;;  %v12425_v16 = vld [vmem:[%s21386_s8 + $0x1310] sm:$0xff]  ;;  %v12420_v56 = vld [vmem:[%s21386_s8 + $0x12e8] sm:$0xff] }
 0x720   :  { %4398 = vmatprep.subr.mxu1 %v12344_v45  ;;  %4469 = vmatprep.subr.mxu0 %v12346_v33  ;;  %v12422_v45 = vld [vmem:[%s21386_s8 + $0x12f8] sm:$0xff]  ;;  %v12419_v33 = vld [vmem:[%s21386_s8 + $0x12e0] sm:$0xff] }
 0x721   :  { %4399 = vmatpush1.msra.mxu1 %v12343_v38  ;;  %4470 = vmatpush1.msra.mxu0 %v12345_v46  ;;  %v12421_v38 = vld [vmem:[%s21386_s8 + $0x12f0] sm:$0xff]  ;;  %v12416_v46 = vld [vmem:[%s21386_s8 + $0x12c8] sm:$0xff] }
 0x722   :  { %4400 = vmatprep.subr.mxu1 %v12340_v8  ;;  %4471 = vmatprep.subr.mxu0 %v12342_v40  ;;  %v12418_v8 = vld [vmem:[%s21386_s8 + $0x12d8] sm:$0xff]  ;;  %v12415_v40 = vld [vmem:[%s21386_s8 + $0x12c0] sm:$0xff] }
 0x723   :  { %4401 = vmatpush1.msra.mxu1 %v12339_v30  ;;  %4472 = vmatpush1.msra.mxu0 %v12341_v35  ;;  %v12417_v30 = vld [vmem:[%s21386_s8 + $0x12d0] sm:$0xff]  ;;  %v12412_v35 = vld [vmem:[%s21386_s8 + $0x12a8] sm:$0xff] }
 0x724   :  { %4402 = vmatprep.subr.mxu1 %v12336_v24  ;;  %4473 = vmatprep.subr.mxu0 %v12338_v48  ;;  %v12414_v24 = vld [vmem:[%s21386_s8 + $0x12b8] sm:$0xff]  ;;  %v12411_v48 = vld [vmem:[%s21386_s8 + $0x12a0] sm:$0xff] }
 0x725   :  { %4403 = vmatpush1.msra.mxu1 %v12335_v49  ;;  %4474 = vmatpush1.msra.mxu0 %v12337_v42  ;;  %v12413_v49 = vld [vmem:[%s21386_s8 + $0x12b0] sm:$0xff]  ;;  %v12408_v42 = vld [vmem:[%s21386_s8 + $0x1288] sm:$0xff] }
 0x726   :  { %4404 = vmatprep.subr.mxu1 %v12332_v7  ;;  %4475 = vmatprep.subr.mxu0 %v12334_v43  ;;  %v12410_v7 = vld [vmem:[%s21386_s8 + $0x1298] sm:$0xff]  ;;  %v12407_v43 = vld [vmem:[%s21386_s8 + $0x1280] sm:$0xff] }
 0x727   :  { %4405 = vmatpush1.msra.mxu1 %v12331_v12  ;;  %4476 = vmatpush1.msra.mxu0 %v12333_v59  ;;  %v12409_v12 = vld [vmem:[%s21386_s8 + $0x1290] sm:$0xff]  ;;  %v12404_v59 = vld [vmem:[%s21386_s8 + $0x1268] sm:$0xff] }
 0x728   :  { %4406 = vmatprep.subr.mxu1 %v12328_v60  ;;  %4477 = vmatprep.subr.mxu0 %v12330_v32  ;;  %v12406_v60 = vld [vmem:[%s21386_s8 + $0x1278] sm:$0xff]  ;;  %v12403_v32 = vld [vmem:[%s21386_s8 + $0x1260] sm:$0xff] }
 0x729   :  { %4407 = vmatpush1.msra.mxu1 %v12327_v13  ;;  %4478 = vmatpush1.msra.mxu0 %v12329_v55  ;;  %v12405_v13 = vld [vmem:[%s21386_s8 + $0x1270] sm:$0xff]  ;;  %v12400_v55 = vld [vmem:[%s21386_s8 + $0x1248] sm:$0xff] }
 0x72a   :  { %4408 = vmatprep.subr.mxu1 %v12452_v61  ;;  %4479 = vmatprep.subr.mxu0 %v12454_v2  ;;  %v12402_v61 = vld [vmem:[%s21386_s8 + $0x1258] sm:$0xff]  ;;  %v12399_v2 = vld [vmem:[%s21386_s8 + $0x1240] sm:$0xff] }
 0x72b   :  { %4409 = vmatpush2.msra.mxu1 %v12451_v3  ;;  %4480 = vmatpush2.msra.mxu0 %v12453_v63  ;;  %v12401_v3 = vld [vmem:[%s21386_s8 + $0x1250] sm:$0xff]  ;;  %v4233_v63 = vld [vmem:[#allocation4 + $0x18] sm:$0xf] }
 0x72c   :  { %4410 = vmatprep.subr.mxu1 %v12448_v18  ;;  %4481 = vmatprep.subr.mxu0 %v12450_v6  ;;  %v12396_v18 = vld [vmem:[%s21386_s8 + $0x1228] sm:$0xff]  ;;  %v12398_v6 = vld [vmem:[%s21386_s8 + $0x1238] sm:$0xff] }
 0x72d   :  { %4411 = vmatpush2.msra.mxu1 %v12447_v11  ;;  %4482 = vmatpush2.msra.mxu0 %v12449_v19  ;;  %v12395_v11 = vld [vmem:[%s21386_s8 + $0x1220] sm:$0xff]  ;;  %v12397_v19 = vld [vmem:[%s21386_s8 + $0x1230] sm:$0xff] }
 0x72e   :  { %4412 = vmatprep.subr.mxu1 %v12444_v62  ;;  %4483 = vmatprep.subr.mxu0 %v12446_v37  ;;  %v4231_v62 = vld [vmem:[#allocation4 + $0x10] sm:$0xf0]  ;;  %v12392_v37 = vld [vmem:[%s21386_s8 + $0x1208] sm:$0xff] }
 0x72f   :  { %4413 = vmatpush2.msra.mxu1 %v12443_v20  ;;  %4484 = vmatpush2.msra.mxu0 %v12445_v23  ;;  %v12394_v20 = vld [vmem:[%s21386_s8 + $0x1218] sm:$0xff]  ;;  %v4369_v23 = vrot.slane %v4233_v63, 4 }
 0x730   :  { %4414 = vmatprep.subr.mxu1 %v12440_v51  ;;  %4485 = vmatprep.subr.mxu0 %v12442_v53  ;;  %v12391_v51 = vld [vmem:[%s21386_s8 + $0x1200] sm:$0xff]  ;;  %v12393_v53 = vld [vmem:[%s21386_s8 + $0x1210] sm:$0xff] }
 0x731   :  { %4415 = vmatpush2.msra.mxu1 %v12439_v25  ;;  %4486 = vmatpush2.msra.mxu0 %v12441_v57  ;;  %v4368_v25 = vrot.slane %v4231_v62, 4 }
 0x732   :  { %4416 = vmatprep.subr.mxu1 %v12436_v14  ;;  %4487 = vmatprep.subr.mxu0 %v12438_v9  ;;  %v3429_v14 = vpop.f32.mrf.mxu1  ;;  %v3500_v9 = vpop.f32.mrf.mxu0 }
 0x733   :  { %4417 = vmatpush2.msra.mxu1 %v12435_v58  ;;  %4488 = vmatpush2.msra.mxu0 %v12437_v29  ;;  %v4370_v57 = vsel %vm619_vm5, %v4368_v25, %v4369_v23 }
 0x734   :  { %4418 = vmatprep.subr.mxu1 %v12432_v26  ;;  %4489 = vmatprep.subr.mxu0 %v12434_v34  ;;  %v3431_v58 = vpop.f32.mrf.mxu1  ;;  %v3502_v29 = vpop.f32.mrf.mxu0 }
 0x735   :  { %4419 = vmatpush2.msra.mxu1 %v12431_v28  ;;  %4490 = vmatpush2.msra.mxu0 %v12433_v22 }
 0x736   :  { %4420 = vmatprep.subr.mxu1 %v12428_v36  ;;  %4491 = vmatprep.subr.mxu0 %v12430_v0 }
 0x737   :  { %4421 = vmatpush2.msra.mxu1 %v12427_v50  ;;  %4492 = vmatpush2.msra.mxu0 %v12429_v27 }
 0x738   :  { %4422 = vmatprep.subr.mxu1 %v12424_v44  ;;  %4493 = vmatprep.subr.mxu0 %v12426_v5 }
 0x739   :  { %4423 = vmatpush2.msra.mxu1 %v12423_v41  ;;  %4494 = vmatpush2.msra.mxu0 %v12425_v16 }
 0x73a   :  { %4424 = vmatprep.subr.mxu1 %v12420_v56  ;;  %4495 = vmatprep.subr.mxu0 %v12422_v45  ;;  %v4554_v56 = vsel %vm4553_vm14, %v21496_v1, 0 }
 0x73b   :  { %4425 = vmatpush2.msra.mxu1 %v12419_v33  ;;  %4496 = vmatpush2.msra.mxu0 %v12421_v38  ;;  %v558_v38 = vld [vmem:[%s21387_s9] sm:$0xf]  ;;  %s13759_s9 = spop %13758 }
 0x73c   :  { %4426 = vmatprep.subr.mxu1 %v12416_v46  ;;  %4497 = vmatprep.subr.mxu0 %v12418_v8  ;;  %s13761_s30 = spop %13760 }
 0x73d   :  { %4427 = vmatpush2.msra.mxu1 %v12415_v40  ;;  %4498 = vmatpush2.msra.mxu0 %v12417_v30 }
 0x73e   :  { %4428 = vmatprep.subr.mxu1 %v12412_v35  ;;  %4499 = vmatprep.subr.mxu0 %v12414_v24 }
 0x73f   :  { %4429 = vmatpush2.msra.mxu1 %v12411_v48  ;;  %4500 = vmatpush2.msra.mxu0 %v12413_v49  ;;  %v16966_v48 = vsub.f32 %v4554_v56, %v4554_v56 }
 0x740   :  { %4430 = vmatprep.subr.mxu1 %v12408_v42  ;;  %4501 = vmatprep.subr.mxu0 %v12410_v7  ;;  %v21507_v7 = vld [vmem:[#allocation23_spill] sm:$0xff] }
 0x741   :  { %4431 = vmatpush2.msra.mxu1 %v12407_v43  ;;  %4502 = vmatpush2.msra.mxu0 %v12409_v12  ;;  %21506 = vst [vmem:[#allocation42_spill] sm:$0xff] %v16966_v48  ;;  %v16969_v43 = vrot.slane %v558_v38, %v21507_v7  ;;  %v21509_v12 = vld [vmem:[#allocation25_spill] sm:$0xff]  ;;  %v16981_v62 = vand.u32 4294901760, %v16966_v48 }
 0x742   :  { %4432 = vmatprep.subr.mxu1 %v12404_v59  ;;  %4503 = vmatprep.subr.mxu0 %v12406_v60  ;;  %v16972_v59 = vrot.slane %v558_v38, %v21509_v12 }
 0x743   :  { %4433 = vmatpush2.msra.mxu1 %v12403_v32  ;;  %4504 = vmatpush2.msra.mxu0 %v12405_v13  ;;  %21508 = vst [vmem:[#allocation43_spill] sm:$0xff] %v16969_v43  ;;  %v21511_v13 = vld [vmem:[#allocation24_spill] sm:$0xff]  ;;  %21515 = vst [vmem:[#allocation47_spill] sm:$0xff] %v16981_v62 }
 0x744   :  { %4434 = vmatprep.subr.mxu1 %v12400_v55  ;;  %4505 = vmatprep.subr.mxu0 %v12402_v61  ;;  %v3571_v26 = vpop.f32.mrf.mxu1  ;;  %v3642_v34 = vpop.f32.mrf.mxu0  ;;  %21510 = vst [vmem:[#allocation44_spill] sm:$0xff] %v16972_v59  ;;  %v16975_v55 = vrot.slane %v558_v38, %v21511_v13  ;;  %v21513_v61 = vld [vmem:[#allocation26_spill] sm:$0xff] }
 0x745   :  { %4435 = vmatpush2.msra.mxu1 %v12399_v2  ;;  %4506 = vmatpush2.msra.mxu0 %v12401_v3  ;;  %v3572_v41 = vadd.f32 %v3571_v26, %v3429_v14  ;;  %v3643_v16 = vadd.f32 %v3642_v34, %v3500_v9  ;;  %v16978_v2 = vrot.slane %v558_v38, %v21513_v61 }
 0x746   :  { %4436 = vmatprep.subr.mxu1 %v12396_v18  ;;  %4507 = vmatprep.subr.mxu0 %v12398_v6  ;;  %v3573_v28 = vpop.f32.mrf.mxu1  ;;  %v3644_v22 = vpop.f32.mrf.mxu0  ;;  %21512 = vst [vmem:[#allocation45_spill] sm:$0xff] %v16975_v55  ;;  %v4626_v26 = vsub.f32 %v16966_v48, %v16981_v62 }
 0x747   :  { %4437 = vmatpush2.msra.mxu1 %v12395_v11  ;;  %4508 = vmatpush2.msra.mxu0 %v12397_v19  ;;  %v3574_v45 = vadd.f32 %v3573_v28, %v3431_v58  ;;  %v3645_v33 = vadd.f32 %v3644_v22, %v3502_v29  ;;  %21514 = vst [vmem:[#allocation46_spill] sm:$0xff] %v16978_v2  ;;  %v5021_v22 = vsel %vm4553_vm14, %v14883_v21, 0 }
 0x748   :  { %4438 = vmatprep.subr.mxu1 %v12392_v37  ;;  %4509 = vmatprep.subr.mxu0 %v12394_v20 }
 0x749   :  { %4439 = vmatpush2.msra.mxu1 %v12391_v51  ;;  %4510 = vmatpush2.msra.mxu0 %v12393_v53 }
 0x74a   :  { %4441 = vmatmul.mubr.f32.vlgmr.msra.gmra.mxu1 %v4370_v57  ;;  %4512 = vmatmul.mubr.f32.vlgmr.msra.gmra.mxu0 %v4370_v57 }
 0x74b   :  { %4622 = vmatprep.mubr.f32.mxu0 %v21479_v15  ;;  %4708 = vmatprep.mubr.f32.mxu1 %v21479_v15 }
 0x786   :  { %v3859_v36 = vpop.f32.mrf.mxu1  ;;  %v3930_v0 = vpop.f32.mrf.mxu0 }
 0x787   :  { %v3935_v46 = vadd.f32 %v3859_v36, %v3572_v41  ;;  %v3937_v8 = vadd.f32 %v3930_v0, %v3643_v16 }
 0x788   :  { %v3861_v50 = vpop.f32.mrf.mxu1  ;;  %v3932_v27 = vpop.f32.mrf.mxu0 }
 0x789   :  { %v3936_v40 = vadd.f32 %v3861_v50, %v3574_v45  ;;  %v3938_v30 = vadd.f32 %v3932_v27, %v3645_v33  ;;  %v16996_v50 = vand.u32 4294901760, %v4626_v26  ;;  %v16998_v27 = vsub.f32 %v5021_v22, %v5021_v22 }
 0x78b   :  { %21516 = vst [vmem:[#allocation48_spill] sm:$0xff] %v16996_v50  ;;  %21517 = vst [vmem:[#allocation49_spill] sm:$0xff] %v16998_v27  ;;  %v17006_v56 = vand.u32 4294901760, %v16998_v27 }
 0x78d   :  { %21518 = vst [vmem:[#allocation50_spill] sm:$0xff] %v17006_v56 }
 0x7c8   :  { %v4151_v44 = vpop.f32.mrf.mxu1  ;;  %v4222_v5 = vpop.f32.mrf.mxu0 }
 0x7c9   :  { %v4227_v49 = vadd.f32 %v4151_v44, %v3935_v46  ;;  %v4229_v42 = vadd.f32 %v4222_v5, %v3937_v8  ;;  %v5093_v46 = vsub.f32 %v16998_v27, %v17006_v56  ;;  %v5519_v8 = vstv %s13759_s9 }
 0x7ca   :  { %v4153_v35 = vpop.f32.mrf.mxu1  ;;  %v4224_v24 = vpop.f32.mrf.mxu0 }
 0x7cb   :  { %v4228_v3 = vadd.f32 %v4153_v35, %v3936_v40  ;;  %v4230_v63 = vadd.f32 %v4224_v24, %v3938_v30  ;;  %v21519_v40 = vld [vmem:[#allocation13_spill] sm:$0xff]  ;;  %v17020_v35 = vand.u32 4294901760, %v5093_v46  ;;  %v5538_v24 = vstv %s13761_s30 }
 0x7cc   :  { %v5521_v30 = vadd.f32 %v5519_v8, %v21519_v40 }
 0x7cd   :  { %21520 = vst [vmem:[#allocation13_spill] sm:$0xff] %v17020_v35 }
 0x80a   :  { %v4442_v60 = vpop.f32.mrf.mxu1  ;;  %v4513_v32 = vpop.f32.mrf.mxu0 }
 0x80b   :  { %v4518_v18 = vadd.f32 %v4442_v60, %v4227_v49  ;;  %v4520_v6 = vadd.f32 %v4513_v32, %v4229_v42  ;;  %v5525_v49 = vand.u32 2147483647, %v5521_v30  ;;  %v21521_v42 = vld [vmem:[#allocation17_spill] sm:$0xff]  ;;  %v21522_v32 = vld [vmem:[#allocation14_spill] sm:$0xff] }
 0x80c   :  { %v4444_v11 = vpop.f32.mrf.mxu1  ;;  %v4515_v19 = vpop.f32.mrf.mxu0  ;;  %v5543_v60 = vadd.f32 %v5538_v24, %v21521_v42 }
 0x80d   :  { %v4543_v37 = vadd.f32 %v16969_v43, %v4518_v18  ;;  %v4545_v20 = vadd.f32 %v16972_v59, %v4520_v6  ;;  %v4519_v23 = vadd.f32 %v4444_v11, %v4228_v3  ;;  %v4521_v51 = vadd.f32 %v4515_v19, %v4230_v63  ;;  %v21523_v63 = vld [vmem:[#allocation15_spill] sm:$0xff]  ;;  %v21524_v11 = vld [vmem:[#allocation18_spill] sm:$0xff] }
 0x80e   :  { %v5522_v3 = vadd.f32 %v5519_v8, %v21522_v32  ;;  %v5523_v18 = vadd.f32 %v5519_v8, %v21523_v63  ;;  %v5529_v6 = vsub.f32 1.0, %v5525_v49  ;;  %v5542_v19 = vadd.f32 %v5538_v24, %v21524_v11 }
 0x80f   :  { %v4547_v53 = vmax.f32 %v4543_v37, 0.0  ;;  %v4549_v25 = vmax.f32 %v4545_v20, 0.0  ;;  %v4544_v57 = vadd.f32 %v16975_v55, %v4519_v23  ;;  %v4546_v14 = vadd.f32 %v16978_v2, %v4521_v51  ;;  %v12464_v20 = vld [vmem:[%s21379_s1 + $0x38] sm:$0xf]  ;;  %v21525_v23 = vld [vmem:[#allocation16_spill] sm:$0xff] }
 0x810   :  { %v5547_v37 = vand.u32 2147483647, %v5543_v60  ;;  %v5524_v51 = vadd.f32 %v5519_v8, %v21525_v23 }
 0x811   :  { %v4551_v9 = vmax.f32 %v4547_v53, %v4549_v25  ;;  %v4548_v58 = vmax.f32 %v4544_v57, 0.0  ;;  %v4550_v29 = vmax.f32 %v4546_v14, 0.0  ;;  %v5526_v53 = vand.u32 2147483647, %v5522_v3  ;;  %v21526_v25 = vld [vmem:[#allocation19_spill] sm:$0xff] }
 0x812   :  { %v5541_v57 = vadd.f32 %v5538_v24, %v21526_v25  ;;  %v5527_v14 = vand.u32 2147483647, %v5523_v18  ;;  %v5551_v22 = vsub.f32 1.0, %v5547_v37 }
 0x813   :  { %v16989_v34 = vand.u32 4294901760, %v4551_v9  ;;  %v4552_v28 = vmax.f32 %v4548_v58, %v4550_v29  ;;  %v5533_v58 = vmax.f32 %v5529_v6, 0.0  ;;  %v21527_v29 = vld [vmem:[#allocation20_spill] sm:$0xff] }
 0x814   :  { %v5540_v26 = vadd.f32 %v5538_v24, %v21527_v29 }
 0x815   :  { %v4671_v36 = vsub.f32 %v4551_v9, %v16989_v34  ;;  %v16994_v0 = vand.u32 4294901760, %v4552_v28  ;;  %v12463_v9 = vld [vmem:[%s21379_s1 + $0x30] sm:$0xff] }
 0x817   :  { %v4665_v44 = vsub.f32 %v4552_v28, %v16994_v0  ;;  %4587 = vmatprep.subr.mxu0 %v16994_v0  ;;  %v4672_v5 = vand.u32 4294901760, %v4671_v36  ;;  %v5546_v28 = vand.u32 2147483647, %v5542_v19 }
 0x818   :  { %4589 = vmatpush1.msra.mxu0 %v16989_v34 }
 0x819   :  { %4628 = vmatmul.mubr.f32.vlgmr.msra.gmra.mxu0 %v16996_v50  ;;  %4748 = vmatprep.subr.mxu0 %v4665_v44  ;;  %v4666_v41 = vand.u32 4294901760, %v4665_v44  ;;  %v4673_v16 = vsub.f32 %v4671_v36, %v4672_v5 }
 0x81a   :  { %4751 = vmatpush1.msra.mxu0 %v4671_v36  ;;  %4784 = vmatprep.mubr.f32.mxu0 %v21479_v15 }
 0x81b   :  { %4902 = vmatprep.subr.mxu0 %v4666_v41  ;;  %v4667_v45 = vsub.f32 %v4665_v44, %v4666_v41  ;;  %v4674_v38 = vand.u32 4294901760, %v4673_v16  ;;  %v5531_v16 = vsub.f32 1.0, %v5527_v14 }
 0x81d   :  { %4787 = vmatmul.mubr.f32.vlgmr.msra.gmra.mxu0 %v16966_v48  ;;  %v4668_v33 = vand.u32 4294901760, %v4667_v45  ;;  %v12461_v45 = vld [vmem:[%s21379_s1 + $0x20] sm:$0xff]  ;;  %v5535_v30 = vmax.f32 %v5531_v16, 0.0 }
 0x81e   :  { %4906 = vmatpush1.msra.mxu0 %v4672_v5  ;;  %4939 = vmatprep.mubr.f32.mxu0 %v21479_v15 }
 0x81f   :  { %5054 = vmatprep.subr.mxu0 %v16994_v0  ;;  %4669 = vmatprep.subr.mxu1 %v4668_v33 }
 0x820   :  { %4675 = vmatpush1.msra.mxu1 %v4674_v38 }
 0x821   :  { %12455 = vmatmul.mubr.msk.f32.vlgmr.msra.gmra.mxu1 %vm4553_vm14, %v21496_v1  ;;  %4824 = vmatprep.subr.mxu1 %v16994_v0 }
 0x822   :  { %12456 = vmatmul.mubr.msk.f32.vlgmr.msra.gmra.mxu0 %vm4553_vm14, %v21496_v1  ;;  %4826 = vmatpush1.msra.mxu1 %v16989_v34 }
 0x823   :  { %5056 = vmatpush1.msra.mxu0 %v16989_v34  ;;  %4978 = vmatprep.subr.mxu1 %v16994_v0 }
 0x824   :  { %5215 = vmatprep.subr.mxu0 %v4665_v44  ;;  %4859 = vmatprep.mubr.f32.mxu1 %v21479_v15  ;;  %v5528_v44 = vand.u32 2147483647, %v5524_v51 }
 0x825   :  { %5089 = vmatprep.mubr.f32.mxu0 %v21479_v15  ;;  %4863 = vmatmul.mubr.f32.vlgmr.msra.gmra.mxu1 %v16981_v62 }
 0x826   :  { %4980 = vmatpush1.msra.mxu1 %v16989_v34  ;;  %5095 = vmatmul.mubr.f32.vlgmr.msra.gmra.mxu0 %v17020_v35  ;;  %v5532_v46 = vsub.f32 1.0, %v5528_v44 }
 0x827   :  { %5218 = vmatpush1.msra.mxu0 %v4671_v36  ;;  %5136 = vmatprep.subr.mxu1 %v4668_v33  ;;  %v12462_v36 = vld [vmem:[%s21379_s1 + $0x28] sm:$0xff]  ;;  %v5544_v33 = vand.u32 2147483647, %v5540_v26  ;;  %s13768_s1 = scalar_lea.vmem %s11783_s21, 32 }
 0x828   :  { %5369 = vmatprep.subr.mxu0 %v4666_v41  ;;  %5013 = vmatprep.mubr.f32.mxu1 %v21479_v15  ;;  %v5545_v41 = vand.u32 2147483647, %v5541_v57  ;;  %p13769_p0 = scmp.ne.s32.totalorder %s11783_s21, %s13768_s1  ;;  %p13774_p2 = scmp.lt.s32.totalorder %s13768_s1, %s13768_s1 }
 0x829   :  { %5251 = vmatprep.mubr.f32.mxu0 %v21479_v15  ;;  %12457 = vmatmul.mubr.msk.f32.vlgmr.msra.gmra.mxu1 %vm4553_vm14, %v21496_v1  ;;  %v5548_v49 = vsub.f32 1.0, %v5544_v33 }
 0x82a   :  { %5142 = vmatpush1.msra.mxu1 %v4674_v38  ;;  %5254 = vmatmul.mubr.f32.vlgmr.msra.gmra.mxu0 %v16998_v27  ;;  %v5550_v38 = vsub.f32 1.0, %v5546_v28  ;;  %v5549_v40 = vsub.f32 1.0, %v5545_v41  ;;  %p13775_p3 = por %p13774_p2, %p13773_p1 }
 0x82b   :  { %5373 = vmatpush1.msra.mxu0 %v4672_v5  ;;  %5291 = vmatprep.subr.mxu1 %v16994_v0  ;;  %v5530_v5 = vsub.f32 1.0, %v5526_v53  ;;  %v5552_v60 = vmax.f32 %v5548_v49, 0.0 }
 0x82c   :  { %5175 = vmatprep.mubr.f32.mxu1 %v21479_v15  ;;  %5406 = vmatprep.mubr.f32.mxu0 %v21479_v15  ;;  %v5554_v24 = vmax.f32 %v5550_v38, 0.0  ;;  %v5553_v42 = vmax.f32 %v5549_v40, 0.0  ;;  %p13776_p4 = pnand %p13775_p3, %p13769_p0 }
 0x82d   :  { %13726 = vmatprep.subr.msk.mxu0 %vm619_vm5, %v12464_v20  ;;  %12458 = vmatmul.mubr.msk.f32.vlgmr.msra.gmra.mxu1 %vm4553_vm14, %v14883_v21  ;;  %v5534_v8 = vmax.f32 %v5530_v5, 0.0 }
 0x82e   :  { %5293 = vmatpush1.msra.mxu1 %v16989_v34  ;;  %12459 = vmatmul.mubr.msk.f32.vlgmr.msra.gmra.mxu0 %vm4553_vm14, %v14883_v21 }
 0x82f   :  { %13727 = vmatpush3.msk.msra.mxu0 %vm619_vm5, %v12464_v20  ;;  %5445 = vmatprep.subr.mxu1 %v16994_v0  ;;  %v5555_v0 = vmax.f32 %v5551_v22, 0.0 }
 0x830   :  { %13728 = vmatprep.subr.mxu0 %v12463_v9  ;;  %13734 = vmatprep.mubr.msk.f32.mxu0 %vm606_vm6, %v5533_v58 }
 0x831   :  { %13729 = vmatpush3.msra.mxu0 %v12463_v9  ;;  %5326 = vmatprep.mubr.f32.mxu1 %v21479_v15 }
 0x832   :  { %13730 = vmatprep.subr.mxu0 %v12462_v36  ;;  %5330 = vmatmul.mubr.f32.vlgmr.msra.gmra.mxu1 %v17006_v56 }
 0x833   :  { %5447 = vmatpush1.msra.mxu1 %v16989_v34  ;;  %13731 = vmatpush3.msra.mxu0 %v12462_v36  ;;  %v5536_v34 = vmax.f32 %v5532_v46, 0.0 }
 0x834   :  { %13732 = vmatprep.subr.mxu0 %v12461_v45  ;;  %13740 = vmatprep.subr.msk.mxu1 %vm619_vm5, %v5555_v0 }
 0x835   :  { %13733 = vmatpush3.msra.mxu0 %v12461_v45  ;;  %5480 = vmatprep.mubr.f32.mxu1 %v21479_v15 }
 0x836   :  { %13735 = vmatmul.mubr.msk.f32.vlgmr.msra.gmra.mxu0 %vm606_vm6, %v5534_v8  ;;  %12460 = vmatmul.mubr.msk.f32.vlgmr.msra.gmra.mxu1 %vm4553_vm14, %v14883_v21 }
 0x837   :  { %13737 = vmatprep.mubr.msk.f32.mxu0 %vm606_vm6, %v5535_v30  ;;  %13741 = vmatpush3.msk.msra.mxu1 %vm619_vm5, %v5555_v0 }
 0x838   :  { %13742 = vmatprep.subr.mxu1 %v5554_v24 }
 0x839   :  { %13743 = vmatpush3.msra.mxu1 %v5554_v24 }
 0x83a   :  { %13738 = vmatmul.mubr.msk.f32.gmra.mxu0 %vm606_vm6, %v5536_v34  ;;  %13744 = vmatprep.subr.mxu1 %v5553_v42 }
 0x83b   :  { %13745 = vmatpush3.msra.mxu1 %v5553_v42  ;;  %5888 = vmatprep.mubr.f32.mxu0 %v21479_v15 }
 0x83c   :  { %13746 = vmatprep.subr.mxu1 %v5552_v60 }
 0x83d   :  { %13747 = vmatpush3.msra.mxu1 %v5552_v60 }
 0x8d9   :  { %v4629_v32 = vpop.f32.mrf.mxu0 }
 0x8db   :  { %v4631_v3 = vpop.f32.mrf.mxu0 }
 0x8dd   :  { %v4788_v63 = vpop.f32.mrf.mxu0 }
 0x8df   :  { %v4790_v18 = vpop.f32.mrf.mxu0 }
 0x8e1   :  { %v4711_v6 = vpop.f32.mrf.mxu1 }
 0x8e2   :  { %v4942_v11 = vpop.f32.mrf.mxu0  ;;  %v4712_v25 = vadd.f32 %v4711_v6, %v4629_v32 }
 0x8e3   :  { %v4713_v19 = vpop.f32.mrf.mxu1 }
 0x8e4   :  { %v4944_v37 = vpop.f32.mrf.mxu0  ;;  %v4714_v57 = vadd.f32 %v4713_v19, %v4631_v3  ;;  %v4789_v26 = vadd.f32 %v4788_v63, %v4712_v25  ;;  %v21528_v25 = vlaneseq }
 0x8e5   :  { %v4864_v20 = vpop.f32.mrf.mxu1 }
 0x8e6   :  { %v5096_v23 = vpop.f32.mrf.mxu0  ;;  %v4791_v28 = vadd.f32 %v4790_v18, %v4714_v57  ;;  %v4865_v45 = vadd.f32 %v4864_v20, %v4789_v26  ;;  %vm17083_vm15 = vcmp.lt.s32.totalorder %v21528_v25, 256  ;;  %v21529_v57 = vmov 0  ;;  %v12488_v26 = vld [vmem:[%s21384_s6 + $0xe8] sm:$0xf]  ;;  %v5774_v25 = vld [vmem:[%s21384_s6 + $0x30] sm:$0xff] }
 0x8e7   :  { %v4866_v51 = vpop.f32.mrf.mxu1  ;;  %v21530_v57 = vsel %vm17083_vm15, 4294967295, %v21529_v57  ;;  %12491 = vmatprep.subr.msk.mxu0 %vm619_vm5, %v12488_v26  ;;  %v5770_v26 = vld [vmem:[%s21384_s6 + $0x10] sm:$0xff] }
 0x8e8   :  { %v5098_v53 = vpop.f32.mrf.mxu0  ;;  %v4867_v33 = vadd.f32 %v4866_v51, %v4791_v28  ;;  %v4943_v30 = vadd.f32 %v4942_v11, %v4865_v45  ;;  %21531 = vst [vmem:[#allocation17_spill] sm:$0xff] %v21530_v57  ;;  %v12490_v28 = vld [vmem:[%s21384_s6 + $0xf8] sm:$0xf]  ;;  %v12480_v45 = vld [vmem:[%s21384_s6 + $0xa8] sm:$0xff] }
 0x8e9   :  { %v5016_v14 = vpop.f32.mrf.mxu1  ;;  %12496 = vmatprep.subr.msk.mxu1 %vm619_vm5, %v12490_v28 }
 0x8ea   :  { %v5255_v9 = vpop.f32.mrf.mxu0  ;;  %v4945_v24 = vadd.f32 %v4944_v37, %v4867_v33  ;;  %v5017_v6 = vadd.f32 %v5016_v14, %v4943_v30  ;;  %v12482_v33 = vld [vmem:[%s21384_s6 + $0xb8] sm:$0xff]  ;;  %v12477_v30 = vld [vmem:[%s21384_s6 + $0x90] sm:$0xff] }
 0x8eb   :  { %v5018_v58 = vpop.f32.mrf.mxu1 }
 0x8ec   :  { %v5257_v29 = vpop.f32.mrf.mxu0  ;;  %v5019_v19 = vadd.f32 %v5018_v58, %v4945_v24  ;;  %v5781_v24 = vld [vmem:[%s21384_s6 + $0x68] sm:$0xf] }
 0x8ed   :  { %v5178_v22 = vpop.f32.mrf.mxu1 }
 0x8ee   :  { %v5179_v36 = vadd.f32 %v5178_v22, %v5096_v23  ;;  %v5409_v5 = vpop.f32.mrf.mxu0  ;;  %v12487_v22 = vld [vmem:[%s21384_s6 + $0xe0] sm:$0xf] }
 0x8ef   :  { %v5180_v44 = vpop.f32.mrf.mxu1  ;;  %12492 = vmatpush1.msk.msra.mxu0 %vm619_vm5, %v12487_v22  ;;  %v12524_v22 = vld [vmem:[%s21384_s6 + $0x168] sm:$0xf] }
 0x8f0   :  { %v5181_v41 = vadd.f32 %v5180_v44, %v5098_v53  ;;  %v5256_v16 = vadd.f32 %v5255_v9, %v5179_v36  ;;  %v5411_v8 = vpop.f32.mrf.mxu0  ;;  %v12489_v36 = vld [vmem:[%s21384_s6 + $0xf0] sm:$0xf]  ;;  %v12484_v44 = vld [vmem:[%s21384_s6 + $0xc8] sm:$0xff] }
 0x8f1   :  { %5850 = vmatprep.subr.mxu0 %v12484_v44  ;;  %v12523_v44 = vld [vmem:[%s21384_s6 + $0x160] sm:$0xf] }
 0x8f2   :  { %v5331_v0 = vpop.f32.mrf.mxu1  ;;  %v5258_v38 = vadd.f32 %v5257_v29, %v5181_v41  ;;  %v12483_v41 = vld [vmem:[%s21384_s6 + $0xc0] sm:$0xff] }
 0x8f3   :  { %v5332_v46 = vadd.f32 %v5331_v0, %v5256_v16  ;;  %v12485_v16 = vld [vmem:[%s21384_s6 + $0xd0] sm:$0xff]  ;;  %5851 = vmatpush1.msra.mxu0 %v12483_v41  ;;  %v12479_v0 = vld [vmem:[%s21384_s6 + $0xa0] sm:$0xff]  ;;  %v12520_v41 = vld [vmem:[%s21384_s6 + $0x148] sm:$0xff] }
 0x8f4   :  { %v5333_v40 = vpop.f32.mrf.mxu1  ;;  %5852 = vmatprep.subr.mxu0 %v12480_v45 }
 0x8f5   :  { %v5334_v49 = vadd.f32 %v5333_v40, %v5258_v38  ;;  %v5410_v34 = vadd.f32 %v5409_v5, %v5332_v46  ;;  %v12486_v5 = vld [vmem:[%s21384_s6 + $0xd8] sm:$0xff]  ;;  %v12481_v38 = vld [vmem:[%s21384_s6 + $0xb0] sm:$0xff]  ;;  %v12476_v46 = vld [vmem:[%s21384_s6 + $0x88] sm:$0xff]  ;;  %5853 = vmatpush1.msra.mxu0 %v12479_v0 }
 0x8f6   :  { %v13736_v42 = vpop.f32.mrf.mxu0  ;;  %v5483_v60 = vpop.f32.mrf.mxu1  ;;  %v12475_v40 = vld [vmem:[%s21384_s6 + $0x80] sm:$0xff]  ;;  %5854 = vmatprep.subr.mxu0 %v12476_v46  ;;  %v12521_v0 = vld [vmem:[%s21384_s6 + $0x150] sm:$0xff]  ;;  %v12518_v46 = vld [vmem:[%s21384_s6 + $0x138] sm:$0xff] }
 0x8f7   :  { %v5484_v32 = vadd.f32 %v5483_v60, %v5410_v34  ;;  %v5412_v3 = vadd.f32 %v5411_v8, %v5334_v49  ;;  %v12478_v8 = vld [vmem:[%s21384_s6 + $0x98] sm:$0xff]  ;;  %5855 = vmatpush1.msra.mxu0 %v12475_v40  ;;  %v12515_v40 = vld [vmem:[%s21384_s6 + $0x120] sm:$0xff] }
 0x8f8   :  { %v5642_v63 = vpop.f32.mrf.mxu0  ;;  %v5485_v18 = vpop.f32.mrf.mxu1  ;;  %v5783_v49 = vld [vmem:[%s21384_s6 + $0x78] sm:$0xf]  ;;  %12501 = vmatprep.subr.msk.mxu0 %vm619_vm5, %v5781_v24  ;;  %v12512_v24 = vld [vmem:[%s21384_s6 + $0x108] sm:$0xff] }
 0x8f9   :  { %v5486_v23 = vadd.f32 %v5485_v18, %v5412_v3  ;;  %13748 = vmatprep.mubr.msk.f32.mxu1 %vm606_vm6, %v5642_v63  ;;  %v5488_v51 = vmax.f32 %v5017_v6, %v5484_v32  ;;  %v5780_v63 = vld [vmem:[%s21384_s6 + $0x60] sm:$0xf]  ;;  %v5782_v18 = vld [vmem:[%s21384_s6 + $0x70] sm:$0xf]  ;;  %v5777_v6 = vld [vmem:[%s21384_s6 + $0x48] sm:$0xff] }
 0x8fa   :  { %v13739_v20 = vpop.f32.mrf.mxu0  ;;  %13749 = vmatmul.mubr.msk.f32.vlgmr.msra.gmra.mxu1 %vm606_vm6, %v13736_v42 }
 0x8fb   :  { %v5489_v53 = vmax.f32 %v5019_v19, %v5486_v23  ;;  %12497 = vmatpush1.msk.msra.mxu1 %vm619_vm5, %v12489_v36  ;;  %v5779_v19 = vld [vmem:[%s21384_s6 + $0x58] sm:$0xff] }
 0x8fc   :  { %v5652_v11 = vpop.f32.mrf.mxu0  ;;  %5933 = vmatprep.subr.mxu1 %v12486_v5  ;;  %v12526_v36 = vld [vmem:[%s21384_s6 + $0x178] sm:$0xf]  ;;  %v12525_v5 = vld [vmem:[%s21384_s6 + $0x170] sm:$0xf] }
 0x8fd   :  { %v5492_v37 = vcombine.low %v5488_v51, %v5489_v53  ;;  %13751 = vmatprep.mubr.msk.f32.mxu1 %vm606_vm6, %v5652_v11  ;;  %5934 = vmatpush1.msra.mxu1 %v12485_v16  ;;  %v5778_v51 = vld [vmem:[%s21384_s6 + $0x50] sm:$0xff]  ;;  %v5773_v53 = vld [vmem:[%s21384_s6 + $0x28] sm:$0xff]  ;;  %v5775_v11 = vld [vmem:[%s21384_s6 + $0x38] sm:$0xff] }
 0x8fe   :  { %13752 = vmatmul.mubr.msk.f32.gmra.mxu1 %vm606_vm6, %v13739_v20  ;;  %5935 = vmatprep.subr.mxu1 %v12482_v33  ;;  %v5776_v20 = vld [vmem:[%s21384_s6 + $0x40] sm:$0xff]  ;;  %v12522_v16 = vld [vmem:[%s21384_s6 + $0x158] sm:$0xff] }
 0x8ff   :  { %5494 = vst [vmem:[#allocation5] sm:$0xff] %v5492_v37  ;;  %5971 = vmatprep.mubr.f32.mxu1 %v21479_v15  ;;  %5936 = vmatpush1.msra.mxu1 %v12481_v38  ;;  %v5772_v37 = vld [vmem:[%s21384_s6 + $0x20] sm:$0xff]  ;;  %v12516_v38 = vld [vmem:[%s21384_s6 + $0x128] sm:$0xff] }
 0x900   :  { %5937 = vmatprep.subr.mxu1 %v12478_v8  ;;  %v12519_v33 = vld [vmem:[%s21384_s6 + $0x140] sm:$0xff] }
 0x901   :  { %5938 = vmatpush1.msra.mxu1 %v12477_v30  ;;  %v12517_v30 = vld [vmem:[%s21384_s6 + $0x130] sm:$0xff] }
 0x902   :  { %12506 = vmatprep.subr.msk.mxu1 %vm619_vm5, %v5783_v49  ;;  %v12514_v49 = vld [vmem:[%s21384_s6 + $0x118] sm:$0xff] }
 0x906   :  { %v5495_v14 = vld [vmem:[#allocation5] ss:$4 sm:$0x3]  ;;  %v5502_v9 = vld [vmem:[#allocation5 + $0x1] ss:$4 sm:$0x3] }
 0x907   :  { %5500 = vst.msk [vmem:[#allocation6] ss:$2 sm:$0x3] %vm17083_vm15, %v5495_v14  ;;  %5504 = vst.msk [vmem:[#allocation6 + $0x4] ss:$2 sm:$0x3] %vm17083_vm15, %v5502_v9 }
 0x908   :  { %v5506_v58 = vld [vmem:[#allocation5 + $0x2] ss:$4 sm:$0x3]  ;;  %v5510_v29 = vld [vmem:[#allocation5 + $0x3] ss:$4 sm:$0x3] }
 0x909   :  { %5508 = vst.msk [vmem:[#allocation6 + $0x8] ss:$2 sm:$0x3] %vm17083_vm15, %v5506_v58  ;;  %5512 = vst.msk [vmem:[#allocation6 + $0xc] ss:$2 sm:$0x3] %vm17083_vm15, %v5510_v29 }
 0x90a   :  { %v5769_v9 = vld [vmem:[%s21384_s6 + $0x8] sm:$0xff]  ;;  %v5771_v58 = vld [vmem:[%s21384_s6 + $0x18] sm:$0xff]  ;;  %v5768_v29 = vld [vmem:[%s21384_s6] sm:$0xff] }
 0x9ba   :  { %v13750_v34 = vpop.f32.mrf.mxu1 }
 0x9bb   :  { %5762 = vst.msk [vmem:[#allocation3 + $0x8] sm:$0xff] %vm606_vm6, %v13750_v34  ;;  %v12511_v34 = vld [vmem:[%s21384_s6 + $0x100] sm:$0xff] }
 0x9bc   :  { %v5742_v42 = vpop.f32.mrf.mxu1 }
 0x9bd   :  { %5761 = vst.msk [vmem:[#allocation3] sm:$0xff] %vm606_vm6, %v5742_v42  ;;  %v12513_v42 = vld [vmem:[%s21384_s6 + $0x110] sm:$0xff] }
 0x9be   :  { %v13753_v60 = vpop.f32.mrf.mxu1 }
 0x9bf   :  { %5764 = vst.msk [vmem:[#allocation3 + $0x18] sm:$0xf] %vm811_vm7, %v13753_v60 }
 0x9c0   :  { %v5752_v32 = vpop.f32.mrf.mxu1 }
 0x9c1   :  { %5763 = vst.msk [vmem:[#allocation3 + $0x10] sm:$0xff] %vm606_vm6, %v5752_v32  ;;  %v12550_v32 = vld [vmem:[%s21384_s6 + $0x1e8] sm:$0xf] }
 0x9c2   :  { %v5766_v45 = vld [vmem:[#allocation3 + $0x8] sm:$0xff] }
 0x9c4   :  { %v5784_v3 = vld [vmem:[#allocation3 + $0x1] sm:$0xff] }
 0x9c5   :  { %12493 = vmatmul.mubr.msk.f32.vlgmr.msra.gmra.mxu0 %vm606_vm6, %v5784_v3  ;;  %12498 = vmatmul.mubr.msk.f32.vlgmr.msra.gmra.mxu1 %vm606_vm6, %v5784_v3  ;;  %v5765_v28 = vld [vmem:[#allocation3] sm:$0xff]  ;;  %v12552_v3 = vld [vmem:[%s21384_s6 + $0x1f8] sm:$0xf] }
 0x9c6   :  { %5894 = vmatprep.mubr.f32.mxu0 %v21479_v15  ;;  %5977 = vmatprep.mubr.f32.mxu1 %v21479_v15  ;;  %v6177_v60 = vld [vmem:[#allocation3 + $0x2] sm:$0xff] }
 0x9c7   :  { %12502 = vmatpush1.msk.msra.mxu0 %vm619_vm5, %v5780_v63  ;;  %12507 = vmatpush1.msk.msra.mxu1 %vm619_vm5, %v5782_v18  ;;  %v12549_v63 = vld [vmem:[%s21384_s6 + $0x1e0] sm:$0xf]  ;;  %v12551_v18 = vld [vmem:[%s21384_s6 + $0x1f0] sm:$0xf] }
 0x9c8   :  { %v5785_v23 = vld [vmem:[#allocation3 + $0x9] sm:$0xff]  ;;  %6037 = vmatprep.subr.mxu0 %v5777_v6  ;;  %6120 = vmatprep.subr.mxu1 %v5779_v19  ;;  %v5786_v14 = vld [vmem:[#allocation3 + $0x11] sm:$0xff] }
 0x9c9   :  { %12494 = vmatmul.mubr.msk.f32.gmra.mxu0 %vm606_vm6, %v5785_v23  ;;  %12499 = vmatmul.mubr.msk.f32.gmra.mxu1 %vm606_vm6, %v5785_v23  ;;  %v5767_v8 = vld [vmem:[#allocation3 + $0x10] sm:$0xff]  ;;  %v12546_v6 = vld [vmem:[%s21384_s6 + $0x1c8] sm:$0xff] }
 0x9ca   :  { %5900 = vmatprep.mubr.f32.mxu0 %v21479_v15  ;;  %5983 = vmatprep.mubr.f32.mxu1 %v21479_v15  ;;  %v12548_v19 = vld [vmem:[%s21384_s6 + $0x1d8] sm:$0xff]  ;;  %v6178_v23 = vld [vmem:[#allocation3 + $0xa] sm:$0xff] }
 0x9cb   :  { %6038 = vmatpush1.msra.mxu0 %v5776_v20  ;;  %6121 = vmatpush1.msra.mxu1 %v5778_v51  ;;  %v12545_v20 = vld [vmem:[%s21384_s6 + $0x1c0] sm:$0xff]  ;;  %v12547_v51 = vld [vmem:[%s21384_s6 + $0x1d0] sm:$0xff] }
 0x9cc   :  { %6039 = vmatprep.subr.mxu0 %v5773_v53  ;;  %6122 = vmatprep.subr.mxu1 %v5775_v11  ;;  %v12542_v53 = vld [vmem:[%s21384_s6 + $0x1a8] sm:$0xff]  ;;  %v12544_v11 = vld [vmem:[%s21384_s6 + $0x1b8] sm:$0xff] }
 0x9cd   :  { %12495 = vmatmul.mubr.msk.f32.gmra.mxu0 %vm606_vm6, %v5786_v14  ;;  %12500 = vmatmul.mubr.msk.f32.gmra.mxu1 %vm606_vm6, %v5786_v14  ;;  %v12543_v14 = vld [vmem:[%s21384_s6 + $0x1b0] sm:$0xff] }
 0x9ce   :  { %6040 = vmatpush1.msra.mxu0 %v5772_v37  ;;  %6123 = vmatpush1.msra.mxu1 %v5774_v25  ;;  %v6179_v37 = vld [vmem:[#allocation3 + $0x12] sm:$0xff]  ;;  %v12541_v25 = vld [vmem:[%s21384_s6 + $0x1a0] sm:$0xff] }
 0x9cf   :  { %6041 = vmatprep.subr.mxu0 %v5769_v9  ;;  %6124 = vmatprep.subr.mxu1 %v5771_v58  ;;  %v12538_v9 = vld [vmem:[%s21384_s6 + $0x188] sm:$0xff]  ;;  %v12540_v58 = vld [vmem:[%s21384_s6 + $0x198] sm:$0xff] }
 0x9d0   :  { %6042 = vmatpush1.msra.mxu0 %v5768_v29  ;;  %6075 = vmatprep.mubr.f32.mxu0 %v21479_v15  ;;  %v12537_v29 = vld [vmem:[%s21384_s6 + $0x180] sm:$0xff] }
 0x9d1   :  { %6125 = vmatpush1.msra.mxu1 %v5770_v26  ;;  %6158 = vmatprep.mubr.f32.mxu1 %v21479_v15  ;;  %v12539_v26 = vld [vmem:[%s21384_s6 + $0x190] sm:$0xff] }
 0x9d2   :  { %12503 = vmatmul.mubr.msk.f32.vlgmr.msra.gmra.mxu0 %vm606_vm6, %v5765_v28  ;;  %12508 = vmatmul.mubr.msk.f32.vlgmr.msra.gmra.mxu1 %vm606_vm6, %v5765_v28  ;;  %v6395_v28 = vld [vmem:[#allocation3 + $0x3] sm:$0xff] }
 0x9d3   :  { %6081 = vmatprep.mubr.f32.mxu0 %v21479_v15  ;;  %6164 = vmatprep.mubr.f32.mxu1 %v21479_v15 }
 0x9d4   :  { %12527 = vmatprep.subr.msk.mxu0 %vm619_vm5, %v12524_v22  ;;  %12532 = vmatprep.subr.msk.mxu1 %vm619_vm5, %v12526_v36  ;;  %v12576_v22 = vld [vmem:[%s21384_s6 + $0x268] sm:$0xf]  ;;  %v12578_v36 = vld [vmem:[%s21384_s6 + $0x278] sm:$0xf] }
 0x9d5   :  { %12528 = vmatpush1.msk.msra.mxu0 %vm619_vm5, %v12523_v44  ;;  %12533 = vmatpush1.msk.msra.mxu1 %vm619_vm5, %v12525_v5  ;;  %v12575_v44 = vld [vmem:[%s21384_s6 + $0x260] sm:$0xf]  ;;  %v12577_v5 = vld [vmem:[%s21384_s6 + $0x270] sm:$0xf] }
 0x9d6   :  { %12504 = vmatmul.mubr.msk.f32.gmra.mxu0 %vm606_vm6, %v5766_v45  ;;  %12509 = vmatmul.mubr.msk.f32.gmra.mxu1 %vm606_vm6, %v5766_v45  ;;  %v6396_v45 = vld [vmem:[#allocation3 + $0xb] sm:$0xff] }
 0x9d7   :  { %6243 = vmatprep.subr.mxu0 %v12520_v41  ;;  %6326 = vmatprep.subr.mxu1 %v12522_v16  ;;  %v12572_v41 = vld [vmem:[%s21384_s6 + $0x248] sm:$0xff]  ;;  %v12574_v16 = vld [vmem:[%s21384_s6 + $0x258] sm:$0xff] }
 0x9d8   :  { %6087 = vmatprep.mubr.f32.mxu0 %v21479_v15  ;;  %6170 = vmatprep.mubr.f32.mxu1 %v21479_v15 }
 0x9d9   :  { %6244 = vmatpush1.msra.mxu0 %v12519_v33  ;;  %6327 = vmatpush1.msra.mxu1 %v12521_v0  ;;  %v12571_v33 = vld [vmem:[%s21384_s6 + $0x240] sm:$0xff]  ;;  %v12573_v0 = vld [vmem:[%s21384_s6 + $0x250] sm:$0xff] }
 0x9da   :  { %12505 = vmatmul.mubr.msk.f32.gmra.mxu0 %vm606_vm6, %v5767_v8  ;;  %12510 = vmatmul.mubr.msk.f32.gmra.mxu1 %vm606_vm6, %v5767_v8  ;;  %v6397_v8 = vld [vmem:[#allocation3 + $0x13] sm:$0xff] }
 0x9db   :  { %6245 = vmatprep.subr.mxu0 %v12516_v38  ;;  %6328 = vmatprep.subr.mxu1 %v12518_v46  ;;  %v12568_v38 = vld [vmem:[%s21384_s6 + $0x228] sm:$0xff]  ;;  %v12570_v46 = vld [vmem:[%s21384_s6 + $0x238] sm:$0xff] }
 0x9dc   :  { %6246 = vmatpush1.msra.mxu0 %v12515_v40  ;;  %6329 = vmatpush1.msra.mxu1 %v12517_v30  ;;  %v12567_v40 = vld [vmem:[%s21384_s6 + $0x220] sm:$0xff]  ;;  %v12569_v30 = vld [vmem:[%s21384_s6 + $0x230] sm:$0xff] }
 0x9dd   :  { %6247 = vmatprep.subr.mxu0 %v12512_v24  ;;  %6330 = vmatprep.subr.mxu1 %v12514_v49  ;;  %v12564_v24 = vld [vmem:[%s21384_s6 + $0x208] sm:$0xff]  ;;  %v12566_v49 = vld [vmem:[%s21384_s6 + $0x218] sm:$0xff] }
 0x9de   :  { %6248 = vmatpush1.msra.mxu0 %v12511_v34  ;;  %6281 = vmatprep.mubr.f32.mxu0 %v21479_v15  ;;  %v12563_v34 = vld [vmem:[%s21384_s6 + $0x200] sm:$0xff] }
 0x9df   :  { %6331 = vmatpush1.msra.mxu1 %v12513_v42  ;;  %6364 = vmatprep.mubr.f32.mxu1 %v21479_v15  ;;  %v12565_v42 = vld [vmem:[%s21384_s6 + $0x210] sm:$0xff] }
 0x9e0   :  { %12529 = vmatmul.mubr.msk.f32.vlgmr.msra.gmra.mxu0 %vm606_vm6, %v6177_v60  ;;  %12534 = vmatmul.mubr.msk.f32.vlgmr.msra.gmra.mxu1 %vm606_vm6, %v6177_v60  ;;  %v6613_v60 = vld [vmem:[#allocation3 + $0x4] sm:$0xff] }
 0x9e1   :  { %6287 = vmatprep.mubr.f32.mxu0 %v21479_v15  ;;  %6370 = vmatprep.mubr.f32.mxu1 %v21479_v15 }
 0x9e2   :  { %12553 = vmatprep.subr.msk.mxu0 %vm619_vm5, %v12550_v32  ;;  %12558 = vmatprep.subr.msk.mxu1 %vm619_vm5, %v12552_v3  ;;  %v6614_v32 = vld [vmem:[#allocation3 + $0xc] sm:$0xff]  ;;  %v6615_v3 = vld [vmem:[#allocation3 + $0x14] sm:$0xff] }
 0x9e3   :  { %12554 = vmatpush1.msk.msra.mxu0 %vm619_vm5, %v12549_v63  ;;  %12559 = vmatpush1.msk.msra.mxu1 %vm619_vm5, %v12551_v18 }
 0x9e4   :  { %12530 = vmatmul.mubr.msk.f32.gmra.mxu0 %vm606_vm6, %v6178_v23  ;;  %12535 = vmatmul.mubr.msk.f32.gmra.mxu1 %vm606_vm6, %v6178_v23 }
 0x9e5   :  { %6461 = vmatprep.subr.mxu0 %v12546_v6  ;;  %6544 = vmatprep.subr.mxu1 %v12548_v19 }
 0x9e6   :  { %6293 = vmatprep.mubr.f32.mxu0 %v21479_v15  ;;  %6376 = vmatprep.mubr.f32.mxu1 %v21479_v15 }
 0x9e7   :  { %6462 = vmatpush1.msra.mxu0 %v12545_v20  ;;  %6545 = vmatpush1.msra.mxu1 %v12547_v51 }
 0x9e8   :  { %12531 = vmatmul.mubr.msk.f32.gmra.mxu0 %vm606_vm6, %v6179_v37  ;;  %12536 = vmatmul.mubr.msk.f32.gmra.mxu1 %vm606_vm6, %v6179_v37 }
 0x9e9   :  { %6463 = vmatprep.subr.mxu0 %v12542_v53  ;;  %6546 = vmatprep.subr.mxu1 %v12544_v11 }
 0x9ea   :  { %6464 = vmatpush1.msra.mxu0 %v12541_v25  ;;  %6547 = vmatpush1.msra.mxu1 %v12543_v14 }
 0x9eb   :  { %6465 = vmatprep.subr.mxu0 %v12538_v9  ;;  %6548 = vmatprep.subr.mxu1 %v12540_v58 }
 0x9ec   :  { %6466 = vmatpush1.msra.mxu0 %v12537_v29  ;;  %6499 = vmatprep.mubr.f32.mxu0 %v21479_v15 }
 0x9ed   :  { %6549 = vmatpush1.msra.mxu1 %v12539_v26  ;;  %6582 = vmatprep.mubr.f32.mxu1 %v21479_v15 }
 0x9ee   :  { %12555 = vmatmul.mubr.msk.f32.vlgmr.msra.gmra.mxu0 %vm606_vm6, %v6395_v28  ;;  %12560 = vmatmul.mubr.msk.f32.vlgmr.msra.gmra.mxu1 %vm606_vm6, %v6395_v28 }
 0x9ef   :  { %6505 = vmatprep.mubr.f32.mxu0 %v21479_v15  ;;  %6588 = vmatprep.mubr.f32.mxu1 %v21479_v15 }
 0x9f0   :  { %12579 = vmatprep.subr.msk.mxu0 %vm619_vm5, %v12576_v22  ;;  %12584 = vmatprep.subr.msk.mxu1 %vm619_vm5, %v12578_v36 }
 0x9f1   :  { %12580 = vmatpush1.msk.msra.mxu0 %vm619_vm5, %v12575_v44  ;;  %12585 = vmatpush1.msk.msra.mxu1 %vm619_vm5, %v12577_v5 }
 0x9f2   :  { %12556 = vmatmul.mubr.msk.f32.gmra.mxu0 %vm606_vm6, %v6396_v45  ;;  %12561 = vmatmul.mubr.msk.f32.gmra.mxu1 %vm606_vm6, %v6396_v45 }
 0x9f3   :  { %6679 = vmatprep.subr.mxu0 %v12572_v41  ;;  %6762 = vmatprep.subr.mxu1 %v12574_v16 }
 0x9f4   :  { %6511 = vmatprep.mubr.f32.mxu0 %v21479_v15  ;;  %6594 = vmatprep.mubr.f32.mxu1 %v21479_v15 }
 0x9f5   :  { %6680 = vmatpush1.msra.mxu0 %v12571_v33  ;;  %6763 = vmatpush1.msra.mxu1 %v12573_v0 }
 0x9f6   :  { %12557 = vmatmul.mubr.msk.f32.gmra.mxu0 %vm606_vm6, %v6397_v8  ;;  %12562 = vmatmul.mubr.msk.f32.gmra.mxu1 %vm606_vm6, %v6397_v8 }
 0x9f7   :  { %6681 = vmatprep.subr.mxu0 %v12568_v38  ;;  %6764 = vmatprep.subr.mxu1 %v12570_v46 }
 0x9f8   :  { %6682 = vmatpush1.msra.mxu0 %v12567_v40  ;;  %6765 = vmatpush1.msra.mxu1 %v12569_v30 }
 0x9f9   :  { %6683 = vmatprep.subr.mxu0 %v12564_v24  ;;  %6766 = vmatprep.subr.mxu1 %v12566_v49 }
 0x9fa   :  { %6684 = vmatpush1.msra.mxu0 %v12563_v34  ;;  %6717 = vmatprep.mubr.f32.mxu0 %v21479_v15 }
 0x9fb   :  { %6767 = vmatpush1.msra.mxu1 %v12565_v42  ;;  %6800 = vmatprep.mubr.f32.mxu1 %v21479_v15 }
 0x9fc   :  { %12581 = vmatmul.mubr.msk.f32.vlgmr.msra.gmra.mxu0 %vm606_vm6, %v6613_v60  ;;  %12586 = vmatmul.mubr.msk.f32.vlgmr.msra.gmra.mxu1 %vm606_vm6, %v6613_v60 }
 0x9fd   :  { %6723 = vmatprep.mubr.f32.mxu0 %v21479_v15  ;;  %6806 = vmatprep.mubr.f32.mxu1 %v21479_v15 }
 0xa00   :  { %12582 = vmatmul.mubr.msk.f32.gmra.mxu0 %vm606_vm6, %v6614_v32  ;;  %12587 = vmatmul.mubr.msk.f32.gmra.mxu1 %vm606_vm6, %v6614_v32 }
 0xa01   :  { %6729 = vmatprep.mubr.f32.mxu0 %v21479_v15  ;;  %6812 = vmatprep.mubr.f32.mxu1 %v21479_v15 }
 0xa04   :  { %12583 = vmatmul.mubr.msk.f32.gmra.mxu0 %vm606_vm6, %v6615_v3  ;;  %12588 = vmatmul.mubr.msk.f32.gmra.mxu1 %vm606_vm6, %v6615_v3 }
 0xa05   :  { %6931 = vmatprep.mubr.f32.mxu0 %v21479_v15  ;;  %7048 = vmatprep.mubr.f32.mxu1 %v21479_v15 }
 0xa85   :  { %v5890_v63 = vpop.f32.mrf.mxu0  ;;  %v5973_v18 = vpop.f32.mrf.mxu1 }
 0xa87   :  { %v5892_v6 = vpop.f32.mrf.mxu0  ;;  %v5975_v19 = vpop.f32.mrf.mxu1 }
 0xa89   :  { %v5896_v23 = vpop.f32.mrf.mxu0  ;;  %v5979_v20 = vpop.f32.mrf.mxu1 }
 0xa8b   :  { %v5898_v51 = vpop.f32.mrf.mxu0  ;;  %v5981_v53 = vpop.f32.mrf.mxu1 }
 0xa8d   :  { %v5902_v11 = vpop.f32.mrf.mxu0  ;;  %v5985_v37 = vpop.f32.mrf.mxu1 }
 0xa8f   :  { %v5904_v25 = vpop.f32.mrf.mxu0  ;;  %v5987_v14 = vpop.f32.mrf.mxu1 }
 0xa92   :  { %v6077_v9 = vpop.f32.mrf.mxu0  ;;  %v6160_v58 = vpop.f32.mrf.mxu1 }
 0xa93   :  { %v6078_v62 = vadd.f32 %v6077_v9, %v5890_v63  ;;  %v6161_v48 = vadd.f32 %v6160_v58, %v5973_v18 }
 0xa94   :  { %v6079_v29 = vpop.f32.mrf.mxu0  ;;  %v6162_v26 = vpop.f32.mrf.mxu1 }
 0xa95   :  { %v6080_v50 = vadd.f32 %v6079_v29, %v5892_v6  ;;  %v6163_v59 = vadd.f32 %v6162_v26, %v5975_v19  ;;  %v21534_v26 = vld [vmem:[#allocation30_spill] sm:$0xff] }
 0xa96   :  { %v6083_v28 = vpop.f32.mrf.mxu0  ;;  %v6166_v22 = vpop.f32.mrf.mxu1 }
 0xa97   :  { %v6084_v43 = vadd.f32 %v6083_v28, %v5896_v23  ;;  %v6167_v52 = vadd.f32 %v6166_v22, %v5979_v20 }
 0xa98   :  { %v6085_v36 = vpop.f32.mrf.mxu0  ;;  %v6168_v44 = vpop.f32.mrf.mxu1 }
 0xa99   :  { %v6086_v1 = vadd.f32 %v6085_v36, %v5898_v51  ;;  %v6169_v47 = vadd.f32 %v6168_v44, %v5981_v53 }
 0xa9a   :  { %v6089_v5 = vpop.f32.mrf.mxu0  ;;  %v6172_v41 = vpop.f32.mrf.mxu1 }
 0xa9b   :  { %v6090_v15 = vadd.f32 %v6089_v5, %v5902_v11  ;;  %v6173_v17 = vadd.f32 %v6172_v41, %v5985_v37 }
 0xa9c   :  { %v6091_v16 = vpop.f32.mrf.mxu0  ;;  %v6174_v45 = vpop.f32.mrf.mxu1 }
 0xa9d   :  { %v6092_v9 = vadd.f32 %v6091_v16, %v5904_v25  ;;  %v6175_v63 = vadd.f32 %v6174_v45, %v5987_v14 }
 0xaa0   :  { %v6283_v33 = vpop.f32.mrf.mxu0  ;;  %v6366_v0 = vpop.f32.mrf.mxu1 }
 0xaa1   :  { %v6383_v21 = vadd.f32 %v6283_v33, %v6078_v62  ;;  %v6385_v4 = vadd.f32 %v6366_v0, %v6161_v48 }
 0xaa2   :  { %v6285_v38 = vpop.f32.mrf.mxu0  ;;  %v6368_v46 = vpop.f32.mrf.mxu1 }
 0xaa3   :  { %v6384_v31 = vadd.f32 %v6285_v38, %v6080_v50  ;;  %v6386_v54 = vadd.f32 %v6368_v46, %v6163_v59  ;;  %v21533_v59 = vld [vmem:[#allocation28_spill] sm:$0xff] }
 0xaa4   :  { %v6289_v8 = vpop.f32.mrf.mxu0  ;;  %v6372_v40 = vpop.f32.mrf.mxu1 }
 0xaa5   :  { %v6387_v18 = vadd.f32 %v6289_v8, %v6084_v43  ;;  %v6389_v62 = vadd.f32 %v6372_v40, %v6167_v52  ;;  %v21535_v52 = vld [vmem:[#allocation29_spill] sm:$0xff] }
 0xaa6   :  { %v6291_v30 = vpop.f32.mrf.mxu0  ;;  %v6374_v24 = vpop.f32.mrf.mxu1 }
 0xaa7   :  { %v6388_v48 = vadd.f32 %v6291_v30, %v6086_v1  ;;  %v6390_v20 = vadd.f32 %v6374_v24, %v6169_v47  ;;  %v21536_v47 = vld [vmem:[#allocation31_spill] sm:$0xff] }
 0xaa8   :  { %v6295_v49 = vpop.f32.mrf.mxu0  ;;  %v6378_v34 = vpop.f32.mrf.mxu1 }
 0xaa9   :  { %v6391_v51 = vadd.f32 %v6295_v49, %v6090_v15  ;;  %v6393_v50 = vadd.f32 %v6378_v34, %v6173_v17 }
 0xaaa   :  { %v6297_v42 = vpop.f32.mrf.mxu0  ;;  %v6380_v60 = vpop.f32.mrf.mxu1 }
 0xaab   :  { %v6392_v25 = vadd.f32 %v6297_v42, %v6092_v9 }
 0xaae   :  { %v6501_v32 = vpop.f32.mrf.mxu0  ;;  %v6584_v3 = vpop.f32.mrf.mxu1 }
 0xaaf   :  { %v6601_v10 = vadd.f32 %v6501_v32, %v6383_v21  ;;  %v6603_v39 = vadd.f32 %v6584_v3, %v6385_v4 }
 0xab0   :  { %v6503_v61 = vpop.f32.mrf.mxu0  ;;  %v6586_v13 = vpop.f32.mrf.mxu1 }
 0xab1   :  { %v6602_v29 = vadd.f32 %v6503_v61, %v6384_v31 }
 0xab2   :  { %v6507_v12 = vpop.f32.mrf.mxu0  ;;  %v6590_v7 = vpop.f32.mrf.mxu1 }
 0xab3   :  { %v6605_v14 = vadd.f32 %v6507_v12, %v6387_v18  ;;  %v6607_v43 = vadd.f32 %v6590_v7, %v6389_v62 }
 0xab4   :  { %v6509_v57 = vpop.f32.mrf.mxu0  ;;  %v6592_v56 = vpop.f32.mrf.mxu1 }
 0xab6   :  { %v6513_v27 = vpop.f32.mrf.mxu0  ;;  %v6596_v35 = vpop.f32.mrf.mxu1 }
 0xab7   :  { %v6609_v61 = vadd.f32 %v6513_v27, %v6391_v51 }
 0xab8   :  { %v6515_v2 = vpop.f32.mrf.mxu0  ;;  %v17419_v55 = vpop.f32.mrf.mxu1 }
 0xab9   :  { %21532 = vst [vmem:[#allocation14_spill] sm:$0xff] %v17419_v55  ;;  %v6604_v55 = vadd.f32 %v6586_v13, %v6386_v54  ;;  %v6608_v13 = vadd.f32 %v6592_v56, %v6390_v20  ;;  %v6610_v5 = vadd.f32 %v6515_v2, %v6392_v25 }
 0xabc   :  { %v6719_v6 = vpop.f32.mrf.mxu0  ;;  %v6802_v58 = vpop.f32.mrf.mxu1 }
 0xabd   :  { %v6819_v19 = vadd.f32 %v6719_v6, %v6601_v10  ;;  %v6821_v23 = vadd.f32 %v6802_v58, %v6603_v39  ;;  %v6394_v10 = vadd.f32 %v6380_v60, %v6175_v63  ;;  %v6606_v39 = vadd.f32 %v6509_v57, %v6388_v48 }
 0xabe   :  { %v6721_v53 = vpop.f32.mrf.mxu0  ;;  %v6804_v11 = vpop.f32.mrf.mxu1 }
 0xabf   :  { %v6831_v21 = vadd.f32 %v6819_v19, %v21533_v59  ;;  %v6820_v4 = vadd.f32 %v6721_v53, %v6602_v29  ;;  %v6822_v37 = vadd.f32 %v6804_v11, %v6604_v55  ;;  %v6833_v28 = vadd.f32 %v6821_v23, %v21534_v26 }
 0xac0   :  { %v6725_v31 = vpop.f32.mrf.mxu0  ;;  %v6808_v54 = vpop.f32.mrf.mxu1  ;;  %v6611_v55 = vadd.f32 %v6596_v35, %v6393_v50  ;;  %v21537_v49 = vld [vmem:[#allocation14_spill] sm:$0xff] }
 0xac1   :  { %v6832_v1 = vadd.f32 %v6820_v4, %v21535_v52  ;;  %v6834_v15 = vadd.f32 %v6822_v37, %v21536_v47  ;;  %v6823_v17 = vadd.f32 %v6725_v31, %v6605_v14  ;;  %v6825_v22 = vadd.f32 %v6808_v54, %v6607_v43 }
 0xac2   :  { %v6727_v36 = vpop.f32.mrf.mxu0  ;;  %v6810_v44 = vpop.f32.mrf.mxu1  ;;  %v6843_v12 = vmax.f32 %v6831_v21, 0.0  ;;  %v6845_v41 = vmax.f32 %v6833_v28, 0.0  ;;  %v6612_v34 = vadd.f32 %v21537_v49, %v6394_v10  ;;  %v21552_v49 = vld [vmem:[#allocation38_spill] sm:$0xff] }
 0xac3   :  { %v6824_v7 = vadd.f32 %v6727_v36, %v6606_v39  ;;  %v6835_v16 = vadd.f32 %v6823_v17, %v21533_v59  ;;  %v6837_v45 = vadd.f32 %v6825_v22, %v21534_v26  ;;  %v6826_v57 = vadd.f32 %v6810_v44, %v6608_v13  ;;  %v21538_v36 = vld [vmem:[#allocation35_spill] sm:$0xff] }
 0xac4   :  { %v6731_v33 = vpop.f32.mrf.mxu0  ;;  %v6814_v0 = vpop.f32.mrf.mxu1  ;;  %v6844_v38 = vmax.f32 %v6832_v1, 0.0  ;;  %v6846_v46 = vmax.f32 %v6834_v15, 0.0  ;;  %v6855_v29 = vmax.f32 %v6843_v12, %v6845_v41 }
 0xac5   :  { %v6836_v27 = vadd.f32 %v6824_v7, %v21535_v52  ;;  %v6827_v56 = vadd.f32 %v6731_v33, %v6609_v61  ;;  %v6847_v8 = vmax.f32 %v6835_v16, 0.0  ;;  %v6849_v40 = vmax.f32 %v6837_v45, 0.0  ;;  %v21540_v45 = vld [vmem:[#allocation10_spill] sm:$0xff] }
 0xac6   :  { %v6838_v35 = vadd.f32 %v6826_v57, %v21536_v47  ;;  %v6829_v2 = vadd.f32 %v6814_v0, %v6611_v55  ;;  %v6733_v30 = vpop.f32.mrf.mxu0  ;;  %v6816_v24 = vpop.f32.mrf.mxu1  ;;  %v6856_v18 = vmax.f32 %v6844_v38, %v6846_v46  ;;  %v17440_v21 = vand.u32 4294901760, %v6855_v29  ;;  %v21541_v0 = vld [vmem:[#allocation22_spill] sm:$0xff]  ;;  %v21542_v38 = vld [vmem:[#allocation32_spill] sm:$0xff]  ;;  %v21543_v46 = vld [vmem:[#allocation27_spill] sm:$0xff] }
 0xac7   :  { %v6848_v42 = vmax.f32 %v6836_v27, 0.0  ;;  %v6839_v60 = vadd.f32 %v6827_v56, %v21533_v59  ;;  %v6857_v32 = vmax.f32 %v6847_v8, %v6849_v40  ;;  %v6828_v63 = vadd.f32 %v6733_v30, %v6610_v5  ;;  %v21544_v27 = vld [vmem:[#allocation33_spill] sm:$0xff]  ;;  %v21546_v8 = vld [vmem:[#allocation34_spill] sm:$0xff]  ;;  %v21547_v40 = vld [vmem:[#allocation40_spill] sm:$0xff] }
 0xac8   :  { %v6850_v3 = vmax.f32 %v6838_v35, 0.0  ;;  %v6841_v9 = vadd.f32 %v6829_v2, %v21534_v26  ;;  %v6830_v58 = vadd.f32 %v6816_v24, %v6612_v34  ;;  %v17438_v50 = vand.u32 4294901760, %v6856_v18  ;;  %v21545_v56 = vld [vmem:[#allocation21_spill] sm:$0xff]  ;;  %v21549_v2 = vld [vmem:[#allocation11_spill] sm:$0xff]  ;;  %v21550_v30 = vld [vmem:[#allocation36_spill] sm:$0xff] }
 0xac9   :  { %v6851_v6 = vmax.f32 %v6839_v60, 0.0  ;;  %v6840_v62 = vadd.f32 %v6828_v63, %v21535_v52  ;;  %v17434_v20 = vand.u32 4294901760, %v6857_v32  ;;  %v17459_v31 = vsub.f32 %v6855_v29, %v17440_v21  ;;  %v21548_v35 = vld [vmem:[#allocation41_spill] sm:$0xff]  ;;  %v21551_v24 = vld [vmem:[#allocation12_spill] sm:$0xff] }
 0xaca   :  { %v6858_v19 = vmax.f32 %v6848_v42, %v6850_v3  ;;  %v6853_v23 = vmax.f32 %v6841_v9, 0.0  ;;  %v6842_v48 = vadd.f32 %v6830_v58, %v21536_v47  ;;  %v17454_v26 = vsub.f32 %v6856_v18, %v17438_v50  ;;  %v21553_v34 = vld [vmem:[#allocation37_spill] sm:$0xff]  ;;  %v21554_v42 = vld [vmem:[#allocation39_spill] sm:$0xff] }
 0xacb   :  { %v6852_v11 = vmax.f32 %v6840_v62, 0.0  ;;  %v17448_v14 = vsub.f32 %v6857_v32, %v17434_v20  ;;  %v17486_v13 = vand.u32 4294901760, %v17459_v31  ;;  %v21539_v5 = vmov 0.0   ;;  %v12662_v60 = vld [vmem:[%s21386_s8 + $0x5e8] sm:$0xff]  ;;  %v12664_v32 = vld [vmem:[%s21386_s8 + $0x5f8] sm:$0xff]  ;;  %v12661_v3 = vld [vmem:[%s21386_s8 + $0x5e0] sm:$0xff] }
 0xacc   :  { %v17436_v51 = vand.u32 4294901760, %v6858_v19  ;;  %v6859_v53 = vmax.f32 %v6851_v6, %v6853_v23  ;;  %v6854_v59 = vmax.f32 %v6842_v48, 0.0  ;;  %v17480_v47 = vand.u32 4294901760, %v17454_v26  ;;  %v12663_v9 = vld [vmem:[%s21386_s8 + $0x5f0] sm:$0xff]  ;;  %v12658_v63 = vld [vmem:[%s21386_s8 + $0x5c8] sm:$0xff]  ;;  %v12660_v18 = vld [vmem:[%s21386_s8 + $0x5d8] sm:$0xff] }
 0xacd   :  { %v17473_v52 = vand.u32 4294901760, %v17448_v14  ;;  %v7013_v7 = vsub.f32 %v17459_v31, %v17486_v13  ;;  %v12657_v6 = vld [vmem:[%s21386_s8 + $0x5c0] sm:$0xff]  ;;  %v12659_v58 = vld [vmem:[%s21386_s8 + $0x5d0] sm:$0xff]  ;;  %v12654_v29 = vld [vmem:[%s21386_s8 + $0x5a8] sm:$0xff] }
 0xace   :  { %v17442_v4 = vand.u32 4294901760, %v6859_v53  ;;  %v17445_v37 = vsub.f32 %v6858_v19, %v17436_v51  ;;  %v6860_v25 = vmax.f32 %v6852_v11, %v6854_v59  ;;  %v7007_v55 = vsub.f32 %v17454_v26, %v17480_v47  ;;  %v12656_v19 = vld [vmem:[%s21386_s8 + $0x5b8] sm:$0xff]  ;;  %v12653_v23 = vld [vmem:[%s21386_s8 + $0x5a0] sm:$0xff]  ;;  %v12655_v62 = vld [vmem:[%s21386_s8 + $0x5b0] sm:$0xff] }
 0xacf   :  { %v7001_v22 = vsub.f32 %v17448_v14, %v17473_v52  ;;  %v7014_v33 = vand.u32 4294901760, %v7013_v7  ;;  %v12650_v48 = vld [vmem:[%s21386_s8 + $0x588] sm:$0xff]  ;;  %v12645_v59 = vld [vmem:[%s21386_s8 + $0x560] sm:$0xff]  ;;  %v12623_v7 = vld [vmem:[%s21386_s8 + $0x4b0] sm:$0xff] }
 0xad0   :  { %v17451_v43 = vsub.f32 %v6859_v53, %v17442_v4  ;;  %v17456_v28 = vand.u32 4294901760, %v6860_v25  ;;  %v17469_v39 = vand.u32 4294901760, %v17445_v37  ;;  %v7008_v57 = vand.u32 4294901760, %v7007_v55  ;;  %v12651_v53 = vld [vmem:[%s21386_s8 + $0x590] sm:$0xff]  ;;  %v12646_v11 = vld [vmem:[%s21386_s8 + $0x568] sm:$0xff]  ;;  %v12624_v55 = vld [vmem:[%s21386_s8 + $0x4b8] sm:$0xff] }
 0xad1   :  { %v7002_v16 = vand.u32 4294901760, %v7001_v22  ;;  %v12625_v22 = vld [vmem:[%s21386_s8 + $0x4c0] sm:$0xff] }
 0xad2   :  { %v17462_v54 = vand.u32 4294901760, %v17451_v43  ;;  %v17465_v10 = vsub.f32 %v6860_v25, %v17456_v28  ;;  %6888 = vmatprep.subr.mxu0 %v17456_v28  ;;  %v6995_v17 = vsub.f32 %v17445_v37, %v17469_v39  ;;  %v12641_v25 = vld [vmem:[%s21386_s8 + $0x540] sm:$0xff] }
 0xad3   :  { %6890 = vmatpush1.msra.mxu0 %v17442_v4 }
 0xad4   :  { %6892 = vmatprep.subr.mxu0 %v17436_v51  ;;  %v17477_v1 = vand.u32 4294901760, %v17465_v10  ;;  %v6989_v15 = vsub.f32 %v17451_v43, %v17462_v54  ;;  %v6996_v41 = vand.u32 4294901760, %v6995_v17  ;;  %v12628_v17 = vld [vmem:[%s21386_s8 + $0x4d8] sm:$0xff] }
 0xad5   :  { %6894 = vmatpush1.msra.mxu0 %v17434_v20 }
 0xad6   :  { %6896 = vmatprep.subr.mxu0 %v17438_v50  ;;  %v6983_v61 = vsub.f32 %v17465_v10, %v17477_v1  ;;  %v6990_v12 = vand.u32 4294901760, %v6989_v15  ;;  %v12629_v15 = vld [vmem:[%s21386_s8 + $0x4e0] sm:$0xff] }
 0xad7   :  { %6898 = vmatpush1.msra.mxu0 %v17440_v21 }
 0xad8   :  { %6937 = vmatmul.mubr.f32.vlgmr.msra.gmra.mxu0 %v21538_v36  ;;  %7091 = vmatprep.subr.mxu0 %v17465_v10  ;;  %v6984_v44 = vand.u32 4294901760, %v6983_v61  ;;  %v12626_v61 = vld [vmem:[%s21386_s8 + $0x4c8] sm:$0xff]  ;;  %v12627_v36 = vld [vmem:[%s21386_s8 + $0x4d0] sm:$0xff] }
 0xad9   :  { %7094 = vmatpush1.msra.mxu0 %v17451_v43  ;;  %6942 = vmatprep.mubr.f32.mxu0 %v21539_v5 }
 0xada   :  { %6985 = vmatprep.subr.mxu1 %v6984_v44  ;;  %7097 = vmatprep.subr.mxu0 %v17445_v37 }
 0xadb   :  { %6991 = vmatpush1.msra.mxu1 %v6990_v12  ;;  %7100 = vmatpush1.msra.mxu0 %v17448_v14 }
 0xadc   :  { %6948 = vmatmul.mubr.f32.gmra.mxu0 %v21540_v45  ;;  %6997 = vmatprep.subr.mxu1 %v6996_v41  ;;  %v12617_v45 = vld [vmem:[%s21386_s8 + $0x480] sm:$0xff] }
 0xadd   :  { %7103 = vmatprep.subr.mxu0 %v17454_v26  ;;  %7003 = vmatpush1.msra.mxu1 %v7002_v16 }
 0xade   :  { %7106 = vmatpush1.msra.mxu0 %v17459_v31  ;;  %7009 = vmatprep.subr.mxu1 %v7008_v57 }
 0xadf   :  { %7274 = vmatprep.subr.mxu0 %v17477_v1  ;;  %7015 = vmatpush1.msra.mxu1 %v7014_v33 }
 0xae0   :  { %7139 = vmatprep.mubr.f32.mxu0 %v21539_v5  ;;  %12589 = vmatmul.mubr.msk.f32.vlgmr.msra.gmra.mxu1 %vm1934_vm9, %v21541_v0 }
 0xae1   :  { %7142 = vmatmul.mubr.f32.vlgmr.msra.gmra.mxu0 %v21542_v38  ;;  %7183 = vmatprep.subr.mxu1 %v17456_v28  ;;  %v12616_v38 = vld [vmem:[%s21386_s8 + $0x478] sm:$0xff] }
 0xae2   :  { %7278 = vmatpush1.msra.mxu0 %v17462_v54  ;;  %7185 = vmatpush1.msra.mxu1 %v17442_v4 }
 0xae3   :  { %7282 = vmatprep.subr.mxu0 %v17469_v39  ;;  %7187 = vmatprep.subr.mxu1 %v17436_v51 }
 0xae4   :  { %7286 = vmatpush1.msra.mxu0 %v17473_v52  ;;  %7055 = vmatprep.mubr.f32.mxu1 %v21539_v5 }
 0xae5   :  { %7147 = vmatprep.mubr.f32.mxu0 %v21539_v5  ;;  %7189 = vmatpush1.msra.mxu1 %v17434_v20 }
 0xae6   :  { %7290 = vmatprep.subr.mxu0 %v17480_v47  ;;  %12590 = vmatmul.mubr.msk.f32.gmra.mxu1 %vm1934_vm9, %v21543_v46 }
 0xae7   :  { %7150 = vmatmul.mubr.f32.gmra.mxu0 %v21544_v27  ;;  %7191 = vmatprep.subr.mxu1 %v17438_v50  ;;  %v12615_v27 = vld [vmem:[%s21386_s8 + $0x470] sm:$0xff] }
 0xae8   :  { %7294 = vmatpush1.msra.mxu0 %v17486_v13  ;;  %7193 = vmatpush1.msra.mxu1 %v17440_v21 }
 0xae9   :  { %7454 = vmatprep.subr.mxu0 %v17456_v28  ;;  %7369 = vmatprep.subr.mxu1 %v17456_v28 }
 0xaea   :  { %7226 = vmatprep.mubr.f32.mxu1 %v21539_v5  ;;  %7327 = vmatprep.mubr.f32.mxu0 %v21539_v5 }
 0xaeb   :  { %7230 = vmatmul.mubr.f32.vlgmr.msra.gmra.mxu1 %v21545_v56  ;;  %12591 = vmatmul.mubr.msk.f32.vlgmr.msra.gmra.mxu0 %vm1934_vm9, %v21541_v0  ;;  %v12610_v56 = vld [vmem:[%s21386_s8 + $0x448] sm:$0xff] }
 0xaec   :  { %7371 = vmatpush1.msra.mxu1 %v17442_v4  ;;  %7456 = vmatpush1.msra.mxu0 %v17442_v4 }
 0xaed   :  { %7373 = vmatprep.subr.mxu1 %v17436_v51  ;;  %7458 = vmatprep.subr.mxu0 %v17436_v51 }
 0xaee   :  { %7375 = vmatpush1.msra.mxu1 %v17434_v20  ;;  %7460 = vmatpush1.msra.mxu0 %v17434_v20 }
 0xaef   :  { %7235 = vmatprep.mubr.f32.mxu1 %v21539_v5  ;;  %7334 = vmatprep.mubr.f32.mxu0 %v21539_v5 }
 0xaf0   :  { %7377 = vmatprep.subr.mxu1 %v17438_v50  ;;  %7462 = vmatprep.subr.mxu0 %v17438_v50 }
 0xaf1   :  { %7239 = vmatmul.mubr.f32.gmra.mxu1 %v21546_v8  ;;  %12592 = vmatmul.mubr.msk.f32.gmra.mxu0 %vm1934_vm9, %v21543_v46  ;;  %v12612_v8 = vld [vmem:[%s21386_s8 + $0x458] sm:$0xff] }
 0xaf2   :  { %7379 = vmatpush1.msra.mxu1 %v17440_v21  ;;  %7464 = vmatpush1.msra.mxu0 %v17440_v21 }
 0xaf3   :  { %7551 = vmatprep.subr.mxu1 %v6984_v44  ;;  %7657 = vmatprep.subr.mxu0 %v17465_v10  ;;  %v12636_v10 = vld [vmem:[%s21386_s8 + $0x518] sm:$0xff]  ;;  %v12622_v44 = vld [vmem:[%s21386_s8 + $0x4a8] sm:$0xff] }
 0xaf4   :  { %7412 = vmatprep.mubr.f32.mxu1 %v21539_v5  ;;  %7497 = vmatprep.mubr.f32.mxu0 %v21539_v5 }
 0xaf5   :  { %12593 = vmatmul.mubr.msk.f32.vlgmr.msra.gmra.mxu1 %vm1934_vm9, %v21541_v0  ;;  %7503 = vmatmul.mubr.f32.vlgmr.msra.gmra.mxu0 %v21547_v40  ;;  %v12609_v40 = vld [vmem:[%s21386_s8 + $0x440] sm:$0xff] }
 0xaf6   :  { %7557 = vmatpush1.msra.mxu1 %v6990_v12  ;;  %7660 = vmatpush1.msra.mxu0 %v17451_v43  ;;  %v12638_v43 = vld [vmem:[%s21386_s8 + $0x528] sm:$0xff]  ;;  %v12621_v12 = vld [vmem:[%s21386_s8 + $0x4a0] sm:$0xff] }
 0xaf7   :  { %7563 = vmatprep.subr.mxu1 %v6996_v41  ;;  %7663 = vmatprep.subr.mxu0 %v17445_v37  ;;  %v12644_v37 = vld [vmem:[%s21386_s8 + $0x558] sm:$0xff]  ;;  %v12618_v41 = vld [vmem:[%s21386_s8 + $0x488] sm:$0xff] }
 0xaf8   :  { %7569 = vmatpush1.msra.mxu1 %v7002_v16  ;;  %7666 = vmatpush1.msra.mxu0 %v17448_v14  ;;  %v12643_v14 = vld [vmem:[%s21386_s8 + $0x550] sm:$0xff]  ;;  %v12620_v16 = vld [vmem:[%s21386_s8 + $0x498] sm:$0xff] }
 0xaf9   :  { %7419 = vmatprep.mubr.f32.mxu1 %v21539_v5  ;;  %7508 = vmatprep.mubr.f32.mxu0 %v21539_v5 }
 0xafa   :  { %7575 = vmatprep.subr.mxu1 %v7008_v57  ;;  %7669 = vmatprep.subr.mxu0 %v17454_v26  ;;  %v12640_v26 = vld [vmem:[%s21386_s8 + $0x538] sm:$0xff]  ;;  %v12619_v57 = vld [vmem:[%s21386_s8 + $0x490] sm:$0xff] }
 0xafb   :  { %12594 = vmatmul.mubr.msk.f32.gmra.mxu1 %vm1934_vm9, %v21543_v46  ;;  %7514 = vmatmul.mubr.f32.gmra.mxu0 %v21548_v35  ;;  %v12613_v46 = vld [vmem:[%s21386_s8 + $0x460] sm:$0xff]  ;;  %v12611_v35 = vld [vmem:[%s21386_s8 + $0x450] sm:$0xff] }
 0xafc   :  { %7581 = vmatpush1.msra.mxu1 %v7014_v33  ;;  %7672 = vmatpush1.msra.mxu0 %v17459_v31  ;;  %v12639_v31 = vld [vmem:[%s21386_s8 + $0x530] sm:$0xff]  ;;  %v12614_v33 = vld [vmem:[%s21386_s8 + $0x468] sm:$0xff] }
 0xafd   :  { %7749 = vmatprep.subr.mxu1 %v17456_v28  ;;  %7840 = vmatprep.subr.mxu0 %v17477_v1  ;;  %v12630_v1 = vld [vmem:[%s21386_s8 + $0x4e8] sm:$0xff] }
 0xafe   :  { %7614 = vmatprep.mubr.f32.mxu1 %v21539_v5  ;;  %7705 = vmatprep.mubr.f32.mxu0 %v21539_v5 }
 0xaff   :  { %12595 = vmatmul.mubr.msk.f32.vlgmr.msra.gmra.mxu1 %vm1934_vm9, %v21549_v2  ;;  %7708 = vmatmul.mubr.f32.vlgmr.msra.gmra.mxu0 %v21550_v30  ;;  %v12606_v30 = vld [vmem:[%s21386_s8 + $0x428] sm:$0xff] }
 0xb00   :  { %7751 = vmatpush1.msra.mxu1 %v17442_v4  ;;  %7844 = vmatpush1.msra.mxu0 %v17462_v54  ;;  %v12634_v54 = vld [vmem:[%s21386_s8 + $0x508] sm:$0xff] }
 0xb01   :  { %7753 = vmatprep.subr.mxu1 %v17436_v51  ;;  %7848 = vmatprep.subr.mxu0 %v17469_v39  ;;  %v12633_v39 = vld [vmem:[%s21386_s8 + $0x500] sm:$0xff] }
 0xb02   :  { %7755 = vmatpush1.msra.mxu1 %v17434_v20  ;;  %7852 = vmatpush1.msra.mxu0 %v17473_v52  ;;  %v12635_v52 = vld [vmem:[%s21386_s8 + $0x510] sm:$0xff] }
 0xb03   :  { %7621 = vmatprep.mubr.f32.mxu1 %v21539_v5  ;;  %7757 = vmatprep.subr.mxu1 %v17438_v50 }
 0xb04   :  { %7856 = vmatprep.subr.mxu0 %v17480_v47  ;;  %12596 = vmatmul.mubr.msk.f32.gmra.mxu1 %vm1934_vm9, %v21551_v24  ;;  %v12632_v47 = vld [vmem:[%s21386_s8 + $0x4f8] sm:$0xff] }
 0xb05   :  { %7759 = vmatpush1.msra.mxu1 %v17440_v21  ;;  %7860 = vmatpush1.msra.mxu0 %v17486_v13  ;;  %v12631_v13 = vld [vmem:[%s21386_s8 + $0x4f0] sm:$0xff] }
 0xb06   :  { %7713 = vmatprep.mubr.f32.mxu0 %v21539_v5  ;;  %7935 = vmatprep.subr.mxu1 %v17456_v28  ;;  %v12637_v28 = vld [vmem:[%s21386_s8 + $0x520] sm:$0xff] }
 0xb07   :  { %7716 = vmatmul.mubr.f32.gmra.mxu0 %v21552_v49  ;;  %7792 = vmatprep.mubr.f32.mxu1 %v21539_v5  ;;  %v12605_v49 = vld [vmem:[%s21386_s8 + $0x420] sm:$0xff] }
 0xb08   :  { %7796 = vmatmul.mubr.f32.vlgmr.msra.gmra.mxu1 %v21553_v34  ;;  %7893 = vmatprep.mubr.f32.mxu0 %v21539_v5  ;;  %v12607_v34 = vld [vmem:[%s21386_s8 + $0x430] sm:$0xff] }
 0xb09   :  { %7937 = vmatpush1.msra.mxu1 %v17442_v4  ;;  %7801 = vmatprep.mubr.f32.mxu1 %v21539_v5  ;;  %v12642_v4 = vld [vmem:[%s21386_s8 + $0x548] sm:$0xff] }
 0xb0a   :  { %7939 = vmatprep.subr.mxu1 %v17436_v51  ;;  %8275 = vmatprep.subr.mxu0 %v12662_v60  ;;  %v12649_v51 = vld [vmem:[%s21386_s8 + $0x580] sm:$0xff]  ;;  %v12604_v60 = vld [vmem:[%s21386_s8 + $0x418] sm:$0xff] }
 0xb0b   :  { %12597 = vmatmul.mubr.msk.f32.vlgmr.msra.gmra.mxu0 %vm1934_vm9, %v21549_v2  ;;  %7941 = vmatpush1.msra.mxu1 %v17434_v20  ;;  %v12652_v20 = vld [vmem:[%s21386_s8 + $0x598] sm:$0xff] }
 0xb0c   :  { %7943 = vmatprep.subr.mxu1 %v17438_v50  ;;  %7805 = vmatmul.mubr.f32.gmra.mxu1 %v21554_v42  ;;  %v12648_v50 = vld [vmem:[%s21386_s8 + $0x578] sm:$0xff]  ;;  %v12602_v42 = vld [vmem:[%s21386_s8 + $0x408] sm:$0xff] }
 0xb0d   :  { %7945 = vmatpush1.msra.mxu1 %v17440_v21  ;;  %7900 = vmatprep.mubr.f32.mxu0 %v21539_v5  ;;  %v12647_v21 = vld [vmem:[%s21386_s8 + $0x570] sm:$0xff] }
 0xb0e   :  { %7978 = vmatprep.mubr.f32.mxu1 %v21539_v5  ;;  %8346 = vmatprep.subr.mxu1 %v12664_v32  ;;  %v12601_v32 = vld [vmem:[%s21386_s8 + $0x400] sm:$0xff] }
 0xb0f   :  { %12598 = vmatmul.mubr.msk.f32.gmra.mxu0 %vm1934_vm9, %v21551_v24 }
 0xb10   :  { %12599 = vmatmul.mubr.msk.f32.vlgmr.msra.gmra.mxu1 %vm1934_vm9, %v21549_v2  ;;  %8276 = vmatpush1.msra.mxu0 %v12661_v3  ;;  %v12603_v3 = vld [vmem:[%s21386_s8 + $0x410] sm:$0xff] }
 0xb11   :  { %7985 = vmatprep.mubr.f32.mxu1 %v21539_v5  ;;  %8347 = vmatpush1.msra.mxu1 %v12663_v9  ;;  %v12726_v9 = vld [vmem:[%s21386_s8 + $0x7e8] sm:$0xff] }
 0xb12   :  { %8277 = vmatprep.subr.mxu0 %v12658_v63  ;;  %8348 = vmatprep.subr.mxu1 %v12660_v18  ;;  %v12728_v63 = vld [vmem:[%s21386_s8 + $0x7f8] sm:$0xff]  ;;  %v12725_v18 = vld [vmem:[%s21386_s8 + $0x7e0] sm:$0xff] }
 0xb13   :  { %8278 = vmatpush1.msra.mxu0 %v12657_v6  ;;  %8349 = vmatpush1.msra.mxu1 %v12659_v58  ;;  %v12727_v6 = vld [vmem:[%s21386_s8 + $0x7f0] sm:$0xff]  ;;  %v12722_v58 = vld [vmem:[%s21386_s8 + $0x7c8] sm:$0xff] }
 0xb14   :  { %12600 = vmatmul.mubr.msk.f32.gmra.mxu1 %vm1934_vm9, %v21551_v24  ;;  %8279 = vmatprep.subr.mxu0 %v12654_v29  ;;  %v12608_v24 = vld [vmem:[%s21386_s8 + $0x438] sm:$0xff] }
 0xb15   :  { %8350 = vmatprep.subr.mxu1 %v12656_v19  ;;  %8280 = vmatpush1.msra.mxu0 %v12653_v23  ;;  %v12724_v29 = vld [vmem:[%s21386_s8 + $0x7d8] sm:$0xff]  ;;  %v12721_v19 = vld [vmem:[%s21386_s8 + $0x7c0] sm:$0xff]  ;;  %v12723_v23 = vld [vmem:[%s21386_s8 + $0x7d0] sm:$0xff] }
 0xb16   :  { %8351 = vmatpush1.msra.mxu1 %v12655_v62  ;;  %8281 = vmatprep.subr.mxu0 %v12650_v48  ;;  %v12718_v62 = vld [vmem:[%s21386_s8 + $0x7a8] sm:$0xff]  ;;  %v12720_v48 = vld [vmem:[%s21386_s8 + $0x7b8] sm:$0xff] }
 0xb17   :  { %8352 = vmatprep.subr.mxu1 %v12652_v20  ;;  %8282 = vmatpush1.msra.mxu0 %v12649_v51  ;;  %v12717_v20 = vld [vmem:[%s21386_s8 + $0x7a0] sm:$0xff]  ;;  %v12719_v51 = vld [vmem:[%s21386_s8 + $0x7b0] sm:$0xff] }
 0xb18   :  { %8353 = vmatpush1.msra.mxu1 %v12651_v53  ;;  %8283 = vmatprep.subr.mxu0 %v12646_v11  ;;  %v12714_v53 = vld [vmem:[%s21386_s8 + $0x788] sm:$0xff]  ;;  %v12716_v11 = vld [vmem:[%s21386_s8 + $0x798] sm:$0xff] }
 0xb19   :  { %8354 = vmatprep.subr.mxu1 %v12648_v50  ;;  %8284 = vmatpush1.msra.mxu0 %v12645_v59  ;;  %v12713_v50 = vld [vmem:[%s21386_s8 + $0x780] sm:$0xff]  ;;  %v12715_v59 = vld [vmem:[%s21386_s8 + $0x790] sm:$0xff] }
 0xb1a   :  { %8355 = vmatpush1.msra.mxu1 %v12647_v21  ;;  %8285 = vmatprep.subr.mxu0 %v12642_v4  ;;  %v12710_v21 = vld [vmem:[%s21386_s8 + $0x768] sm:$0xff]  ;;  %v12712_v4 = vld [vmem:[%s21386_s8 + $0x778] sm:$0xff] }
 0xb1b   :  { %8356 = vmatprep.subr.mxu1 %v12644_v37  ;;  %8286 = vmatpush1.msra.mxu0 %v12641_v25  ;;  %v12709_v37 = vld [vmem:[%s21386_s8 + $0x760] sm:$0xff]  ;;  %v12711_v25 = vld [vmem:[%s21386_s8 + $0x770] sm:$0xff] }
 0xb1c   :  { %8357 = vmatpush1.msra.mxu1 %v12643_v14  ;;  %8287 = vmatprep.subr.mxu0 %v12638_v43  ;;  %v12706_v14 = vld [vmem:[%s21386_s8 + $0x748] sm:$0xff]  ;;  %v12708_v43 = vld [vmem:[%s21386_s8 + $0x758] sm:$0xff] }
 0xb1d   :  { %8358 = vmatprep.subr.mxu1 %v12640_v26  ;;  %8288 = vmatpush1.msra.mxu0 %v12637_v28  ;;  %v12705_v26 = vld [vmem:[%s21386_s8 + $0x740] sm:$0xff]  ;;  %v12707_v28 = vld [vmem:[%s21386_s8 + $0x750] sm:$0xff] }
 0xb1e   :  { %8359 = vmatpush1.msra.mxu1 %v12639_v31  ;;  %8289 = vmatprep.subr.mxu0 %v12634_v54  ;;  %v12702_v31 = vld [vmem:[%s21386_s8 + $0x728] sm:$0xff]  ;;  %v12704_v54 = vld [vmem:[%s21386_s8 + $0x738] sm:$0xff] }
 0xb1f   :  { %8360 = vmatprep.subr.mxu1 %v12636_v10  ;;  %8290 = vmatpush1.msra.mxu0 %v12633_v39  ;;  %v12701_v10 = vld [vmem:[%s21386_s8 + $0x720] sm:$0xff]  ;;  %v12703_v39 = vld [vmem:[%s21386_s8 + $0x730] sm:$0xff] }
 0xb20   :  { %8361 = vmatpush1.msra.mxu1 %v12635_v52  ;;  %8291 = vmatprep.subr.mxu0 %v12630_v1  ;;  %v12698_v52 = vld [vmem:[%s21386_s8 + $0x708] sm:$0xff]  ;;  %v12700_v1 = vld [vmem:[%s21386_s8 + $0x718] sm:$0xff] }
 0xb21   :  { %8362 = vmatprep.subr.mxu1 %v12632_v47  ;;  %8292 = vmatpush1.msra.mxu0 %v12629_v15  ;;  %v12697_v47 = vld [vmem:[%s21386_s8 + $0x700] sm:$0xff]  ;;  %v12699_v15 = vld [vmem:[%s21386_s8 + $0x710] sm:$0xff] }
 0xb22   :  { %8363 = vmatpush1.msra.mxu1 %v12631_v13  ;;  %8293 = vmatprep.subr.mxu0 %v12626_v61  ;;  %v12694_v13 = vld [vmem:[%s21386_s8 + $0x6e8] sm:$0xff]  ;;  %v12696_v61 = vld [vmem:[%s21386_s8 + $0x6f8] sm:$0xff] }
 0xb23   :  { %8364 = vmatprep.subr.mxu1 %v12628_v17  ;;  %8294 = vmatpush1.msra.mxu0 %v12625_v22  ;;  %v12693_v17 = vld [vmem:[%s21386_s8 + $0x6e0] sm:$0xff]  ;;  %v12695_v22 = vld [vmem:[%s21386_s8 + $0x6f0] sm:$0xff] }
 0xb24   :  { %8365 = vmatpush1.msra.mxu1 %v12627_v36  ;;  %8295 = vmatprep.subr.mxu0 %v12622_v44  ;;  %v12690_v36 = vld [vmem:[%s21386_s8 + $0x6c8] sm:$0xff]  ;;  %v12692_v44 = vld [vmem:[%s21386_s8 + $0x6d8] sm:$0xff] }
 0xb25   :  { %8366 = vmatprep.subr.mxu1 %v12624_v55  ;;  %8296 = vmatpush1.msra.mxu0 %v12621_v12  ;;  %v12689_v55 = vld [vmem:[%s21386_s8 + $0x6c0] sm:$0xff]  ;;  %v12691_v12 = vld [vmem:[%s21386_s8 + $0x6d0] sm:$0xff] }
 0xb26   :  { %8367 = vmatpush1.msra.mxu1 %v12623_v7  ;;  %8297 = vmatprep.subr.mxu0 %v12618_v41  ;;  %v12686_v7 = vld [vmem:[%s21386_s8 + $0x6a8] sm:$0xff]  ;;  %v12688_v41 = vld [vmem:[%s21386_s8 + $0x6b8] sm:$0xff] }
 0xb27   :  { %8368 = vmatprep.subr.mxu1 %v12620_v16  ;;  %8298 = vmatpush1.msra.mxu0 %v12617_v45  ;;  %v12685_v16 = vld [vmem:[%s21386_s8 + $0x6a0] sm:$0xff]  ;;  %v12687_v45 = vld [vmem:[%s21386_s8 + $0x6b0] sm:$0xff] }
 0xb28   :  { %8369 = vmatpush1.msra.mxu1 %v12619_v57  ;;  %8299 = vmatprep.subr.mxu0 %v12614_v33  ;;  %v12682_v57 = vld [vmem:[%s21386_s8 + $0x688] sm:$0xff]  ;;  %v12684_v33 = vld [vmem:[%s21386_s8 + $0x698] sm:$0xff] }
 0xb29   :  { %8370 = vmatprep.subr.mxu1 %v12616_v38  ;;  %8300 = vmatpush1.msra.mxu0 %v12613_v46  ;;  %v12681_v38 = vld [vmem:[%s21386_s8 + $0x680] sm:$0xff]  ;;  %v12683_v46 = vld [vmem:[%s21386_s8 + $0x690] sm:$0xff] }
 0xb2a   :  { %8371 = vmatpush1.msra.mxu1 %v12615_v27  ;;  %8301 = vmatprep.subr.mxu0 %v12610_v56  ;;  %v12678_v27 = vld [vmem:[%s21386_s8 + $0x668] sm:$0xff]  ;;  %v12680_v56 = vld [vmem:[%s21386_s8 + $0x678] sm:$0xff] }
 0xb2b   :  { %8372 = vmatprep.subr.mxu1 %v12612_v8  ;;  %8302 = vmatpush1.msra.mxu0 %v12609_v40  ;;  %v12677_v8 = vld [vmem:[%s21386_s8 + $0x660] sm:$0xff]  ;;  %v12679_v40 = vld [vmem:[%s21386_s8 + $0x670] sm:$0xff] }
 0xb2c   :  { %8373 = vmatpush1.msra.mxu1 %v12611_v35  ;;  %8303 = vmatprep.subr.mxu0 %v12606_v30  ;;  %v12674_v35 = vld [vmem:[%s21386_s8 + $0x648] sm:$0xff]  ;;  %v12676_v30 = vld [vmem:[%s21386_s8 + $0x658] sm:$0xff] }
 0xb2d   :  { %8374 = vmatprep.subr.mxu1 %v12608_v24  ;;  %8304 = vmatpush1.msra.mxu0 %v12605_v49  ;;  %v12673_v24 = vld [vmem:[%s21386_s8 + $0x640] sm:$0xff]  ;;  %v12675_v49 = vld [vmem:[%s21386_s8 + $0x650] sm:$0xff] }
 0xb2e   :  { %8375 = vmatpush1.msra.mxu1 %v12607_v34  ;;  %8305 = vmatprep.subr.mxu0 %v12602_v42  ;;  %v12670_v34 = vld [vmem:[%s21386_s8 + $0x628] sm:$0xff]  ;;  %v12672_v42 = vld [vmem:[%s21386_s8 + $0x638] sm:$0xff] }
 0xb2f   :  { %8376 = vmatprep.subr.mxu1 %v12604_v60  ;;  %8306 = vmatpush1.msra.mxu0 %v12601_v32  ;;  %v12669_v60 = vld [vmem:[%s21386_s8 + $0x620] sm:$0xff]  ;;  %v12671_v32 = vld [vmem:[%s21386_s8 + $0x630] sm:$0xff] }
 0xb30   :  { %8377 = vmatpush1.msra.mxu1 %v12603_v3  ;;  %8307 = vmatprep.subr.mxu0 %v12726_v9  ;;  %v12666_v3 = vld [vmem:[%s21386_s8 + $0x608] sm:$0xff]  ;;  %v12668_v9 = vld [vmem:[%s21386_s8 + $0x618] sm:$0xff] }
 0xb31   :  { %8378 = vmatprep.subr.mxu1 %v12728_v63  ;;  %8308 = vmatpush2.msra.mxu0 %v12725_v18  ;;  %v12665_v63 = vld [vmem:[%s21386_s8 + $0x600] sm:$0xff]  ;;  %v12667_v18 = vld [vmem:[%s21386_s8 + $0x610] sm:$0xff] }
 0xb32   :  { %8379 = vmatpush2.msra.mxu1 %v12727_v6  ;;  %8309 = vmatprep.subr.mxu0 %v12722_v58  ;;  %v8064_v6 = vld [vmem:[%s21386_s8 + $0x1e8] sm:$0xff]  ;;  %v8066_v58 = vld [vmem:[%s21386_s8 + $0x1f8] sm:$0xff] }
 0xb33   :  { %8380 = vmatprep.subr.mxu1 %v12724_v29  ;;  %8310 = vmatpush2.msra.mxu0 %v12721_v19 }
 0xb34   :  { %8381 = vmatpush2.msra.mxu1 %v12723_v23  ;;  %8311 = vmatprep.subr.mxu0 %v12718_v62 }
 0xb35   :  { %8382 = vmatprep.subr.mxu1 %v12720_v48  ;;  %8312 = vmatpush2.msra.mxu0 %v12717_v20 }
 0xb36   :  { %8383 = vmatpush2.msra.mxu1 %v12719_v51  ;;  %8313 = vmatprep.subr.mxu0 %v12714_v53 }
 0xb37   :  { %8384 = vmatprep.subr.mxu1 %v12716_v11  ;;  %8314 = vmatpush2.msra.mxu0 %v12713_v50 }
 0xb38   :  { %8385 = vmatpush2.msra.mxu1 %v12715_v59  ;;  %8315 = vmatprep.subr.mxu0 %v12710_v21 }
 0xb39   :  { %8386 = vmatprep.subr.mxu1 %v12712_v4  ;;  %8316 = vmatpush2.msra.mxu0 %v12709_v37 }
 0xb3a   :  { %8387 = vmatpush2.msra.mxu1 %v12711_v25  ;;  %8317 = vmatprep.subr.mxu0 %v12706_v14 }
 0xb3b   :  { %8388 = vmatprep.subr.mxu1 %v12708_v43  ;;  %8318 = vmatpush2.msra.mxu0 %v12705_v26 }
 0xb3c   :  { %8389 = vmatpush2.msra.mxu1 %v12707_v28  ;;  %8319 = vmatprep.subr.mxu0 %v12702_v31 }
 0xb3d   :  { %8390 = vmatprep.subr.mxu1 %v12704_v54  ;;  %8320 = vmatpush2.msra.mxu0 %v12701_v10 }
 0xb3e   :  { %8391 = vmatpush2.msra.mxu1 %v12703_v39  ;;  %8321 = vmatprep.subr.mxu0 %v12698_v52 }
 0xb3f   :  { %8392 = vmatprep.subr.mxu1 %v12700_v1  ;;  %8322 = vmatpush2.msra.mxu0 %v12697_v47 }
 0xb40   :  { %8393 = vmatpush2.msra.mxu1 %v12699_v15  ;;  %8323 = vmatprep.subr.mxu0 %v12694_v13 }
 0xb41   :  { %8394 = vmatprep.subr.mxu1 %v12696_v61  ;;  %8324 = vmatpush2.msra.mxu0 %v12693_v17 }
 0xb42   :  { %8395 = vmatpush2.msra.mxu1 %v12695_v22  ;;  %8325 = vmatprep.subr.mxu0 %v12690_v36 }
 0xb43   :  { %8396 = vmatprep.subr.mxu1 %v12692_v44  ;;  %8326 = vmatpush2.msra.mxu0 %v12689_v55 }
 0xb44   :  { %8397 = vmatpush2.msra.mxu1 %v12691_v12  ;;  %8327 = vmatprep.subr.mxu0 %v12686_v7 }
 0xb45   :  { %8398 = vmatprep.subr.mxu1 %v12688_v41  ;;  %8328 = vmatpush2.msra.mxu0 %v12685_v16 }
 0xb46   :  { %8399 = vmatpush2.msra.mxu1 %v12687_v45  ;;  %8329 = vmatprep.subr.mxu0 %v12682_v57 }
 0xb47   :  { %8400 = vmatprep.subr.mxu1 %v12684_v33  ;;  %8330 = vmatpush2.msra.mxu0 %v12681_v38 }
 0xb48   :  { %8401 = vmatpush2.msra.mxu1 %v12683_v46  ;;  %8331 = vmatprep.subr.mxu0 %v12678_v27 }
 0xb49   :  { %8402 = vmatprep.subr.mxu1 %v12680_v56  ;;  %8332 = vmatpush2.msra.mxu0 %v12677_v8 }
 0xb4a   :  { %8403 = vmatpush2.msra.mxu1 %v12679_v40  ;;  %8333 = vmatprep.subr.mxu0 %v12674_v35 }
 0xb4b   :  { %8404 = vmatprep.subr.mxu1 %v12676_v30  ;;  %8334 = vmatpush2.msra.mxu0 %v12673_v24 }
 0xb4c   :  { %8405 = vmatpush2.msra.mxu1 %v12675_v49  ;;  %8335 = vmatprep.subr.mxu0 %v12670_v34 }
 0xb4d   :  { %8406 = vmatprep.subr.mxu1 %v12672_v42  ;;  %8336 = vmatpush2.msra.mxu0 %v12669_v60 }
 0xb4e   :  { %8407 = vmatpush2.msra.mxu1 %v12671_v32  ;;  %8337 = vmatprep.subr.mxu0 %v12666_v3 }
 0xb4f   :  { %8408 = vmatprep.subr.mxu1 %v12668_v9  ;;  %8338 = vmatpush2.msra.mxu0 %v12665_v63 }
 0xb50   :  { %8409 = vmatpush2.msra.mxu1 %v12667_v18  ;;  %8417 = vmatprep.subr.mxu0 %v8064_v6 }
 0xb51   :  { %8488 = vmatprep.subr.mxu1 %v8066_v58 }
 0xb98   :  { %v6938_v29 = vpop.f32.mrf.mxu0 }
 0xb9a   :  { %v6940_v19 = vpop.f32.mrf.mxu0 }
 0xb9c   :  { %v6949_v23 = vpop.f32.mrf.mxu0 }
 0xb9e   :  { %v6951_v62 = vpop.f32.mrf.mxu0 }
 0xba0   :  { %v7051_v48 = vpop.f32.mrf.mxu1 }
 0xba1   :  { %v7143_v20 = vpop.f32.mrf.mxu0  ;;  %v7052_v55 = vadd.f32 %v7051_v48, %v6938_v29 }
 0xba2   :  { %v7053_v51 = vpop.f32.mrf.mxu1 }
 0xba3   :  { %v7145_v53 = vpop.f32.mrf.mxu0  ;;  %v7054_v7 = vadd.f32 %v7053_v51, %v6940_v19  ;;  %v7144_v38 = vadd.f32 %v7143_v20, %v7052_v55 }
 0xba5   :  { %v7146_v8 = vadd.f32 %v7145_v53, %v7054_v7 }
 0xba6   :  { %v7058_v11 = vpop.f32.mrf.mxu1 }
 0xba7   :  { %v7151_v50 = vpop.f32.mrf.mxu0  ;;  %v7059_v57 = vadd.f32 %v7058_v11, %v6949_v23 }
 0xba8   :  { %v7060_v59 = vpop.f32.mrf.mxu1 }
 0xba9   :  { %v7153_v21 = vpop.f32.mrf.mxu0  ;;  %v7061_v40 = vadd.f32 %v7060_v59, %v6951_v62  ;;  %v7152_v60 = vadd.f32 %v7151_v50, %v7059_v57 }
 0xbab   :  { %v7231_v4 = vpop.f32.mrf.mxu1  ;;  %v7330_v37 = vpop.f32.mrf.mxu0  ;;  %v7154_v6 = vadd.f32 %v7153_v21, %v7061_v40  ;;  %v8061_v40 = vld [vmem:[%s21386_s8 + $0x1d0] sm:$0xff] }
 0xbac   :  { %v7232_v30 = vadd.f32 %v7231_v4, %v7144_v38  ;;  %v8065_v38 = vld [vmem:[%s21386_s8 + $0x1f0] sm:$0xff] }
 0xbad   :  { %v7233_v25 = vpop.f32.mrf.mxu1  ;;  %v7332_v14 = vpop.f32.mrf.mxu0 }
 0xbae   :  { %v7234_v32 = vadd.f32 %v7233_v25, %v7146_v8  ;;  %v7331_v19 = vadd.f32 %v7330_v37, %v7232_v30  ;;  %v8059_v8 = vld [vmem:[%s21386_s8 + $0x1c0] sm:$0xff]  ;;  %v8058_v30 = vld [vmem:[%s21386_s8 + $0x1b8] sm:$0xff] }
 0xbb0   :  { %v7333_v51 = vadd.f32 %v7332_v14, %v7234_v32  ;;  %v8053_v32 = vld [vmem:[%s21386_s8 + $0x190] sm:$0xff] }
 0xbb1   :  { %v7240_v43 = vpop.f32.mrf.mxu1  ;;  %v7337_v26 = vpop.f32.mrf.mxu0 }
 0xbb2   :  { %v7241_v58 = vadd.f32 %v7240_v43, %v7152_v60  ;;  %v8051_v60 = vld [vmem:[%s21386_s8 + $0x180] sm:$0xff] }
 0xbb3   :  { %v7242_v28 = vpop.f32.mrf.mxu1  ;;  %v7339_v31 = vpop.f32.mrf.mxu0 }
 0xbb4   :  { %v7243_v53 = vadd.f32 %v7242_v28, %v7154_v6  ;;  %v7338_v25 = vadd.f32 %v7337_v26, %v7241_v58  ;;  %v8044_v6 = vld [vmem:[%s21386_s8 + $0x148] sm:$0xff]  ;;  %v8046_v58 = vld [vmem:[%s21386_s8 + $0x158] sm:$0xff] }
 0xbb5   :  { %v7415_v54 = vpop.f32.mrf.mxu1  ;;  %v7504_v10 = vpop.f32.mrf.mxu0 }
 0xbb6   :  { %v7416_v59 = vadd.f32 %v7415_v54, %v7331_v19  ;;  %v7340_v37 = vadd.f32 %v7339_v31, %v7243_v53  ;;  %v8045_v19 = vld [vmem:[%s21386_s8 + $0x150] sm:$0xff]  ;;  %v8038_v53 = vld [vmem:[%s21386_s8 + $0x118] sm:$0xff] }
 0xbb7   :  { %v7417_v39 = vpop.f32.mrf.mxu1  ;;  %v7506_v52 = vpop.f32.mrf.mxu0 }
 0xbbb   :  { %v7422_v1 = vpop.f32.mrf.mxu1  ;;  %v7515_v47 = vpop.f32.mrf.mxu0 }
 0xbbd   :  { %v18002_v15 = vpop.f32.mrf.mxu1  ;;  %v7517_v13 = vpop.f32.mrf.mxu0 }
 0xbbf   :  { %v7617_v61 = vpop.f32.mrf.mxu1  ;;  %v7709_v17 = vpop.f32.mrf.mxu0 }
 0xbc0   :  { %v7618_v12 = vadd.f32 %v7617_v61, %v7504_v10 }
 0xbc1   :  { %v7619_v22 = vpop.f32.mrf.mxu1  ;;  %v7711_v36 = vpop.f32.mrf.mxu0 }
 0xbc2   :  { %v7620_v16 = vadd.f32 %v7619_v22, %v7506_v52  ;;  %v7710_v46 = vadd.f32 %v7709_v17, %v7618_v12  ;;  %v7423_v22 = vadd.f32 %v7422_v1, %v7338_v25  ;;  %v8033_v25 = vld [vmem:[%s21386_s8 + $0xf0] sm:$0xff] }
 0xbc4   :  { %v7624_v44 = vpop.f32.mrf.mxu1  ;;  %v7712_v24 = vadd.f32 %v7711_v36, %v7620_v16 }
 0xbc5   :  { %v7625_v27 = vadd.f32 %v7624_v44, %v7515_v47  ;;  %v7425_v44 = vadd.f32 %v18002_v15, %v7340_v37  ;;  %v8063_v15 = vld [vmem:[%s21386_s8 + $0x1e0] sm:$0xff]  ;;  %v8026_v37 = vld [vmem:[%s21386_s8 + $0xb8] sm:$0xff] }
 0xbc6   :  { %v7626_v41 = vpop.f32.mrf.mxu1 }
 0xbc7   :  { %v7717_v45 = vpop.f32.mrf.mxu0  ;;  %v7627_v49 = vadd.f32 %v7626_v41, %v7517_v13  ;;  %v7418_v13 = vadd.f32 %v7417_v39, %v7333_v51  ;;  %v8036_v51 = vld [vmem:[%s21386_s8 + $0x108] sm:$0xff] }
 0xbc8   :  { %v7797_v33 = vpop.f32.mrf.mxu1  ;;  %v7718_v9 = vadd.f32 %v7717_v45, %v7625_v27  ;;  %v8060_v27 = vld [vmem:[%s21386_s8 + $0x1c8] sm:$0xff] }
 0xbc9   :  { %v7719_v56 = vpop.f32.mrf.mxu0  ;;  %v7798_v34 = vadd.f32 %v7797_v33, %v7710_v46 }
 0xbca   :  { %v7799_v35 = vpop.f32.mrf.mxu1  ;;  %v7720_v23 = vadd.f32 %v7719_v56, %v7627_v49  ;;  %v8062_v56 = vld [vmem:[%s21386_s8 + $0x1d8] sm:$0xff]  ;;  %v8057_v49 = vld [vmem:[%s21386_s8 + $0x1b0] sm:$0xff] }
 0xbcb   :  { %v7896_v42 = vpop.f32.mrf.mxu0  ;;  %v7800_v63 = vadd.f32 %v7799_v35, %v7712_v24  ;;  %v8056_v35 = vld [vmem:[%s21386_s8 + $0x1a8] sm:$0xff]  ;;  %v8055_v24 = vld [vmem:[%s21386_s8 + $0x1a0] sm:$0xff] }
 0xbcc   :  { %v7806_v3 = vpop.f32.mrf.mxu1  ;;  %v7897_v48 = vadd.f32 %v7896_v42, %v7798_v34  ;;  %v8052_v34 = vld [vmem:[%s21386_s8 + $0x188] sm:$0xff]  ;;  %v8054_v42 = vld [vmem:[%s21386_s8 + $0x198] sm:$0xff] }
 0xbcd   :  { %v7898_v18 = vpop.f32.mrf.mxu0  ;;  %v7807_v20 = vadd.f32 %v7806_v3, %v7718_v9  ;;  %v8048_v3 = vld [vmem:[%s21386_s8 + $0x168] sm:$0xff]  ;;  %v8050_v9 = vld [vmem:[%s21386_s8 + $0x178] sm:$0xff] }
 0xbce   :  { %v7808_v29 = vpop.f32.mrf.mxu1  ;;  %v7899_v4 = vadd.f32 %v7898_v18, %v7800_v63  ;;  %v8047_v63 = vld [vmem:[%s21386_s8 + $0x160] sm:$0xff]  ;;  %v8049_v18 = vld [vmem:[%s21386_s8 + $0x170] sm:$0xff] }
 0xbcf   :  { %v7903_v62 = vpop.f32.mrf.mxu0  ;;  %v7809_v10 = vadd.f32 %v7808_v29, %v7720_v23  ;;  %v8043_v29 = vld [vmem:[%s21386_s8 + $0x140] sm:$0xff]  ;;  %v8040_v23 = vld [vmem:[%s21386_s8 + $0x128] sm:$0xff] }
 0xbd0   :  { %v7981_v11 = vpop.f32.mrf.mxu1  ;;  %v7904_v61 = vadd.f32 %v7903_v62, %v7807_v20  ;;  %v8039_v20 = vld [vmem:[%s21386_s8 + $0x120] sm:$0xff]  ;;  %v8041_v62 = vld [vmem:[%s21386_s8 + $0x130] sm:$0xff] }
 0xbd1   :  { %v7982_v50 = vadd.f32 %v7981_v11, %v7897_v48  ;;  %v7905_v52 = vpop.f32.mrf.mxu0  ;;  %v8042_v48 = vld [vmem:[%s21386_s8 + $0x138] sm:$0xff]  ;;  %v8035_v11 = vld [vmem:[%s21386_s8 + $0x100] sm:$0xff] }
 0xbd2   :  { %v7983_v47 = vpop.f32.mrf.mxu1  ;;  %v7906_v36 = vadd.f32 %v7905_v52, %v7809_v10  ;;  %v8034_v10 = vld [vmem:[%s21386_s8 + $0xf8] sm:$0xff]  ;;  %v8028_v52 = vld [vmem:[%s21386_s8 + $0xc8] sm:$0xff] }
 0xbd3   :  { %v18004_v21 = vmax.f32 %v7416_v59, %v7982_v50  ;;  %v7984_v43 = vadd.f32 %v7983_v47, %v7899_v4  ;;  %v8037_v59 = vld [vmem:[%s21386_s8 + $0x110] sm:$0xff]  ;;  %v8032_v4 = vld [vmem:[%s21386_s8 + $0xe8] sm:$0xff]  ;;  %v8031_v50 = vld [vmem:[%s21386_s8 + $0xe0] sm:$0xff] }
 0xbd4   :  { %v7988_v17 = vpop.f32.mrf.mxu1  ;;  %v8030_v47 = vld [vmem:[%s21386_s8 + $0xd8] sm:$0xff] }
 0xbd5   :  { %7997 = vst [vmem:[#allocation4 + $0x10] sm:$0xff] %v18004_v21  ;;  %v7994_v14 = vmax.f32 %v7418_v13, %v7984_v43  ;;  %v7989_v28 = vadd.f32 %v7988_v17, %v7904_v61  ;;  %v8027_v13 = vld [vmem:[%s21386_s8 + $0xc0] sm:$0xff]  ;;  %v8029_v61 = vld [vmem:[%s21386_s8 + $0xd0] sm:$0xff]  ;;  %v8024_v43 = vld [vmem:[%s21386_s8 + $0xa8] sm:$0xff] }
 0xbd6   :  { %v7990_v54 = vpop.f32.mrf.mxu1  ;;  %v8023_v17 = vld [vmem:[%s21386_s8 + $0xa0] sm:$0xff] }
 0xbd7   :  { %7998 = vst [vmem:[#allocation4] sm:$0xff] %v7994_v14  ;;  %v7995_v26 = vmax.f32 %v7423_v22, %v7989_v28  ;;  %v7991_v55 = vadd.f32 %v7990_v54, %v7906_v36  ;;  %v8025_v22 = vld [vmem:[%s21386_s8 + $0xb0] sm:$0xff]  ;;  %v8020_v36 = vld [vmem:[%s21386_s8 + $0x88] sm:$0xff]  ;;  %v8019_v28 = vld [vmem:[%s21386_s8 + $0x80] sm:$0xff] }
 0xbd8   :  { %v8021_v54 = vld [vmem:[%s21386_s8 + $0x90] sm:$0xff] }
 0xbd9   :  { %7999 = vst [vmem:[#allocation4 + $0x18] sm:$0xf] %v7995_v26  ;;  %v7996_v39 = vmax.f32 %v7425_v44, %v7991_v55  ;;  %v8016_v44 = vld [vmem:[%s21386_s8 + $0x68] sm:$0xff]  ;;  %v8018_v26 = vld [vmem:[%s21386_s8 + $0x78] sm:$0xff]  ;;  %v8015_v55 = vld [vmem:[%s21386_s8 + $0x60] sm:$0xff] }
 0xbdb   :  { %8000 = vst [vmem:[#allocation4 + $0x8] sm:$0xf] %v7996_v39  ;;  %v8017_v39 = vld [vmem:[%s21386_s8 + $0x70] sm:$0xff] }
 0xbdc   :  { %v8131_v41 = vld [vmem:[#allocation4 + $0x10] sm:$0xfe] }
 0xbdd   :  { %v8267_v57 = vrot.slane %v8131_v41, 1  ;;  %v8011_v41 = vld [vmem:[%s21386_s8 + $0x40] sm:$0xff] }
 0xbde   :  { %v8132_v12 = vld [vmem:[#allocation4] sm:$0xfe] }
 0xbdf   :  { %v8270_v1 = vrot.slane %v8132_v12, 1  ;;  %v8012_v12 = vld [vmem:[%s21386_s8 + $0x48] sm:$0xff] }
 0xbe0   :  { %v8133_v7 = vld [vmem:[#allocation4 + $0x18] sm:$0x1] }
 0xbe1   :  { %v8268_v16 = vrot.slane %v8133_v7, 1  ;;  %v8014_v7 = vld [vmem:[%s21386_s8 + $0x58] sm:$0xff] }
 0xbe2   :  { %v8134_v31 = vld [vmem:[#allocation4 + $0x8] sm:$0x1] }
 0xbe3   :  { %v8271_v45 = vrot.slane %v8134_v31, 1  ;;  %v8269_v46 = vsel %vm3354_vm11, %v8267_v57, %v8268_v16  ;;  %v8013_v31 = vld [vmem:[%s21386_s8 + $0x50] sm:$0xff]  ;;  %v8008_v16 = vld [vmem:[%s21386_s8 + $0x28] sm:$0xff] }
 0xbe4   :  { %v8009_v57 = vld [vmem:[%s21386_s8 + $0x30] sm:$0xff] }
 0xbe5   :  { %v8272_v33 = vsel %vm3354_vm11, %v8270_v1, %v8271_v45  ;;  %v8010_v1 = vld [vmem:[%s21386_s8 + $0x38] sm:$0xff]  ;;  %v8007_v45 = vld [vmem:[%s21386_s8 + $0x20] sm:$0xff] }
 0xbe6   :  { %8339 = vmatprep.mubr.f32.mxu0 %v8272_v33  ;;  %8410 = vmatprep.mubr.f32.mxu1 %v8272_v33  ;;  %v8004_v33 = vld [vmem:[%s21386_s8 + $0x8] sm:$0xff] }
 0xbe7   :  { %8340 = vmatmul.mubr.f32.vlgmr.msra.gmra.mxu0 %v8269_v46  ;;  %8411 = vmatmul.mubr.f32.vlgmr.msra.gmra.mxu1 %v8269_v46  ;;  %v8005_v46 = vld [vmem:[%s21386_s8 + $0x10] sm:$0xff] }
 0xbe8   :  { %8418 = vmatpush1.msra.mxu0 %v8063_v15  ;;  %8489 = vmatpush1.msra.mxu1 %v8065_v38  ;;  %v8006_v15 = vld [vmem:[%s21386_s8 + $0x18] sm:$0xff]  ;;  %v8003_v38 = vld [vmem:[%s21386_s8] sm:$0xff] }
 0xbe9   :  { %8419 = vmatprep.subr.mxu0 %v8060_v27  ;;  %8481 = vmatprep.mubr.f32.mxu0 %v7994_v14  ;;  %v8128_v27 = vld [vmem:[%s21386_s8 + $0x3e8] sm:$0xff] }
 0xbea   :  { %8490 = vmatprep.subr.mxu1 %v8062_v56  ;;  %8552 = vmatprep.mubr.f32.mxu1 %v7994_v14  ;;  %v8022_v14 = vld [vmem:[%s21386_s8 + $0x98] sm:$0xff] }
 0xbeb   :  { %8420 = vmatpush1.msra.mxu0 %v8059_v8  ;;  %8491 = vmatpush1.msra.mxu1 %v8061_v40  ;;  %v8130_v56 = vld [vmem:[%s21386_s8 + $0x3f8] sm:$0xff]  ;;  %v8127_v8 = vld [vmem:[%s21386_s8 + $0x3e0] sm:$0xff]  ;;  %v8129_v40 = vld [vmem:[%s21386_s8 + $0x3f0] sm:$0xff] }
 0xbec   :  { %8421 = vmatprep.subr.mxu0 %v8056_v35  ;;  %8492 = vmatprep.subr.mxu1 %v8058_v30  ;;  %v8124_v35 = vld [vmem:[%s21386_s8 + $0x3c8] sm:$0xff]  ;;  %v8126_v30 = vld [vmem:[%s21386_s8 + $0x3d8] sm:$0xff] }
 0xbed   :  { %8422 = vmatpush1.msra.mxu0 %v8055_v24  ;;  %8493 = vmatpush1.msra.mxu1 %v8057_v49  ;;  %v8123_v24 = vld [vmem:[%s21386_s8 + $0x3c0] sm:$0xff]  ;;  %v8125_v49 = vld [vmem:[%s21386_s8 + $0x3d0] sm:$0xff] }
 0xbee   :  { %8423 = vmatprep.subr.mxu0 %v8052_v34  ;;  %8494 = vmatprep.subr.mxu1 %v8054_v42  ;;  %v8120_v34 = vld [vmem:[%s21386_s8 + $0x3a8] sm:$0xff]  ;;  %v8122_v42 = vld [vmem:[%s21386_s8 + $0x3b8] sm:$0xff] }
 0xbef   :  { %8424 = vmatpush1.msra.mxu0 %v8051_v60  ;;  %8495 = vmatpush1.msra.mxu1 %v8053_v32  ;;  %v8119_v60 = vld [vmem:[%s21386_s8 + $0x3a0] sm:$0xff]  ;;  %v8121_v32 = vld [vmem:[%s21386_s8 + $0x3b0] sm:$0xff] }
 0xbf0   :  { %8425 = vmatprep.subr.mxu0 %v8048_v3  ;;  %8496 = vmatprep.subr.mxu1 %v8050_v9  ;;  %v8116_v3 = vld [vmem:[%s21386_s8 + $0x388] sm:$0xff]  ;;  %v8118_v9 = vld [vmem:[%s21386_s8 + $0x398] sm:$0xff] }
 0xbf1   :  { %8426 = vmatpush1.msra.mxu0 %v8047_v63  ;;  %8497 = vmatpush1.msra.mxu1 %v8049_v18  ;;  %v8115_v63 = vld [vmem:[%s21386_s8 + $0x380] sm:$0xff]  ;;  %v8117_v18 = vld [vmem:[%s21386_s8 + $0x390] sm:$0xff] }
 0xbf2   :  { %8427 = vmatprep.subr.mxu0 %v8044_v6  ;;  %8498 = vmatprep.subr.mxu1 %v8046_v58  ;;  %v8112_v6 = vld [vmem:[%s21386_s8 + $0x368] sm:$0xff]  ;;  %v8114_v58 = vld [vmem:[%s21386_s8 + $0x378] sm:$0xff] }
 0xbf3   :  { %8428 = vmatpush1.msra.mxu0 %v8043_v29  ;;  %8499 = vmatpush1.msra.mxu1 %v8045_v19  ;;  %v8111_v29 = vld [vmem:[%s21386_s8 + $0x360] sm:$0xff]  ;;  %v8113_v19 = vld [vmem:[%s21386_s8 + $0x370] sm:$0xff] }
 0xbf4   :  { %8429 = vmatprep.subr.mxu0 %v8040_v23  ;;  %8500 = vmatprep.subr.mxu1 %v8042_v48  ;;  %v8108_v23 = vld [vmem:[%s21386_s8 + $0x348] sm:$0xff]  ;;  %v8110_v48 = vld [vmem:[%s21386_s8 + $0x358] sm:$0xff] }
 0xbf5   :  { %8430 = vmatpush1.msra.mxu0 %v8039_v20  ;;  %8501 = vmatpush1.msra.mxu1 %v8041_v62  ;;  %v8107_v20 = vld [vmem:[%s21386_s8 + $0x340] sm:$0xff]  ;;  %v8109_v62 = vld [vmem:[%s21386_s8 + $0x350] sm:$0xff] }
 0xbf6   :  { %8431 = vmatprep.subr.mxu0 %v8036_v51  ;;  %8502 = vmatprep.subr.mxu1 %v8038_v53  ;;  %v8104_v51 = vld [vmem:[%s21386_s8 + $0x328] sm:$0xff]  ;;  %v8106_v53 = vld [vmem:[%s21386_s8 + $0x338] sm:$0xff] }
 0xbf7   :  { %8432 = vmatpush1.msra.mxu0 %v8035_v11  ;;  %8503 = vmatpush1.msra.mxu1 %v8037_v59  ;;  %v8103_v11 = vld [vmem:[%s21386_s8 + $0x320] sm:$0xff]  ;;  %v8105_v59 = vld [vmem:[%s21386_s8 + $0x330] sm:$0xff] }
 0xbf8   :  { %8433 = vmatprep.subr.mxu0 %v8032_v4  ;;  %8504 = vmatprep.subr.mxu1 %v8034_v10  ;;  %v8100_v4 = vld [vmem:[%s21386_s8 + $0x308] sm:$0xff]  ;;  %v8102_v10 = vld [vmem:[%s21386_s8 + $0x318] sm:$0xff] }
 0xbf9   :  { %8434 = vmatpush1.msra.mxu0 %v8031_v50  ;;  %8505 = vmatpush1.msra.mxu1 %v8033_v25  ;;  %v8099_v50 = vld [vmem:[%s21386_s8 + $0x300] sm:$0xff]  ;;  %v8101_v25 = vld [vmem:[%s21386_s8 + $0x310] sm:$0xff] }
 0xbfa   :  { %8435 = vmatprep.subr.mxu0 %v8028_v52  ;;  %8506 = vmatprep.subr.mxu1 %v8030_v47  ;;  %v8096_v52 = vld [vmem:[%s21386_s8 + $0x2e8] sm:$0xff]  ;;  %v8098_v47 = vld [vmem:[%s21386_s8 + $0x2f8] sm:$0xff] }
 0xbfb   :  { %8436 = vmatpush1.msra.mxu0 %v8027_v13  ;;  %8507 = vmatpush1.msra.mxu1 %v8029_v61  ;;  %v8095_v13 = vld [vmem:[%s21386_s8 + $0x2e0] sm:$0xff]  ;;  %v8097_v61 = vld [vmem:[%s21386_s8 + $0x2f0] sm:$0xff] }
 0xbfc   :  { %8437 = vmatprep.subr.mxu0 %v8024_v43  ;;  %8508 = vmatprep.subr.mxu1 %v8026_v37  ;;  %v8092_v43 = vld [vmem:[%s21386_s8 + $0x2c8] sm:$0xff]  ;;  %v8094_v37 = vld [vmem:[%s21386_s8 + $0x2d8] sm:$0xff] }
 0xbfd   :  { %8438 = vmatpush1.msra.mxu0 %v8023_v17  ;;  %8509 = vmatpush1.msra.mxu1 %v8025_v22  ;;  %v8091_v17 = vld [vmem:[%s21386_s8 + $0x2c0] sm:$0xff]  ;;  %v8093_v22 = vld [vmem:[%s21386_s8 + $0x2d0] sm:$0xff] }
 0xbfe   :  { %8439 = vmatprep.subr.mxu0 %v8020_v36  ;;  %8510 = vmatprep.subr.mxu1 %v8022_v14  ;;  %v8088_v36 = vld [vmem:[%s21386_s8 + $0x2a8] sm:$0xff]  ;;  %v8090_v14 = vld [vmem:[%s21386_s8 + $0x2b8] sm:$0xff] }
 0xbff   :  { %8440 = vmatpush1.msra.mxu0 %v8019_v28  ;;  %8511 = vmatpush1.msra.mxu1 %v8021_v54  ;;  %v8087_v28 = vld [vmem:[%s21386_s8 + $0x2a0] sm:$0xff]  ;;  %v8089_v54 = vld [vmem:[%s21386_s8 + $0x2b0] sm:$0xff] }
 0xc00   :  { %8441 = vmatprep.subr.mxu0 %v8016_v44  ;;  %8512 = vmatprep.subr.mxu1 %v8018_v26  ;;  %v8084_v44 = vld [vmem:[%s21386_s8 + $0x288] sm:$0xff]  ;;  %v8086_v26 = vld [vmem:[%s21386_s8 + $0x298] sm:$0xff] }
 0xc01   :  { %8442 = vmatpush1.msra.mxu0 %v8015_v55  ;;  %8513 = vmatpush1.msra.mxu1 %v8017_v39  ;;  %v8083_v55 = vld [vmem:[%s21386_s8 + $0x280] sm:$0xff]  ;;  %v8085_v39 = vld [vmem:[%s21386_s8 + $0x290] sm:$0xff] }
 0xc02   :  { %8443 = vmatprep.subr.mxu0 %v8012_v12  ;;  %8514 = vmatprep.subr.mxu1 %v8014_v7  ;;  %v8080_v12 = vld [vmem:[%s21386_s8 + $0x268] sm:$0xff]  ;;  %v8082_v7 = vld [vmem:[%s21386_s8 + $0x278] sm:$0xff] }
 0xc03   :  { %8444 = vmatpush1.msra.mxu0 %v8011_v41  ;;  %8515 = vmatpush1.msra.mxu1 %v8013_v31  ;;  %v8079_v41 = vld [vmem:[%s21386_s8 + $0x260] sm:$0xff]  ;;  %v8081_v31 = vld [vmem:[%s21386_s8 + $0x270] sm:$0xff] }
 0xc04   :  { %8445 = vmatprep.subr.mxu0 %v8008_v16  ;;  %8516 = vmatprep.subr.mxu1 %v8010_v1  ;;  %v8076_v16 = vld [vmem:[%s21386_s8 + $0x248] sm:$0xff]  ;;  %v8078_v1 = vld [vmem:[%s21386_s8 + $0x258] sm:$0xff] }
 0xc05   :  { %8446 = vmatpush1.msra.mxu0 %v8007_v45  ;;  %8517 = vmatpush1.msra.mxu1 %v8009_v57  ;;  %v8075_v45 = vld [vmem:[%s21386_s8 + $0x240] sm:$0xff]  ;;  %v8077_v57 = vld [vmem:[%s21386_s8 + $0x250] sm:$0xff] }
 0xc06   :  { %8447 = vmatprep.subr.mxu0 %v8004_v33  ;;  %8518 = vmatprep.subr.mxu1 %v8006_v15  ;;  %v8072_v33 = vld [vmem:[%s21386_s8 + $0x228] sm:$0xff]  ;;  %v8074_v15 = vld [vmem:[%s21386_s8 + $0x238] sm:$0xff] }
 0xc07   :  { %8448 = vmatpush1.msra.mxu0 %v8003_v38  ;;  %8519 = vmatpush1.msra.mxu1 %v8005_v46  ;;  %v8071_v38 = vld [vmem:[%s21386_s8 + $0x220] sm:$0xff]  ;;  %v8073_v46 = vld [vmem:[%s21386_s8 + $0x230] sm:$0xff] }
 0xc08   :  { %8449 = vmatprep.subr.mxu0 %v8128_v27  ;;  %8520 = vmatprep.subr.mxu1 %v8130_v56  ;;  %v8562_v27 = vld [vmem:[#allocation4 + $0x8] sm:$0x3] }
 0xc09   :  { %8450 = vmatpush2.msra.mxu0 %v8127_v8  ;;  %8521 = vmatpush2.msra.mxu1 %v8129_v40  ;;  %v8068_v56 = vld [vmem:[%s21386_s8 + $0x208] sm:$0xff]  ;;  %v8070_v8 = vld [vmem:[%s21386_s8 + $0x218] sm:$0xff]  ;;  %v8067_v40 = vld [vmem:[%s21386_s8 + $0x200] sm:$0xff] }
 0xc0a   :  { %8451 = vmatprep.subr.mxu0 %v8124_v35  ;;  %8522 = vmatprep.subr.mxu1 %v8126_v30  ;;  %v8069_v35 = vld [vmem:[%s21386_s8 + $0x210] sm:$0xff]  ;;  %v8560_v30 = vld [vmem:[#allocation4] sm:$0xfc] }
 0xc0b   :  { %8452 = vmatpush2.msra.mxu0 %v8123_v24  ;;  %8523 = vmatpush2.msra.mxu1 %v8125_v49  ;;  %v8699_v24 = vrot.slane %v8562_v27, 2  ;;  %v12790_v49 = vld [vmem:[%s21386_s8 + $0x9e8] sm:$0xff] }
 0xc0c   :  { %8453 = vmatprep.subr.mxu0 %v8120_v34  ;;  %8524 = vmatprep.subr.mxu1 %v8122_v42  ;;  %v12792_v34 = vld [vmem:[%s21386_s8 + $0x9f8] sm:$0xff]  ;;  %v12789_v42 = vld [vmem:[%s21386_s8 + $0x9e0] sm:$0xff]  ;;  %v12738_v27 = vld [vmem:[%s21386_s8 + $0x848] sm:$0xff] }
 0xc0d   :  { %8454 = vmatpush2.msra.mxu0 %v8119_v60  ;;  %8525 = vmatpush2.msra.mxu1 %v8121_v32  ;;  %v8698_v60 = vrot.slane %v8560_v30, 2  ;;  %v12791_v32 = vld [vmem:[%s21386_s8 + $0x9f0] sm:$0xff]  ;;  %v12736_v30 = vld [vmem:[%s21386_s8 + $0x838] sm:$0xff] }
 0xc0e   :  { %8455 = vmatprep.subr.mxu0 %v8116_v3  ;;  %8526 = vmatprep.subr.mxu1 %v8118_v9  ;;  %v12786_v9 = vld [vmem:[%s21386_s8 + $0x9c8] sm:$0xff] }
 0xc0f   :  { %8456 = vmatpush2.msra.mxu0 %v8115_v63  ;;  %8527 = vmatpush2.msra.mxu1 %v8117_v18  ;;  %v8700_v3 = vsel %vm3784_vm12, %v8698_v60, %v8699_v24  ;;  %v12788_v63 = vld [vmem:[%s21386_s8 + $0x9d8] sm:$0xff]  ;;  %v12787_v18 = vld [vmem:[%s21386_s8 + $0x9d0] sm:$0xff]  ;;  %v12733_v24 = vld [vmem:[%s21386_s8 + $0x820] sm:$0xff] }
 0xc10   :  { %8457 = vmatprep.subr.mxu0 %v8112_v6  ;;  %8528 = vmatprep.subr.mxu1 %v8114_v58  ;;  %v12782_v6 = vld [vmem:[%s21386_s8 + $0x9a8] sm:$0xff]  ;;  %v12784_v58 = vld [vmem:[%s21386_s8 + $0x9b8] sm:$0xff]  ;;  %v12729_v60 = vld [vmem:[%s21386_s8 + $0x800] sm:$0xff] }
 0xc11   :  { %8458 = vmatpush2.msra.mxu0 %v8111_v29  ;;  %8529 = vmatpush2.msra.mxu1 %v8113_v19  ;;  %v12781_v29 = vld [vmem:[%s21386_s8 + $0x9a0] sm:$0xff]  ;;  %v12783_v19 = vld [vmem:[%s21386_s8 + $0x9b0] sm:$0xff] }
 0xc12   :  { %8459 = vmatprep.subr.mxu0 %v8108_v23  ;;  %8530 = vmatprep.subr.mxu1 %v8110_v48  ;;  %v12778_v23 = vld [vmem:[%s21386_s8 + $0x988] sm:$0xff]  ;;  %v12780_v48 = vld [vmem:[%s21386_s8 + $0x998] sm:$0xff] }
 0xc13   :  { %8460 = vmatpush2.msra.mxu0 %v8107_v20  ;;  %8531 = vmatpush2.msra.mxu1 %v8109_v62  ;;  %v12777_v20 = vld [vmem:[%s21386_s8 + $0x980] sm:$0xff]  ;;  %v12779_v62 = vld [vmem:[%s21386_s8 + $0x990] sm:$0xff] }
 0xc14   :  { %8461 = vmatprep.subr.mxu0 %v8104_v51  ;;  %8532 = vmatprep.subr.mxu1 %v8106_v53  ;;  %v12774_v51 = vld [vmem:[%s21386_s8 + $0x968] sm:$0xff]  ;;  %v12776_v53 = vld [vmem:[%s21386_s8 + $0x978] sm:$0xff] }
 0xc15   :  { %8462 = vmatpush2.msra.mxu0 %v8103_v11  ;;  %8533 = vmatpush2.msra.mxu1 %v8105_v59  ;;  %v12773_v11 = vld [vmem:[%s21386_s8 + $0x960] sm:$0xff]  ;;  %v12775_v59 = vld [vmem:[%s21386_s8 + $0x970] sm:$0xff] }
 0xc16   :  { %8463 = vmatprep.subr.mxu0 %v8100_v4  ;;  %8534 = vmatprep.subr.mxu1 %v8102_v10  ;;  %v12770_v4 = vld [vmem:[%s21386_s8 + $0x948] sm:$0xff]  ;;  %v12772_v10 = vld [vmem:[%s21386_s8 + $0x958] sm:$0xff] }
 0xc17   :  { %8464 = vmatpush2.msra.mxu0 %v8099_v50  ;;  %8535 = vmatpush2.msra.mxu1 %v8101_v25  ;;  %v12769_v50 = vld [vmem:[%s21386_s8 + $0x940] sm:$0xff]  ;;  %v12771_v25 = vld [vmem:[%s21386_s8 + $0x950] sm:$0xff] }
 0xc18   :  { %8465 = vmatprep.subr.mxu0 %v8096_v52  ;;  %8536 = vmatprep.subr.mxu1 %v8098_v47  ;;  %v12766_v52 = vld [vmem:[%s21386_s8 + $0x928] sm:$0xff]  ;;  %v12768_v47 = vld [vmem:[%s21386_s8 + $0x938] sm:$0xff] }
 0xc19   :  { %8466 = vmatpush2.msra.mxu0 %v8095_v13  ;;  %8537 = vmatpush2.msra.mxu1 %v8097_v61  ;;  %v12765_v13 = vld [vmem:[%s21386_s8 + $0x920] sm:$0xff]  ;;  %v12767_v61 = vld [vmem:[%s21386_s8 + $0x930] sm:$0xff] }
 0xc1a   :  { %8467 = vmatprep.subr.mxu0 %v8092_v43  ;;  %8538 = vmatprep.subr.mxu1 %v8094_v37  ;;  %v12762_v43 = vld [vmem:[%s21386_s8 + $0x908] sm:$0xff]  ;;  %v12764_v37 = vld [vmem:[%s21386_s8 + $0x918] sm:$0xff] }
 0xc1b   :  { %8468 = vmatpush2.msra.mxu0 %v8091_v17  ;;  %8539 = vmatpush2.msra.mxu1 %v8093_v22  ;;  %v12761_v17 = vld [vmem:[%s21386_s8 + $0x900] sm:$0xff]  ;;  %v12763_v22 = vld [vmem:[%s21386_s8 + $0x910] sm:$0xff] }
 0xc1c   :  { %8469 = vmatprep.subr.mxu0 %v8088_v36  ;;  %8540 = vmatprep.subr.mxu1 %v8090_v14  ;;  %v12758_v36 = vld [vmem:[%s21386_s8 + $0x8e8] sm:$0xff]  ;;  %v12760_v14 = vld [vmem:[%s21386_s8 + $0x8f8] sm:$0xff] }
 0xc1d   :  { %8470 = vmatpush2.msra.mxu0 %v8087_v28  ;;  %8541 = vmatpush2.msra.mxu1 %v8089_v54  ;;  %v12757_v28 = vld [vmem:[%s21386_s8 + $0x8e0] sm:$0xff]  ;;  %v12759_v54 = vld [vmem:[%s21386_s8 + $0x8f0] sm:$0xff] }
 0xc1e   :  { %8471 = vmatprep.subr.mxu0 %v8084_v44  ;;  %8542 = vmatprep.subr.mxu1 %v8086_v26  ;;  %v12754_v44 = vld [vmem:[%s21386_s8 + $0x8c8] sm:$0xff]  ;;  %v12756_v26 = vld [vmem:[%s21386_s8 + $0x8d8] sm:$0xff] }
 0xc1f   :  { %8472 = vmatpush2.msra.mxu0 %v8083_v55  ;;  %8543 = vmatpush2.msra.mxu1 %v8085_v39  ;;  %v12753_v55 = vld [vmem:[%s21386_s8 + $0x8c0] sm:$0xff]  ;;  %v12755_v39 = vld [vmem:[%s21386_s8 + $0x8d0] sm:$0xff] }
 0xc20   :  { %8473 = vmatprep.subr.mxu0 %v8080_v12  ;;  %8544 = vmatprep.subr.mxu1 %v8082_v7  ;;  %v12750_v12 = vld [vmem:[%s21386_s8 + $0x8a8] sm:$0xff]  ;;  %v12752_v7 = vld [vmem:[%s21386_s8 + $0x8b8] sm:$0xff] }
 0xc21   :  { %8474 = vmatpush2.msra.mxu0 %v8079_v41  ;;  %8545 = vmatpush2.msra.mxu1 %v8081_v31  ;;  %v12749_v41 = vld [vmem:[%s21386_s8 + $0x8a0] sm:$0xff]  ;;  %v12751_v31 = vld [vmem:[%s21386_s8 + $0x8b0] sm:$0xff] }
 0xc22   :  { %8475 = vmatprep.subr.mxu0 %v8076_v16  ;;  %8546 = vmatprep.subr.mxu1 %v8078_v1  ;;  %v12746_v16 = vld [vmem:[%s21386_s8 + $0x888] sm:$0xff]  ;;  %v12748_v1 = vld [vmem:[%s21386_s8 + $0x898] sm:$0xff] }
 0xc23   :  { %8476 = vmatpush2.msra.mxu0 %v8075_v45  ;;  %8547 = vmatpush2.msra.mxu1 %v8077_v57  ;;  %v12745_v45 = vld [vmem:[%s21386_s8 + $0x880] sm:$0xff]  ;;  %v12747_v57 = vld [vmem:[%s21386_s8 + $0x890] sm:$0xff] }
 0xc24   :  { %8477 = vmatprep.subr.mxu0 %v8072_v33  ;;  %8548 = vmatprep.subr.mxu1 %v8074_v15  ;;  %v12742_v33 = vld [vmem:[%s21386_s8 + $0x868] sm:$0xff]  ;;  %v12744_v15 = vld [vmem:[%s21386_s8 + $0x878] sm:$0xff] }
 0xc25   :  { %8478 = vmatpush2.msra.mxu0 %v8071_v38  ;;  %8549 = vmatpush2.msra.mxu1 %v8073_v46  ;;  %v12741_v38 = vld [vmem:[%s21386_s8 + $0x860] sm:$0xff]  ;;  %v12743_v46 = vld [vmem:[%s21386_s8 + $0x870] sm:$0xff] }
 0xc26   :  { %8479 = vmatprep.subr.mxu0 %v8068_v56  ;;  %8550 = vmatprep.subr.mxu1 %v8070_v8  ;;  %v12740_v56 = vld [vmem:[%s21386_s8 + $0x858] sm:$0xff]  ;;  %v12737_v8 = vld [vmem:[%s21386_s8 + $0x840] sm:$0xff] }
 0xc27   :  { %8480 = vmatpush2.msra.mxu0 %v8067_v40  ;;  %8551 = vmatpush2.msra.mxu1 %v8069_v35  ;;  %v12739_v40 = vld [vmem:[%s21386_s8 + $0x850] sm:$0xff]  ;;  %v12734_v35 = vld [vmem:[%s21386_s8 + $0x828] sm:$0xff] }
 0xc28   :  { %8482 = vmatmul.mubr.f32.vlgmr.msra.gmra.mxu0 %v18004_v21  ;;  %8553 = vmatmul.mubr.f32.vlgmr.msra.gmra.mxu1 %v18004_v21  ;;  %v12785_v21 = vld [vmem:[%s21386_s8 + $0x9c0] sm:$0xff] }
 0xc29   :  { %8703 = vmatprep.subr.mxu0 %v12790_v49  ;;  %8774 = vmatprep.subr.mxu1 %v12792_v34  ;;  %v12735_v49 = vld [vmem:[%s21386_s8 + $0x830] sm:$0xff]  ;;  %v12730_v34 = vld [vmem:[%s21386_s8 + $0x808] sm:$0xff] }
 0xc2a   :  { %8704 = vmatpush1.msra.mxu0 %v12789_v42  ;;  %8767 = vmatprep.mubr.f32.mxu0 %v8700_v3  ;;  %v12732_v42 = vld [vmem:[%s21386_s8 + $0x818] sm:$0xff] }
 0xc2b   :  { %8775 = vmatpush1.msra.mxu1 %v12791_v32  ;;  %8838 = vmatprep.mubr.f32.mxu1 %v8700_v3  ;;  %v12731_v32 = vld [vmem:[%s21386_s8 + $0x810] sm:$0xff]  ;;  %v12854_v3 = vld [vmem:[%s21386_s8 + $0xbe8] sm:$0xff] }
 0xc2c   :  { %8705 = vmatprep.subr.mxu0 %v12786_v9  ;;  %8776 = vmatprep.subr.mxu1 %v12788_v63  ;;  %v12856_v9 = vld [vmem:[%s21386_s8 + $0xbf8] sm:$0xff]  ;;  %v12853_v63 = vld [vmem:[%s21386_s8 + $0xbe0] sm:$0xff] }
 0xc2d   :  { %8706 = vmatpush1.msra.mxu0 %v12785_v21  ;;  %8777 = vmatpush1.msra.mxu1 %v12787_v18  ;;  %v12855_v21 = vld [vmem:[%s21386_s8 + $0xbf0] sm:$0xff]  ;;  %v12850_v18 = vld [vmem:[%s21386_s8 + $0xbc8] sm:$0xff] }
 0xc2e   :  { %8707 = vmatprep.subr.mxu0 %v12782_v6  ;;  %8778 = vmatprep.subr.mxu1 %v12784_v58  ;;  %v12852_v6 = vld [vmem:[%s21386_s8 + $0xbd8] sm:$0xff]  ;;  %v12849_v58 = vld [vmem:[%s21386_s8 + $0xbc0] sm:$0xff] }
 0xc2f   :  { %8708 = vmatpush1.msra.mxu0 %v12781_v29  ;;  %8779 = vmatpush1.msra.mxu1 %v12783_v19  ;;  %v12851_v29 = vld [vmem:[%s21386_s8 + $0xbd0] sm:$0xff]  ;;  %v12846_v19 = vld [vmem:[%s21386_s8 + $0xba8] sm:$0xff] }
 0xc30   :  { %8709 = vmatprep.subr.mxu0 %v12778_v23  ;;  %8780 = vmatprep.subr.mxu1 %v12780_v48  ;;  %v12848_v23 = vld [vmem:[%s21386_s8 + $0xbb8] sm:$0xff]  ;;  %v12845_v48 = vld [vmem:[%s21386_s8 + $0xba0] sm:$0xff] }
 0xc31   :  { %8710 = vmatpush1.msra.mxu0 %v12777_v20  ;;  %8781 = vmatpush1.msra.mxu1 %v12779_v62  ;;  %v12847_v20 = vld [vmem:[%s21386_s8 + $0xbb0] sm:$0xff]  ;;  %v12842_v62 = vld [vmem:[%s21386_s8 + $0xb88] sm:$0xff] }
 0xc32   :  { %8711 = vmatprep.subr.mxu0 %v12774_v51  ;;  %8782 = vmatprep.subr.mxu1 %v12776_v53  ;;  %v12844_v51 = vld [vmem:[%s21386_s8 + $0xb98] sm:$0xff]  ;;  %v12841_v53 = vld [vmem:[%s21386_s8 + $0xb80] sm:$0xff] }
 0xc33   :  { %8712 = vmatpush1.msra.mxu0 %v12773_v11  ;;  %8783 = vmatpush1.msra.mxu1 %v12775_v59  ;;  %v12843_v11 = vld [vmem:[%s21386_s8 + $0xb90] sm:$0xff]  ;;  %v12838_v59 = vld [vmem:[%s21386_s8 + $0xb68] sm:$0xff] }
 0xc34   :  { %8713 = vmatprep.subr.mxu0 %v12770_v4  ;;  %8784 = vmatprep.subr.mxu1 %v12772_v10  ;;  %v12840_v4 = vld [vmem:[%s21386_s8 + $0xb78] sm:$0xff]  ;;  %v12837_v10 = vld [vmem:[%s21386_s8 + $0xb60] sm:$0xff] }
 0xc35   :  { %8714 = vmatpush1.msra.mxu0 %v12769_v50  ;;  %8785 = vmatpush1.msra.mxu1 %v12771_v25  ;;  %v12839_v50 = vld [vmem:[%s21386_s8 + $0xb70] sm:$0xff]  ;;  %v12834_v25 = vld [vmem:[%s21386_s8 + $0xb48] sm:$0xff] }
 0xc36   :  { %8715 = vmatprep.subr.mxu0 %v12766_v52  ;;  %8786 = vmatprep.subr.mxu1 %v12768_v47  ;;  %v12836_v52 = vld [vmem:[%s21386_s8 + $0xb58] sm:$0xff]  ;;  %v12833_v47 = vld [vmem:[%s21386_s8 + $0xb40] sm:$0xff] }
 0xc37   :  { %8716 = vmatpush1.msra.mxu0 %v12765_v13  ;;  %8787 = vmatpush1.msra.mxu1 %v12767_v61  ;;  %v12835_v13 = vld [vmem:[%s21386_s8 + $0xb50] sm:$0xff]  ;;  %v12830_v61 = vld [vmem:[%s21386_s8 + $0xb28] sm:$0xff] }
 0xc38   :  { %8717 = vmatprep.subr.mxu0 %v12762_v43  ;;  %8788 = vmatprep.subr.mxu1 %v12764_v37  ;;  %v12832_v43 = vld [vmem:[%s21386_s8 + $0xb38] sm:$0xff]  ;;  %v12829_v37 = vld [vmem:[%s21386_s8 + $0xb20] sm:$0xff] }
 0xc39   :  { %8718 = vmatpush1.msra.mxu0 %v12761_v17  ;;  %8789 = vmatpush1.msra.mxu1 %v12763_v22  ;;  %v12831_v17 = vld [vmem:[%s21386_s8 + $0xb30] sm:$0xff]  ;;  %v12826_v22 = vld [vmem:[%s21386_s8 + $0xb08] sm:$0xff] }
 0xc3a   :  { %8719 = vmatprep.subr.mxu0 %v12758_v36  ;;  %8790 = vmatprep.subr.mxu1 %v12760_v14  ;;  %v12828_v36 = vld [vmem:[%s21386_s8 + $0xb18] sm:$0xff]  ;;  %v12825_v14 = vld [vmem:[%s21386_s8 + $0xb00] sm:$0xff] }
 0xc3b   :  { %8720 = vmatpush1.msra.mxu0 %v12757_v28  ;;  %8791 = vmatpush1.msra.mxu1 %v12759_v54  ;;  %v12827_v28 = vld [vmem:[%s21386_s8 + $0xb10] sm:$0xff]  ;;  %v12822_v54 = vld [vmem:[%s21386_s8 + $0xae8] sm:$0xff] }
 0xc3c   :  { %8721 = vmatprep.subr.mxu0 %v12754_v44  ;;  %8792 = vmatprep.subr.mxu1 %v12756_v26  ;;  %v12824_v44 = vld [vmem:[%s21386_s8 + $0xaf8] sm:$0xff]  ;;  %v12821_v26 = vld [vmem:[%s21386_s8 + $0xae0] sm:$0xff] }
 0xc3d   :  { %8722 = vmatpush1.msra.mxu0 %v12753_v55  ;;  %8793 = vmatpush1.msra.mxu1 %v12755_v39  ;;  %v12823_v55 = vld [vmem:[%s21386_s8 + $0xaf0] sm:$0xff]  ;;  %v12818_v39 = vld [vmem:[%s21386_s8 + $0xac8] sm:$0xff] }
 0xc3e   :  { %8723 = vmatprep.subr.mxu0 %v12750_v12  ;;  %8794 = vmatprep.subr.mxu1 %v12752_v7  ;;  %v12820_v12 = vld [vmem:[%s21386_s8 + $0xad8] sm:$0xff]  ;;  %v12817_v7 = vld [vmem:[%s21386_s8 + $0xac0] sm:$0xff] }
 0xc3f   :  { %8724 = vmatpush1.msra.mxu0 %v12749_v41  ;;  %8795 = vmatpush1.msra.mxu1 %v12751_v31  ;;  %v12819_v41 = vld [vmem:[%s21386_s8 + $0xad0] sm:$0xff]  ;;  %v12814_v31 = vld [vmem:[%s21386_s8 + $0xaa8] sm:$0xff] }
 0xc40   :  { %8725 = vmatprep.subr.mxu0 %v12746_v16  ;;  %8796 = vmatprep.subr.mxu1 %v12748_v1  ;;  %v12816_v16 = vld [vmem:[%s21386_s8 + $0xab8] sm:$0xff]  ;;  %v12813_v1 = vld [vmem:[%s21386_s8 + $0xaa0] sm:$0xff] }
 0xc41   :  { %8726 = vmatpush1.msra.mxu0 %v12745_v45  ;;  %8797 = vmatpush1.msra.mxu1 %v12747_v57  ;;  %v12815_v45 = vld [vmem:[%s21386_s8 + $0xab0] sm:$0xff]  ;;  %v12810_v57 = vld [vmem:[%s21386_s8 + $0xa88] sm:$0xff] }
 0xc42   :  { %8727 = vmatprep.subr.mxu0 %v12742_v33  ;;  %8798 = vmatprep.subr.mxu1 %v12744_v15  ;;  %v12812_v33 = vld [vmem:[%s21386_s8 + $0xa98] sm:$0xff]  ;;  %v12809_v15 = vld [vmem:[%s21386_s8 + $0xa80] sm:$0xff] }
 0xc43   :  { %8728 = vmatpush1.msra.mxu0 %v12741_v38  ;;  %8799 = vmatpush1.msra.mxu1 %v12743_v46  ;;  %v12811_v38 = vld [vmem:[%s21386_s8 + $0xa90] sm:$0xff]  ;;  %v12806_v46 = vld [vmem:[%s21386_s8 + $0xa68] sm:$0xff] }
 0xc44   :  { %8729 = vmatprep.subr.mxu0 %v12738_v27  ;;  %8800 = vmatprep.subr.mxu1 %v12740_v56  ;;  %v12808_v27 = vld [vmem:[%s21386_s8 + $0xa78] sm:$0xff]  ;;  %v12805_v56 = vld [vmem:[%s21386_s8 + $0xa60] sm:$0xff] }
 0xc45   :  { %8730 = vmatpush1.msra.mxu0 %v12737_v8  ;;  %8801 = vmatpush1.msra.mxu1 %v12739_v40  ;;  %v12807_v8 = vld [vmem:[%s21386_s8 + $0xa70] sm:$0xff]  ;;  %v12802_v40 = vld [vmem:[%s21386_s8 + $0xa48] sm:$0xff] }
 0xc46   :  { %8731 = vmatprep.subr.mxu0 %v12734_v35  ;;  %8802 = vmatprep.subr.mxu1 %v12736_v30  ;;  %v12804_v35 = vld [vmem:[%s21386_s8 + $0xa58] sm:$0xff]  ;;  %v12801_v30 = vld [vmem:[%s21386_s8 + $0xa40] sm:$0xff] }
 0xc47   :  { %8732 = vmatpush1.msra.mxu0 %v12733_v24  ;;  %8803 = vmatpush1.msra.mxu1 %v12735_v49  ;;  %v12803_v24 = vld [vmem:[%s21386_s8 + $0xa50] sm:$0xff]  ;;  %v8561_v49 = vld [vmem:[#allocation4 + $0x18] sm:$0x3] }
 0xc48   :  { %8733 = vmatprep.subr.mxu0 %v12730_v34  ;;  %8804 = vmatprep.subr.mxu1 %v12732_v42  ;;  %v12798_v34 = vld [vmem:[%s21386_s8 + $0xa28] sm:$0xff]  ;;  %v12800_v42 = vld [vmem:[%s21386_s8 + $0xa38] sm:$0xff] }
 0xc49   :  { %8734 = vmatpush1.msra.mxu0 %v12729_v60  ;;  %8805 = vmatpush1.msra.mxu1 %v12731_v32  ;;  %v8559_v60 = vld [vmem:[#allocation4 + $0x10] sm:$0xfc]  ;;  %v12797_v32 = vld [vmem:[%s21386_s8 + $0xa20] sm:$0xff] }
 0xc4a   :  { %8735 = vmatprep.subr.mxu0 %v12854_v3  ;;  %8806 = vmatprep.subr.mxu1 %v12856_v9  ;;  %v12799_v3 = vld [vmem:[%s21386_s8 + $0xa30] sm:$0xff]  ;;  %v8852_v9 = vld [vmem:[#allocation4 + $0x8] sm:$0x7] }
 0xc4b   :  { %8736 = vmatpush2.msra.mxu0 %v12853_v63  ;;  %8807 = vmatpush2.msra.mxu1 %v12855_v21  ;;  %v12794_v63 = vld [vmem:[%s21386_s8 + $0xa08] sm:$0xff]  ;;  %v12796_v21 = vld [vmem:[%s21386_s8 + $0xa18] sm:$0xff] }
 0xc4c   :  { %8737 = vmatprep.subr.mxu0 %v12850_v18  ;;  %8808 = vmatprep.subr.mxu1 %v12852_v6  ;;  %v8696_v18 = vrot.slane %v8561_v49, 2  ;;  %v12793_v6 = vld [vmem:[%s21386_s8 + $0xa00] sm:$0xff]  ;;  %v12879_v49 = vld [vmem:[%s21386_s8 + $0xcb0] sm:$0xff] }
 0xc4d   :  { %8738 = vmatpush2.msra.mxu0 %v12849_v58  ;;  %8809 = vmatpush2.msra.mxu1 %v12851_v29  ;;  %v12795_v58 = vld [vmem:[%s21386_s8 + $0xa10] sm:$0xff]  ;;  %v8850_v29 = vld [vmem:[#allocation4] sm:$0xf8] }
 0xc4e   :  { %8739 = vmatprep.subr.mxu0 %v12846_v19  ;;  %8810 = vmatprep.subr.mxu1 %v12848_v23  ;;  %v8695_v19 = vrot.slane %v8559_v60, 2  ;;  %v8989_v23 = vrot.slane %v8852_v9, 3  ;;  %v12873_v60 = vld [vmem:[%s21386_s8 + $0xc80] sm:$0xff]  ;;  %v12872_v9 = vld [vmem:[%s21386_s8 + $0xc78] sm:$0xff] }
 0xc4f   :  { %8740 = vmatpush2.msra.mxu0 %v12845_v48  ;;  %8811 = vmatpush2.msra.mxu1 %v12847_v20  ;;  %v12918_v48 = vld [vmem:[%s21386_s8 + $0xde8] sm:$0xff]  ;;  %v12920_v20 = vld [vmem:[%s21386_s8 + $0xdf8] sm:$0xff] }
 0xc50   :  { %8741 = vmatprep.subr.mxu0 %v12842_v62  ;;  %8812 = vmatprep.subr.mxu1 %v12844_v51  ;;  %v8697_v62 = vsel %vm3784_vm12, %v8695_v19, %v8696_v18  ;;  %v12917_v51 = vld [vmem:[%s21386_s8 + $0xde0] sm:$0xff]  ;;  %v12866_v18 = vld [vmem:[%s21386_s8 + $0xc48] sm:$0xff] }
 0xc51   :  { %8742 = vmatpush2.msra.mxu0 %v12841_v53  ;;  %8813 = vmatpush2.msra.mxu1 %v12843_v11  ;;  %v8988_v53 = vrot.slane %v8850_v29, 3  ;;  %v12919_v11 = vld [vmem:[%s21386_s8 + $0xdf0] sm:$0xff]  ;;  %v12862_v19 = vld [vmem:[%s21386_s8 + $0xc28] sm:$0xff] }
 0xc52   :  { %8743 = vmatprep.subr.mxu0 %v12838_v59  ;;  %8814 = vmatprep.subr.mxu1 %v12840_v4  ;;  %v12914_v4 = vld [vmem:[%s21386_s8 + $0xdc8] sm:$0xff]  ;;  %v12867_v29 = vld [vmem:[%s21386_s8 + $0xc50] sm:$0xff] }
 0xc53   :  { %8744 = vmatpush2.msra.mxu0 %v12837_v10  ;;  %8815 = vmatpush2.msra.mxu1 %v12839_v50  ;;  %v8990_v59 = vsel %vm4076_vm13, %v8988_v53, %v8989_v23  ;;  %v12916_v10 = vld [vmem:[%s21386_s8 + $0xdd8] sm:$0xff]  ;;  %v12913_v50 = vld [vmem:[%s21386_s8 + $0xdc0] sm:$0xff] }
 0xc54   :  { %8745 = vmatprep.subr.mxu0 %v12834_v25  ;;  %8816 = vmatprep.subr.mxu1 %v12836_v52  ;;  %v12915_v25 = vld [vmem:[%s21386_s8 + $0xdd0] sm:$0xff]  ;;  %v12910_v52 = vld [vmem:[%s21386_s8 + $0xda8] sm:$0xff]  ;;  %v12864_v23 = vld [vmem:[%s21386_s8 + $0xc38] sm:$0xff] }
 0xc55   :  { %8746 = vmatpush2.msra.mxu0 %v12833_v47  ;;  %8817 = vmatpush2.msra.mxu1 %v12835_v13  ;;  %v12912_v47 = vld [vmem:[%s21386_s8 + $0xdb8] sm:$0xff]  ;;  %v12909_v13 = vld [vmem:[%s21386_s8 + $0xda0] sm:$0xff] }
 0xc56   :  { %8747 = vmatprep.subr.mxu0 %v12830_v61  ;;  %8818 = vmatprep.subr.mxu1 %v12832_v43  ;;  %v12911_v61 = vld [vmem:[%s21386_s8 + $0xdb0] sm:$0xff]  ;;  %v12906_v43 = vld [vmem:[%s21386_s8 + $0xd88] sm:$0xff]  ;;  %v12857_v53 = vld [vmem:[%s21386_s8 + $0xc00] sm:$0xff] }
 0xc57   :  { %8748 = vmatpush2.msra.mxu0 %v12829_v37  ;;  %8819 = vmatpush2.msra.mxu1 %v12831_v17  ;;  %v12908_v37 = vld [vmem:[%s21386_s8 + $0xd98] sm:$0xff]  ;;  %v12905_v17 = vld [vmem:[%s21386_s8 + $0xd80] sm:$0xff] }
 0xc58   :  { %8749 = vmatprep.subr.mxu0 %v12826_v22  ;;  %8820 = vmatprep.subr.mxu1 %v12828_v36  ;;  %v12907_v22 = vld [vmem:[%s21386_s8 + $0xd90] sm:$0xff]  ;;  %v12902_v36 = vld [vmem:[%s21386_s8 + $0xd68] sm:$0xff] }
 0xc59   :  { %8750 = vmatpush2.msra.mxu0 %v12825_v14  ;;  %8821 = vmatpush2.msra.mxu1 %v12827_v28  ;;  %v12904_v14 = vld [vmem:[%s21386_s8 + $0xd78] sm:$0xff]  ;;  %v12901_v28 = vld [vmem:[%s21386_s8 + $0xd60] sm:$0xff] }
 0xc5a   :  { %8751 = vmatprep.subr.mxu0 %v12822_v54  ;;  %8822 = vmatprep.subr.mxu1 %v12824_v44  ;;  %v12903_v54 = vld [vmem:[%s21386_s8 + $0xd70] sm:$0xff]  ;;  %v12898_v44 = vld [vmem:[%s21386_s8 + $0xd48] sm:$0xff] }
 0xc5b   :  { %8752 = vmatpush2.msra.mxu0 %v12821_v26  ;;  %8823 = vmatpush2.msra.mxu1 %v12823_v55  ;;  %v12900_v26 = vld [vmem:[%s21386_s8 + $0xd58] sm:$0xff]  ;;  %v12897_v55 = vld [vmem:[%s21386_s8 + $0xd40] sm:$0xff] }
 0xc5c   :  { %8753 = vmatprep.subr.mxu0 %v12818_v39  ;;  %8824 = vmatprep.subr.mxu1 %v12820_v12  ;;  %v12899_v39 = vld [vmem:[%s21386_s8 + $0xd50] sm:$0xff]  ;;  %v12894_v12 = vld [vmem:[%s21386_s8 + $0xd28] sm:$0xff] }
 0xc5d   :  { %8754 = vmatpush2.msra.mxu0 %v12817_v7  ;;  %8825 = vmatpush2.msra.mxu1 %v12819_v41  ;;  %v12896_v7 = vld [vmem:[%s21386_s8 + $0xd38] sm:$0xff]  ;;  %v12893_v41 = vld [vmem:[%s21386_s8 + $0xd20] sm:$0xff] }
 0xc5e   :  { %8755 = vmatprep.subr.mxu0 %v12814_v31  ;;  %8826 = vmatprep.subr.mxu1 %v12816_v16  ;;  %v12895_v31 = vld [vmem:[%s21386_s8 + $0xd30] sm:$0xff]  ;;  %v12890_v16 = vld [vmem:[%s21386_s8 + $0xd08] sm:$0xff] }
 0xc5f   :  { %8756 = vmatpush2.msra.mxu0 %v12813_v1  ;;  %8827 = vmatpush2.msra.mxu1 %v12815_v45  ;;  %v12892_v1 = vld [vmem:[%s21386_s8 + $0xd18] sm:$0xff]  ;;  %v12889_v45 = vld [vmem:[%s21386_s8 + $0xd00] sm:$0xff] }
 0xc60   :  { %8757 = vmatprep.subr.mxu0 %v12810_v57  ;;  %8828 = vmatprep.subr.mxu1 %v12812_v33  ;;  %v12891_v57 = vld [vmem:[%s21386_s8 + $0xd10] sm:$0xff]  ;;  %v12886_v33 = vld [vmem:[%s21386_s8 + $0xce8] sm:$0xff] }
 0xc61   :  { %8758 = vmatpush2.msra.mxu0 %v12809_v15  ;;  %8829 = vmatpush2.msra.mxu1 %v12811_v38  ;;  %v12888_v15 = vld [vmem:[%s21386_s8 + $0xcf8] sm:$0xff]  ;;  %v12885_v38 = vld [vmem:[%s21386_s8 + $0xce0] sm:$0xff] }
 0xc62   :  { %8759 = vmatprep.subr.mxu0 %v12806_v46  ;;  %8830 = vmatprep.subr.mxu1 %v12808_v27  ;;  %v12887_v46 = vld [vmem:[%s21386_s8 + $0xcf0] sm:$0xff]  ;;  %v12882_v27 = vld [vmem:[%s21386_s8 + $0xcc8] sm:$0xff] }
 0xc63   :  { %8760 = vmatpush2.msra.mxu0 %v12805_v56  ;;  %8831 = vmatpush2.msra.mxu1 %v12807_v8  ;;  %v12884_v56 = vld [vmem:[%s21386_s8 + $0xcd8] sm:$0xff]  ;;  %v12881_v8 = vld [vmem:[%s21386_s8 + $0xcc0] sm:$0xff] }
 0xc64   :  { %8761 = vmatprep.subr.mxu0 %v12802_v40  ;;  %8832 = vmatprep.subr.mxu1 %v12804_v35  ;;  %v12883_v40 = vld [vmem:[%s21386_s8 + $0xcd0] sm:$0xff]  ;;  %v12878_v35 = vld [vmem:[%s21386_s8 + $0xca8] sm:$0xff] }
 0xc65   :  { %8762 = vmatpush2.msra.mxu0 %v12801_v30  ;;  %8833 = vmatpush2.msra.mxu1 %v12803_v24  ;;  %v12880_v30 = vld [vmem:[%s21386_s8 + $0xcb8] sm:$0xff]  ;;  %v12877_v24 = vld [vmem:[%s21386_s8 + $0xca0] sm:$0xff] }
 0xc66   :  { %8763 = vmatprep.subr.mxu0 %v12798_v34  ;;  %8834 = vmatprep.subr.mxu1 %v12800_v42  ;;  %v12874_v34 = vld [vmem:[%s21386_s8 + $0xc88] sm:$0xff]  ;;  %v12876_v42 = vld [vmem:[%s21386_s8 + $0xc98] sm:$0xff] }
 0xc67   :  { %8764 = vmatpush2.msra.mxu0 %v12797_v32  ;;  %8835 = vmatpush2.msra.mxu1 %v12799_v3  ;;  %v12875_v32 = vld [vmem:[%s21386_s8 + $0xc90] sm:$0xff]  ;;  %v12870_v3 = vld [vmem:[%s21386_s8 + $0xc68] sm:$0xff] }
 0xc68   :  { %8765 = vmatprep.subr.mxu0 %v12794_v63  ;;  %8836 = vmatprep.subr.mxu1 %v12796_v21  ;;  %v12869_v63 = vld [vmem:[%s21386_s8 + $0xc60] sm:$0xff]  ;;  %v12871_v21 = vld [vmem:[%s21386_s8 + $0xc70] sm:$0xff] }
 0xc69   :  { %8766 = vmatpush2.msra.mxu0 %v12793_v6  ;;  %8837 = vmatpush2.msra.mxu1 %v12795_v58  ;;  %v12868_v6 = vld [vmem:[%s21386_s8 + $0xc58] sm:$0xff]  ;;  %v12865_v58 = vld [vmem:[%s21386_s8 + $0xc40] sm:$0xff] }
 0xc6a   :  { %8768 = vmatmul.mubr.f32.vlgmr.msra.gmra.mxu0 %v8697_v62  ;;  %8839 = vmatmul.mubr.f32.vlgmr.msra.gmra.mxu1 %v8697_v62  ;;  %v12858_v62 = vld [vmem:[%s21386_s8 + $0xc08] sm:$0xff] }
 0xc6b   :  { %8993 = vmatprep.subr.mxu0 %v12918_v48  ;;  %9064 = vmatprep.subr.mxu1 %v12920_v20  ;;  %v12861_v48 = vld [vmem:[%s21386_s8 + $0xc20] sm:$0xff]  ;;  %v12863_v20 = vld [vmem:[%s21386_s8 + $0xc30] sm:$0xff] }
 0xc6c   :  { %8994 = vmatpush1.msra.mxu0 %v12917_v51  ;;  %9057 = vmatprep.mubr.f32.mxu0 %v8990_v59  ;;  %v12860_v51 = vld [vmem:[%s21386_s8 + $0xc18] sm:$0xff] }
 0xc6d   :  { %9065 = vmatpush1.msra.mxu1 %v12919_v11  ;;  %9128 = vmatprep.mubr.f32.mxu1 %v8990_v59  ;;  %v12859_v11 = vld [vmem:[%s21386_s8 + $0xc10] sm:$0xff]  ;;  %v12982_v59 = vld [vmem:[%s21386_s8 + $0xfe8] sm:$0xff] }
 0xc6e   :  { %8995 = vmatprep.subr.mxu0 %v12914_v4  ;;  %9066 = vmatprep.subr.mxu1 %v12916_v10  ;;  %v12984_v4 = vld [vmem:[%s21386_s8 + $0xff8] sm:$0xff]  ;;  %v12981_v10 = vld [vmem:[%s21386_s8 + $0xfe0] sm:$0xff] }
 0xc6f   :  { %8996 = vmatpush1.msra.mxu0 %v12913_v50  ;;  %9067 = vmatpush1.msra.mxu1 %v12915_v25  ;;  %v12983_v50 = vld [vmem:[%s21386_s8 + $0xff0] sm:$0xff]  ;;  %v12978_v25 = vld [vmem:[%s21386_s8 + $0xfc8] sm:$0xff] }
 0xc70   :  { %8997 = vmatprep.subr.mxu0 %v12910_v52  ;;  %9068 = vmatprep.subr.mxu1 %v12912_v47  ;;  %v12980_v52 = vld [vmem:[%s21386_s8 + $0xfd8] sm:$0xff]  ;;  %v12977_v47 = vld [vmem:[%s21386_s8 + $0xfc0] sm:$0xff] }
 0xc71   :  { %8998 = vmatpush1.msra.mxu0 %v12909_v13  ;;  %9069 = vmatpush1.msra.mxu1 %v12911_v61  ;;  %v12979_v13 = vld [vmem:[%s21386_s8 + $0xfd0] sm:$0xff]  ;;  %v12974_v61 = vld [vmem:[%s21386_s8 + $0xfa8] sm:$0xff] }
 0xc72   :  { %8999 = vmatprep.subr.mxu0 %v12906_v43  ;;  %9070 = vmatprep.subr.mxu1 %v12908_v37  ;;  %v12976_v43 = vld [vmem:[%s21386_s8 + $0xfb8] sm:$0xff]  ;;  %v12973_v37 = vld [vmem:[%s21386_s8 + $0xfa0] sm:$0xff] }
 0xc73   :  { %9000 = vmatpush1.msra.mxu0 %v12905_v17  ;;  %9071 = vmatpush1.msra.mxu1 %v12907_v22  ;;  %v12975_v17 = vld [vmem:[%s21386_s8 + $0xfb0] sm:$0xff]  ;;  %v12970_v22 = vld [vmem:[%s21386_s8 + $0xf88] sm:$0xff] }
 0xc74   :  { %9001 = vmatprep.subr.mxu0 %v12902_v36  ;;  %9072 = vmatprep.subr.mxu1 %v12904_v14  ;;  %v12972_v36 = vld [vmem:[%s21386_s8 + $0xf98] sm:$0xff]  ;;  %v12969_v14 = vld [vmem:[%s21386_s8 + $0xf80] sm:$0xff] }
 0xc75   :  { %9002 = vmatpush1.msra.mxu0 %v12901_v28  ;;  %9073 = vmatpush1.msra.mxu1 %v12903_v54  ;;  %v12971_v28 = vld [vmem:[%s21386_s8 + $0xf90] sm:$0xff]  ;;  %v12966_v54 = vld [vmem:[%s21386_s8 + $0xf68] sm:$0xff] }
 0xc76   :  { %9003 = vmatprep.subr.mxu0 %v12898_v44  ;;  %9074 = vmatprep.subr.mxu1 %v12900_v26  ;;  %v12968_v44 = vld [vmem:[%s21386_s8 + $0xf78] sm:$0xff]  ;;  %v12965_v26 = vld [vmem:[%s21386_s8 + $0xf60] sm:$0xff] }
 0xc77   :  { %9004 = vmatpush1.msra.mxu0 %v12897_v55  ;;  %9075 = vmatpush1.msra.mxu1 %v12899_v39  ;;  %v12967_v55 = vld [vmem:[%s21386_s8 + $0xf70] sm:$0xff]  ;;  %v12962_v39 = vld [vmem:[%s21386_s8 + $0xf48] sm:$0xff] }
 0xc78   :  { %9005 = vmatprep.subr.mxu0 %v12894_v12  ;;  %9076 = vmatprep.subr.mxu1 %v12896_v7  ;;  %v12964_v12 = vld [vmem:[%s21386_s8 + $0xf58] sm:$0xff]  ;;  %v12961_v7 = vld [vmem:[%s21386_s8 + $0xf40] sm:$0xff] }
 0xc79   :  { %9006 = vmatpush1.msra.mxu0 %v12893_v41  ;;  %9077 = vmatpush1.msra.mxu1 %v12895_v31  ;;  %v12963_v41 = vld [vmem:[%s21386_s8 + $0xf50] sm:$0xff]  ;;  %v12958_v31 = vld [vmem:[%s21386_s8 + $0xf28] sm:$0xff] }
 0xc7a   :  { %9007 = vmatprep.subr.mxu0 %v12890_v16  ;;  %9078 = vmatprep.subr.mxu1 %v12892_v1  ;;  %v12960_v16 = vld [vmem:[%s21386_s8 + $0xf38] sm:$0xff]  ;;  %v12957_v1 = vld [vmem:[%s21386_s8 + $0xf20] sm:$0xff] }
 0xc7b   :  { %9008 = vmatpush1.msra.mxu0 %v12889_v45  ;;  %9079 = vmatpush1.msra.mxu1 %v12891_v57  ;;  %v12959_v45 = vld [vmem:[%s21386_s8 + $0xf30] sm:$0xff]  ;;  %v12954_v57 = vld [vmem:[%s21386_s8 + $0xf08] sm:$0xff] }
 0xc7c   :  { %9009 = vmatprep.subr.mxu0 %v12886_v33  ;;  %9080 = vmatprep.subr.mxu1 %v12888_v15  ;;  %v12956_v33 = vld [vmem:[%s21386_s8 + $0xf18] sm:$0xff]  ;;  %v12953_v15 = vld [vmem:[%s21386_s8 + $0xf00] sm:$0xff] }
 0xc7d   :  { %9010 = vmatpush1.msra.mxu0 %v12885_v38  ;;  %9081 = vmatpush1.msra.mxu1 %v12887_v46  ;;  %v12955_v38 = vld [vmem:[%s21386_s8 + $0xf10] sm:$0xff]  ;;  %v12950_v46 = vld [vmem:[%s21386_s8 + $0xee8] sm:$0xff] }
 0xc7e   :  { %9011 = vmatprep.subr.mxu0 %v12882_v27  ;;  %9082 = vmatprep.subr.mxu1 %v12884_v56  ;;  %v12952_v27 = vld [vmem:[%s21386_s8 + $0xef8] sm:$0xff]  ;;  %v12949_v56 = vld [vmem:[%s21386_s8 + $0xee0] sm:$0xff] }
 0xc7f   :  { %9012 = vmatpush1.msra.mxu0 %v12881_v8  ;;  %9083 = vmatpush1.msra.mxu1 %v12883_v40  ;;  %v12951_v8 = vld [vmem:[%s21386_s8 + $0xef0] sm:$0xff]  ;;  %v12946_v40 = vld [vmem:[%s21386_s8 + $0xec8] sm:$0xff] }
 0xc80   :  { %9013 = vmatprep.subr.mxu0 %v12878_v35  ;;  %9084 = vmatprep.subr.mxu1 %v12880_v30  ;;  %v12948_v35 = vld [vmem:[%s21386_s8 + $0xed8] sm:$0xff]  ;;  %v12945_v30 = vld [vmem:[%s21386_s8 + $0xec0] sm:$0xff] }
 0xc81   :  { %9014 = vmatpush1.msra.mxu0 %v12877_v24  ;;  %9085 = vmatpush1.msra.mxu1 %v12879_v49  ;;  %v12947_v24 = vld [vmem:[%s21386_s8 + $0xed0] sm:$0xff]  ;;  %v12942_v49 = vld [vmem:[%s21386_s8 + $0xea8] sm:$0xff] }
 0xc82   :  { %9015 = vmatprep.subr.mxu0 %v12874_v34  ;;  %9086 = vmatprep.subr.mxu1 %v12876_v42  ;;  %v12944_v34 = vld [vmem:[%s21386_s8 + $0xeb8] sm:$0xff]  ;;  %v12941_v42 = vld [vmem:[%s21386_s8 + $0xea0] sm:$0xff] }
 0xc83   :  { %9016 = vmatpush1.msra.mxu0 %v12873_v60  ;;  %9087 = vmatpush1.msra.mxu1 %v12875_v32  ;;  %v12943_v60 = vld [vmem:[%s21386_s8 + $0xeb0] sm:$0xff]  ;;  %v12938_v32 = vld [vmem:[%s21386_s8 + $0xe88] sm:$0xff] }
 0xc84   :  { %9017 = vmatprep.subr.mxu0 %v12870_v3  ;;  %9088 = vmatprep.subr.mxu1 %v12872_v9  ;;  %v12940_v3 = vld [vmem:[%s21386_s8 + $0xe98] sm:$0xff]  ;;  %v12937_v9 = vld [vmem:[%s21386_s8 + $0xe80] sm:$0xff] }
 0xc85   :  { %9018 = vmatpush1.msra.mxu0 %v12869_v63  ;;  %9089 = vmatpush1.msra.mxu1 %v12871_v21  ;;  %v12939_v63 = vld [vmem:[%s21386_s8 + $0xe90] sm:$0xff]  ;;  %v12934_v21 = vld [vmem:[%s21386_s8 + $0xe68] sm:$0xff] }
 0xc86   :  { %9019 = vmatprep.subr.mxu0 %v12866_v18  ;;  %9090 = vmatprep.subr.mxu1 %v12868_v6  ;;  %v12936_v18 = vld [vmem:[%s21386_s8 + $0xe78] sm:$0xff]  ;;  %v12933_v6 = vld [vmem:[%s21386_s8 + $0xe60] sm:$0xff] }
 0xc87   :  { %9020 = vmatpush1.msra.mxu0 %v12865_v58  ;;  %9091 = vmatpush1.msra.mxu1 %v12867_v29  ;;  %v12935_v58 = vld [vmem:[%s21386_s8 + $0xe70] sm:$0xff]  ;;  %v12930_v29 = vld [vmem:[%s21386_s8 + $0xe48] sm:$0xff] }
 0xc88   :  { %9021 = vmatprep.subr.mxu0 %v12862_v19  ;;  %9092 = vmatprep.subr.mxu1 %v12864_v23  ;;  %v12932_v19 = vld [vmem:[%s21386_s8 + $0xe58] sm:$0xff]  ;;  %v12929_v23 = vld [vmem:[%s21386_s8 + $0xe40] sm:$0xff] }
 0xc89   :  { %9022 = vmatpush1.msra.mxu0 %v12861_v48  ;;  %9093 = vmatpush1.msra.mxu1 %v12863_v20  ;;  %v12931_v48 = vld [vmem:[%s21386_s8 + $0xe50] sm:$0xff]  ;;  %v8851_v20 = vld [vmem:[#allocation4 + $0x18] sm:$0x7] }
 0xc8a   :  { %9023 = vmatprep.subr.mxu0 %v12858_v62  ;;  %9094 = vmatprep.subr.mxu1 %v12860_v51  ;;  %v12926_v62 = vld [vmem:[%s21386_s8 + $0xe28] sm:$0xff]  ;;  %v12928_v51 = vld [vmem:[%s21386_s8 + $0xe38] sm:$0xff] }
 0xc8b   :  { %9024 = vmatpush1.msra.mxu0 %v12857_v53  ;;  %9095 = vmatpush1.msra.mxu1 %v12859_v11  ;;  %v8849_v53 = vld [vmem:[#allocation4 + $0x10] sm:$0xf8]  ;;  %v12925_v11 = vld [vmem:[%s21386_s8 + $0xe20] sm:$0xff] }
 0xc8c   :  { %9025 = vmatprep.subr.mxu0 %v12982_v59  ;;  %9096 = vmatprep.subr.mxu1 %v12984_v4  ;;  %v12927_v59 = vld [vmem:[%s21386_s8 + $0xe30] sm:$0xff]  ;;  %v9142_v4 = vld [vmem:[#allocation4 + $0x8] sm:$0xf] }
 0xc8d   :  { %9026 = vmatpush2.msra.mxu0 %v12981_v10  ;;  %9097 = vmatpush2.msra.mxu1 %v12983_v50  ;;  %v12922_v10 = vld [vmem:[%s21386_s8 + $0xe08] sm:$0xff]  ;;  %v12924_v50 = vld [vmem:[%s21386_s8 + $0xe18] sm:$0xff] }
 0xc8e   :  { %9027 = vmatprep.subr.mxu0 %v12978_v25  ;;  %9098 = vmatprep.subr.mxu1 %v12980_v52  ;;  %v8986_v25 = vrot.slane %v8851_v20, 3  ;;  %v12921_v52 = vld [vmem:[%s21386_s8 + $0xe00] sm:$0xff]  ;;  %v13007_v20 = vld [vmem:[%s21386_s8 + $0x10b0] sm:$0xff] }
 0xc8f   :  { %9028 = vmatpush2.msra.mxu0 %v12977_v47  ;;  %9099 = vmatpush2.msra.mxu1 %v12979_v13  ;;  %v12923_v47 = vld [vmem:[%s21386_s8 + $0xe10] sm:$0xff]  ;;  %v9140_v13 = vld [vmem:[#allocation4] sm:$0xf0] }
 0xc90   :  { %9029 = vmatprep.subr.mxu0 %v12974_v61  ;;  %9100 = vmatprep.subr.mxu1 %v12976_v43  ;;  %v8985_v61 = vrot.slane %v8849_v53, 3  ;;  %v9279_v43 = vrot.slane %v9142_v4, 4  ;;  %v13001_v53 = vld [vmem:[%s21386_s8 + $0x1080] sm:$0xff]  ;;  %v13000_v4 = vld [vmem:[%s21386_s8 + $0x1078] sm:$0xff] }
 0xc91   :  { %9030 = vmatpush2.msra.mxu0 %v12973_v37  ;;  %9101 = vmatpush2.msra.mxu1 %v12975_v17  ;;  %v13046_v37 = vld [vmem:[%s21386_s8 + $0x11e8] sm:$0xff]  ;;  %v13048_v17 = vld [vmem:[%s21386_s8 + $0x11f8] sm:$0xff] }
 0xc92   :  { %9031 = vmatprep.subr.mxu0 %v12970_v22  ;;  %9102 = vmatprep.subr.mxu1 %v12972_v36  ;;  %v8987_v22 = vsel %vm4076_vm13, %v8985_v61, %v8986_v25  ;;  %v13045_v36 = vld [vmem:[%s21386_s8 + $0x11e0] sm:$0xff]  ;;  %v12994_v25 = vld [vmem:[%s21386_s8 + $0x1048] sm:$0xff] }
 0xc93   :  { %9032 = vmatpush2.msra.mxu0 %v12969_v14  ;;  %9103 = vmatpush2.msra.mxu1 %v12971_v28  ;;  %v9278_v14 = vrot.slane %v9140_v13, 4  ;;  %v13047_v28 = vld [vmem:[%s21386_s8 + $0x11f0] sm:$0xff]  ;;  %v12990_v61 = vld [vmem:[%s21386_s8 + $0x1028] sm:$0xff] }
 0xc94   :  { %9033 = vmatprep.subr.mxu0 %v12966_v54  ;;  %9104 = vmatprep.subr.mxu1 %v12968_v44  ;;  %v13042_v44 = vld [vmem:[%s21386_s8 + $0x11c8] sm:$0xff]  ;;  %v12995_v13 = vld [vmem:[%s21386_s8 + $0x1050] sm:$0xff] }
 0xc95   :  { %9034 = vmatpush2.msra.mxu0 %v12965_v26  ;;  %9105 = vmatpush2.msra.mxu1 %v12967_v55  ;;  %v9280_v54 = vsel %vm619_vm5, %v9278_v14, %v9279_v43  ;;  %v13044_v26 = vld [vmem:[%s21386_s8 + $0x11d8] sm:$0xff]  ;;  %v13041_v55 = vld [vmem:[%s21386_s8 + $0x11c0] sm:$0xff] }
 0xc96   :  { %9035 = vmatprep.subr.mxu0 %v12962_v39  ;;  %9106 = vmatprep.subr.mxu1 %v12964_v12  ;;  %v13043_v39 = vld [vmem:[%s21386_s8 + $0x11d0] sm:$0xff]  ;;  %v13038_v12 = vld [vmem:[%s21386_s8 + $0x11a8] sm:$0xff]  ;;  %v12992_v43 = vld [vmem:[%s21386_s8 + $0x1038] sm:$0xff] }
 0xc97   :  { %9036 = vmatpush2.msra.mxu0 %v12961_v7  ;;  %9107 = vmatpush2.msra.mxu1 %v12963_v41  ;;  %v13040_v7 = vld [vmem:[%s21386_s8 + $0x11b8] sm:$0xff]  ;;  %v13037_v41 = vld [vmem:[%s21386_s8 + $0x11a0] sm:$0xff] }
 0xc98   :  { %9037 = vmatprep.subr.mxu0 %v12958_v31  ;;  %9108 = vmatprep.subr.mxu1 %v12960_v16  ;;  %v13039_v31 = vld [vmem:[%s21386_s8 + $0x11b0] sm:$0xff]  ;;  %v13034_v16 = vld [vmem:[%s21386_s8 + $0x1188] sm:$0xff]  ;;  %v12985_v14 = vld [vmem:[%s21386_s8 + $0x1000] sm:$0xff] }
 0xc99   :  { %9038 = vmatpush2.msra.mxu0 %v12957_v1  ;;  %9109 = vmatpush2.msra.mxu1 %v12959_v45  ;;  %v13036_v1 = vld [vmem:[%s21386_s8 + $0x1198] sm:$0xff]  ;;  %v13033_v45 = vld [vmem:[%s21386_s8 + $0x1180] sm:$0xff] }
 0xc9a   :  { %9039 = vmatprep.subr.mxu0 %v12954_v57  ;;  %9110 = vmatprep.subr.mxu1 %v12956_v33  ;;  %v13035_v57 = vld [vmem:[%s21386_s8 + $0x1190] sm:$0xff]  ;;  %v13030_v33 = vld [vmem:[%s21386_s8 + $0x1168] sm:$0xff] }
 0xc9b   :  { %9040 = vmatpush2.msra.mxu0 %v12953_v15  ;;  %9111 = vmatpush2.msra.mxu1 %v12955_v38  ;;  %v13032_v15 = vld [vmem:[%s21386_s8 + $0x1178] sm:$0xff]  ;;  %v13029_v38 = vld [vmem:[%s21386_s8 + $0x1160] sm:$0xff] }
 0xc9c   :  { %9041 = vmatprep.subr.mxu0 %v12950_v46  ;;  %9112 = vmatprep.subr.mxu1 %v12952_v27  ;;  %v13031_v46 = vld [vmem:[%s21386_s8 + $0x1170] sm:$0xff]  ;;  %v13026_v27 = vld [vmem:[%s21386_s8 + $0x1148] sm:$0xff] }
 0xc9d   :  { %9042 = vmatpush2.msra.mxu0 %v12949_v56  ;;  %9113 = vmatpush2.msra.mxu1 %v12951_v8  ;;  %v13028_v56 = vld [vmem:[%s21386_s8 + $0x1158] sm:$0xff]  ;;  %v13025_v8 = vld [vmem:[%s21386_s8 + $0x1140] sm:$0xff] }
 0xc9e   :  { %9043 = vmatprep.subr.mxu0 %v12946_v40  ;;  %9114 = vmatprep.subr.mxu1 %v12948_v35  ;;  %v13027_v40 = vld [vmem:[%s21386_s8 + $0x1150] sm:$0xff]  ;;  %v13022_v35 = vld [vmem:[%s21386_s8 + $0x1128] sm:$0xff] }
 0xc9f   :  { %9044 = vmatpush2.msra.mxu0 %v12945_v30  ;;  %9115 = vmatpush2.msra.mxu1 %v12947_v24  ;;  %v13024_v30 = vld [vmem:[%s21386_s8 + $0x1138] sm:$0xff]  ;;  %v13021_v24 = vld [vmem:[%s21386_s8 + $0x1120] sm:$0xff] }
 0xca0   :  { %9045 = vmatprep.subr.mxu0 %v12942_v49  ;;  %9116 = vmatprep.subr.mxu1 %v12944_v34  ;;  %v13023_v49 = vld [vmem:[%s21386_s8 + $0x1130] sm:$0xff]  ;;  %v13018_v34 = vld [vmem:[%s21386_s8 + $0x1108] sm:$0xff] }
 0xca1   :  { %9046 = vmatpush2.msra.mxu0 %v12941_v42  ;;  %9117 = vmatpush2.msra.mxu1 %v12943_v60  ;;  %v13020_v42 = vld [vmem:[%s21386_s8 + $0x1118] sm:$0xff]  ;;  %v13017_v60 = vld [vmem:[%s21386_s8 + $0x1100] sm:$0xff] }
 0xca2   :  { %9047 = vmatprep.subr.mxu0 %v12938_v32  ;;  %9118 = vmatprep.subr.mxu1 %v12940_v3  ;;  %v13019_v32 = vld [vmem:[%s21386_s8 + $0x1110] sm:$0xff]  ;;  %v13014_v3 = vld [vmem:[%s21386_s8 + $0x10e8] sm:$0xff] }
 0xca3   :  { %9048 = vmatpush2.msra.mxu0 %v12937_v9  ;;  %9119 = vmatpush2.msra.mxu1 %v12939_v63  ;;  %v13016_v9 = vld [vmem:[%s21386_s8 + $0x10f8] sm:$0xff]  ;;  %v13013_v63 = vld [vmem:[%s21386_s8 + $0x10e0] sm:$0xff] }
 0xca4   :  { %9049 = vmatprep.subr.mxu0 %v12934_v21  ;;  %9120 = vmatprep.subr.mxu1 %v12936_v18  ;;  %v13015_v21 = vld [vmem:[%s21386_s8 + $0x10f0] sm:$0xff]  ;;  %v13010_v18 = vld [vmem:[%s21386_s8 + $0x10c8] sm:$0xff] }
 0xca5   :  { %9050 = vmatpush2.msra.mxu0 %v12933_v6  ;;  %9121 = vmatpush2.msra.mxu1 %v12935_v58  ;;  %v13012_v6 = vld [vmem:[%s21386_s8 + $0x10d8] sm:$0xff]  ;;  %v13009_v58 = vld [vmem:[%s21386_s8 + $0x10c0] sm:$0xff] }
 0xca6   :  { %9051 = vmatprep.subr.mxu0 %v12930_v29  ;;  %9122 = vmatprep.subr.mxu1 %v12932_v19  ;;  %v13011_v29 = vld [vmem:[%s21386_s8 + $0x10d0] sm:$0xff]  ;;  %v13006_v19 = vld [vmem:[%s21386_s8 + $0x10a8] sm:$0xff] }
 0xca7   :  { %9052 = vmatpush2.msra.mxu0 %v12929_v23  ;;  %9123 = vmatpush2.msra.mxu1 %v12931_v48  ;;  %v13008_v23 = vld [vmem:[%s21386_s8 + $0x10b8] sm:$0xff]  ;;  %v13005_v48 = vld [vmem:[%s21386_s8 + $0x10a0] sm:$0xff] }
 0xca8   :  { %9053 = vmatprep.subr.mxu0 %v12926_v62  ;;  %9124 = vmatprep.subr.mxu1 %v12928_v51  ;;  %v13002_v62 = vld [vmem:[%s21386_s8 + $0x1088] sm:$0xff]  ;;  %v13004_v51 = vld [vmem:[%s21386_s8 + $0x1098] sm:$0xff] }
 0xca9   :  { %9054 = vmatpush2.msra.mxu0 %v12925_v11  ;;  %9125 = vmatpush2.msra.mxu1 %v12927_v59  ;;  %v13003_v11 = vld [vmem:[%s21386_s8 + $0x1090] sm:$0xff]  ;;  %v12998_v59 = vld [vmem:[%s21386_s8 + $0x1068] sm:$0xff] }
 0xcaa   :  { %9055 = vmatprep.subr.mxu0 %v12922_v10  ;;  %9126 = vmatprep.subr.mxu1 %v12924_v50  ;;  %v12997_v10 = vld [vmem:[%s21386_s8 + $0x1060] sm:$0xff]  ;;  %v12999_v50 = vld [vmem:[%s21386_s8 + $0x1070] sm:$0xff] }
 0xcab   :  { %9056 = vmatpush2.msra.mxu0 %v12921_v52  ;;  %9127 = vmatpush2.msra.mxu1 %v12923_v47  ;;  %v12996_v52 = vld [vmem:[%s21386_s8 + $0x1058] sm:$0xff]  ;;  %v12993_v47 = vld [vmem:[%s21386_s8 + $0x1040] sm:$0xff] }
 0xcac   :  { %9058 = vmatmul.mubr.f32.vlgmr.msra.gmra.mxu0 %v8987_v22  ;;  %9129 = vmatmul.mubr.f32.vlgmr.msra.gmra.mxu1 %v8987_v22  ;;  %v12986_v22 = vld [vmem:[%s21386_s8 + $0x1008] sm:$0xff] }
 0xcad   :  { %9283 = vmatprep.subr.mxu0 %v13046_v37  ;;  %9354 = vmatprep.subr.mxu1 %v13048_v17  ;;  %v12989_v37 = vld [vmem:[%s21386_s8 + $0x1020] sm:$0xff]  ;;  %v12991_v17 = vld [vmem:[%s21386_s8 + $0x1030] sm:$0xff] }
 0xcae   :  { %9284 = vmatpush1.msra.mxu0 %v13045_v36  ;;  %9347 = vmatprep.mubr.f32.mxu0 %v9280_v54  ;;  %v12988_v36 = vld [vmem:[%s21386_s8 + $0x1018] sm:$0xff] }
 0xcaf   :  { %9355 = vmatpush1.msra.mxu1 %v13047_v28  ;;  %9418 = vmatprep.mubr.f32.mxu1 %v9280_v54  ;;  %v12987_v28 = vld [vmem:[%s21386_s8 + $0x1010] sm:$0xff]  ;;  %v13110_v54 = vld [vmem:[%s21386_s8 + $0x13e8] sm:$0xff] }
 0xcb0   :  { %9285 = vmatprep.subr.mxu0 %v13042_v44  ;;  %9356 = vmatprep.subr.mxu1 %v13044_v26  ;;  %v13112_v44 = vld [vmem:[%s21386_s8 + $0x13f8] sm:$0xff]  ;;  %v13109_v26 = vld [vmem:[%s21386_s8 + $0x13e0] sm:$0xff] }
 0xcb1   :  { %9286 = vmatpush1.msra.mxu0 %v13041_v55  ;;  %9357 = vmatpush1.msra.mxu1 %v13043_v39  ;;  %v13111_v55 = vld [vmem:[%s21386_s8 + $0x13f0] sm:$0xff]  ;;  %v13106_v39 = vld [vmem:[%s21386_s8 + $0x13c8] sm:$0xff] }
 0xcb2   :  { %9287 = vmatprep.subr.mxu0 %v13038_v12  ;;  %9358 = vmatprep.subr.mxu1 %v13040_v7  ;;  %v13108_v12 = vld [vmem:[%s21386_s8 + $0x13d8] sm:$0xff]  ;;  %v13105_v7 = vld [vmem:[%s21386_s8 + $0x13c0] sm:$0xff] }
 0xcb3   :  { %9288 = vmatpush1.msra.mxu0 %v13037_v41  ;;  %9359 = vmatpush1.msra.mxu1 %v13039_v31  ;;  %v13107_v41 = vld [vmem:[%s21386_s8 + $0x13d0] sm:$0xff]  ;;  %v13102_v31 = vld [vmem:[%s21386_s8 + $0x13a8] sm:$0xff] }
 0xcb4   :  { %9289 = vmatprep.subr.mxu0 %v13034_v16  ;;  %9360 = vmatprep.subr.mxu1 %v13036_v1  ;;  %v13104_v16 = vld [vmem:[%s21386_s8 + $0x13b8] sm:$0xff]  ;;  %v13101_v1 = vld [vmem:[%s21386_s8 + $0x13a0] sm:$0xff] }
 0xcb5   :  { %9290 = vmatpush1.msra.mxu0 %v13033_v45  ;;  %9361 = vmatpush1.msra.mxu1 %v13035_v57  ;;  %v13103_v45 = vld [vmem:[%s21386_s8 + $0x13b0] sm:$0xff]  ;;  %v13098_v57 = vld [vmem:[%s21386_s8 + $0x1388] sm:$0xff] }
 0xcb6   :  { %9291 = vmatprep.subr.mxu0 %v13030_v33  ;;  %9362 = vmatprep.subr.mxu1 %v13032_v15  ;;  %v13100_v33 = vld [vmem:[%s21386_s8 + $0x1398] sm:$0xff]  ;;  %v13097_v15 = vld [vmem:[%s21386_s8 + $0x1380] sm:$0xff] }
 0xcb7   :  { %9292 = vmatpush1.msra.mxu0 %v13029_v38  ;;  %9363 = vmatpush1.msra.mxu1 %v13031_v46  ;;  %v13099_v38 = vld [vmem:[%s21386_s8 + $0x1390] sm:$0xff]  ;;  %v13094_v46 = vld [vmem:[%s21386_s8 + $0x1368] sm:$0xff] }
 0xcb8   :  { %9293 = vmatprep.subr.mxu0 %v13026_v27  ;;  %9364 = vmatprep.subr.mxu1 %v13028_v56  ;;  %v13096_v27 = vld [vmem:[%s21386_s8 + $0x1378] sm:$0xff]  ;;  %v13093_v56 = vld [vmem:[%s21386_s8 + $0x1360] sm:$0xff] }
 0xcb9   :  { %9294 = vmatpush1.msra.mxu0 %v13025_v8  ;;  %9365 = vmatpush1.msra.mxu1 %v13027_v40  ;;  %v13095_v8 = vld [vmem:[%s21386_s8 + $0x1370] sm:$0xff]  ;;  %v13090_v40 = vld [vmem:[%s21386_s8 + $0x1348] sm:$0xff] }
 0xcba   :  { %9295 = vmatprep.subr.mxu0 %v13022_v35  ;;  %9366 = vmatprep.subr.mxu1 %v13024_v30  ;;  %v13092_v35 = vld [vmem:[%s21386_s8 + $0x1358] sm:$0xff]  ;;  %v13089_v30 = vld [vmem:[%s21386_s8 + $0x1340] sm:$0xff] }
 0xcbb   :  { %9296 = vmatpush1.msra.mxu0 %v13021_v24  ;;  %9367 = vmatpush1.msra.mxu1 %v13023_v49  ;;  %v13091_v24 = vld [vmem:[%s21386_s8 + $0x1350] sm:$0xff]  ;;  %v13086_v49 = vld [vmem:[%s21386_s8 + $0x1328] sm:$0xff] }
 0xcbc   :  { %9297 = vmatprep.subr.mxu0 %v13018_v34  ;;  %9368 = vmatprep.subr.mxu1 %v13020_v42  ;;  %v13088_v34 = vld [vmem:[%s21386_s8 + $0x1338] sm:$0xff]  ;;  %v13085_v42 = vld [vmem:[%s21386_s8 + $0x1320] sm:$0xff] }
 0xcbd   :  { %9298 = vmatpush1.msra.mxu0 %v13017_v60  ;;  %9369 = vmatpush1.msra.mxu1 %v13019_v32  ;;  %v13087_v60 = vld [vmem:[%s21386_s8 + $0x1330] sm:$0xff]  ;;  %v13082_v32 = vld [vmem:[%s21386_s8 + $0x1308] sm:$0xff] }
 0xcbe   :  { %9299 = vmatprep.subr.mxu0 %v13014_v3  ;;  %9370 = vmatprep.subr.mxu1 %v13016_v9  ;;  %v13084_v3 = vld [vmem:[%s21386_s8 + $0x1318] sm:$0xff]  ;;  %v13081_v9 = vld [vmem:[%s21386_s8 + $0x1300] sm:$0xff] }
 0xcbf   :  { %9300 = vmatpush1.msra.mxu0 %v13013_v63  ;;  %9371 = vmatpush1.msra.mxu1 %v13015_v21  ;;  %v13083_v63 = vld [vmem:[%s21386_s8 + $0x1310] sm:$0xff]  ;;  %v13078_v21 = vld [vmem:[%s21386_s8 + $0x12e8] sm:$0xff] }
 0xcc0   :  { %9301 = vmatprep.subr.mxu0 %v13010_v18  ;;  %9372 = vmatprep.subr.mxu1 %v13012_v6  ;;  %v13080_v18 = vld [vmem:[%s21386_s8 + $0x12f8] sm:$0xff]  ;;  %v13077_v6 = vld [vmem:[%s21386_s8 + $0x12e0] sm:$0xff] }
 0xcc1   :  { %9302 = vmatpush1.msra.mxu0 %v13009_v58  ;;  %9373 = vmatpush1.msra.mxu1 %v13011_v29  ;;  %v13079_v58 = vld [vmem:[%s21386_s8 + $0x12f0] sm:$0xff]  ;;  %v13074_v29 = vld [vmem:[%s21386_s8 + $0x12c8] sm:$0xff] }
 0xcc2   :  { %9303 = vmatprep.subr.mxu0 %v13006_v19  ;;  %9374 = vmatprep.subr.mxu1 %v13008_v23  ;;  %v13076_v19 = vld [vmem:[%s21386_s8 + $0x12d8] sm:$0xff]  ;;  %v13073_v23 = vld [vmem:[%s21386_s8 + $0x12c0] sm:$0xff] }
 0xcc3   :  { %9304 = vmatpush1.msra.mxu0 %v13005_v48  ;;  %9375 = vmatpush1.msra.mxu1 %v13007_v20  ;;  %v13075_v48 = vld [vmem:[%s21386_s8 + $0x12d0] sm:$0xff]  ;;  %v13070_v20 = vld [vmem:[%s21386_s8 + $0x12a8] sm:$0xff] }
 0xcc4   :  { %9305 = vmatprep.subr.mxu0 %v13002_v62  ;;  %9376 = vmatprep.subr.mxu1 %v13004_v51  ;;  %v13072_v62 = vld [vmem:[%s21386_s8 + $0x12b8] sm:$0xff]  ;;  %v13069_v51 = vld [vmem:[%s21386_s8 + $0x12a0] sm:$0xff] }
 0xcc5   :  { %9306 = vmatpush1.msra.mxu0 %v13001_v53  ;;  %9377 = vmatpush1.msra.mxu1 %v13003_v11  ;;  %v13071_v53 = vld [vmem:[%s21386_s8 + $0x12b0] sm:$0xff]  ;;  %v13066_v11 = vld [vmem:[%s21386_s8 + $0x1288] sm:$0xff] }
 0xcc6   :  { %9307 = vmatprep.subr.mxu0 %v12998_v59  ;;  %9378 = vmatprep.subr.mxu1 %v13000_v4  ;;  %v13068_v59 = vld [vmem:[%s21386_s8 + $0x1298] sm:$0xff]  ;;  %v13065_v4 = vld [vmem:[%s21386_s8 + $0x1280] sm:$0xff] }
 0xcc7   :  { %9308 = vmatpush1.msra.mxu0 %v12997_v10  ;;  %9379 = vmatpush1.msra.mxu1 %v12999_v50  ;;  %v13067_v10 = vld [vmem:[%s21386_s8 + $0x1290] sm:$0xff]  ;;  %v13062_v50 = vld [vmem:[%s21386_s8 + $0x1268] sm:$0xff] }
 0xcc8   :  { %9309 = vmatprep.subr.mxu0 %v12994_v25  ;;  %9380 = vmatprep.subr.mxu1 %v12996_v52  ;;  %v13064_v25 = vld [vmem:[%s21386_s8 + $0x1278] sm:$0xff]  ;;  %v13061_v52 = vld [vmem:[%s21386_s8 + $0x1260] sm:$0xff] }
 0xcc9   :  { %9310 = vmatpush1.msra.mxu0 %v12993_v47  ;;  %9381 = vmatpush1.msra.mxu1 %v12995_v13  ;;  %v13063_v47 = vld [vmem:[%s21386_s8 + $0x1270] sm:$0xff]  ;;  %v13058_v13 = vld [vmem:[%s21386_s8 + $0x1248] sm:$0xff] }
 0xcca   :  { %9311 = vmatprep.subr.mxu0 %v12990_v61  ;;  %9382 = vmatprep.subr.mxu1 %v12992_v43  ;;  %v13060_v61 = vld [vmem:[%s21386_s8 + $0x1258] sm:$0xff]  ;;  %v13057_v43 = vld [vmem:[%s21386_s8 + $0x1240] sm:$0xff] }
 0xccb   :  { %9312 = vmatpush1.msra.mxu0 %v12989_v37  ;;  %9383 = vmatpush1.msra.mxu1 %v12991_v17  ;;  %v13059_v37 = vld [vmem:[%s21386_s8 + $0x1250] sm:$0xff]  ;;  %v9141_v17 = vld [vmem:[#allocation4 + $0x18] sm:$0xf] }
 0xccc   :  { %9313 = vmatprep.subr.mxu0 %v12986_v22  ;;  %9384 = vmatprep.subr.mxu1 %v12988_v36  ;;  %v13054_v22 = vld [vmem:[%s21386_s8 + $0x1228] sm:$0xff]  ;;  %v13056_v36 = vld [vmem:[%s21386_s8 + $0x1238] sm:$0xff] }
 0xccd   :  { %9314 = vmatpush1.msra.mxu0 %v12985_v14  ;;  %9385 = vmatpush1.msra.mxu1 %v12987_v28  ;;  %v13053_v14 = vld [vmem:[%s21386_s8 + $0x1220] sm:$0xff]  ;;  %v13055_v28 = vld [vmem:[%s21386_s8 + $0x1230] sm:$0xff] }
 0xcce   :  { %9315 = vmatprep.subr.mxu0 %v13110_v54  ;;  %9386 = vmatprep.subr.mxu1 %v13112_v44  ;;  %v9139_v54 = vld [vmem:[#allocation4 + $0x10] sm:$0xf0]  ;;  %v13050_v44 = vld [vmem:[%s21386_s8 + $0x1208] sm:$0xff] }
 0xccf   :  { %9316 = vmatpush2.msra.mxu0 %v13109_v26  ;;  %9387 = vmatpush2.msra.mxu1 %v13111_v55  ;;  %v13052_v26 = vld [vmem:[%s21386_s8 + $0x1218] sm:$0xff]  ;;  %v9276_v55 = vrot.slane %v9141_v17, 4 }
 0xcd0   :  { %9317 = vmatprep.subr.mxu0 %v13106_v39  ;;  %9388 = vmatprep.subr.mxu1 %v13108_v12  ;;  %v13049_v39 = vld [vmem:[%s21386_s8 + $0x1200] sm:$0xff]  ;;  %v13051_v12 = vld [vmem:[%s21386_s8 + $0x1210] sm:$0xff] }
 0xcd1   :  { %9318 = vmatpush2.msra.mxu0 %v13105_v7  ;;  %9389 = vmatpush2.msra.mxu1 %v13107_v41  ;;  %v9275_v7 = vrot.slane %v9139_v54, 4 }
 0xcd2   :  { %9319 = vmatprep.subr.mxu0 %v13102_v31  ;;  %9390 = vmatprep.subr.mxu1 %v13104_v16  ;;  %v8341_v31 = vpop.f32.mrf.mxu0  ;;  %v8412_v16 = vpop.f32.mrf.mxu1 }
 0xcd3   :  { %9320 = vmatpush2.msra.mxu0 %v13101_v1  ;;  %9391 = vmatpush2.msra.mxu1 %v13103_v45  ;;  %v9277_v41 = vsel %vm619_vm5, %v9275_v7, %v9276_v55  ;;  %v21560_v7 = vld [vmem:[#allocation42_spill] sm:$0xff] }
 0xcd4   :  { %9321 = vmatprep.subr.mxu0 %v13098_v57  ;;  %9392 = vmatprep.subr.mxu1 %v13100_v33  ;;  %v8343_v1 = vpop.f32.mrf.mxu0  ;;  %v8414_v45 = vpop.f32.mrf.mxu1 }
 0xcd5   :  { %9322 = vmatpush2.msra.mxu0 %v13097_v15  ;;  %9393 = vmatpush2.msra.mxu1 %v13099_v38 }
 0xcd6   :  { %9323 = vmatprep.subr.mxu0 %v13094_v46  ;;  %9394 = vmatprep.subr.mxu1 %v13096_v27 }
 0xcd7   :  { %9324 = vmatpush2.msra.mxu0 %v13093_v56  ;;  %9395 = vmatpush2.msra.mxu1 %v13095_v8 }
 0xcd8   :  { %9325 = vmatprep.subr.mxu0 %v13090_v40  ;;  %9396 = vmatprep.subr.mxu1 %v13092_v35 }
 0xcd9   :  { %9326 = vmatpush2.msra.mxu0 %v13089_v30  ;;  %9397 = vmatpush2.msra.mxu1 %v13091_v24 }
 0xcda   :  { %9327 = vmatprep.subr.mxu0 %v13086_v49  ;;  %9398 = vmatprep.subr.mxu1 %v13088_v34 }
 0xcdb   :  { %9328 = vmatpush2.msra.mxu0 %v13085_v42  ;;  %9399 = vmatpush2.msra.mxu1 %v13087_v60 }
 0xcdc   :  { %9329 = vmatprep.subr.mxu0 %v13082_v32  ;;  %9400 = vmatprep.subr.mxu1 %v13084_v3 }
 0xcdd   :  { %9330 = vmatpush2.msra.mxu0 %v13081_v9  ;;  %9401 = vmatpush2.msra.mxu1 %v13083_v63 }
 0xcde   :  { %9331 = vmatprep.subr.mxu0 %v13078_v21  ;;  %9402 = vmatprep.subr.mxu1 %v13080_v18 }
 0xcdf   :  { %9332 = vmatpush2.msra.mxu0 %v13077_v6  ;;  %9403 = vmatpush2.msra.mxu1 %v13079_v58 }
 0xce0   :  { %9333 = vmatprep.subr.mxu0 %v13074_v29  ;;  %9404 = vmatprep.subr.mxu1 %v13076_v19 }
 0xce1   :  { %9334 = vmatpush2.msra.mxu0 %v13073_v23  ;;  %9405 = vmatpush2.msra.mxu1 %v13075_v48 }
 0xce2   :  { %9335 = vmatprep.subr.mxu0 %v13070_v20  ;;  %9406 = vmatprep.subr.mxu1 %v13072_v62 }
 0xce3   :  { %9336 = vmatpush2.msra.mxu0 %v13069_v51  ;;  %9407 = vmatpush2.msra.mxu1 %v13071_v53  ;;  %v21555_v51 = vld [vmem:[#allocation43_spill] sm:$0xff] }
 0xce4   :  { %9337 = vmatprep.subr.mxu0 %v13066_v11  ;;  %9408 = vmatprep.subr.mxu1 %v13068_v59  ;;  %v21556_v11 = vld [vmem:[#allocation44_spill] sm:$0xff] }
 0xce5   :  { %9338 = vmatpush2.msra.mxu0 %v13065_v4  ;;  %9409 = vmatpush2.msra.mxu1 %v13067_v10 }
 0xce6   :  { %9339 = vmatprep.subr.mxu0 %v13062_v50  ;;  %9410 = vmatprep.subr.mxu1 %v13064_v25 }
 0xce7   :  { %9340 = vmatpush2.msra.mxu0 %v13061_v52  ;;  %9411 = vmatpush2.msra.mxu1 %v13063_v47  ;;  %v21557_v52 = vld [vmem:[#allocation45_spill] sm:$0xff] }
 0xce8   :  { %9341 = vmatprep.subr.mxu0 %v13058_v13  ;;  %9412 = vmatprep.subr.mxu1 %v13060_v61  ;;  %v8483_v57 = vpop.f32.mrf.mxu0  ;;  %v8554_v33 = vpop.f32.mrf.mxu1  ;;  %v21558_v13 = vld [vmem:[#allocation46_spill] sm:$0xff] }
 0xce9   :  { %9342 = vmatpush2.msra.mxu0 %v13057_v43  ;;  %9413 = vmatpush2.msra.mxu1 %v13059_v37  ;;  %v8484_v30 = vadd.f32 %v8483_v57, %v8341_v31  ;;  %v8555_v24 = vadd.f32 %v8554_v33, %v8412_v16  ;;  %v21561_v16 = vld [vmem:[#allocation47_spill] sm:$0xff] }
 0xcea   :  { %9343 = vmatprep.subr.mxu0 %v13054_v22  ;;  %9414 = vmatprep.subr.mxu1 %v13056_v36  ;;  %v8485_v15 = vpop.f32.mrf.mxu0  ;;  %v8556_v38 = vpop.f32.mrf.mxu1  ;;  %v13180_v57 = vld [vmem:[%s21388_s10 + $0x5e8] sm:$0xff] }
 0xceb   :  { %9344 = vmatpush2.msra.mxu0 %v13053_v14  ;;  %9415 = vmatpush2.msra.mxu1 %v13055_v28  ;;  %v8486_v49 = vadd.f32 %v8485_v15, %v8343_v1  ;;  %v8557_v34 = vadd.f32 %v8556_v38, %v8414_v45  ;;  %v21562_v1 = vld [vmem:[#allocation13_spill] sm:$0xff]  ;;  %v13176_v33 = vld [vmem:[%s21388_s10 + $0x5c8] sm:$0xff]  ;;  %v13175_v38 = vld [vmem:[%s21388_s10 + $0x5c0] sm:$0xff] }
 0xcec   :  { %9345 = vmatprep.subr.mxu0 %v13050_v44  ;;  %9416 = vmatprep.subr.mxu1 %v13052_v26  ;;  %v21559_v26 = vld [vmem:[#allocation48_spill] sm:$0xff]  ;;  %v21563_v45 = vld [vmem:[#allocation49_spill] sm:$0xff] }
 0xced   :  { %9346 = vmatpush2.msra.mxu0 %v13049_v39  ;;  %9417 = vmatpush2.msra.mxu1 %v13051_v12  ;;  %v13182_v15 = vld [vmem:[%s21388_s10 + $0x5f8] sm:$0xff] }
 0xcee   :  { %9348 = vmatmul.mubr.f32.vlgmr.msra.gmra.mxu0 %v9277_v41  ;;  %9419 = vmatmul.mubr.f32.vlgmr.msra.gmra.mxu1 %v9277_v41 }
 0xcef   :  { %9505 = vmatprep.mubr.f32.mxu0 %v21539_v5  ;;  %9591 = vmatprep.mubr.f32.mxu1 %v21539_v5 }
 0xd2a   :  { %v8769_v46 = vpop.f32.mrf.mxu0  ;;  %v8840_v27 = vpop.f32.mrf.mxu1 }
 0xd2b   :  { %v8845_v42 = vadd.f32 %v8769_v46, %v8484_v30  ;;  %v8847_v60 = vadd.f32 %v8840_v27, %v8555_v24  ;;  %v21564_v46 = vld [vmem:[#allocation50_spill] sm:$0xff]  ;;  %v13172_v27 = vld [vmem:[%s21388_s10 + $0x5a8] sm:$0xff]  ;;  %v13177_v24 = vld [vmem:[%s21388_s10 + $0x5d0] sm:$0xff] }
 0xd2c   :  { %v8771_v56 = vpop.f32.mrf.mxu0  ;;  %v8842_v8 = vpop.f32.mrf.mxu1  ;;  %v13167_v30 = vld [vmem:[%s21388_s10 + $0x580] sm:$0xff] }
 0xd2d   :  { %v8846_v9 = vadd.f32 %v8771_v56, %v8486_v49  ;;  %v8848_v63 = vadd.f32 %v8842_v8, %v8557_v34  ;;  %v13171_v56 = vld [vmem:[%s21388_s10 + $0x5a0] sm:$0xff]  ;;  %v13181_v8 = vld [vmem:[%s21388_s10 + $0x5f0] sm:$0xff]  ;;  %v13164_v49 = vld [vmem:[%s21388_s10 + $0x568] sm:$0xff] }
 0xd2e   :  { %v13174_v34 = vld [vmem:[%s21388_s10 + $0x5b8] sm:$0xff] }
 0xd6c   :  { %v9059_v40 = vpop.f32.mrf.mxu0  ;;  %v9130_v35 = vpop.f32.mrf.mxu1 }
 0xd6d   :  { %v9135_v21 = vadd.f32 %v9059_v40, %v8845_v42  ;;  %v9137_v18 = vadd.f32 %v9130_v35, %v8847_v60  ;;  %v13168_v40 = vld [vmem:[%s21388_s10 + $0x588] sm:$0xff]  ;;  %v13178_v35 = vld [vmem:[%s21388_s10 + $0x5d8] sm:$0xff]  ;;  %v13163_v42 = vld [vmem:[%s21388_s10 + $0x560] sm:$0xff] }
 0xd6e   :  { %v9061_v32 = vpop.f32.mrf.mxu0  ;;  %v9132_v3 = vpop.f32.mrf.mxu1  ;;  %v13160_v60 = vld [vmem:[%s21388_s10 + $0x548] sm:$0xff] }
 0xd6f   :  { %v9136_v29 = vadd.f32 %v9061_v32, %v8846_v9  ;;  %v9138_v19 = vadd.f32 %v9132_v3, %v8848_v63  ;;  %v13170_v32 = vld [vmem:[%s21388_s10 + $0x598] sm:$0xff]  ;;  %v13159_v3 = vld [vmem:[%s21388_s10 + $0x540] sm:$0xff]  ;;  %v13169_v9 = vld [vmem:[%s21388_s10 + $0x590] sm:$0xff] }
 0xd70   :  { %v13156_v63 = vld [vmem:[%s21388_s10 + $0x528] sm:$0xff] }
 0xdae   :  { %v9349_v6 = vpop.f32.mrf.mxu0  ;;  %v9420_v58 = vpop.f32.mrf.mxu1 }
 0xdaf   :  { %v9425_v23 = vadd.f32 %v9349_v6, %v9135_v21  ;;  %v9427_v48 = vadd.f32 %v9420_v58, %v9137_v18  ;;  %v13166_v21 = vld [vmem:[%s21388_s10 + $0x578] sm:$0xff]  ;;  %v13155_v18 = vld [vmem:[%s21388_s10 + $0x520] sm:$0xff]  ;;  %v13165_v6 = vld [vmem:[%s21388_s10 + $0x570] sm:$0xff] }
 0xdb0   :  { %v9351_v20 = vpop.f32.mrf.mxu0  ;;  %v9422_v62 = vpop.f32.mrf.mxu1  ;;  %v13152_v58 = vld [vmem:[%s21388_s10 + $0x508] sm:$0xff] }
 0xdb1   :  { %v9429_v53 = vadd.f32 %v9425_v23, %v21555_v51  ;;  %v9431_v59 = vadd.f32 %v9427_v48, %v21556_v11  ;;  %v9426_v4 = vadd.f32 %v9351_v20, %v9136_v29  ;;  %v9428_v10 = vadd.f32 %v9422_v62, %v9138_v19  ;;  %v13162_v29 = vld [vmem:[%s21388_s10 + $0x558] sm:$0xff]  ;;  %v13161_v19 = vld [vmem:[%s21388_s10 + $0x550] sm:$0xff]  ;;  %v13151_v62 = vld [vmem:[%s21388_s10 + $0x500] sm:$0xff] }
 0xdb2   :  { %v13158_v23 = vld [vmem:[%s21388_s10 + $0x538] sm:$0xff]  ;;  %v13157_v48 = vld [vmem:[%s21388_s10 + $0x530] sm:$0xff] }
 0xdb3   :  { %v9433_v50 = vmax.f32 %v9429_v53, 0.0  ;;  %v9435_v25 = vmax.f32 %v9431_v59, 0.0  ;;  %v9430_v47 = vadd.f32 %v9426_v4, %v21557_v52  ;;  %v9432_v61 = vadd.f32 %v9428_v10, %v21558_v13  ;;  %v13154_v20 = vld [vmem:[%s21388_s10 + $0x518] sm:$0xff]  ;;  %v13153_v51 = vld [vmem:[%s21388_s10 + $0x510] sm:$0xff]  ;;  %v13148_v53 = vld [vmem:[%s21388_s10 + $0x4e8] sm:$0xff] }
 0xdb4   :  { %v13150_v11 = vld [vmem:[%s21388_s10 + $0x4f8] sm:$0xff]  ;;  %v13147_v59 = vld [vmem:[%s21388_s10 + $0x4e0] sm:$0xff]  ;;  %v13149_v4 = vld [vmem:[%s21388_s10 + $0x4f0] sm:$0xff] }
 0xdb5   :  { %v9437_v43 = vmax.f32 %v9433_v50, %v9435_v25  ;;  %v9434_v37 = vmax.f32 %v9430_v47, 0.0  ;;  %v9436_v17 = vmax.f32 %v9432_v61, 0.0  ;;  %v13144_v10 = vld [vmem:[%s21388_s10 + $0x4c8] sm:$0xff]  ;;  %v13146_v50 = vld [vmem:[%s21388_s10 + $0x4d8] sm:$0xff]  ;;  %v13143_v25 = vld [vmem:[%s21388_s10 + $0x4c0] sm:$0xff] }
 0xdb6   :  { %v13145_v52 = vld [vmem:[%s21388_s10 + $0x4d0] sm:$0xff]  ;;  %v13140_v47 = vld [vmem:[%s21388_s10 + $0x4a8] sm:$0xff]  ;;  %v13142_v13 = vld [vmem:[%s21388_s10 + $0x4b8] sm:$0xff] }
 0xdb7   :  { %v9471_v22 = vand.u32 4294901760, %v9437_v43  ;;  %v9438_v36 = vmax.f32 %v9434_v37, %v9436_v17  ;;  %v13139_v61 = vld [vmem:[%s21388_s10 + $0x4a0] sm:$0xff]  ;;  %v13136_v37 = vld [vmem:[%s21388_s10 + $0x488] sm:$0xff]  ;;  %v13138_v17 = vld [vmem:[%s21388_s10 + $0x498] sm:$0xff] }
 0xdb9   :  { %v9554_v14 = vsub.f32 %v9437_v43, %v9471_v22  ;;  %v9469_v28 = vand.u32 4294901760, %v9438_v36  ;;  %v13141_v43 = vld [vmem:[%s21388_s10 + $0x4b0] sm:$0xff] }
 0xdbb   :  { %v9548_v54 = vsub.f32 %v9438_v36, %v9469_v28  ;;  %9470 = vmatprep.subr.mxu0 %v9469_v28  ;;  %v9555_v44 = vand.u32 4294901760, %v9554_v14  ;;  %v13137_v36 = vld [vmem:[%s21388_s10 + $0x490] sm:$0xff] }
 0xdbc   :  { %9472 = vmatpush1.msra.mxu0 %v9471_v22 }
 0xdbd   :  { %9511 = vmatmul.mubr.f32.vlgmr.msra.gmra.mxu0 %v21559_v26  ;;  %9631 = vmatprep.subr.mxu0 %v9548_v54  ;;  %v9549_v55 = vand.u32 4294901760, %v9548_v54  ;;  %v9556_v39 = vsub.f32 %v9554_v14, %v9555_v44  ;;  %v13128_v26 = vld [vmem:[%s21388_s10 + $0x448] sm:$0xff] }
 0xdbe   :  { %9634 = vmatpush1.msra.mxu0 %v9554_v14  ;;  %9667 = vmatprep.mubr.f32.mxu0 %v21539_v5 }
 0xdbf   :  { %9785 = vmatprep.subr.mxu0 %v9549_v55  ;;  %v9550_v12 = vsub.f32 %v9548_v54, %v9549_v55  ;;  %v9557_v31 = vand.u32 4294901760, %v9556_v39  ;;  %v13127_v39 = vld [vmem:[%s21388_s10 + $0x440] sm:$0xff] }
 0xdc1   :  { %9670 = vmatmul.mubr.f32.vlgmr.msra.gmra.mxu0 %v21560_v7  ;;  %v9551_v41 = vand.u32 4294901760, %v9550_v12  ;;  %v13129_v12 = vld [vmem:[%s21388_s10 + $0x450] sm:$0xff]  ;;  %v13124_v7 = vld [vmem:[%s21388_s10 + $0x428] sm:$0xff] }
 0xdc2   :  { %9789 = vmatpush1.msra.mxu0 %v9555_v44  ;;  %9822 = vmatprep.mubr.f32.mxu0 %v21539_v5 }
 0xdc3   :  { %9935 = vmatprep.subr.mxu0 %v9469_v28  ;;  %9552 = vmatprep.subr.mxu1 %v9551_v41 }
 0xdc4   :  { %9558 = vmatpush1.msra.mxu1 %v9557_v31 }
 0xdc5   :  { %13113 = vmatmul.mubr.msk.f32.vlgmr.msra.gmra.mxu1 %vm4553_vm14, %v21541_v0  ;;  %9707 = vmatprep.subr.mxu1 %v9469_v28 }
 0xdc6   :  { %13114 = vmatmul.mubr.msk.f32.vlgmr.msra.gmra.mxu0 %vm4553_vm14, %v21541_v0  ;;  %9709 = vmatpush1.msra.mxu1 %v9471_v22 }
 0xdc7   :  { %9937 = vmatpush1.msra.mxu0 %v9471_v22  ;;  %9861 = vmatprep.subr.mxu1 %v9469_v28 }
 0xdc8   :  { %10096 = vmatprep.subr.mxu0 %v9548_v54  ;;  %9742 = vmatprep.mubr.f32.mxu1 %v21539_v5  ;;  %v13131_v54 = vld [vmem:[%s21388_s10 + $0x460] sm:$0xff] }
 0xdc9   :  { %9970 = vmatprep.mubr.f32.mxu0 %v21539_v5  ;;  %9746 = vmatmul.mubr.f32.vlgmr.msra.gmra.mxu1 %v21561_v16  ;;  %v13125_v16 = vld [vmem:[%s21388_s10 + $0x430] sm:$0xff] }
 0xdca   :  { %9863 = vmatpush1.msra.mxu1 %v9471_v22  ;;  %9976 = vmatmul.mubr.f32.vlgmr.msra.gmra.mxu0 %v21562_v1  ;;  %v13120_v1 = vld [vmem:[%s21388_s10 + $0x408] sm:$0xff] }
 0xdcb   :  { %10099 = vmatpush1.msra.mxu0 %v9554_v14  ;;  %10017 = vmatprep.subr.mxu1 %v9551_v41  ;;  %v13132_v14 = vld [vmem:[%s21388_s10 + $0x468] sm:$0xff]  ;;  %v13126_v41 = vld [vmem:[%s21388_s10 + $0x438] sm:$0xff] }
 0xdcc   :  { %10250 = vmatprep.subr.mxu0 %v9549_v55  ;;  %9896 = vmatprep.mubr.f32.mxu1 %v21539_v5  ;;  %v13130_v55 = vld [vmem:[%s21388_s10 + $0x458] sm:$0xff] }
 0xdcd   :  { %10132 = vmatprep.mubr.f32.mxu0 %v21539_v5  ;;  %13115 = vmatmul.mubr.msk.f32.vlgmr.msra.gmra.mxu1 %vm4553_vm14, %v21541_v0  ;;  %v13179_v0 = vld [vmem:[%s21388_s10 + $0x5e0] sm:$0xff] }
 0xdce   :  { %10023 = vmatpush1.msra.mxu1 %v9557_v31  ;;  %10135 = vmatmul.mubr.f32.vlgmr.msra.gmra.mxu0 %v21563_v45  ;;  %v13123_v31 = vld [vmem:[%s21388_s10 + $0x420] sm:$0xff]  ;;  %v13122_v45 = vld [vmem:[%s21388_s10 + $0x418] sm:$0xff] }
 0xdcf   :  { %10254 = vmatpush1.msra.mxu0 %v9555_v44  ;;  %10172 = vmatprep.subr.mxu1 %v9469_v28  ;;  %v13133_v44 = vld [vmem:[%s21388_s10 + $0x470] sm:$0xff] }
 0xdd0   :  { %10056 = vmatprep.mubr.f32.mxu1 %v21539_v5  ;;  %10287 = vmatprep.mubr.f32.mxu0 %v21539_v5 }
 0xdd1   :  { %13116 = vmatmul.mubr.msk.f32.vlgmr.msra.gmra.mxu1 %vm4553_vm14, %v21549_v2  ;;  %10658 = vmatprep.subr.mxu0 %v13180_v57  ;;  %v13119_v57 = vld [vmem:[%s21388_s10 + $0x400] sm:$0xff] }
 0xdd2   :  { %10174 = vmatpush1.msra.mxu1 %v9471_v22  ;;  %10207 = vmatprep.mubr.f32.mxu1 %v21539_v5 }
 0xdd3   :  { %10326 = vmatprep.subr.mxu1 %v9469_v28  ;;  %13117 = vmatmul.mubr.msk.f32.vlgmr.msra.gmra.mxu0 %vm4553_vm14, %v21549_v2  ;;  %v13134_v28 = vld [vmem:[%s21388_s10 + $0x478] sm:$0xff] }
 0xdd4   :  { %10659 = vmatpush1.msra.mxu0 %v13179_v0  ;;  %v13121_v0 = vld [vmem:[%s21388_s10 + $0x410] sm:$0xff] }
 0xdd5   :  { %10211 = vmatmul.mubr.f32.vlgmr.msra.gmra.mxu1 %v21564_v46  ;;  %10660 = vmatprep.subr.mxu0 %v13176_v33  ;;  %v13244_v33 = vld [vmem:[%s21388_s10 + $0x7e8] sm:$0xff]  ;;  %v13245_v46 = vld [vmem:[%s21388_s10 + $0x7f0] sm:$0xff] }
 0xdd6   :  { %10328 = vmatpush1.msra.mxu1 %v9471_v22  ;;  %10361 = vmatprep.mubr.f32.mxu1 %v21539_v5  ;;  %v13135_v22 = vld [vmem:[%s21388_s10 + $0x480] sm:$0xff] }
 0xdd7   :  { %10729 = vmatprep.subr.mxu1 %v13182_v15  ;;  %10661 = vmatpush1.msra.mxu0 %v13175_v38  ;;  %v13246_v15 = vld [vmem:[%s21388_s10 + $0x7f8] sm:$0xff]  ;;  %v13243_v38 = vld [vmem:[%s21388_s10 + $0x7e0] sm:$0xff] }
 0xdd8   :  { %10662 = vmatprep.subr.mxu0 %v13172_v27  ;;  %v13240_v27 = vld [vmem:[%s21388_s10 + $0x7c8] sm:$0xff] }
 0xdd9   :  { %13118 = vmatmul.mubr.msk.f32.vlgmr.msra.gmra.mxu1 %vm4553_vm14, %v21549_v2  ;;  %10663 = vmatpush1.msra.mxu0 %v13171_v56  ;;  %v13173_v2 = vld [vmem:[%s21388_s10 + $0x5b0] sm:$0xff]  ;;  %v13242_v56 = vld [vmem:[%s21388_s10 + $0x7d8] sm:$0xff] }
 0xdda   :  { %10730 = vmatpush1.msra.mxu1 %v13181_v8  ;;  %10664 = vmatprep.subr.mxu0 %v13168_v40  ;;  %v13239_v8 = vld [vmem:[%s21388_s10 + $0x7c0] sm:$0xff]  ;;  %v13241_v40 = vld [vmem:[%s21388_s10 + $0x7d0] sm:$0xff] }
 0xddb   :  { %10731 = vmatprep.subr.mxu1 %v13178_v35  ;;  %10665 = vmatpush1.msra.mxu0 %v13167_v30  ;;  %v13236_v35 = vld [vmem:[%s21388_s10 + $0x7a8] sm:$0xff]  ;;  %v13238_v30 = vld [vmem:[%s21388_s10 + $0x7b8] sm:$0xff] }
 0xddc   :  { %10732 = vmatpush1.msra.mxu1 %v13177_v24  ;;  %10666 = vmatprep.subr.mxu0 %v13164_v49  ;;  %v13235_v24 = vld [vmem:[%s21388_s10 + $0x7a0] sm:$0xff]  ;;  %v13237_v49 = vld [vmem:[%s21388_s10 + $0x7b0] sm:$0xff] }
 0xddd   :  { %10733 = vmatprep.subr.mxu1 %v13174_v34  ;;  %10667 = vmatpush1.msra.mxu0 %v13163_v42  ;;  %v13232_v34 = vld [vmem:[%s21388_s10 + $0x788] sm:$0xff]  ;;  %v13234_v42 = vld [vmem:[%s21388_s10 + $0x798] sm:$0xff] }
 0xdde   :  { %10734 = vmatpush1.msra.mxu1 %v13173_v2  ;;  %10668 = vmatprep.subr.mxu0 %v13160_v60  ;;  %v13231_v2 = vld [vmem:[%s21388_s10 + $0x780] sm:$0xff]  ;;  %v13233_v60 = vld [vmem:[%s21388_s10 + $0x790] sm:$0xff] }
 0xddf   :  { %10735 = vmatprep.subr.mxu1 %v13170_v32  ;;  %10669 = vmatpush1.msra.mxu0 %v13159_v3  ;;  %v13228_v32 = vld [vmem:[%s21388_s10 + $0x768] sm:$0xff]  ;;  %v13230_v3 = vld [vmem:[%s21388_s10 + $0x778] sm:$0xff] }
 0xde0   :  { %10736 = vmatpush1.msra.mxu1 %v13169_v9  ;;  %10670 = vmatprep.subr.mxu0 %v13156_v63  ;;  %v13227_v9 = vld [vmem:[%s21388_s10 + $0x760] sm:$0xff]  ;;  %v13229_v63 = vld [vmem:[%s21388_s10 + $0x770] sm:$0xff] }
 0xde1   :  { %10737 = vmatprep.subr.mxu1 %v13166_v21  ;;  %10671 = vmatpush1.msra.mxu0 %v13155_v18  ;;  %v13224_v21 = vld [vmem:[%s21388_s10 + $0x748] sm:$0xff]  ;;  %v13226_v18 = vld [vmem:[%s21388_s10 + $0x758] sm:$0xff] }
 0xde2   :  { %10738 = vmatpush1.msra.mxu1 %v13165_v6  ;;  %10672 = vmatprep.subr.mxu0 %v13152_v58  ;;  %v13223_v6 = vld [vmem:[%s21388_s10 + $0x740] sm:$0xff]  ;;  %v13225_v58 = vld [vmem:[%s21388_s10 + $0x750] sm:$0xff] }
 0xde3   :  { %10739 = vmatprep.subr.mxu1 %v13162_v29  ;;  %10673 = vmatpush1.msra.mxu0 %v13151_v62  ;;  %v13220_v29 = vld [vmem:[%s21388_s10 + $0x728] sm:$0xff]  ;;  %v13218_v62 = vld [vmem:[%s21388_s10 + $0x718] sm:$0xff] }
 0xde4   :  { %10740 = vmatpush1.msra.mxu1 %v13161_v19  ;;  %10674 = vmatprep.subr.mxu0 %v13148_v53  ;;  %v13222_v19 = vld [vmem:[%s21388_s10 + $0x738] sm:$0xff]  ;;  %v13217_v53 = vld [vmem:[%s21388_s10 + $0x710] sm:$0xff] }
 0xde5   :  { %10741 = vmatprep.subr.mxu1 %v13158_v23  ;;  %10675 = vmatpush1.msra.mxu0 %v13147_v59  ;;  %v13219_v23 = vld [vmem:[%s21388_s10 + $0x720] sm:$0xff]  ;;  %v13214_v59 = vld [vmem:[%s21388_s10 + $0x6f8] sm:$0xff] }
 0xde6   :  { %10742 = vmatpush1.msra.mxu1 %v13157_v48  ;;  %10676 = vmatprep.subr.mxu0 %v13144_v10  ;;  %v13221_v48 = vld [vmem:[%s21388_s10 + $0x730] sm:$0xff] }
 0xde7   :  { %10743 = vmatprep.subr.mxu1 %v13154_v20  ;;  %10677 = vmatpush1.msra.mxu0 %v13143_v25  ;;  %v13216_v20 = vld [vmem:[%s21388_s10 + $0x708] sm:$0xff]  ;;  %v13213_v10 = vld [vmem:[%s21388_s10 + $0x6f0] sm:$0xff]  ;;  %v13210_v25 = vld [vmem:[%s21388_s10 + $0x6d8] sm:$0xff] }
 0xde8   :  { %10744 = vmatpush1.msra.mxu1 %v13153_v51  ;;  %10678 = vmatprep.subr.mxu0 %v13140_v47  ;;  %v13215_v51 = vld [vmem:[%s21388_s10 + $0x700] sm:$0xff]  ;;  %v13209_v47 = vld [vmem:[%s21388_s10 + $0x6d0] sm:$0xff] }
 0xde9   :  { %10745 = vmatprep.subr.mxu1 %v13150_v11  ;;  %10679 = vmatpush1.msra.mxu0 %v13139_v61  ;;  %v13212_v11 = vld [vmem:[%s21388_s10 + $0x6e8] sm:$0xff]  ;;  %v13206_v61 = vld [vmem:[%s21388_s10 + $0x6b8] sm:$0xff] }
 0xdea   :  { %10746 = vmatpush1.msra.mxu1 %v13149_v4  ;;  %10680 = vmatprep.subr.mxu0 %v13136_v37  ;;  %v13211_v4 = vld [vmem:[%s21388_s10 + $0x6e0] sm:$0xff]  ;;  %v13205_v37 = vld [vmem:[%s21388_s10 + $0x6b0] sm:$0xff] }
 0xdeb   :  { %10747 = vmatprep.subr.mxu1 %v13146_v50  ;;  %10681 = vmatpush1.msra.mxu0 %v13135_v22  ;;  %v13208_v50 = vld [vmem:[%s21388_s10 + $0x6c8] sm:$0xff]  ;;  %v13202_v22 = vld [vmem:[%s21388_s10 + $0x698] sm:$0xff] }
 0xdec   :  { %10748 = vmatpush1.msra.mxu1 %v13145_v52  ;;  %10682 = vmatprep.subr.mxu0 %v13132_v14  ;;  %v13207_v52 = vld [vmem:[%s21388_s10 + $0x6c0] sm:$0xff]  ;;  %v13201_v14 = vld [vmem:[%s21388_s10 + $0x690] sm:$0xff] }
 0xded   :  { %10749 = vmatprep.subr.mxu1 %v13142_v13  ;;  %10683 = vmatpush1.msra.mxu0 %v13131_v54  ;;  %v13204_v13 = vld [vmem:[%s21388_s10 + $0x6a8] sm:$0xff]  ;;  %v13198_v54 = vld [vmem:[%s21388_s10 + $0x678] sm:$0xff] }
 0xdee   :  { %10750 = vmatpush1.msra.mxu1 %v13141_v43  ;;  %10684 = vmatprep.subr.mxu0 %v13128_v26  ;;  %v13203_v43 = vld [vmem:[%s21388_s10 + $0x6a0] sm:$0xff]  ;;  %v13197_v26 = vld [vmem:[%s21388_s10 + $0x670] sm:$0xff] }
 0xdef   :  { %10751 = vmatprep.subr.mxu1 %v13138_v17  ;;  %10685 = vmatpush1.msra.mxu0 %v13127_v39  ;;  %v13200_v17 = vld [vmem:[%s21388_s10 + $0x688] sm:$0xff]  ;;  %v13194_v39 = vld [vmem:[%s21388_s10 + $0x658] sm:$0xff] }
 0xdf0   :  { %10752 = vmatpush1.msra.mxu1 %v13137_v36  ;;  %10686 = vmatprep.subr.mxu0 %v13124_v7  ;;  %v13199_v36 = vld [vmem:[%s21388_s10 + $0x680] sm:$0xff]  ;;  %v13193_v7 = vld [vmem:[%s21388_s10 + $0x650] sm:$0xff] }
 0xdf1   :  { %10753 = vmatprep.subr.mxu1 %v13134_v28  ;;  %10687 = vmatpush1.msra.mxu0 %v13123_v31  ;;  %v13196_v28 = vld [vmem:[%s21388_s10 + $0x668] sm:$0xff]  ;;  %v13190_v31 = vld [vmem:[%s21388_s10 + $0x638] sm:$0xff] }
 0xdf2   :  { %10754 = vmatpush1.msra.mxu1 %v13133_v44  ;;  %10688 = vmatprep.subr.mxu0 %v13120_v1  ;;  %v13195_v44 = vld [vmem:[%s21388_s10 + $0x660] sm:$0xff]  ;;  %v13189_v1 = vld [vmem:[%s21388_s10 + $0x630] sm:$0xff] }
 0xdf3   :  { %10755 = vmatprep.subr.mxu1 %v13130_v55  ;;  %10689 = vmatpush1.msra.mxu0 %v13119_v57  ;;  %v13192_v55 = vld [vmem:[%s21388_s10 + $0x648] sm:$0xff]  ;;  %v13186_v57 = vld [vmem:[%s21388_s10 + $0x618] sm:$0xff] }
 0xdf4   :  { %10756 = vmatpush1.msra.mxu1 %v13129_v12  ;;  %10690 = vmatprep.subr.mxu0 %v13244_v33  ;;  %v13191_v12 = vld [vmem:[%s21388_s10 + $0x640] sm:$0xff]  ;;  %v13185_v33 = vld [vmem:[%s21388_s10 + $0x610] sm:$0xff] }
 0xdf5   :  { %10757 = vmatprep.subr.mxu1 %v13126_v41  ;;  %10691 = vmatpush2.msra.mxu0 %v13243_v38  ;;  %v13188_v41 = vld [vmem:[%s21388_s10 + $0x628] sm:$0xff]  ;;  %v10452_v38 = vld [vmem:[%s21388_s10 + $0x1f8] sm:$0xff] }
 0xdf6   :  { %10758 = vmatpush1.msra.mxu1 %v13125_v16  ;;  %10692 = vmatprep.subr.mxu0 %v13240_v27  ;;  %v13187_v16 = vld [vmem:[%s21388_s10 + $0x620] sm:$0xff] }
 0xdf7   :  { %10759 = vmatprep.subr.mxu1 %v13122_v45  ;;  %10693 = vmatpush2.msra.mxu0 %v13239_v8  ;;  %v13184_v45 = vld [vmem:[%s21388_s10 + $0x608] sm:$0xff] }
 0xdf8   :  { %10760 = vmatpush1.msra.mxu1 %v13121_v0  ;;  %10694 = vmatprep.subr.mxu0 %v13236_v35  ;;  %v13183_v0 = vld [vmem:[%s21388_s10 + $0x600] sm:$0xff] }
 0xdf9   :  { %10761 = vmatprep.subr.mxu1 %v13246_v15  ;;  %10695 = vmatpush2.msra.mxu0 %v13235_v24  ;;  %v10450_v15 = vld [vmem:[%s21388_s10 + $0x1e8] sm:$0xff] }
 0xdfa   :  { %10762 = vmatpush2.msra.mxu1 %v13245_v46  ;;  %10696 = vmatprep.subr.mxu0 %v13232_v34 }
 0xdfb   :  { %10763 = vmatprep.subr.mxu1 %v13242_v56  ;;  %10697 = vmatpush2.msra.mxu0 %v13231_v2 }
 0xdfc   :  { %10764 = vmatpush2.msra.mxu1 %v13241_v40  ;;  %10698 = vmatprep.subr.mxu0 %v13228_v32 }
 0xdfd   :  { %10765 = vmatprep.subr.mxu1 %v13238_v30  ;;  %10699 = vmatpush2.msra.mxu0 %v13227_v9 }
 0xdfe   :  { %10766 = vmatpush2.msra.mxu1 %v13237_v49  ;;  %10700 = vmatprep.subr.mxu0 %v13224_v21 }
 0xdff   :  { %10767 = vmatprep.subr.mxu1 %v13234_v42  ;;  %10701 = vmatpush2.msra.mxu0 %v13223_v6 }
 0xe00   :  { %10768 = vmatpush2.msra.mxu1 %v13233_v60  ;;  %10702 = vmatprep.subr.mxu0 %v13220_v29 }
 0xe01   :  { %10769 = vmatprep.subr.mxu1 %v13230_v3  ;;  %10703 = vmatpush2.msra.mxu0 %v13219_v23 }
 0xe02   :  { %10770 = vmatpush2.msra.mxu1 %v13229_v63  ;;  %10704 = vmatprep.subr.mxu0 %v13216_v20 }
 0xe03   :  { %10771 = vmatprep.subr.mxu1 %v13226_v18  ;;  %10705 = vmatpush2.msra.mxu0 %v13215_v51 }
 0xe04   :  { %10772 = vmatpush2.msra.mxu1 %v13225_v58  ;;  %10706 = vmatprep.subr.mxu0 %v13212_v11 }
 0xe05   :  { %10773 = vmatprep.subr.mxu1 %v13222_v19  ;;  %10707 = vmatpush2.msra.mxu0 %v13211_v4 }
 0xe06   :  { %10774 = vmatpush2.msra.mxu1 %v13221_v48  ;;  %10708 = vmatprep.subr.mxu0 %v13208_v50 }
 0xe07   :  { %10775 = vmatprep.subr.mxu1 %v13218_v62  ;;  %10709 = vmatpush2.msra.mxu0 %v13207_v52 }
 0xe08   :  { %10776 = vmatpush2.msra.mxu1 %v13217_v53  ;;  %10710 = vmatprep.subr.mxu0 %v13204_v13 }
 0xe09   :  { %10777 = vmatprep.subr.mxu1 %v13214_v59  ;;  %10711 = vmatpush2.msra.mxu0 %v13203_v43 }
 0xe0a   :  { %10778 = vmatpush2.msra.mxu1 %v13213_v10  ;;  %10712 = vmatprep.subr.mxu0 %v13200_v17 }
 0xe0b   :  { %10779 = vmatprep.subr.mxu1 %v13210_v25  ;;  %10713 = vmatpush2.msra.mxu0 %v13199_v36 }
 0xe0c   :  { %10780 = vmatpush2.msra.mxu1 %v13209_v47  ;;  %10714 = vmatprep.subr.mxu0 %v13196_v28 }
 0xe0d   :  { %10781 = vmatprep.subr.mxu1 %v13206_v61  ;;  %10715 = vmatpush2.msra.mxu0 %v13195_v44 }
 0xe0e   :  { %10782 = vmatpush2.msra.mxu1 %v13205_v37  ;;  %10716 = vmatprep.subr.mxu0 %v13192_v55  ;;  %v10393_v55 = vld [vmem:[%s21388_s10 + $0x20] sm:$0xff] }
 0xe0f   :  { %10783 = vmatprep.subr.mxu1 %v13202_v22  ;;  %10717 = vmatpush2.msra.mxu0 %v13191_v12 }
 0xe10   :  { %10784 = vmatpush2.msra.mxu1 %v13201_v14  ;;  %10718 = vmatprep.subr.mxu0 %v13188_v41 }
 0xe11   :  { %10785 = vmatprep.subr.mxu1 %v13198_v54  ;;  %10719 = vmatpush2.msra.mxu0 %v13187_v16  ;;  %v10449_v16 = vld [vmem:[%s21388_s10 + $0x1e0] sm:$0xff] }
 0xe12   :  { %10786 = vmatpush2.msra.mxu1 %v13197_v26  ;;  %10720 = vmatprep.subr.mxu0 %v13184_v45  ;;  %v10446_v45 = vld [vmem:[%s21388_s10 + $0x1c8] sm:$0xff] }
 0xe13   :  { %10787 = vmatprep.subr.mxu1 %v13194_v39  ;;  %10721 = vmatpush2.msra.mxu0 %v13183_v0  ;;  %v10448_v0 = vld [vmem:[%s21388_s10 + $0x1d8] sm:$0xff] }
 0xe14   :  { %10788 = vmatpush2.msra.mxu1 %v13193_v7  ;;  %10811 = vmatprep.subr.mxu0 %v10450_v15  ;;  %v10447_v15 = vld [vmem:[%s21388_s10 + $0x1d0] sm:$0xff] }
 0xe15   :  { %10789 = vmatprep.subr.mxu1 %v13190_v31 }
 0xe16   :  { %10790 = vmatpush2.msra.mxu1 %v13189_v1  ;;  %v10451_v1 = vld [vmem:[%s21388_s10 + $0x1f0] sm:$0xff] }
 0xe17   :  { %10791 = vmatprep.subr.mxu1 %v13186_v57 }
 0xe18   :  { %10792 = vmatpush2.msra.mxu1 %v13185_v33  ;;  %v10445_v33 = vld [vmem:[%s21388_s10 + $0x1c0] sm:$0xff] }
 0xe19   :  { %10882 = vmatprep.subr.mxu1 %v10452_v38  ;;  %v10442_v38 = vld [vmem:[%s21388_s10 + $0x1a8] sm:$0xff] }
 0xe7d   :  { %v9512_v46 = vpop.f32.mrf.mxu0 }
 0xe7f   :  { %v9514_v27 = vpop.f32.mrf.mxu0 }
 0xe81   :  { %v9671_v56 = vpop.f32.mrf.mxu0 }
 0xe83   :  { %v9673_v8 = vpop.f32.mrf.mxu0 }
 0xe85   :  { %v9594_v40 = vpop.f32.mrf.mxu1 }
 0xe86   :  { %v9825_v35 = vpop.f32.mrf.mxu0  ;;  %v9595_v2 = vadd.f32 %v9594_v40, %v9512_v46  ;;  %v10444_v46 = vld [vmem:[%s21388_s10 + $0x1b8] sm:$0xff] }
 0xe87   :  { %v9596_v30 = vpop.f32.mrf.mxu1  ;;  %v10440_v40 = vld [vmem:[%s21388_s10 + $0x198] sm:$0xff] }
 0xe88   :  { %v9827_v24 = vpop.f32.mrf.mxu0  ;;  %v9597_v60 = vadd.f32 %v9596_v30, %v9514_v27  ;;  %v9672_v21 = vadd.f32 %v9671_v56, %v9595_v2  ;;  %v10441_v27 = vld [vmem:[%s21388_s10 + $0x1a0] sm:$0xff]  ;;  %v10443_v56 = vld [vmem:[%s21388_s10 + $0x1b0] sm:$0xff]  ;;  %v10430_v2 = vld [vmem:[%s21388_s10 + $0x148] sm:$0xff] }
 0xe89   :  { %v9747_v49 = vpop.f32.mrf.mxu1  ;;  %v10439_v30 = vld [vmem:[%s21388_s10 + $0x190] sm:$0xff] }
 0xe8a   :  { %v9977_v34 = vpop.f32.mrf.mxu0  ;;  %v9674_v18 = vadd.f32 %v9673_v8, %v9597_v60  ;;  %v9748_v23 = vadd.f32 %v9747_v49, %v9672_v21  ;;  %v10438_v8 = vld [vmem:[%s21388_s10 + $0x188] sm:$0xff]  ;;  %v10436_v49 = vld [vmem:[%s21388_s10 + $0x178] sm:$0xff]  ;;  %v10425_v21 = vld [vmem:[%s21388_s10 + $0x120] sm:$0xff] }
 0xe8b   :  { %v9749_v42 = vpop.f32.mrf.mxu1  ;;  %v10432_v60 = vld [vmem:[%s21388_s10 + $0x158] sm:$0xff] }
 0xe8c   :  { %v9979_v32 = vpop.f32.mrf.mxu0  ;;  %v9750_v48 = vadd.f32 %v9749_v42, %v9674_v18  ;;  %v9826_v10 = vadd.f32 %v9825_v35, %v9748_v23  ;;  %v10437_v35 = vld [vmem:[%s21388_s10 + $0x180] sm:$0xff]  ;;  %v10435_v42 = vld [vmem:[%s21388_s10 + $0x170] sm:$0xff]  ;;  %v10418_v23 = vld [vmem:[%s21388_s10 + $0xe8] sm:$0xff] }
 0xe8d   :  { %v9899_v3 = vpop.f32.mrf.mxu1  ;;  %v10427_v18 = vld [vmem:[%s21388_s10 + $0x130] sm:$0xff] }
 0xe8e   :  { %v10136_v9 = vpop.f32.mrf.mxu0  ;;  %v9828_v50 = vadd.f32 %v9827_v24, %v9750_v48  ;;  %v9900_v17 = vadd.f32 %v9899_v3, %v9826_v10  ;;  %v10434_v24 = vld [vmem:[%s21388_s10 + $0x168] sm:$0xff]  ;;  %v10431_v3 = vld [vmem:[%s21388_s10 + $0x150] sm:$0xff]  ;;  %v10420_v48 = vld [vmem:[%s21388_s10 + $0xf8] sm:$0xff] }
 0xe8f   :  { %v9901_v63 = vpop.f32.mrf.mxu1  ;;  %v10412_v10 = vld [vmem:[%s21388_s10 + $0xb8] sm:$0xff] }
 0xe90   :  { %v10138_v58 = vpop.f32.mrf.mxu0  ;;  %v9902_v22 = vadd.f32 %v9901_v63, %v9828_v50  ;;  %v10428_v63 = vld [vmem:[%s21388_s10 + $0x138] sm:$0xff]  ;;  %v10409_v50 = vld [vmem:[%s21388_s10 + $0xa0] sm:$0xff] }
 0xe91   :  { %v10059_v6 = vpop.f32.mrf.mxu1 }
 0xe92   :  { %v10060_v29 = vadd.f32 %v10059_v6, %v9977_v34  ;;  %v10433_v34 = vld [vmem:[%s21388_s10 + $0x160] sm:$0xff]  ;;  %v10422_v6 = vld [vmem:[%s21388_s10 + $0x108] sm:$0xff] }
 0xe93   :  { %v10061_v19 = vpop.f32.mrf.mxu1  ;;  %v10290_v53 = vpop.f32.mrf.mxu0 }
 0xe94   :  { %v10062_v20 = vadd.f32 %v10061_v19, %v9979_v32  ;;  %v10137_v62 = vadd.f32 %v10136_v9, %v10060_v29  ;;  %v10429_v32 = vld [vmem:[%s21388_s10 + $0x140] sm:$0xff]  ;;  %v10426_v9 = vld [vmem:[%s21388_s10 + $0x128] sm:$0xff]  ;;  %v10423_v19 = vld [vmem:[%s21388_s10 + $0x110] sm:$0xff] }
 0xe95   :  { %v10212_v51 = vpop.f32.mrf.mxu1  ;;  %v10292_v47 = vpop.f32.mrf.mxu0  ;;  %v10421_v29 = vld [vmem:[%s21388_s10 + $0x100] sm:$0xff] }
 0xe96   :  { %v10139_v11 = vadd.f32 %v10138_v58, %v10062_v20  ;;  %v10213_v59 = vadd.f32 %v10212_v51, %v10137_v62  ;;  %v10424_v58 = vld [vmem:[%s21388_s10 + $0x118] sm:$0xff]  ;;  %v10417_v20 = vld [vmem:[%s21388_s10 + $0xe0] sm:$0xff]  ;;  %v10419_v62 = vld [vmem:[%s21388_s10 + $0xf0] sm:$0xff] }
 0xe97   :  { %v10214_v4 = vpop.f32.mrf.mxu1  ;;  %v10414_v51 = vld [vmem:[%s21388_s10 + $0xc8] sm:$0xff] }
 0xe98   :  { %v10215_v25 = vadd.f32 %v10214_v4, %v10139_v11  ;;  %v10291_v52 = vadd.f32 %v10290_v53, %v10213_v59  ;;  %v10416_v53 = vld [vmem:[%s21388_s10 + $0xd8] sm:$0xff]  ;;  %v10413_v11 = vld [vmem:[%s21388_s10 + $0xc0] sm:$0xff]  ;;  %v10415_v59 = vld [vmem:[%s21388_s10 + $0xd0] sm:$0xff] }
 0xe99   :  { %v10364_v13 = vpop.f32.mrf.mxu1  ;;  %v10410_v4 = vld [vmem:[%s21388_s10 + $0xa8] sm:$0xff] }
 0xe9a   :  { %v10293_v61 = vadd.f32 %v10292_v47, %v10215_v25  ;;  %v10365_v43 = vadd.f32 %v10364_v13, %v10291_v52  ;;  %v10411_v25 = vld [vmem:[%s21388_s10 + $0xb0] sm:$0xff]  ;;  %v10406_v52 = vld [vmem:[%s21388_s10 + $0x88] sm:$0xff]  ;;  %v10408_v47 = vld [vmem:[%s21388_s10 + $0x98] sm:$0xff] }
 0xe9b   :  { %v10366_v37 = vpop.f32.mrf.mxu1  ;;  %v10405_v13 = vld [vmem:[%s21388_s10 + $0x80] sm:$0xff] }
 0xe9c   :  { %v10367_v36 = vadd.f32 %v10366_v37, %v10293_v61  ;;  %v10369_v14 = vmax.f32 %v9900_v17, %v10365_v43  ;;  %v10407_v61 = vld [vmem:[%s21388_s10 + $0x90] sm:$0xff]  ;;  %v10402_v43 = vld [vmem:[%s21388_s10 + $0x68] sm:$0xff]  ;;  %v10404_v37 = vld [vmem:[%s21388_s10 + $0x78] sm:$0xff] }
 0xe9d   :  { %v10401_v17 = vld [vmem:[%s21388_s10 + $0x60] sm:$0xff] }
 0xe9e   :  { %v10370_v28 = vmax.f32 %v9902_v22, %v10367_v36  ;;  %v10403_v22 = vld [vmem:[%s21388_s10 + $0x70] sm:$0xff]  ;;  %v10398_v36 = vld [vmem:[%s21388_s10 + $0x48] sm:$0xff] }
 0xea0   :  { %v10373_v54 = vcombine.low %v10369_v14, %v10370_v28  ;;  %v10400_v14 = vld [vmem:[%s21388_s10 + $0x58] sm:$0xff]  ;;  %v10397_v28 = vld [vmem:[%s21388_s10 + $0x40] sm:$0xff] }
 0xea2   :  { %10375 = vst [vmem:[#allocation5] sm:$0xff] %v10373_v54  ;;  %v10399_v54 = vld [vmem:[%s21388_s10 + $0x50] sm:$0xff] }
 0xea9   :  { %v10379_v44 = vld [vmem:[#allocation5 + $0x1] ss:$4 sm:$0x3]  ;;  %v10376_v26 = vld [vmem:[#allocation5] ss:$4 sm:$0x3] }
 0xeaa   :  { %10381 = vst.msk [vmem:[#allocation6 + $0x5] ss:$2 sm:$0x3] %vm17083_vm15, %v10379_v44  ;;  %10378 = vst.msk [vmem:[#allocation6 + $0x1] ss:$2 sm:$0x3] %vm17083_vm15, %v10376_v26 }
 0xeab   :  { %v10382_v39 = vld [vmem:[#allocation5 + $0x2] ss:$4 sm:$0x3]  ;;  %v10385_v12 = vld [vmem:[#allocation5 + $0x3] ss:$4 sm:$0x3] }
 0xeac   :  { %10384 = vst.msk [vmem:[#allocation6 + $0x9] ss:$2 sm:$0x3] %vm17083_vm15, %v10382_v39  ;;  %10387 = vst.msk [vmem:[#allocation6 + $0xd] ss:$2 sm:$0x3] %vm17083_vm15, %v10385_v12 }
 0xead   :  { %v10394_v44 = vld [vmem:[%s21388_s10 + $0x28] sm:$0xff]  ;;  %v10396_v26 = vld [vmem:[%s21388_s10 + $0x38] sm:$0xff]  ;;  %v10395_v39 = vld [vmem:[%s21388_s10 + $0x30] sm:$0xff] }
 0xeae   :  { %v10390_v12 = vld [vmem:[%s21388_s10 + $0x8] sm:$0xff] }
 0xeb1   :  { %v13247_v7 = vld.sshfl [vmem:[#allocation6 + $0x4] sm:$0x33 pattern:$0x76325410] }
 0xeb2   :  { %v10655_v41 = vcombine.high %v13247_v7, %v13247_v7  ;;  %v19980_v31 = vld.sshfl [vmem:[#allocation6] sm:$0x33 pattern:$0x76325410] }
 0xeb3   :  { %v10808_v57 = vcombine.high %v19980_v31, %v19980_v31 }
 0xeb4   :  { %10722 = vmatprep.mubr.f32.mxu0 %v10655_v41  ;;  %10793 = vmatprep.mubr.f32.mxu1 %v10655_v41  ;;  %v10389_v41 = vld [vmem:[%s21388_s10] sm:$0xff] }
 0xeb5   :  { %10723 = vmatmul.mubr.f32.vlgmr.msra.gmra.mxu0 %v13247_v7  ;;  %10794 = vmatmul.mubr.f32.vlgmr.msra.gmra.mxu1 %v13247_v7  ;;  %v10392_v7 = vld [vmem:[%s21388_s10 + $0x18] sm:$0xff] }
 0xeb6   :  { %10812 = vmatpush1.msra.mxu0 %v10449_v16  ;;  %10883 = vmatpush1.msra.mxu1 %v10451_v1  ;;  %v10391_v16 = vld [vmem:[%s21388_s10 + $0x10] sm:$0xff]  ;;  %v10514_v1 = vld [vmem:[%s21388_s10 + $0x3e8] sm:$0xff] }
 0xeb7   :  { %10813 = vmatprep.subr.mxu0 %v10446_v45  ;;  %10875 = vmatprep.mubr.f32.mxu0 %v10808_v57  ;;  %v10516_v45 = vld [vmem:[%s21388_s10 + $0x3f8] sm:$0xff] }
 0xeb8   :  { %10884 = vmatprep.subr.mxu1 %v10448_v0  ;;  %10946 = vmatprep.mubr.f32.mxu1 %v10808_v57  ;;  %v10513_v57 = vld [vmem:[%s21388_s10 + $0x3e0] sm:$0xff]  ;;  %v10515_v0 = vld [vmem:[%s21388_s10 + $0x3f0] sm:$0xff] }
 0xeb9   :  { %10814 = vmatpush1.msra.mxu0 %v10445_v33  ;;  %10885 = vmatpush1.msra.mxu1 %v10447_v15  ;;  %v10510_v33 = vld [vmem:[%s21388_s10 + $0x3c8] sm:$0xff]  ;;  %v10512_v15 = vld [vmem:[%s21388_s10 + $0x3d8] sm:$0xff] }
 0xeba   :  { %10815 = vmatprep.subr.mxu0 %v10442_v38  ;;  %10886 = vmatprep.subr.mxu1 %v10444_v46  ;;  %v10509_v38 = vld [vmem:[%s21388_s10 + $0x3c0] sm:$0xff]  ;;  %v10511_v46 = vld [vmem:[%s21388_s10 + $0x3d0] sm:$0xff] }
 0xebb   :  { %10816 = vmatpush1.msra.mxu0 %v10441_v27  ;;  %10887 = vmatpush1.msra.mxu1 %v10443_v56  ;;  %v10506_v27 = vld [vmem:[%s21388_s10 + $0x3a8] sm:$0xff]  ;;  %v10508_v56 = vld [vmem:[%s21388_s10 + $0x3b8] sm:$0xff] }
 0xebc   :  { %10817 = vmatprep.subr.mxu0 %v10438_v8  ;;  %10888 = vmatprep.subr.mxu1 %v10440_v40  ;;  %v10505_v8 = vld [vmem:[%s21388_s10 + $0x3a0] sm:$0xff]  ;;  %v10507_v40 = vld [vmem:[%s21388_s10 + $0x3b0] sm:$0xff] }
 0xebd   :  { %10818 = vmatpush1.msra.mxu0 %v10437_v35  ;;  %10889 = vmatpush1.msra.mxu1 %v10439_v30  ;;  %v10502_v35 = vld [vmem:[%s21388_s10 + $0x388] sm:$0xff]  ;;  %v10504_v30 = vld [vmem:[%s21388_s10 + $0x398] sm:$0xff] }
 0xebe   :  { %10819 = vmatprep.subr.mxu0 %v10434_v24  ;;  %10890 = vmatprep.subr.mxu1 %v10436_v49  ;;  %v10501_v24 = vld [vmem:[%s21388_s10 + $0x380] sm:$0xff]  ;;  %v10503_v49 = vld [vmem:[%s21388_s10 + $0x390] sm:$0xff] }
 0xebf   :  { %10820 = vmatpush1.msra.mxu0 %v10433_v34  ;;  %10891 = vmatpush1.msra.mxu1 %v10435_v42  ;;  %v10498_v34 = vld [vmem:[%s21388_s10 + $0x368] sm:$0xff]  ;;  %v10500_v42 = vld [vmem:[%s21388_s10 + $0x378] sm:$0xff] }
 0xec0   :  { %10821 = vmatprep.subr.mxu0 %v10430_v2  ;;  %10892 = vmatprep.subr.mxu1 %v10432_v60  ;;  %v10497_v2 = vld [vmem:[%s21388_s10 + $0x360] sm:$0xff]  ;;  %v10499_v60 = vld [vmem:[%s21388_s10 + $0x370] sm:$0xff] }
 0xec1   :  { %10822 = vmatpush1.msra.mxu0 %v10429_v32  ;;  %10893 = vmatpush1.msra.mxu1 %v10431_v3  ;;  %v10494_v32 = vld [vmem:[%s21388_s10 + $0x348] sm:$0xff]  ;;  %v10496_v3 = vld [vmem:[%s21388_s10 + $0x358] sm:$0xff] }
 0xec2   :  { %10823 = vmatprep.subr.mxu0 %v10426_v9  ;;  %10894 = vmatprep.subr.mxu1 %v10428_v63  ;;  %v10493_v9 = vld [vmem:[%s21388_s10 + $0x340] sm:$0xff]  ;;  %v10495_v63 = vld [vmem:[%s21388_s10 + $0x350] sm:$0xff] }
 0xec3   :  { %10824 = vmatpush1.msra.mxu0 %v10425_v21  ;;  %10895 = vmatpush1.msra.mxu1 %v10427_v18  ;;  %v10490_v21 = vld [vmem:[%s21388_s10 + $0x328] sm:$0xff]  ;;  %v10492_v18 = vld [vmem:[%s21388_s10 + $0x338] sm:$0xff] }
 0xec4   :  { %10825 = vmatprep.subr.mxu0 %v10422_v6  ;;  %10896 = vmatprep.subr.mxu1 %v10424_v58  ;;  %v10489_v6 = vld [vmem:[%s21388_s10 + $0x320] sm:$0xff]  ;;  %v10491_v58 = vld [vmem:[%s21388_s10 + $0x330] sm:$0xff] }
 0xec5   :  { %10826 = vmatpush1.msra.mxu0 %v10421_v29  ;;  %10897 = vmatpush1.msra.mxu1 %v10423_v19  ;;  %v10486_v29 = vld [vmem:[%s21388_s10 + $0x308] sm:$0xff]  ;;  %v10488_v19 = vld [vmem:[%s21388_s10 + $0x318] sm:$0xff] }
 0xec6   :  { %10827 = vmatprep.subr.mxu0 %v10418_v23  ;;  %10898 = vmatprep.subr.mxu1 %v10420_v48  ;;  %v10485_v23 = vld [vmem:[%s21388_s10 + $0x300] sm:$0xff]  ;;  %v10487_v48 = vld [vmem:[%s21388_s10 + $0x310] sm:$0xff] }
 0xec7   :  { %10828 = vmatpush1.msra.mxu0 %v10417_v20  ;;  %10899 = vmatpush1.msra.mxu1 %v10419_v62  ;;  %v10482_v20 = vld [vmem:[%s21388_s10 + $0x2e8] sm:$0xff]  ;;  %v10484_v62 = vld [vmem:[%s21388_s10 + $0x2f8] sm:$0xff] }
 0xec8   :  { %10829 = vmatprep.subr.mxu0 %v10414_v51  ;;  %10900 = vmatprep.subr.mxu1 %v10416_v53  ;;  %v10481_v51 = vld [vmem:[%s21388_s10 + $0x2e0] sm:$0xff]  ;;  %v10483_v53 = vld [vmem:[%s21388_s10 + $0x2f0] sm:$0xff] }
 0xec9   :  { %10830 = vmatpush1.msra.mxu0 %v10413_v11  ;;  %10901 = vmatpush1.msra.mxu1 %v10415_v59  ;;  %v10478_v11 = vld [vmem:[%s21388_s10 + $0x2c8] sm:$0xff]  ;;  %v10480_v59 = vld [vmem:[%s21388_s10 + $0x2d8] sm:$0xff] }
 0xeca   :  { %10831 = vmatprep.subr.mxu0 %v10410_v4  ;;  %10902 = vmatprep.subr.mxu1 %v10412_v10  ;;  %v10477_v4 = vld [vmem:[%s21388_s10 + $0x2c0] sm:$0xff]  ;;  %v10479_v10 = vld [vmem:[%s21388_s10 + $0x2d0] sm:$0xff] }
 0xecb   :  { %10832 = vmatpush1.msra.mxu0 %v10409_v50  ;;  %10903 = vmatpush1.msra.mxu1 %v10411_v25  ;;  %v10474_v50 = vld [vmem:[%s21388_s10 + $0x2a8] sm:$0xff]  ;;  %v10476_v25 = vld [vmem:[%s21388_s10 + $0x2b8] sm:$0xff] }
 0xecc   :  { %10833 = vmatprep.subr.mxu0 %v10406_v52  ;;  %10904 = vmatprep.subr.mxu1 %v10408_v47  ;;  %v10473_v52 = vld [vmem:[%s21388_s10 + $0x2a0] sm:$0xff]  ;;  %v10475_v47 = vld [vmem:[%s21388_s10 + $0x2b0] sm:$0xff] }
 0xecd   :  { %10834 = vmatpush1.msra.mxu0 %v10405_v13  ;;  %10905 = vmatpush1.msra.mxu1 %v10407_v61  ;;  %v10470_v13 = vld [vmem:[%s21388_s10 + $0x288] sm:$0xff]  ;;  %v10472_v61 = vld [vmem:[%s21388_s10 + $0x298] sm:$0xff] }
 0xece   :  { %10835 = vmatprep.subr.mxu0 %v10402_v43  ;;  %10906 = vmatprep.subr.mxu1 %v10404_v37  ;;  %v10469_v43 = vld [vmem:[%s21388_s10 + $0x280] sm:$0xff]  ;;  %v10471_v37 = vld [vmem:[%s21388_s10 + $0x290] sm:$0xff] }
 0xecf   :  { %10836 = vmatpush1.msra.mxu0 %v10401_v17  ;;  %10907 = vmatpush1.msra.mxu1 %v10403_v22  ;;  %v10466_v17 = vld [vmem:[%s21388_s10 + $0x268] sm:$0xff]  ;;  %v10468_v22 = vld [vmem:[%s21388_s10 + $0x278] sm:$0xff] }
 0xed0   :  { %10837 = vmatprep.subr.mxu0 %v10398_v36  ;;  %10908 = vmatprep.subr.mxu1 %v10400_v14  ;;  %v10465_v36 = vld [vmem:[%s21388_s10 + $0x260] sm:$0xff]  ;;  %v10467_v14 = vld [vmem:[%s21388_s10 + $0x270] sm:$0xff] }
 0xed1   :  { %10838 = vmatpush1.msra.mxu0 %v10397_v28  ;;  %10909 = vmatpush1.msra.mxu1 %v10399_v54  ;;  %v10462_v28 = vld [vmem:[%s21388_s10 + $0x248] sm:$0xff]  ;;  %v10464_v54 = vld [vmem:[%s21388_s10 + $0x258] sm:$0xff] }
 0xed2   :  { %10839 = vmatprep.subr.mxu0 %v10394_v44  ;;  %10910 = vmatprep.subr.mxu1 %v10396_v26  ;;  %v10461_v44 = vld [vmem:[%s21388_s10 + $0x240] sm:$0xff]  ;;  %v10463_v26 = vld [vmem:[%s21388_s10 + $0x250] sm:$0xff] }
 0xed3   :  { %10840 = vmatpush1.msra.mxu0 %v10393_v55  ;;  %10911 = vmatpush1.msra.mxu1 %v10395_v39  ;;  %v10458_v55 = vld [vmem:[%s21388_s10 + $0x228] sm:$0xff]  ;;  %v10460_v39 = vld [vmem:[%s21388_s10 + $0x238] sm:$0xff] }
 0xed4   :  { %10841 = vmatprep.subr.mxu0 %v10390_v12  ;;  %10912 = vmatprep.subr.mxu1 %v10392_v7  ;;  %v10457_v12 = vld [vmem:[%s21388_s10 + $0x220] sm:$0xff]  ;;  %v10459_v7 = vld [vmem:[%s21388_s10 + $0x230] sm:$0xff] }
 0xed5   :  { %10842 = vmatpush1.msra.mxu0 %v10389_v41  ;;  %10913 = vmatpush1.msra.mxu1 %v10391_v16  ;;  %v10454_v41 = vld [vmem:[%s21388_s10 + $0x208] sm:$0xff]  ;;  %v10456_v16 = vld [vmem:[%s21388_s10 + $0x218] sm:$0xff] }
 0xed6   :  { %10843 = vmatprep.subr.mxu0 %v10514_v1  ;;  %10914 = vmatprep.subr.mxu1 %v10516_v45  ;;  %v10453_v1 = vld [vmem:[%s21388_s10 + $0x200] sm:$0xff]  ;;  %v10455_v45 = vld [vmem:[%s21388_s10 + $0x210] sm:$0xff] }
 0xed7   :  { %10844 = vmatpush2.msra.mxu0 %v10513_v57  ;;  %10915 = vmatpush2.msra.mxu1 %v10515_v0  ;;  %v20362_v57 = vld.sshfl [vmem:[#allocation6 + $0x8] sm:$0x33 pattern:$0x76325410]  ;;  %v13310_v0 = vld [vmem:[%s21388_s10 + $0x9e8] sm:$0xff] }
 0xed8   :  { %10845 = vmatprep.subr.mxu0 %v10510_v33  ;;  %10916 = vmatprep.subr.mxu1 %v10512_v15  ;;  %v13312_v33 = vld [vmem:[%s21388_s10 + $0x9f8] sm:$0xff]  ;;  %v13309_v15 = vld [vmem:[%s21388_s10 + $0x9e0] sm:$0xff] }
 0xed9   :  { %10846 = vmatpush2.msra.mxu0 %v10509_v38  ;;  %10917 = vmatpush2.msra.mxu1 %v10511_v46  ;;  %v11091_v38 = vcombine.high %v20362_v57, %v20362_v57  ;;  %v13311_v46 = vld [vmem:[%s21388_s10 + $0x9f0] sm:$0xff] }
 0xeda   :  { %10847 = vmatprep.subr.mxu0 %v10506_v27  ;;  %10918 = vmatprep.subr.mxu1 %v10508_v56  ;;  %v13306_v27 = vld [vmem:[%s21388_s10 + $0x9c8] sm:$0xff]  ;;  %v13308_v56 = vld [vmem:[%s21388_s10 + $0x9d8] sm:$0xff] }
 0xedb   :  { %10848 = vmatpush2.msra.mxu0 %v10505_v8  ;;  %10919 = vmatpush2.msra.mxu1 %v10507_v40  ;;  %v13307_v8 = vld [vmem:[%s21388_s10 + $0x9d0] sm:$0xff]  ;;  %v13302_v40 = vld [vmem:[%s21388_s10 + $0x9a8] sm:$0xff] }
 0xedc   :  { %10849 = vmatprep.subr.mxu0 %v10502_v35  ;;  %10920 = vmatprep.subr.mxu1 %v10504_v30  ;;  %v13304_v35 = vld [vmem:[%s21388_s10 + $0x9b8] sm:$0xff]  ;;  %v13301_v30 = vld [vmem:[%s21388_s10 + $0x9a0] sm:$0xff] }
 0xedd   :  { %10850 = vmatpush2.msra.mxu0 %v10501_v24  ;;  %10921 = vmatpush2.msra.mxu1 %v10503_v49  ;;  %v13303_v24 = vld [vmem:[%s21388_s10 + $0x9b0] sm:$0xff]  ;;  %v13298_v49 = vld [vmem:[%s21388_s10 + $0x988] sm:$0xff] }
 0xede   :  { %10851 = vmatprep.subr.mxu0 %v10498_v34  ;;  %10922 = vmatprep.subr.mxu1 %v10500_v42  ;;  %v13300_v34 = vld [vmem:[%s21388_s10 + $0x998] sm:$0xff]  ;;  %v13297_v42 = vld [vmem:[%s21388_s10 + $0x980] sm:$0xff] }
 0xedf   :  { %10852 = vmatpush2.msra.mxu0 %v10497_v2  ;;  %10923 = vmatpush2.msra.mxu1 %v10499_v60  ;;  %v13299_v2 = vld [vmem:[%s21388_s10 + $0x990] sm:$0xff]  ;;  %v13294_v60 = vld [vmem:[%s21388_s10 + $0x968] sm:$0xff] }
 0xee0   :  { %10853 = vmatprep.subr.mxu0 %v10494_v32  ;;  %10924 = vmatprep.subr.mxu1 %v10496_v3  ;;  %v13296_v32 = vld [vmem:[%s21388_s10 + $0x978] sm:$0xff]  ;;  %v13293_v3 = vld [vmem:[%s21388_s10 + $0x960] sm:$0xff] }
 0xee1   :  { %10854 = vmatpush2.msra.mxu0 %v10493_v9  ;;  %10925 = vmatpush2.msra.mxu1 %v10495_v63  ;;  %v13295_v9 = vld [vmem:[%s21388_s10 + $0x970] sm:$0xff]  ;;  %v13290_v63 = vld [vmem:[%s21388_s10 + $0x948] sm:$0xff] }
 0xee2   :  { %10855 = vmatprep.subr.mxu0 %v10490_v21  ;;  %10926 = vmatprep.subr.mxu1 %v10492_v18  ;;  %v13292_v21 = vld [vmem:[%s21388_s10 + $0x958] sm:$0xff]  ;;  %v13289_v18 = vld [vmem:[%s21388_s10 + $0x940] sm:$0xff] }
 0xee3   :  { %10856 = vmatpush2.msra.mxu0 %v10489_v6  ;;  %10927 = vmatpush2.msra.mxu1 %v10491_v58  ;;  %v13291_v6 = vld [vmem:[%s21388_s10 + $0x950] sm:$0xff]  ;;  %v13286_v58 = vld [vmem:[%s21388_s10 + $0x928] sm:$0xff] }
 0xee4   :  { %10857 = vmatprep.subr.mxu0 %v10486_v29  ;;  %10928 = vmatprep.subr.mxu1 %v10488_v19  ;;  %v13288_v29 = vld [vmem:[%s21388_s10 + $0x938] sm:$0xff]  ;;  %v13285_v19 = vld [vmem:[%s21388_s10 + $0x920] sm:$0xff] }
 0xee5   :  { %10858 = vmatpush2.msra.mxu0 %v10485_v23  ;;  %10929 = vmatpush2.msra.mxu1 %v10487_v48  ;;  %v13287_v23 = vld [vmem:[%s21388_s10 + $0x930] sm:$0xff]  ;;  %v13282_v48 = vld [vmem:[%s21388_s10 + $0x908] sm:$0xff] }
 0xee6   :  { %10859 = vmatprep.subr.mxu0 %v10482_v20  ;;  %10930 = vmatprep.subr.mxu1 %v10484_v62  ;;  %v13284_v20 = vld [vmem:[%s21388_s10 + $0x918] sm:$0xff]  ;;  %v13281_v62 = vld [vmem:[%s21388_s10 + $0x900] sm:$0xff] }
 0xee7   :  { %10860 = vmatpush2.msra.mxu0 %v10481_v51  ;;  %10931 = vmatpush2.msra.mxu1 %v10483_v53  ;;  %v13283_v51 = vld [vmem:[%s21388_s10 + $0x910] sm:$0xff]  ;;  %v13278_v53 = vld [vmem:[%s21388_s10 + $0x8e8] sm:$0xff] }
 0xee8   :  { %10861 = vmatprep.subr.mxu0 %v10478_v11  ;;  %10932 = vmatprep.subr.mxu1 %v10480_v59  ;;  %v13280_v11 = vld [vmem:[%s21388_s10 + $0x8f8] sm:$0xff]  ;;  %v13277_v59 = vld [vmem:[%s21388_s10 + $0x8e0] sm:$0xff] }
 0xee9   :  { %10862 = vmatpush2.msra.mxu0 %v10477_v4  ;;  %10933 = vmatpush2.msra.mxu1 %v10479_v10  ;;  %v13279_v4 = vld [vmem:[%s21388_s10 + $0x8f0] sm:$0xff]  ;;  %v13274_v10 = vld [vmem:[%s21388_s10 + $0x8c8] sm:$0xff] }
 0xeea   :  { %10863 = vmatprep.subr.mxu0 %v10474_v50  ;;  %10934 = vmatprep.subr.mxu1 %v10476_v25  ;;  %v13276_v50 = vld [vmem:[%s21388_s10 + $0x8d8] sm:$0xff]  ;;  %v13273_v25 = vld [vmem:[%s21388_s10 + $0x8c0] sm:$0xff] }
 0xeeb   :  { %10864 = vmatpush2.msra.mxu0 %v10473_v52  ;;  %10935 = vmatpush2.msra.mxu1 %v10475_v47  ;;  %v13275_v52 = vld [vmem:[%s21388_s10 + $0x8d0] sm:$0xff]  ;;  %v13270_v47 = vld [vmem:[%s21388_s10 + $0x8a8] sm:$0xff] }
 0xeec   :  { %10865 = vmatprep.subr.mxu0 %v10470_v13  ;;  %10936 = vmatprep.subr.mxu1 %v10472_v61  ;;  %v13272_v13 = vld [vmem:[%s21388_s10 + $0x8b8] sm:$0xff]  ;;  %v13269_v61 = vld [vmem:[%s21388_s10 + $0x8a0] sm:$0xff] }
 0xeed   :  { %10866 = vmatpush2.msra.mxu0 %v10469_v43  ;;  %10937 = vmatpush2.msra.mxu1 %v10471_v37  ;;  %v13271_v43 = vld [vmem:[%s21388_s10 + $0x8b0] sm:$0xff]  ;;  %v13266_v37 = vld [vmem:[%s21388_s10 + $0x888] sm:$0xff] }
 0xeee   :  { %10867 = vmatprep.subr.mxu0 %v10466_v17  ;;  %10938 = vmatprep.subr.mxu1 %v10468_v22  ;;  %v13268_v17 = vld [vmem:[%s21388_s10 + $0x898] sm:$0xff]  ;;  %v13265_v22 = vld [vmem:[%s21388_s10 + $0x880] sm:$0xff] }
 0xeef   :  { %10868 = vmatpush2.msra.mxu0 %v10465_v36  ;;  %10939 = vmatpush2.msra.mxu1 %v10467_v14  ;;  %v13267_v36 = vld [vmem:[%s21388_s10 + $0x890] sm:$0xff]  ;;  %v13262_v14 = vld [vmem:[%s21388_s10 + $0x868] sm:$0xff] }
 0xef0   :  { %10869 = vmatprep.subr.mxu0 %v10462_v28  ;;  %10940 = vmatprep.subr.mxu1 %v10464_v54  ;;  %v13264_v28 = vld [vmem:[%s21388_s10 + $0x878] sm:$0xff]  ;;  %v13261_v54 = vld [vmem:[%s21388_s10 + $0x860] sm:$0xff] }
 0xef1   :  { %10870 = vmatpush2.msra.mxu0 %v10461_v44  ;;  %10941 = vmatpush2.msra.mxu1 %v10463_v26  ;;  %v13263_v44 = vld [vmem:[%s21388_s10 + $0x870] sm:$0xff]  ;;  %v13258_v26 = vld [vmem:[%s21388_s10 + $0x848] sm:$0xff] }
 0xef2   :  { %10871 = vmatprep.subr.mxu0 %v10458_v55  ;;  %10942 = vmatprep.subr.mxu1 %v10460_v39  ;;  %v13260_v55 = vld [vmem:[%s21388_s10 + $0x858] sm:$0xff]  ;;  %v13257_v39 = vld [vmem:[%s21388_s10 + $0x840] sm:$0xff] }
 0xef3   :  { %10872 = vmatpush2.msra.mxu0 %v10457_v12  ;;  %10943 = vmatpush2.msra.mxu1 %v10459_v7  ;;  %v13259_v12 = vld [vmem:[%s21388_s10 + $0x850] sm:$0xff]  ;;  %v13254_v7 = vld [vmem:[%s21388_s10 + $0x828] sm:$0xff] }
 0xef4   :  { %10873 = vmatprep.subr.mxu0 %v10454_v41  ;;  %10944 = vmatprep.subr.mxu1 %v10456_v16  ;;  %v13256_v41 = vld [vmem:[%s21388_s10 + $0x838] sm:$0xff]  ;;  %v13253_v16 = vld [vmem:[%s21388_s10 + $0x820] sm:$0xff] }
 0xef5   :  { %10874 = vmatpush2.msra.mxu0 %v10453_v1  ;;  %10945 = vmatpush2.msra.mxu1 %v10455_v45  ;;  %v13255_v1 = vld [vmem:[%s21388_s10 + $0x830] sm:$0xff]  ;;  %v13250_v45 = vld [vmem:[%s21388_s10 + $0x808] sm:$0xff] }
 0xef6   :  { %10876 = vmatmul.mubr.f32.vlgmr.msra.gmra.mxu0 %v19980_v31  ;;  %10947 = vmatmul.mubr.f32.vlgmr.msra.gmra.mxu1 %v19980_v31  ;;  %v13305_v31 = vld [vmem:[%s21388_s10 + $0x9c0] sm:$0xff] }
 0xef7   :  { %11094 = vmatprep.subr.mxu0 %v13310_v0  ;;  %11165 = vmatprep.subr.mxu1 %v13312_v33  ;;  %v13252_v0 = vld [vmem:[%s21388_s10 + $0x818] sm:$0xff]  ;;  %v13249_v33 = vld [vmem:[%s21388_s10 + $0x800] sm:$0xff] }
 0xef8   :  { %11095 = vmatpush1.msra.mxu0 %v13309_v15  ;;  %11158 = vmatprep.mubr.f32.mxu0 %v11091_v38  ;;  %v13251_v15 = vld [vmem:[%s21388_s10 + $0x810] sm:$0xff] }
 0xef9   :  { %11166 = vmatpush1.msra.mxu1 %v13311_v46  ;;  %11229 = vmatprep.mubr.f32.mxu1 %v11091_v38  ;;  %v13374_v38 = vld [vmem:[%s21388_s10 + $0xbe8] sm:$0xff]  ;;  %v13376_v46 = vld [vmem:[%s21388_s10 + $0xbf8] sm:$0xff] }
 0xefa   :  { %11096 = vmatprep.subr.mxu0 %v13306_v27  ;;  %11167 = vmatprep.subr.mxu1 %v13308_v56  ;;  %v13373_v27 = vld [vmem:[%s21388_s10 + $0xbe0] sm:$0xff]  ;;  %v13375_v56 = vld [vmem:[%s21388_s10 + $0xbf0] sm:$0xff] }
 0xefb   :  { %11097 = vmatpush1.msra.mxu0 %v13305_v31  ;;  %11168 = vmatpush1.msra.mxu1 %v13307_v8  ;;  %v13370_v31 = vld [vmem:[%s21388_s10 + $0xbc8] sm:$0xff]  ;;  %v13372_v8 = vld [vmem:[%s21388_s10 + $0xbd8] sm:$0xff] }
 0xefc   :  { %11098 = vmatprep.subr.mxu0 %v13302_v40  ;;  %11169 = vmatprep.subr.mxu1 %v13304_v35  ;;  %v13369_v40 = vld [vmem:[%s21388_s10 + $0xbc0] sm:$0xff]  ;;  %v13371_v35 = vld [vmem:[%s21388_s10 + $0xbd0] sm:$0xff] }
 0xefd   :  { %11099 = vmatpush1.msra.mxu0 %v13301_v30  ;;  %11170 = vmatpush1.msra.mxu1 %v13303_v24  ;;  %v13366_v30 = vld [vmem:[%s21388_s10 + $0xba8] sm:$0xff]  ;;  %v13368_v24 = vld [vmem:[%s21388_s10 + $0xbb8] sm:$0xff] }
 0xefe   :  { %11100 = vmatprep.subr.mxu0 %v13298_v49  ;;  %11171 = vmatprep.subr.mxu1 %v13300_v34  ;;  %v13365_v49 = vld [vmem:[%s21388_s10 + $0xba0] sm:$0xff]  ;;  %v13367_v34 = vld [vmem:[%s21388_s10 + $0xbb0] sm:$0xff] }
 0xeff   :  { %11101 = vmatpush1.msra.mxu0 %v13297_v42  ;;  %11172 = vmatpush1.msra.mxu1 %v13299_v2  ;;  %v13362_v42 = vld [vmem:[%s21388_s10 + $0xb88] sm:$0xff]  ;;  %v13364_v2 = vld [vmem:[%s21388_s10 + $0xb98] sm:$0xff] }
 0xf00   :  { %11102 = vmatprep.subr.mxu0 %v13294_v60  ;;  %11173 = vmatprep.subr.mxu1 %v13296_v32  ;;  %v13361_v60 = vld [vmem:[%s21388_s10 + $0xb80] sm:$0xff]  ;;  %v13363_v32 = vld [vmem:[%s21388_s10 + $0xb90] sm:$0xff] }
 0xf01   :  { %11103 = vmatpush1.msra.mxu0 %v13293_v3  ;;  %11174 = vmatpush1.msra.mxu1 %v13295_v9  ;;  %v13358_v3 = vld [vmem:[%s21388_s10 + $0xb68] sm:$0xff]  ;;  %v13360_v9 = vld [vmem:[%s21388_s10 + $0xb78] sm:$0xff] }
 0xf02   :  { %11104 = vmatprep.subr.mxu0 %v13290_v63  ;;  %11175 = vmatprep.subr.mxu1 %v13292_v21  ;;  %v13357_v63 = vld [vmem:[%s21388_s10 + $0xb60] sm:$0xff]  ;;  %v13359_v21 = vld [vmem:[%s21388_s10 + $0xb70] sm:$0xff] }
 0xf03   :  { %11105 = vmatpush1.msra.mxu0 %v13289_v18  ;;  %11176 = vmatpush1.msra.mxu1 %v13291_v6  ;;  %v13354_v18 = vld [vmem:[%s21388_s10 + $0xb48] sm:$0xff]  ;;  %v13356_v6 = vld [vmem:[%s21388_s10 + $0xb58] sm:$0xff] }
 0xf04   :  { %11106 = vmatprep.subr.mxu0 %v13286_v58  ;;  %11177 = vmatprep.subr.mxu1 %v13288_v29  ;;  %v13353_v58 = vld [vmem:[%s21388_s10 + $0xb40] sm:$0xff]  ;;  %v13355_v29 = vld [vmem:[%s21388_s10 + $0xb50] sm:$0xff] }
 0xf05   :  { %11107 = vmatpush1.msra.mxu0 %v13285_v19  ;;  %11178 = vmatpush1.msra.mxu1 %v13287_v23  ;;  %v13350_v19 = vld [vmem:[%s21388_s10 + $0xb28] sm:$0xff]  ;;  %v13352_v23 = vld [vmem:[%s21388_s10 + $0xb38] sm:$0xff] }
 0xf06   :  { %11108 = vmatprep.subr.mxu0 %v13282_v48  ;;  %11179 = vmatprep.subr.mxu1 %v13284_v20  ;;  %v13349_v48 = vld [vmem:[%s21388_s10 + $0xb20] sm:$0xff]  ;;  %v13351_v20 = vld [vmem:[%s21388_s10 + $0xb30] sm:$0xff] }
 0xf07   :  { %11109 = vmatpush1.msra.mxu0 %v13281_v62  ;;  %11180 = vmatpush1.msra.mxu1 %v13283_v51  ;;  %v13346_v62 = vld [vmem:[%s21388_s10 + $0xb08] sm:$0xff]  ;;  %v13348_v51 = vld [vmem:[%s21388_s10 + $0xb18] sm:$0xff] }
 0xf08   :  { %11110 = vmatprep.subr.mxu0 %v13278_v53  ;;  %11181 = vmatprep.subr.mxu1 %v13280_v11  ;;  %v13345_v53 = vld [vmem:[%s21388_s10 + $0xb00] sm:$0xff]  ;;  %v13347_v11 = vld [vmem:[%s21388_s10 + $0xb10] sm:$0xff] }
 0xf09   :  { %11111 = vmatpush1.msra.mxu0 %v13277_v59  ;;  %11182 = vmatpush1.msra.mxu1 %v13279_v4  ;;  %v13342_v59 = vld [vmem:[%s21388_s10 + $0xae8] sm:$0xff]  ;;  %v13344_v4 = vld [vmem:[%s21388_s10 + $0xaf8] sm:$0xff] }
 0xf0a   :  { %11112 = vmatprep.subr.mxu0 %v13274_v10  ;;  %11183 = vmatprep.subr.mxu1 %v13276_v50  ;;  %v13341_v10 = vld [vmem:[%s21388_s10 + $0xae0] sm:$0xff]  ;;  %v13343_v50 = vld [vmem:[%s21388_s10 + $0xaf0] sm:$0xff] }
 0xf0b   :  { %11113 = vmatpush1.msra.mxu0 %v13273_v25  ;;  %11184 = vmatpush1.msra.mxu1 %v13275_v52  ;;  %v13338_v25 = vld [vmem:[%s21388_s10 + $0xac8] sm:$0xff]  ;;  %v13340_v52 = vld [vmem:[%s21388_s10 + $0xad8] sm:$0xff] }
 0xf0c   :  { %11114 = vmatprep.subr.mxu0 %v13270_v47  ;;  %11185 = vmatprep.subr.mxu1 %v13272_v13  ;;  %v13337_v47 = vld [vmem:[%s21388_s10 + $0xac0] sm:$0xff]  ;;  %v13339_v13 = vld [vmem:[%s21388_s10 + $0xad0] sm:$0xff] }
 0xf0d   :  { %11115 = vmatpush1.msra.mxu0 %v13269_v61  ;;  %11186 = vmatpush1.msra.mxu1 %v13271_v43  ;;  %v13334_v61 = vld [vmem:[%s21388_s10 + $0xaa8] sm:$0xff]  ;;  %v13336_v43 = vld [vmem:[%s21388_s10 + $0xab8] sm:$0xff] }
 0xf0e   :  { %11116 = vmatprep.subr.mxu0 %v13266_v37  ;;  %11187 = vmatprep.subr.mxu1 %v13268_v17  ;;  %v13333_v37 = vld [vmem:[%s21388_s10 + $0xaa0] sm:$0xff]  ;;  %v13335_v17 = vld [vmem:[%s21388_s10 + $0xab0] sm:$0xff] }
 0xf0f   :  { %11117 = vmatpush1.msra.mxu0 %v13265_v22  ;;  %11188 = vmatpush1.msra.mxu1 %v13267_v36  ;;  %v13330_v22 = vld [vmem:[%s21388_s10 + $0xa88] sm:$0xff]  ;;  %v13332_v36 = vld [vmem:[%s21388_s10 + $0xa98] sm:$0xff] }
 0xf10   :  { %11118 = vmatprep.subr.mxu0 %v13262_v14  ;;  %11189 = vmatprep.subr.mxu1 %v13264_v28  ;;  %v13329_v14 = vld [vmem:[%s21388_s10 + $0xa80] sm:$0xff]  ;;  %v13331_v28 = vld [vmem:[%s21388_s10 + $0xa90] sm:$0xff] }
 0xf11   :  { %11119 = vmatpush1.msra.mxu0 %v13261_v54  ;;  %11190 = vmatpush1.msra.mxu1 %v13263_v44  ;;  %v13326_v54 = vld [vmem:[%s21388_s10 + $0xa68] sm:$0xff]  ;;  %v13328_v44 = vld [vmem:[%s21388_s10 + $0xa78] sm:$0xff] }
 0xf12   :  { %11120 = vmatprep.subr.mxu0 %v13258_v26  ;;  %11191 = vmatprep.subr.mxu1 %v13260_v55  ;;  %v13325_v26 = vld [vmem:[%s21388_s10 + $0xa60] sm:$0xff]  ;;  %v13327_v55 = vld [vmem:[%s21388_s10 + $0xa70] sm:$0xff] }
 0xf13   :  { %11121 = vmatpush1.msra.mxu0 %v13257_v39  ;;  %11192 = vmatpush1.msra.mxu1 %v13259_v12  ;;  %v13322_v39 = vld [vmem:[%s21388_s10 + $0xa48] sm:$0xff]  ;;  %v13324_v12 = vld [vmem:[%s21388_s10 + $0xa58] sm:$0xff] }
 0xf14   :  { %11122 = vmatprep.subr.mxu0 %v13254_v7  ;;  %11193 = vmatprep.subr.mxu1 %v13256_v41  ;;  %v13321_v7 = vld [vmem:[%s21388_s10 + $0xa40] sm:$0xff]  ;;  %v13323_v41 = vld [vmem:[%s21388_s10 + $0xa50] sm:$0xff] }
 0xf15   :  { %11123 = vmatpush1.msra.mxu0 %v13253_v16  ;;  %11194 = vmatpush1.msra.mxu1 %v13255_v1  ;;  %v13318_v16 = vld [vmem:[%s21388_s10 + $0xa28] sm:$0xff]  ;;  %v13320_v1 = vld [vmem:[%s21388_s10 + $0xa38] sm:$0xff] }
 0xf16   :  { %11124 = vmatprep.subr.mxu0 %v13250_v45  ;;  %11195 = vmatprep.subr.mxu1 %v13252_v0  ;;  %v13317_v45 = vld [vmem:[%s21388_s10 + $0xa20] sm:$0xff]  ;;  %v13319_v0 = vld [vmem:[%s21388_s10 + $0xa30] sm:$0xff] }
 0xf17   :  { %11125 = vmatpush1.msra.mxu0 %v13249_v33  ;;  %11196 = vmatpush1.msra.mxu1 %v13251_v15  ;;  %v13314_v33 = vld [vmem:[%s21388_s10 + $0xa08] sm:$0xff]  ;;  %v13316_v15 = vld [vmem:[%s21388_s10 + $0xa18] sm:$0xff] }
 0xf18   :  { %11126 = vmatprep.subr.mxu0 %v13374_v38  ;;  %11197 = vmatprep.subr.mxu1 %v13376_v46  ;;  %v13313_v38 = vld [vmem:[%s21388_s10 + $0xa00] sm:$0xff]  ;;  %v13315_v46 = vld [vmem:[%s21388_s10 + $0xa10] sm:$0xff] }
 0xf19   :  { %11127 = vmatpush2.msra.mxu0 %v13373_v27  ;;  %11198 = vmatpush2.msra.mxu1 %v13375_v56  ;;  %v20752_v27 = vld.sshfl [vmem:[#allocation6 + $0xc] sm:$0x33 pattern:$0x76325410]  ;;  %v13439_v56 = vld [vmem:[%s21388_s10 + $0xde8] sm:$0xff] }
 0xf1a   :  { %11128 = vmatprep.subr.mxu0 %v13370_v31  ;;  %11199 = vmatprep.subr.mxu1 %v13372_v8  ;;  %v13441_v31 = vld [vmem:[%s21388_s10 + $0xdf8] sm:$0xff]  ;;  %v13438_v8 = vld [vmem:[%s21388_s10 + $0xde0] sm:$0xff] }
 0xf1b   :  { %11129 = vmatpush2.msra.mxu0 %v13369_v40  ;;  %11200 = vmatpush2.msra.mxu1 %v13371_v35  ;;  %v11378_v40 = vcombine.high %v20752_v27, %v20752_v27  ;;  %v13440_v35 = vld [vmem:[%s21388_s10 + $0xdf0] sm:$0xff] }
 0xf1c   :  { %11130 = vmatprep.subr.mxu0 %v13366_v30  ;;  %11201 = vmatprep.subr.mxu1 %v13368_v24  ;;  %v13435_v30 = vld [vmem:[%s21388_s10 + $0xdc8] sm:$0xff]  ;;  %v13437_v24 = vld [vmem:[%s21388_s10 + $0xdd8] sm:$0xff] }
 0xf1d   :  { %11131 = vmatpush2.msra.mxu0 %v13365_v49  ;;  %11202 = vmatpush2.msra.mxu1 %v13367_v34  ;;  %v13436_v49 = vld [vmem:[%s21388_s10 + $0xdd0] sm:$0xff]  ;;  %v13431_v34 = vld [vmem:[%s21388_s10 + $0xda8] sm:$0xff] }
 0xf1e   :  { %11132 = vmatprep.subr.mxu0 %v13362_v42  ;;  %11203 = vmatprep.subr.mxu1 %v13364_v2  ;;  %v13433_v42 = vld [vmem:[%s21388_s10 + $0xdb8] sm:$0xff]  ;;  %v13430_v2 = vld [vmem:[%s21388_s10 + $0xda0] sm:$0xff] }
 0xf1f   :  { %11133 = vmatpush2.msra.mxu0 %v13361_v60  ;;  %11204 = vmatpush2.msra.mxu1 %v13363_v32  ;;  %v13432_v60 = vld [vmem:[%s21388_s10 + $0xdb0] sm:$0xff]  ;;  %v13427_v32 = vld [vmem:[%s21388_s10 + $0xd88] sm:$0xff] }
 0xf20   :  { %11134 = vmatprep.subr.mxu0 %v13358_v3  ;;  %11205 = vmatprep.subr.mxu1 %v13360_v9  ;;  %v13429_v3 = vld [vmem:[%s21388_s10 + $0xd98] sm:$0xff]  ;;  %v13426_v9 = vld [vmem:[%s21388_s10 + $0xd80] sm:$0xff] }
 0xf21   :  { %11135 = vmatpush2.msra.mxu0 %v13357_v63  ;;  %11206 = vmatpush2.msra.mxu1 %v13359_v21  ;;  %v13428_v63 = vld [vmem:[%s21388_s10 + $0xd90] sm:$0xff]  ;;  %v13423_v21 = vld [vmem:[%s21388_s10 + $0xd68] sm:$0xff] }
 0xf22   :  { %11136 = vmatprep.subr.mxu0 %v13354_v18  ;;  %11207 = vmatprep.subr.mxu1 %v13356_v6  ;;  %v13425_v18 = vld [vmem:[%s21388_s10 + $0xd78] sm:$0xff]  ;;  %v13422_v6 = vld [vmem:[%s21388_s10 + $0xd60] sm:$0xff] }
 0xf23   :  { %11137 = vmatpush2.msra.mxu0 %v13353_v58  ;;  %11208 = vmatpush2.msra.mxu1 %v13355_v29  ;;  %v13424_v58 = vld [vmem:[%s21388_s10 + $0xd70] sm:$0xff]  ;;  %v13419_v29 = vld [vmem:[%s21388_s10 + $0xd48] sm:$0xff] }
 0xf24   :  { %11138 = vmatprep.subr.mxu0 %v13350_v19  ;;  %11209 = vmatprep.subr.mxu1 %v13352_v23  ;;  %v13421_v19 = vld [vmem:[%s21388_s10 + $0xd58] sm:$0xff]  ;;  %v13418_v23 = vld [vmem:[%s21388_s10 + $0xd40] sm:$0xff] }
 0xf25   :  { %11139 = vmatpush2.msra.mxu0 %v13349_v48  ;;  %11210 = vmatpush2.msra.mxu1 %v13351_v20  ;;  %v13420_v48 = vld [vmem:[%s21388_s10 + $0xd50] sm:$0xff]  ;;  %v13415_v20 = vld [vmem:[%s21388_s10 + $0xd28] sm:$0xff] }
 0xf26   :  { %11140 = vmatprep.subr.mxu0 %v13346_v62  ;;  %11211 = vmatprep.subr.mxu1 %v13348_v51  ;;  %v13417_v62 = vld [vmem:[%s21388_s10 + $0xd38] sm:$0xff]  ;;  %v13414_v51 = vld [vmem:[%s21388_s10 + $0xd20] sm:$0xff] }
 0xf27   :  { %11141 = vmatpush2.msra.mxu0 %v13345_v53  ;;  %11212 = vmatpush2.msra.mxu1 %v13347_v11  ;;  %v13416_v53 = vld [vmem:[%s21388_s10 + $0xd30] sm:$0xff]  ;;  %v13411_v11 = vld [vmem:[%s21388_s10 + $0xd08] sm:$0xff] }
 0xf28   :  { %11142 = vmatprep.subr.mxu0 %v13342_v59  ;;  %11213 = vmatprep.subr.mxu1 %v13344_v4  ;;  %v13413_v59 = vld [vmem:[%s21388_s10 + $0xd18] sm:$0xff]  ;;  %v13410_v4 = vld [vmem:[%s21388_s10 + $0xd00] sm:$0xff] }
 0xf29   :  { %11143 = vmatpush2.msra.mxu0 %v13341_v10  ;;  %11214 = vmatpush2.msra.mxu1 %v13343_v50  ;;  %v13412_v10 = vld [vmem:[%s21388_s10 + $0xd10] sm:$0xff]  ;;  %v13407_v50 = vld [vmem:[%s21388_s10 + $0xce8] sm:$0xff] }
 0xf2a   :  { %11144 = vmatprep.subr.mxu0 %v13338_v25  ;;  %11215 = vmatprep.subr.mxu1 %v13340_v52  ;;  %v13409_v25 = vld [vmem:[%s21388_s10 + $0xcf8] sm:$0xff]  ;;  %v13406_v52 = vld [vmem:[%s21388_s10 + $0xce0] sm:$0xff] }
 0xf2b   :  { %11145 = vmatpush2.msra.mxu0 %v13337_v47  ;;  %11216 = vmatpush2.msra.mxu1 %v13339_v13  ;;  %v13408_v47 = vld [vmem:[%s21388_s10 + $0xcf0] sm:$0xff]  ;;  %v13403_v13 = vld [vmem:[%s21388_s10 + $0xcc8] sm:$0xff] }
 0xf2c   :  { %11146 = vmatprep.subr.mxu0 %v13334_v61  ;;  %11217 = vmatprep.subr.mxu1 %v13336_v43  ;;  %v13405_v61 = vld [vmem:[%s21388_s10 + $0xcd8] sm:$0xff]  ;;  %v13402_v43 = vld [vmem:[%s21388_s10 + $0xcc0] sm:$0xff] }
 0xf2d   :  { %11147 = vmatpush2.msra.mxu0 %v13333_v37  ;;  %11218 = vmatpush2.msra.mxu1 %v13335_v17  ;;  %v13404_v37 = vld [vmem:[%s21388_s10 + $0xcd0] sm:$0xff]  ;;  %v13399_v17 = vld [vmem:[%s21388_s10 + $0xca8] sm:$0xff] }
 0xf2e   :  { %11148 = vmatprep.subr.mxu0 %v13330_v22  ;;  %11219 = vmatprep.subr.mxu1 %v13332_v36  ;;  %v13401_v22 = vld [vmem:[%s21388_s10 + $0xcb8] sm:$0xff]  ;;  %v13398_v36 = vld [vmem:[%s21388_s10 + $0xca0] sm:$0xff] }
 0xf2f   :  { %11149 = vmatpush2.msra.mxu0 %v13329_v14  ;;  %11220 = vmatpush2.msra.mxu1 %v13331_v28  ;;  %v13400_v14 = vld [vmem:[%s21388_s10 + $0xcb0] sm:$0xff]  ;;  %v13395_v28 = vld [vmem:[%s21388_s10 + $0xc88] sm:$0xff] }
 0xf30   :  { %11150 = vmatprep.subr.mxu0 %v13326_v54  ;;  %11221 = vmatprep.subr.mxu1 %v13328_v44  ;;  %v13397_v54 = vld [vmem:[%s21388_s10 + $0xc98] sm:$0xff]  ;;  %v13394_v44 = vld [vmem:[%s21388_s10 + $0xc80] sm:$0xff] }
 0xf31   :  { %11151 = vmatpush2.msra.mxu0 %v13325_v26  ;;  %11222 = vmatpush2.msra.mxu1 %v13327_v55  ;;  %v13396_v26 = vld [vmem:[%s21388_s10 + $0xc90] sm:$0xff]  ;;  %v13391_v55 = vld [vmem:[%s21388_s10 + $0xc68] sm:$0xff] }
 0xf32   :  { %11152 = vmatprep.subr.mxu0 %v13322_v39  ;;  %11223 = vmatprep.subr.mxu1 %v13324_v12  ;;  %v13393_v39 = vld [vmem:[%s21388_s10 + $0xc78] sm:$0xff]  ;;  %v13390_v12 = vld [vmem:[%s21388_s10 + $0xc60] sm:$0xff] }
 0xf33   :  { %11153 = vmatpush2.msra.mxu0 %v13321_v7  ;;  %11224 = vmatpush2.msra.mxu1 %v13323_v41  ;;  %v13392_v7 = vld [vmem:[%s21388_s10 + $0xc70] sm:$0xff]  ;;  %v13387_v41 = vld [vmem:[%s21388_s10 + $0xc48] sm:$0xff] }
 0xf34   :  { %11154 = vmatprep.subr.mxu0 %v13318_v16  ;;  %11225 = vmatprep.subr.mxu1 %v13320_v1  ;;  %v13389_v16 = vld [vmem:[%s21388_s10 + $0xc58] sm:$0xff]  ;;  %v13386_v1 = vld [vmem:[%s21388_s10 + $0xc40] sm:$0xff] }
 0xf35   :  { %11155 = vmatpush2.msra.mxu0 %v13317_v45  ;;  %11226 = vmatpush2.msra.mxu1 %v13319_v0  ;;  %v13388_v45 = vld [vmem:[%s21388_s10 + $0xc50] sm:$0xff]  ;;  %v13383_v0 = vld [vmem:[%s21388_s10 + $0xc28] sm:$0xff] }
 0xf36   :  { %11156 = vmatprep.subr.mxu0 %v13314_v33  ;;  %11227 = vmatprep.subr.mxu1 %v13316_v15  ;;  %v13385_v33 = vld [vmem:[%s21388_s10 + $0xc38] sm:$0xff]  ;;  %v13382_v15 = vld [vmem:[%s21388_s10 + $0xc20] sm:$0xff] }
 0xf37   :  { %11157 = vmatpush2.msra.mxu0 %v13313_v38  ;;  %11228 = vmatpush2.msra.mxu1 %v13315_v46  ;;  %v13384_v38 = vld [vmem:[%s21388_s10 + $0xc30] sm:$0xff]  ;;  %v13379_v46 = vld [vmem:[%s21388_s10 + $0xc08] sm:$0xff] }
 0xf38   :  { %11159 = vmatmul.mubr.f32.vlgmr.msra.gmra.mxu0 %v20362_v57  ;;  %11230 = vmatmul.mubr.f32.vlgmr.msra.gmra.mxu1 %v20362_v57  ;;  %v13434_v57 = vld [vmem:[%s21388_s10 + $0xdc0] sm:$0xff] }
 0xf39   :  { %11381 = vmatprep.subr.mxu0 %v13439_v56  ;;  %11452 = vmatprep.subr.mxu1 %v13441_v31  ;;  %v13381_v56 = vld [vmem:[%s21388_s10 + $0xc18] sm:$0xff]  ;;  %v13378_v31 = vld [vmem:[%s21388_s10 + $0xc00] sm:$0xff] }
 0xf3a   :  { %11382 = vmatpush1.msra.mxu0 %v13438_v8  ;;  %11445 = vmatprep.mubr.f32.mxu0 %v11378_v40  ;;  %v13380_v8 = vld [vmem:[%s21388_s10 + $0xc10] sm:$0xff] }
 0xf3b   :  { %11453 = vmatpush1.msra.mxu1 %v13440_v35  ;;  %11516 = vmatprep.mubr.f32.mxu1 %v11378_v40  ;;  %v13503_v40 = vld [vmem:[%s21388_s10 + $0xfe8] sm:$0xff]  ;;  %v13505_v35 = vld [vmem:[%s21388_s10 + $0xff8] sm:$0xff] }
 0xf3c   :  { %11383 = vmatprep.subr.mxu0 %v13435_v30  ;;  %11454 = vmatprep.subr.mxu1 %v13437_v24  ;;  %v13502_v30 = vld [vmem:[%s21388_s10 + $0xfe0] sm:$0xff]  ;;  %v13504_v24 = vld [vmem:[%s21388_s10 + $0xff0] sm:$0xff] }
 0xf3d   :  { %11384 = vmatpush1.msra.mxu0 %v13434_v57  ;;  %11455 = vmatpush1.msra.mxu1 %v13436_v49  ;;  %v13499_v57 = vld [vmem:[%s21388_s10 + $0xfc8] sm:$0xff]  ;;  %v13501_v49 = vld [vmem:[%s21388_s10 + $0xfd8] sm:$0xff] }
 0xf3e   :  { %11385 = vmatprep.subr.mxu0 %v13431_v34  ;;  %11456 = vmatprep.subr.mxu1 %v13433_v42  ;;  %v13498_v34 = vld [vmem:[%s21388_s10 + $0xfc0] sm:$0xff]  ;;  %v13500_v42 = vld [vmem:[%s21388_s10 + $0xfd0] sm:$0xff] }
 0xf3f   :  { %11386 = vmatpush1.msra.mxu0 %v13430_v2  ;;  %11457 = vmatpush1.msra.mxu1 %v13432_v60  ;;  %v13495_v2 = vld [vmem:[%s21388_s10 + $0xfa8] sm:$0xff]  ;;  %v13497_v60 = vld [vmem:[%s21388_s10 + $0xfb8] sm:$0xff] }
 0xf40   :  { %11387 = vmatprep.subr.mxu0 %v13427_v32  ;;  %11458 = vmatprep.subr.mxu1 %v13429_v3  ;;  %v13494_v32 = vld [vmem:[%s21388_s10 + $0xfa0] sm:$0xff]  ;;  %v13496_v3 = vld [vmem:[%s21388_s10 + $0xfb0] sm:$0xff] }
 0xf41   :  { %11388 = vmatpush1.msra.mxu0 %v13426_v9  ;;  %11459 = vmatpush1.msra.mxu1 %v13428_v63  ;;  %v13491_v9 = vld [vmem:[%s21388_s10 + $0xf88] sm:$0xff]  ;;  %v13493_v63 = vld [vmem:[%s21388_s10 + $0xf98] sm:$0xff] }
 0xf42   :  { %11389 = vmatprep.subr.mxu0 %v13423_v21  ;;  %11460 = vmatprep.subr.mxu1 %v13425_v18  ;;  %v13490_v21 = vld [vmem:[%s21388_s10 + $0xf80] sm:$0xff]  ;;  %v13492_v18 = vld [vmem:[%s21388_s10 + $0xf90] sm:$0xff] }
 0xf43   :  { %11390 = vmatpush1.msra.mxu0 %v13422_v6  ;;  %11461 = vmatpush1.msra.mxu1 %v13424_v58  ;;  %v13487_v6 = vld [vmem:[%s21388_s10 + $0xf68] sm:$0xff]  ;;  %v13489_v58 = vld [vmem:[%s21388_s10 + $0xf78] sm:$0xff] }
 0xf44   :  { %11391 = vmatprep.subr.mxu0 %v13419_v29  ;;  %11462 = vmatprep.subr.mxu1 %v13421_v19  ;;  %v13486_v29 = vld [vmem:[%s21388_s10 + $0xf60] sm:$0xff]  ;;  %v13488_v19 = vld [vmem:[%s21388_s10 + $0xf70] sm:$0xff] }
 0xf45   :  { %11392 = vmatpush1.msra.mxu0 %v13418_v23  ;;  %11463 = vmatpush1.msra.mxu1 %v13420_v48  ;;  %v13483_v23 = vld [vmem:[%s21388_s10 + $0xf48] sm:$0xff]  ;;  %v13485_v48 = vld [vmem:[%s21388_s10 + $0xf58] sm:$0xff] }
 0xf46   :  { %11393 = vmatprep.subr.mxu0 %v13415_v20  ;;  %11464 = vmatprep.subr.mxu1 %v13417_v62  ;;  %v13482_v20 = vld [vmem:[%s21388_s10 + $0xf40] sm:$0xff]  ;;  %v13484_v62 = vld [vmem:[%s21388_s10 + $0xf50] sm:$0xff] }
 0xf47   :  { %11394 = vmatpush1.msra.mxu0 %v13414_v51  ;;  %11465 = vmatpush1.msra.mxu1 %v13416_v53  ;;  %v13479_v51 = vld [vmem:[%s21388_s10 + $0xf28] sm:$0xff]  ;;  %v13481_v53 = vld [vmem:[%s21388_s10 + $0xf38] sm:$0xff] }
 0xf48   :  { %11395 = vmatprep.subr.mxu0 %v13411_v11  ;;  %11466 = vmatprep.subr.mxu1 %v13413_v59  ;;  %v13478_v11 = vld [vmem:[%s21388_s10 + $0xf20] sm:$0xff]  ;;  %v13480_v59 = vld [vmem:[%s21388_s10 + $0xf30] sm:$0xff] }
 0xf49   :  { %11396 = vmatpush1.msra.mxu0 %v13410_v4  ;;  %11467 = vmatpush1.msra.mxu1 %v13412_v10  ;;  %v13475_v4 = vld [vmem:[%s21388_s10 + $0xf08] sm:$0xff]  ;;  %v13477_v10 = vld [vmem:[%s21388_s10 + $0xf18] sm:$0xff] }
 0xf4a   :  { %11397 = vmatprep.subr.mxu0 %v13407_v50  ;;  %11468 = vmatprep.subr.mxu1 %v13409_v25  ;;  %v13474_v50 = vld [vmem:[%s21388_s10 + $0xf00] sm:$0xff]  ;;  %v13476_v25 = vld [vmem:[%s21388_s10 + $0xf10] sm:$0xff] }
 0xf4b   :  { %11398 = vmatpush1.msra.mxu0 %v13406_v52  ;;  %11469 = vmatpush1.msra.mxu1 %v13408_v47  ;;  %v13471_v52 = vld [vmem:[%s21388_s10 + $0xee8] sm:$0xff]  ;;  %v13473_v47 = vld [vmem:[%s21388_s10 + $0xef8] sm:$0xff] }
 0xf4c   :  { %11399 = vmatprep.subr.mxu0 %v13403_v13  ;;  %11470 = vmatprep.subr.mxu1 %v13405_v61  ;;  %v13470_v13 = vld [vmem:[%s21388_s10 + $0xee0] sm:$0xff]  ;;  %v13472_v61 = vld [vmem:[%s21388_s10 + $0xef0] sm:$0xff] }
 0xf4d   :  { %11400 = vmatpush1.msra.mxu0 %v13402_v43  ;;  %11471 = vmatpush1.msra.mxu1 %v13404_v37  ;;  %v13467_v43 = vld [vmem:[%s21388_s10 + $0xec8] sm:$0xff]  ;;  %v13469_v37 = vld [vmem:[%s21388_s10 + $0xed8] sm:$0xff] }
 0xf4e   :  { %11401 = vmatprep.subr.mxu0 %v13399_v17  ;;  %11472 = vmatprep.subr.mxu1 %v13401_v22  ;;  %v13466_v17 = vld [vmem:[%s21388_s10 + $0xec0] sm:$0xff]  ;;  %v13468_v22 = vld [vmem:[%s21388_s10 + $0xed0] sm:$0xff] }
 0xf4f   :  { %11402 = vmatpush1.msra.mxu0 %v13398_v36  ;;  %11473 = vmatpush1.msra.mxu1 %v13400_v14  ;;  %v13463_v36 = vld [vmem:[%s21388_s10 + $0xea8] sm:$0xff]  ;;  %v13465_v14 = vld [vmem:[%s21388_s10 + $0xeb8] sm:$0xff] }
 0xf50   :  { %11403 = vmatprep.subr.mxu0 %v13395_v28  ;;  %11474 = vmatprep.subr.mxu1 %v13397_v54  ;;  %v13462_v28 = vld [vmem:[%s21388_s10 + $0xea0] sm:$0xff]  ;;  %v13464_v54 = vld [vmem:[%s21388_s10 + $0xeb0] sm:$0xff] }
 0xf51   :  { %11404 = vmatpush1.msra.mxu0 %v13394_v44  ;;  %11475 = vmatpush1.msra.mxu1 %v13396_v26  ;;  %v13459_v44 = vld [vmem:[%s21388_s10 + $0xe88] sm:$0xff]  ;;  %v13461_v26 = vld [vmem:[%s21388_s10 + $0xe98] sm:$0xff] }
 0xf52   :  { %11405 = vmatprep.subr.mxu0 %v13391_v55  ;;  %11476 = vmatprep.subr.mxu1 %v13393_v39  ;;  %v13458_v55 = vld [vmem:[%s21388_s10 + $0xe80] sm:$0xff]  ;;  %v13460_v39 = vld [vmem:[%s21388_s10 + $0xe90] sm:$0xff] }
 0xf53   :  { %11406 = vmatpush1.msra.mxu0 %v13390_v12  ;;  %11477 = vmatpush1.msra.mxu1 %v13392_v7  ;;  %v13455_v12 = vld [vmem:[%s21388_s10 + $0xe68] sm:$0xff]  ;;  %v13457_v7 = vld [vmem:[%s21388_s10 + $0xe78] sm:$0xff] }
 0xf54   :  { %11407 = vmatprep.subr.mxu0 %v13387_v41  ;;  %11478 = vmatprep.subr.mxu1 %v13389_v16  ;;  %v13454_v41 = vld [vmem:[%s21388_s10 + $0xe60] sm:$0xff]  ;;  %v13456_v16 = vld [vmem:[%s21388_s10 + $0xe70] sm:$0xff] }
 0xf55   :  { %11408 = vmatpush1.msra.mxu0 %v13386_v1  ;;  %11479 = vmatpush1.msra.mxu1 %v13388_v45  ;;  %v13451_v1 = vld [vmem:[%s21388_s10 + $0xe48] sm:$0xff]  ;;  %v13453_v45 = vld [vmem:[%s21388_s10 + $0xe58] sm:$0xff] }
 0xf56   :  { %11409 = vmatprep.subr.mxu0 %v13383_v0  ;;  %11480 = vmatprep.subr.mxu1 %v13385_v33  ;;  %v13450_v0 = vld [vmem:[%s21388_s10 + $0xe40] sm:$0xff]  ;;  %v13452_v33 = vld [vmem:[%s21388_s10 + $0xe50] sm:$0xff] }
 0xf57   :  { %11410 = vmatpush1.msra.mxu0 %v13382_v15  ;;  %11481 = vmatpush1.msra.mxu1 %v13384_v38  ;;  %v13447_v15 = vld [vmem:[%s21388_s10 + $0xe28] sm:$0xff]  ;;  %v13449_v38 = vld [vmem:[%s21388_s10 + $0xe38] sm:$0xff] }
 0xf58   :  { %11411 = vmatprep.subr.mxu0 %v13379_v46  ;;  %11482 = vmatprep.subr.mxu1 %v13381_v56  ;;  %v13446_v46 = vld [vmem:[%s21388_s10 + $0xe20] sm:$0xff]  ;;  %v13448_v56 = vld [vmem:[%s21388_s10 + $0xe30] sm:$0xff] }
 0xf59   :  { %11412 = vmatpush1.msra.mxu0 %v13378_v31  ;;  %11483 = vmatpush1.msra.mxu1 %v13380_v8  ;;  %v13443_v31 = vld [vmem:[%s21388_s10 + $0xe08] sm:$0xff]  ;;  %v13445_v8 = vld [vmem:[%s21388_s10 + $0xe18] sm:$0xff] }
 0xf5a   :  { %11413 = vmatprep.subr.mxu0 %v13503_v40  ;;  %11484 = vmatprep.subr.mxu1 %v13505_v35  ;;  %v13442_v40 = vld [vmem:[%s21388_s10 + $0xe00] sm:$0xff]  ;;  %v13444_v35 = vld [vmem:[%s21388_s10 + $0xe10] sm:$0xff] }
 0xf5b   :  { %11414 = vmatpush2.msra.mxu0 %v13502_v30  ;;  %11485 = vmatpush2.msra.mxu1 %v13504_v24  ;;  %v11604_v30 = vld [vmem:[%s21390_s12 + $0x178] sm:$0xff]  ;;  %v11603_v24 = vld [vmem:[%s21390_s12 + $0x170] sm:$0xff] }
 0xf5c   :  { %11415 = vmatprep.subr.mxu0 %v13499_v57  ;;  %11486 = vmatprep.subr.mxu1 %v13501_v49  ;;  %v11602_v57 = vld [vmem:[%s21390_s12 + $0x168] sm:$0xff]  ;;  %v11588_v49 = vld [vmem:[%s21390_s12 + $0xf8] sm:$0xff] }
 0xf5d   :  { %11416 = vmatpush2.msra.mxu0 %v13498_v34  ;;  %11487 = vmatpush2.msra.mxu1 %v13500_v42  ;;  %v11572_v34 = vld [vmem:[%s21390_s12 + $0x78] sm:$0xff] }
 0xf5e   :  { %11417 = vmatprep.subr.mxu0 %v13495_v2  ;;  %11488 = vmatprep.subr.mxu1 %v13497_v60  ;;  %v11600_v42 = vld [vmem:[%s21390_s12 + $0x158] sm:$0xff]  ;;  %v11587_v2 = vld [vmem:[%s21390_s12 + $0xf0] sm:$0xff] }
 0xf5f   :  { %11418 = vmatpush2.msra.mxu0 %v13494_v32  ;;  %11489 = vmatpush2.msra.mxu1 %v13496_v3  ;;  %v11571_v60 = vld [vmem:[%s21390_s12 + $0x70] sm:$0xff]  ;;  %v11586_v32 = vld [vmem:[%s21390_s12 + $0xe8] sm:$0xff] }
 0xf60   :  { %11419 = vmatprep.subr.mxu0 %v13491_v9  ;;  %11490 = vmatprep.subr.mxu1 %v13493_v63  ;;  %v11599_v3 = vld [vmem:[%s21390_s12 + $0x150] sm:$0xff]  ;;  %v11570_v9 = vld [vmem:[%s21390_s12 + $0x68] sm:$0xff]  ;;  %v11585_v63 = vld [vmem:[%s21390_s12 + $0xe0] sm:$0xff] }
 0xf61   :  { %11420 = vmatpush2.msra.mxu0 %v13490_v21  ;;  %11491 = vmatpush2.msra.mxu1 %v13492_v18  ;;  %v11598_v21 = vld [vmem:[%s21390_s12 + $0x148] sm:$0xff]  ;;  %v11569_v18 = vld [vmem:[%s21390_s12 + $0x60] sm:$0xff] }
 0xf62   :  { %11421 = vmatprep.subr.mxu0 %v13487_v6  ;;  %11492 = vmatprep.subr.mxu1 %v13489_v58  ;;  %v11584_v6 = vld [vmem:[%s21390_s12 + $0xd8] sm:$0xff]  ;;  %v11597_v58 = vld [vmem:[%s21390_s12 + $0x140] sm:$0xff] }
 0xf63   :  { %11422 = vmatpush2.msra.mxu0 %v13486_v29  ;;  %11493 = vmatpush2.msra.mxu1 %v13488_v19  ;;  %v11568_v29 = vld [vmem:[%s21390_s12 + $0x58] sm:$0xff]  ;;  %v11583_v19 = vld [vmem:[%s21390_s12 + $0xd0] sm:$0xff] }
 0xf64   :  { %11423 = vmatprep.subr.mxu0 %v13483_v23  ;;  %11494 = vmatprep.subr.mxu1 %v13485_v48  ;;  %v11596_v23 = vld [vmem:[%s21390_s12 + $0x138] sm:$0xff]  ;;  %v11567_v48 = vld [vmem:[%s21390_s12 + $0x50] sm:$0xff] }
 0xf65   :  { %11424 = vmatpush2.msra.mxu0 %v13482_v20  ;;  %11495 = vmatpush2.msra.mxu1 %v13484_v62  ;;  %v11582_v20 = vld [vmem:[%s21390_s12 + $0xc8] sm:$0xff]  ;;  %v11595_v62 = vld [vmem:[%s21390_s12 + $0x130] sm:$0xff] }
 0xf66   :  { %11425 = vmatprep.subr.mxu0 %v13479_v51  ;;  %11496 = vmatprep.subr.mxu1 %v13481_v53  ;;  %v11566_v51 = vld [vmem:[%s21390_s12 + $0x48] sm:$0xff]  ;;  %v11581_v53 = vld [vmem:[%s21390_s12 + $0xc0] sm:$0xff] }
 0xf67   :  { %11426 = vmatpush2.msra.mxu0 %v13478_v11  ;;  %11497 = vmatpush2.msra.mxu1 %v13480_v59  ;;  %v11594_v11 = vld [vmem:[%s21390_s12 + $0x128] sm:$0xff]  ;;  %v11565_v59 = vld [vmem:[%s21390_s12 + $0x40] sm:$0xff] }
 0xf68   :  { %11427 = vmatprep.subr.mxu0 %v13475_v4  ;;  %11498 = vmatprep.subr.mxu1 %v13477_v10  ;;  %v11580_v4 = vld [vmem:[%s21390_s12 + $0xb8] sm:$0xff]  ;;  %v11593_v10 = vld [vmem:[%s21390_s12 + $0x120] sm:$0xff] }
 0xf69   :  { %11428 = vmatpush2.msra.mxu0 %v13474_v50  ;;  %11499 = vmatpush2.msra.mxu1 %v13476_v25  ;;  %v11564_v50 = vld [vmem:[%s21390_s12 + $0x38] sm:$0xff]  ;;  %v11579_v25 = vld [vmem:[%s21390_s12 + $0xb0] sm:$0xff] }
 0xf6a   :  { %11429 = vmatprep.subr.mxu0 %v13471_v52  ;;  %11500 = vmatprep.subr.mxu1 %v13473_v47  ;;  %v11592_v52 = vld [vmem:[%s21390_s12 + $0x118] sm:$0xff]  ;;  %v11563_v47 = vld [vmem:[%s21390_s12 + $0x30] sm:$0xff] }
 0xf6b   :  { %11430 = vmatpush2.msra.mxu0 %v13470_v13  ;;  %11501 = vmatpush2.msra.mxu1 %v13472_v61  ;;  %v11578_v13 = vld [vmem:[%s21390_s12 + $0xa8] sm:$0xff]  ;;  %v11591_v61 = vld [vmem:[%s21390_s12 + $0x110] sm:$0xff] }
 0xf6c   :  { %11431 = vmatprep.subr.mxu0 %v13467_v43  ;;  %11502 = vmatprep.subr.mxu1 %v13469_v37  ;;  %v11562_v43 = vld [vmem:[%s21390_s12 + $0x28] sm:$0xff] }
 0xf6d   :  { %11432 = vmatpush2.msra.mxu0 %v13466_v17  ;;  %11503 = vmatpush2.msra.mxu1 %v13468_v22  ;;  %v11590_v37 = vld [vmem:[%s21390_s12 + $0x108] sm:$0xff]  ;;  %v11589_v17 = vld [vmem:[%s21390_s12 + $0x100] sm:$0xff]  ;;  %v11619_v22 = vld [vmem:[%s21390_s12 + $0x1f0] sm:$0xf] }
 0xf6e   :  { %11433 = vmatprep.subr.mxu0 %v13463_v36  ;;  %11504 = vmatprep.subr.mxu1 %v13465_v14  ;;  %v11618_v36 = vld [vmem:[%s21390_s12 + $0x1e8] sm:$0xff]  ;;  %v11617_v14 = vld [vmem:[%s21390_s12 + $0x1e0] sm:$0xff] }
 0xf6f   :  { %11434 = vmatpush2.msra.mxu0 %v13462_v28  ;;  %11505 = vmatpush2.msra.mxu1 %v13464_v54  ;;  %v11616_v28 = vld [vmem:[%s21390_s12 + $0x1d8] sm:$0xff]  ;;  %v11615_v54 = vld [vmem:[%s21390_s12 + $0x1d0] sm:$0xff] }
 0xf70   :  { %11435 = vmatprep.subr.mxu0 %v13459_v44  ;;  %11506 = vmatprep.subr.mxu1 %v13461_v26  ;;  %v11614_v44 = vld [vmem:[%s21390_s12 + $0x1c8] sm:$0xff]  ;;  %v11613_v26 = vld [vmem:[%s21390_s12 + $0x1c0] sm:$0xff] }
 0xf71   :  { %11436 = vmatpush2.msra.mxu0 %v13458_v55  ;;  %11507 = vmatpush2.msra.mxu1 %v13460_v39  ;;  %v11612_v55 = vld [vmem:[%s21390_s12 + $0x1b8] sm:$0xff]  ;;  %v11611_v39 = vld [vmem:[%s21390_s12 + $0x1b0] sm:$0xff] }
 0xf72   :  { %11437 = vmatprep.subr.mxu0 %v13455_v12  ;;  %11508 = vmatprep.subr.mxu1 %v13457_v7  ;;  %v11610_v12 = vld [vmem:[%s21390_s12 + $0x1a8] sm:$0xff]  ;;  %v11577_v7 = vld [vmem:[%s21390_s12 + $0xa0] sm:$0xff] }
 0xf73   :  { %11438 = vmatpush2.msra.mxu0 %v13454_v41  ;;  %11509 = vmatpush2.msra.mxu1 %v13456_v16  ;;  %v11561_v41 = vld [vmem:[%s21390_s12 + $0x20] sm:$0xff] }
 0xf74   :  { %11439 = vmatprep.subr.mxu0 %v13451_v1  ;;  %11510 = vmatprep.subr.mxu1 %v13453_v45  ;;  %v11609_v16 = vld [vmem:[%s21390_s12 + $0x1a0] sm:$0xff]  ;;  %v11576_v1 = vld [vmem:[%s21390_s12 + $0x98] sm:$0xff] }
 0xf75   :  { %11440 = vmatpush2.msra.mxu0 %v13450_v0  ;;  %11511 = vmatpush2.msra.mxu1 %v13452_v33  ;;  %v11560_v45 = vld [vmem:[%s21390_s12 + $0x18] sm:$0xff]  ;;  %v11575_v33 = vld [vmem:[%s21390_s12 + $0x90] sm:$0xff] }
 0xf76   :  { %11441 = vmatprep.subr.mxu0 %v13447_v15  ;;  %11512 = vmatprep.subr.mxu1 %v13449_v38  ;;  %v11608_v0 = vld [vmem:[%s21390_s12 + $0x198] sm:$0xff]  ;;  %v11559_v15 = vld [vmem:[%s21390_s12 + $0x10] sm:$0xff] }
 0xf77   :  { %11442 = vmatpush2.msra.mxu0 %v13446_v46  ;;  %11513 = vmatpush2.msra.mxu1 %v13448_v56  ;;  %v11607_v38 = vld [vmem:[%s21390_s12 + $0x190] sm:$0xff]  ;;  %v11574_v46 = vld [vmem:[%s21390_s12 + $0x88] sm:$0xff] }
 0xf78   :  { %11443 = vmatprep.subr.mxu0 %v13443_v31  ;;  %11514 = vmatprep.subr.mxu1 %v13445_v8  ;;  %v11558_v56 = vld [vmem:[%s21390_s12 + $0x8] sm:$0xff]  ;;  %v11573_v8 = vld [vmem:[%s21390_s12 + $0x80] sm:$0xff] }
 0xf79   :  { %11444 = vmatpush2.msra.mxu0 %v13442_v40  ;;  %11515 = vmatpush2.msra.mxu1 %v13444_v35  ;;  %v11606_v31 = vld [vmem:[%s21390_s12 + $0x188] sm:$0xff]  ;;  %v11557_v40 = vld [vmem:[%s21390_s12] sm:$0xff] }
 0xf7a   :  { %11446 = vmatmul.mubr.f32.vlgmr.msra.gmra.mxu0 %v20752_v27  ;;  %11517 = vmatmul.mubr.f32.vlgmr.msra.gmra.mxu1 %v20752_v27  ;;  %v11601_v27 = vld [vmem:[%s21390_s12 + $0x160] sm:$0xff] }
 0xf7b   :  { %11704 = vmatprep.subr.mxu1 %v21539_v5  ;;  %13652 = vmatprep.subr.mxu0 %v11588_v49  ;;  %v11605_v35 = vld [vmem:[%s21390_s12 + $0x180] sm:$0xff] }
 0xf7c   :  { %11705 = vmatpush1.msra.mxu1 %v11604_v30  ;;  %13653 = vmatpush3.msra.mxu0 %v11572_v34  ;;  %v10724_v30 = vpop.f32.mrf.mxu0 }
 0xf7d   :  { %11706 = vmatprep.subr.mxu1 %v21539_v5  ;;  %13654 = vmatprep.subr.mxu0 %v11587_v2 }
 0xf7e   :  { %11707 = vmatpush1.msra.mxu1 %v11603_v24  ;;  %13655 = vmatpush3.msra.mxu0 %v11571_v60  ;;  %v10795_v24 = vpop.f32.mrf.mxu1 }
 0xf7f   :  { %11708 = vmatprep.subr.mxu1 %v21539_v5  ;;  %13656 = vmatprep.subr.mxu0 %v11586_v32 }
 0xf80   :  { %11709 = vmatpush1.msra.mxu1 %v11602_v57  ;;  %13657 = vmatpush3.msra.mxu0 %v11570_v9  ;;  %v10726_v57 = vpop.f32.mrf.mxu0 }
 0xf81   :  { %11710 = vmatprep.subr.mxu1 %v21539_v5  ;;  %13658 = vmatprep.subr.mxu0 %v11585_v63 }
 0xf82   :  { %11711 = vmatpush1.msra.mxu1 %v11601_v27  ;;  %13659 = vmatpush3.msra.mxu0 %v11569_v18  ;;  %v10797_v27 = vpop.f32.mrf.mxu1 }
 0xf83   :  { %11712 = vmatprep.subr.mxu1 %v21539_v5  ;;  %13660 = vmatprep.subr.mxu0 %v11584_v6 }
 0xf84   :  { %11713 = vmatpush1.msra.mxu1 %v11600_v42  ;;  %13661 = vmatpush3.msra.mxu0 %v11568_v29 }
 0xf85   :  { %11714 = vmatprep.subr.mxu1 %v21539_v5  ;;  %13662 = vmatprep.subr.mxu0 %v11583_v19 }
 0xf86   :  { %11715 = vmatpush1.msra.mxu1 %v11599_v3  ;;  %13663 = vmatpush3.msra.mxu0 %v11567_v48 }
 0xf87   :  { %11716 = vmatprep.subr.mxu1 %v21539_v5  ;;  %13664 = vmatprep.subr.mxu0 %v11582_v20 }
 0xf88   :  { %11717 = vmatpush1.msra.mxu1 %v11598_v21  ;;  %13665 = vmatpush3.msra.mxu0 %v11566_v51 }
 0xf89   :  { %11718 = vmatprep.subr.mxu1 %v21539_v5  ;;  %13666 = vmatprep.subr.mxu0 %v11581_v53  ;;  %v21568_v53 = vld [vmem:[#allocation24_spill] sm:$0xff] }
 0xf8a   :  { %11719 = vmatpush1.msra.mxu1 %v11597_v58  ;;  %13667 = vmatpush3.msra.mxu0 %v11565_v59  ;;  %v21569_v59 = vld [vmem:[#allocation26_spill] sm:$0xff] }
 0xf8b   :  { %11720 = vmatprep.subr.mxu1 %v21539_v5  ;;  %13668 = vmatprep.subr.mxu0 %v11580_v4 }
 0xf8c   :  { %11721 = vmatpush1.msra.mxu1 %v11596_v23  ;;  %13669 = vmatpush3.msra.mxu0 %v11564_v50  ;;  %v21566_v23 = vld [vmem:[#allocation23_spill] sm:$0xff] }
 0xf8d   :  { %11722 = vmatprep.subr.mxu1 %v21539_v5  ;;  %13670 = vmatprep.subr.mxu0 %v11579_v25 }
 0xf8e   :  { %11723 = vmatpush1.msra.mxu1 %v11595_v62  ;;  %13671 = vmatpush3.msra.mxu0 %v11563_v47  ;;  %v21567_v62 = vld [vmem:[#allocation25_spill] sm:$0xff] }
 0xf8f   :  { %11724 = vmatprep.subr.mxu1 %v21539_v5  ;;  %13672 = vmatprep.subr.mxu0 %v11578_v13 }
 0xf90   :  { %11725 = vmatpush1.msra.mxu1 %v11594_v11  ;;  %13673 = vmatpush3.msra.mxu0 %v11562_v43 }
 0xf91   :  { %11726 = vmatprep.subr.mxu1 %v21539_v5  ;;  %13674 = vmatprep.subr.mxu0 %v11577_v7 }
 0xf92   :  { %11727 = vmatpush1.msra.mxu1 %v11593_v10  ;;  %13675 = vmatpush3.msra.mxu0 %v11561_v41 }
 0xf93   :  { %11728 = vmatprep.subr.mxu1 %v21539_v5  ;;  %13676 = vmatprep.subr.mxu0 %v11576_v1 }
 0xf94   :  { %11729 = vmatpush1.msra.mxu1 %v11592_v52  ;;  %13677 = vmatpush3.msra.mxu0 %v11560_v45 }
 0xf95   :  { %11730 = vmatprep.subr.mxu1 %v21539_v5  ;;  %13678 = vmatprep.subr.mxu0 %v11575_v33 }
 0xf96   :  { %11731 = vmatpush1.msra.mxu1 %v11591_v61  ;;  %13679 = vmatpush3.msra.mxu0 %v11559_v15 }
 0xf97   :  { %11732 = vmatprep.subr.mxu1 %v21539_v5  ;;  %13680 = vmatprep.subr.mxu0 %v11574_v46 }
 0xf98   :  { %11733 = vmatpush1.msra.mxu1 %v11590_v37  ;;  %13681 = vmatpush3.msra.mxu0 %v11558_v56 }
 0xf99   :  { %11734 = vmatprep.subr.mxu1 %v21539_v5  ;;  %13682 = vmatprep.subr.mxu0 %v11573_v8 }
 0xf9a   :  { %11735 = vmatpush1.msra.mxu1 %v11589_v17  ;;  %13683 = vmatpush3.msra.mxu0 %v11557_v40 }
 0xf9b   :  { %11738 = vmatprep.subr.mxu1 %v21539_v5 }
 0xf9c   :  { %13508 = vmatpush2.msk.msra.mxu1 %vm619_vm5, %v11619_v22 }
 0xf9d   :  { %11740 = vmatprep.subr.mxu1 %v21539_v5 }
 0xf9e   :  { %11741 = vmatpush2.msra.mxu1 %v11618_v36 }
 0xf9f   :  { %11742 = vmatprep.subr.mxu1 %v21539_v5 }
 0xfa0   :  { %11743 = vmatpush2.msra.mxu1 %v11617_v14 }
 0xfa1   :  { %11744 = vmatprep.subr.mxu1 %v21539_v5 }
 0xfa2   :  { %11745 = vmatpush2.msra.mxu1 %v11616_v28 }
 0xfa3   :  { %11746 = vmatprep.subr.mxu1 %v21539_v5 }
 0xfa4   :  { %11747 = vmatpush2.msra.mxu1 %v11615_v54 }
 0xfa5   :  { %11748 = vmatprep.subr.mxu1 %v21539_v5 }
 0xfa6   :  { %11749 = vmatpush2.msra.mxu1 %v11614_v44 }
 0xfa7   :  { %11750 = vmatprep.subr.mxu1 %v21539_v5 }
 0xfa8   :  { %11751 = vmatpush2.msra.mxu1 %v11613_v26 }
 0xfa9   :  { %11752 = vmatprep.subr.mxu1 %v21539_v5 }
 0xfaa   :  { %11753 = vmatpush2.msra.mxu1 %v11612_v55 }
 0xfab   :  { %11754 = vmatprep.subr.mxu1 %v21539_v5 }
 0xfac   :  { %11755 = vmatpush2.msra.mxu1 %v11611_v39  ;;  %v13507_v39 = vld [vmem:[%s21391_s13] ss:$0 sm:$0xff] }
 0xfad   :  { %11756 = vmatprep.subr.mxu1 %v21539_v5 }
 0xfae   :  { %11757 = vmatpush2.msra.mxu1 %v11610_v12 }
 0xfaf   :  { %11758 = vmatprep.subr.mxu1 %v21539_v5 }
 0xfb0   :  { %11759 = vmatpush2.msra.mxu1 %v11609_v16 }
 0xfb1   :  { %11760 = vmatprep.subr.mxu1 %v21539_v5 }
 0xfb2   :  { %11761 = vmatpush2.msra.mxu1 %v11608_v0 }
 0xfb3   :  { %11762 = vmatprep.subr.mxu1 %v21539_v5 }
 0xfb4   :  { %11763 = vmatpush2.msra.mxu1 %v11607_v38 }
 0xfb5   :  { %11764 = vmatprep.subr.mxu1 %v21539_v5 }
 0xfb6   :  { %11765 = vmatpush2.msra.mxu1 %v11606_v31  ;;  %v10877_v49 = vpop.f32.mrf.mxu0  ;;  %v10948_v34 = vpop.f32.mrf.mxu1 }
 0xfb7   :  { %11766 = vmatprep.subr.mxu1 %v21539_v5  ;;  %v10878_v3 = vadd.f32 %v10877_v49, %v10724_v30  ;;  %v10949_v9 = vadd.f32 %v10948_v34, %v10795_v24  ;;  %v11527_v5 = vld [vmem:[%s21389_s11] sm:$0xf] }
 0xfb8   :  { %11767 = vmatpush2.msra.mxu1 %v11605_v35  ;;  %v10879_v42 = vpop.f32.mrf.mxu0  ;;  %v10950_v2 = vpop.f32.mrf.mxu1  ;;  %v11532_v48 = vrot.slane %v11527_v5, %v21566_v23  ;;  %v11540_v51 = vrot.slane %v11527_v5, %v21567_v62  ;;  %v11536_v11 = vrot.slane %v11527_v5, %v21568_v53  ;;  %v11544_v4 = vrot.slane %v11527_v5, %v21569_v59 }
 0xfb9   :  { %v10880_v18 = vadd.f32 %v10879_v42, %v10726_v57  ;;  %v10951_v6 = vadd.f32 %v10950_v2, %v10797_v27 }
 0xff8   :  { %v11160_v60 = vpop.f32.mrf.mxu0  ;;  %v11231_v32 = vpop.f32.mrf.mxu1 }
 0xff9   :  { %v11236_v58 = vadd.f32 %v11160_v60, %v10878_v3  ;;  %v11238_v29 = vadd.f32 %v11231_v32, %v10949_v9 }
 0xffa   :  { %v11162_v63 = vpop.f32.mrf.mxu0  ;;  %v11233_v21 = vpop.f32.mrf.mxu1 }
 0xffb   :  { %v11237_v10 = vadd.f32 %v11162_v63, %v10880_v18  ;;  %v11239_v50 = vadd.f32 %v11233_v21, %v10951_v6 }
0x103a   :  { %v11447_v19 = vpop.f32.mrf.mxu0  ;;  %v11518_v20 = vpop.f32.mrf.mxu1 }
0x103b   :  { %v11523_v25 = vadd.f32 %v11447_v19, %v11236_v58  ;;  %v11525_v52 = vadd.f32 %v11518_v20, %v11238_v29 }
0x103c   :  { %v11449_v47 = vpop.f32.mrf.mxu0  ;;  %v11520_v13 = vpop.f32.mrf.mxu1 }
0x103d   :  { %v11524_v61 = vadd.f32 %v11449_v47, %v11237_v10  ;;  %v11526_v43 = vadd.f32 %v11520_v13, %v11239_v50  ;;  %v11549_v37 = vadd.f32 %v11532_v48, %v11523_v25  ;;  %v11551_v17 = vadd.f32 %v11540_v51, %v11525_v52 }
0x103f   :  { %v11550_v22 = vadd.f32 %v11536_v11, %v11524_v61  ;;  %v11552_v36 = vadd.f32 %v11544_v4, %v11526_v43  ;;  %v11553_v54 = vmax.f32 %v11549_v37, 0.0  ;;  %v11555_v44 = vmax.f32 %v11551_v17, 0.0 }
0x1041   :  { %v11554_v14 = vmax.f32 %v11550_v22, 0.0  ;;  %v11556_v28 = vmax.f32 %v11552_v36, 0.0 }
0x1043   :  { %11698 = vmatprep.mubr.f32.mxu0 %v11554_v14  ;;  %13509 = vmatprep.mubr.msk.f32.mxu1 %vm11627_vm0, %v11556_v28 }
0x1044   :  { %11699 = vmatmul.mubr.f32.vlgmr.msra.gmra.mxu0 %v11553_v54  ;;  %11769 = vmatmul.mubr.f32.vlgmr.msra.gmra.mxu1 %v11555_v44 }
0x1104   :  { %v13684_v26 = vpop.f32.mrf.mxu0  ;;  %v11770_v55 = vpop.f32.mrf.mxu1 }
0x1106   :  { %v13685_v12 = vpop.f32.mrf.mxu0  ;;  %v11772_v7 = vpop.f32.mrf.mxu1 }
0x1107   :  { %v13686_v41 = vadd.f32 %v13685_v12, %v13684_v26 }
0x1109   :  { %v11701_v16 = vadd.f32 %v13686_v41, %v13507_v39 }
0x110b   :  { %v11771_v1 = vadd.f32 %v11770_v55, %v11701_v16 }
0x110d   :  { %11775 = vst.msk [vmem:[#allocation7] sm:$0x3] %vm11774_vm1, %v11771_v1 }
0x110e   :  { %13779 = shalt.err (!%p13776_p4)
}
0x110f   :  { %11785 = dma.vmem_to_hbm [thread:$0]  %s11783_s21, 32, %s21392_s14, [#allocation8]  }
0x1110   :  { %13788 = dma.done.wait [#allocation8], 32  }
0x1111   :  { %13789 = vsyncadd [#allocation8], 4294967264 }
0x1112   :  { %11789 = vsyncpa [#allocation8], 1 }

</bundles_post_ra>
